<compile_context>
chip_gen: v7x
topology: tpu7x:2x2x1
jax: 0.10.0
libtpu: 0.0.40
codegen_flags: <defaults>
</compile_context>

<pallas_src>
import functools

import jax
import jax.numpy as jnp
from jax.experimental import pallas as pl
from jax.experimental.pallas import tpu as pltpu

UPSCALE = 4
N_BATCH, H, W = 2, 16, 16


# ------------------------------ Pallas kernel ------------------------------ #
def _espcn_kernel(xcol_ref, w1_ref, b1_ref, w2_ref, b2_ref, w3_ref, b3_ref,
                  o_ref, pad2_ref, col2_ref, pad3_ref, col3_ref,
                  *, height, width, pad_rows):
    m = o_ref.shape[0]                         # H*W pixels of this image

    # conv1: one MXU matmul over the K-padded 5x5 im2col of the input + tanh.
    h1 = jnp.tanh(
        jnp.dot(xcol_ref[...], w1_ref[...], preferred_element_type=jnp.float32)
        + b1_ref[...])

    pow2 = (width & (width - 1)) == 0

    def coords():
        rows = jax.lax.broadcasted_iota(jnp.int32, (m, 1), 0)
        if pow2:                                # strength-reduced div/mod
            return rows >> (int(width).bit_length() - 1), rows & (width - 1)
        return rows // width, rows % width

    def conv3x3(h_in, pad_ref, col_ref, w_ref, b_ref):
        # Fused-K 3x3 conv: build the border-masked im2col slab [m, 9*Cin] in a
        # VMEM scratch (one shifted row-slice per tap), then a single
        # [m, 9*Cin] x [9*Cin, Cout] MXU matmul (f32 accumulation).
        cin = h_in.shape[1]
        hh, ww = coords()
        # Stage the activation row-padded; halo rows stay UNINITIALIZED -- every
        # read that can touch them is killed by the masks below.  Do not drop
        # the masks if the memset stays dropped.
        pad_ref[pl.ds(pad_rows, m), :] = h_in
        t = 0
        for dh in (-1, 0, 1):
            for dw in (-1, 0, 1):
                if dh == 0 and dw == 0:
                    col_ref[:, t * cin:(t + 1) * cin] = h_in
                else:
                    v = pad_ref[pl.ds(pad_rows + dh * width + dw, m), :]
                    conds = []
                    if dh < 0:
                        conds.append(hh >= -dh)
                    elif dh > 0:
                        conds.append(hh < height - dh)
                    if dw < 0:
                        conds.append(ww >= -dw)
                    elif dw > 0:
                        conds.append(ww < width - dw)
                    valid = functools.reduce(lambda a, b: a & b, conds)
                    col_ref[:, t * cin:(t + 1) * cin] = jnp.where(valid, v, 0.0)
                t += 1
        return jnp.dot(col_ref[...], w_ref[...],
                       preferred_element_type=jnp.float32) + b_ref[...]

    h2 = jnp.tanh(conv3x3(h1, pad2_ref, col2_ref, w2_ref, b2_ref))   # [m, 32]
    h3 = conv3x3(h2, pad3_ref, col3_ref, w3_ref, b3_ref)             # [m, r^2]

    # sigmoid(x) = 0.5 * tanh(x / 2) + 0.5  -> tanh on the EUP slot, no VPU
    # Newton-Raphson divide on the epilogue critical path.
    o_ref[...] = 0.5 * jnp.tanh(0.5 * h3) + 0.5


# ------------------------------ host wrappers ------------------------------ #
def _im2col_5x5(x_nhwc):
    n, h, w, c = x_nhwc.shape
    xp = jnp.pad(x_nhwc, ((0, 0), (2, 2), (2, 2), (0, 0)))
    cols = [xp[:, i:i + h, j:j + w, :] for i in range(5) for j in range(5)]
    return jnp.concatenate(cols, axis=-1).reshape(n * h * w, 25 * c)


def espcn_forward(x_nchw, params):
    n, cin, h, w = x_nchw.shape
    hw = h * w
    c1 = params["w1"].shape[0]                 # 64
    c2 = params["w2"].shape[0]                 # 32
    r2 = params["w3"].shape[0]                 # upscale^2
    r = int(round(r2 ** 0.5))

    # Plain-JAX glue: 5x5 im2col of the tiny input + PyTorch->matmul weight layout.
    k0 = 25 * cin
    kpad = -(-k0 // 8) * 8                                          # 25 -> 32
    xcol = _im2col_5x5(jnp.transpose(x_nchw, (0, 2, 3, 1)))         # [n*hw, 25]
    xcol = jnp.pad(xcol, ((0, 0), (0, kpad - k0)))
    w1 = jnp.pad(jnp.transpose(params["w1"], (2, 3, 1, 0)).reshape(k0, c1),
                 ((0, kpad - k0), (0, 0)))                          # [32, 64]
    b1 = params["b1"].reshape(1, c1)
    # Fused-K weights: (kh, kw, cin) flattened along K, matching the in-kernel
    # im2col tap/channel order.
    w2 = jnp.transpose(params["w2"], (2, 3, 1, 0)).reshape(9 * c1, c2)   # [576,32]
    b2 = params["b2"].reshape(1, c2)
    w3 = jnp.transpose(params["w3"], (2, 3, 1, 0)).reshape(9 * c2, r2)   # [288,16]
    b3 = params["b3"].reshape(1, r2)

    pad_rows = -(-(w + 1) // 8) * 8            # >= max tap offset (W+1), 8-aligned
    kern = functools.partial(_espcn_kernel, height=h, width=w, pad_rows=pad_rows)

    cost = pl.CostEstimate(
        flops=2 * n * hw * (kpad * c1 + 9 * c1 * c2 + 9 * c2 * r2),
        transcendentals=n * hw * (c1 + c2 + r2),
        bytes_accessed=4 * (xcol.size + w1.size + w2.size + w3.size
                            + b1.size + b2.size + b3.size + n * hw * r2))

    grid_spec = pltpu.PrefetchScalarGridSpec(
        num_scalar_prefetch=0,
        grid=(n,),                                  # one image per program
        in_specs=[
            pl.BlockSpec((hw, kpad), lambda b: (b, 0)),
            pl.BlockSpec((kpad, c1), lambda b: (0, 0)),
            pl.BlockSpec((1, c1), lambda b: (0, 0)),
            pl.BlockSpec((9 * c1, c2), lambda b: (0, 0)),
            pl.BlockSpec((1, c2), lambda b: (0, 0)),
            pl.BlockSpec((9 * c2, r2), lambda b: (0, 0)),
            pl.BlockSpec((1, r2), lambda b: (0, 0)),
        ],
        out_specs=pl.BlockSpec((hw, r2), lambda b: (b, 0)),
        scratch_shapes=[
            pltpu.VMEM((hw + 2 * pad_rows, c1), jnp.float32),  # conv2 tap staging
            pltpu.VMEM((hw, 9 * c1), jnp.float32),             # conv2 im2col
            pltpu.VMEM((hw + 2 * pad_rows, c2), jnp.float32),  # conv3 tap staging
            pltpu.VMEM((hw, 9 * c2), jnp.float32),             # conv3 im2col
        ])

    y = pl.pallas_call(
        kern,
        out_shape=jax.ShapeDtypeStruct((n * hw, r2), jnp.float32),
        grid_spec=grid_spec,
        compiler_params=pltpu.CompilerParams(
            dimension_semantics=("parallel",)),     # both TCs on v7x
        cost_estimate=cost,
    )(xcol, w1, b1, w2, b2, w3, b3)

    # PixelShuffle(r): [n*hw, r^2] (NHWC pixel order) -> [N, 1, H*r, W*r].
    # (sigmoid already fused in-kernel; it commutes with the shuffle.)
    y = y.reshape(n, h, w, r, r)
    y = jnp.transpose(y, (0, 1, 3, 2, 4))
    return y.reshape(n, 1, h * r, w * r)


# -------------------------- params & XLA reference ------------------------- #
def _conv_params(key, cout, cin, k):
    kw, kb = jax.random.split(key)
    bound = 1.0 / float(cin * k * k) ** 0.5
    wgt = jax.random.uniform(kw, (cout, cin, k, k), jnp.float32, -bound, bound)
    b = jax.random.uniform(kb, (cout,), jnp.float32, -bound, bound)
    return wgt, b


def init_params(key, upscale=UPSCALE):
    k1, k2, k3 = jax.random.split(key, 3)
    w1, b1 = _conv_params(k1, 64, 1, 5)
    w2, b2 = _conv_params(k2, 32, 64, 3)
    w3, b3 = _conv_params(k3, upscale * upscale, 32, 3)
    return dict(w1=w1, b1=b1, w2=w2, b2=b2, w3=w3, b3=b3)


def _reference_forward(x_nchw, params):
    dn = ("NCHW", "OIHW", "NCHW")
    prec = jax.lax.Precision.HIGHEST
    y = jax.lax.conv_general_dilated(x_nchw, params["w1"], (1, 1), [(2, 2), (2, 2)],
                                     dimension_numbers=dn, precision=prec)
    y = jnp.tanh(y + params["b1"].reshape(1, -1, 1, 1))
    y = jax.lax.conv_general_dilated(y, params["w2"], (1, 1), [(1, 1), (1, 1)],
                                     dimension_numbers=dn, precision=prec)
    y = jnp.tanh(y + params["b2"].reshape(1, -1, 1, 1))
    y = jax.lax.conv_general_dilated(y, params["w3"], (1, 1), [(1, 1), (1, 1)],
                                     dimension_numbers=dn, precision=prec)
    y = y + params["b3"].reshape(1, -1, 1, 1)
    n, c, h, w = y.shape
    r = UPSCALE
    y = y.reshape(n, c // (r * r), r, r, h, w)
    y = jnp.transpose(y, (0, 1, 4, 2, 5, 3)).reshape(n, c // (r * r), h * r, w * r)
    return jax.nn.sigmoid(y)


if __name__ == "__main__":
    key = jax.random.PRNGKey(0)
    kx, kp = jax.random.split(key)
    x = jax.random.normal(kx, (N_BATCH, 1, H, W), jnp.float32)   # NCHW like PyTorch
    params = init_params(kp)

    fwd = jax.jit(espcn_forward)
    out = jax.block_until_ready(fwd(x, params))

    assert out.shape == (N_BATCH, 1, H * UPSCALE, W * UPSCALE), out.shape
    assert out.dtype == jnp.float32

    ref = jax.block_until_ready(jax.jit(_reference_forward)(x, params))
    err = float(jnp.max(jnp.abs(out - ref)))
    # Tolerance tightened 1e-2 -> 5e-3 (catches any layout/indexing regression,
    # which would be O(0.1)); not 1e-5 because in-kernel MXU matmuls at default
    # precision may use bf16 passes vs the HIGHEST-precision XLA reference.
    assert err < 5e-3, f"max abs error vs XLA reference: {err}"
    print("KERNEL_OK")
</pallas_src>

<mosaic_0001>
module attributes {stable_mosaic.version = 11 : i64} {
  func.func @_espcn_kernel(%arg0: i32, %arg1: memref<256x32xf32, #tpu.memory_space<vmem>>, %arg2: memref<32x64xf32, #tpu.memory_space<vmem>>, %arg3: memref<1x64xf32, #tpu.memory_space<vmem>>, %arg4: memref<576x32xf32, #tpu.memory_space<vmem>>, %arg5: memref<1x32xf32, #tpu.memory_space<vmem>>, %arg6: memref<288x16xf32, #tpu.memory_space<vmem>>, %arg7: memref<1x16xf32, #tpu.memory_space<vmem>>, %arg8: memref<256x16xf32, #tpu.memory_space<vmem>>, %arg9: memref<304x64xf32, #tpu.memory_space<vmem>>, %arg10: memref<256x576xf32, #tpu.memory_space<vmem>>, %arg11: memref<304x32xf32, #tpu.memory_space<vmem>>, %arg12: memref<256x288xf32, #tpu.memory_space<vmem>>) attributes {dimension_semantics = [#tpu.dimension_semantics<parallel>], iteration_bounds = array<i64: 2>, scalar_prefetch = 0 : i64, scratch_operands = 4 : i64, tpu.core_type = #tpu.core_type<tc>, window_params = [{transform_indices = @transform_0, window_bounds = array<i64: 256, 32>}, {pipeline_mode = #tpu.pipeline_mode<synchronous>, transform_indices = @transform_1, window_bounds = array<i64: 32, 64>}, {pipeline_mode = #tpu.pipeline_mode<synchronous>, transform_indices = @transform_2, window_bounds = array<i64: 1, 64>}, {pipeline_mode = #tpu.pipeline_mode<synchronous>, transform_indices = @transform_3, window_bounds = array<i64: 576, 32>}, {pipeline_mode = #tpu.pipeline_mode<synchronous>, transform_indices = @transform_4, window_bounds = array<i64: 1, 32>}, {pipeline_mode = #tpu.pipeline_mode<synchronous>, transform_indices = @transform_5, window_bounds = array<i64: 288, 16>}, {pipeline_mode = #tpu.pipeline_mode<synchronous>, transform_indices = @transform_6, window_bounds = array<i64: 1, 16>}, {transform_indices = @transform_7, window_bounds = array<i64: 256, 16>}]} {
    %c0 = arith.constant 0 : index
    %c0_0 = arith.constant 0 : index
    %0 = vector.load %arg1[%c0, %c0_0] : memref<256x32xf32, #tpu.memory_space<vmem>>, vector<256x32xf32>
    %c0_1 = arith.constant 0 : index
    %c0_2 = arith.constant 0 : index
    %1 = vector.load %arg2[%c0_1, %c0_2] : memref<32x64xf32, #tpu.memory_space<vmem>>, vector<32x64xf32>
    %cst = arith.constant dense<0.000000e+00> : vector<256x64xf32>
    %2 = tpu.matmul %0, %1, %cst {dimension_numbers = #tpu.dot_dimension_numbers<[1], [0], [0], [1], [0, 0, 1, 1], [], []>} : vector<256x32xf32>, vector<32x64xf32>, vector<256x64xf32> -> vector<256x64xf32>
    %c0_3 = arith.constant 0 : index
    %c0_4 = arith.constant 0 : index
    %3 = vector.load %arg3[%c0_3, %c0_4] : memref<1x64xf32, #tpu.memory_space<vmem>>, vector<1x64xf32>
    %4 = vector.broadcast %3 : vector<1x64xf32> to vector<256x64xf32>
    %5 = arith.addf %2, %4 : vector<256x64xf32>
    %6 = math.tanh %5 : vector<256x64xf32>
    %7 = tpu.iota {dimensions = array<i32: 0>} : vector<256x1xi32>
    %c4_i32 = arith.constant 4 : i32
    %8 = vector.broadcast %c4_i32 : i32 to vector<256x1xi32>
    %9 = arith.shrsi %7, %8 : vector<256x1xi32>
    %c15_i32 = arith.constant 15 : i32
    %10 = vector.broadcast %c15_i32 : i32 to vector<256x1xi32>
    %11 = arith.andi %7, %10 : vector<256x1xi32>
    %c24 = arith.constant 24 : index
    %c0_5 = arith.constant 0 : index
    %12 = vector.load %arg9[%c24, %c0_5] : memref<304x64xf32, #tpu.memory_space<vmem>>, vector<256x64xf32>
    tpu.vector_store %arg9[%c24, %c0_5], %6 {strides = array<i32>} : memref<304x64xf32, #tpu.memory_space<vmem>>, vector<256x64xf32>,
    %c7 = arith.constant 7 : index
    %c0_6 = arith.constant 0 : index
    %13 = vector.load %arg9[%c7, %c0_6] : memref<304x64xf32, #tpu.memory_space<vmem>>, vector<256x64xf32>
    %c1_i32 = arith.constant 1 : i32
    %14 = vector.broadcast %c1_i32 : i32 to vector<256x1xi32>
    %15 = arith.cmpi sge, %9, %14 : vector<256x1xi32>
    %c1_i32_7 = arith.constant 1 : i32
    %16 = vector.broadcast %c1_i32_7 : i32 to vector<256x1xi32>
    %17 = arith.cmpi sge, %11, %16 : vector<256x1xi32>
    %18 = arith.andi %15, %17 : vector<256x1xi1>
    %cst_8 = arith.constant 0.000000e+00 : f32
    %19 = vector.shape_cast %18 : vector<256x1xi1> to vector<256x1xi1>
    %20 = vector.broadcast %19 : vector<256x1xi1> to vector<256x64xi1>
    %21 = vector.broadcast %cst_8 : f32 to vector<256x64xf32>
    %22 = arith.select %20, %13, %21 : vector<256x64xi1>, vector<256x64xf32>
    %c0_9 = arith.constant 0 : index
    %c0_10 = arith.constant 0 : index
    %23 = vector.load %arg10[%c0_9, %c0_10] : memref<256x576xf32, #tpu.memory_space<vmem>>, vector<256x64xf32>
    tpu.vector_store %arg10[%c0_9, %c0_10], %22 {strides = array<i32>} : memref<256x576xf32, #tpu.memory_space<vmem>>, vector<256x64xf32>,
    %c8 = arith.constant 8 : index
    %c0_11 = arith.constant 0 : index
    %24 = vector.load %arg9[%c8, %c0_11] : memref<304x64xf32, #tpu.memory_space<vmem>>, vector<256x64xf32>
    %c1_i32_12 = arith.constant 1 : i32
    %25 = vector.broadcast %c1_i32_12 : i32 to vector<256x1xi32>
    %26 = arith.cmpi sge, %9, %25 : vector<256x1xi32>
    %cst_13 = arith.constant 0.000000e+00 : f32
    %27 = vector.shape_cast %26 : vector<256x1xi1> to vector<256x1xi1>
    %28 = vector.broadcast %27 : vector<256x1xi1> to vector<256x64xi1>
    %29 = vector.broadcast %cst_13 : f32 to vector<256x64xf32>
    %30 = arith.select %28, %24, %29 : vector<256x64xi1>, vector<256x64xf32>
    %c0_14 = arith.constant 0 : index
    %c64 = arith.constant 64 : index
    %31 = vector.load %arg10[%c0_14, %c64] : memref<256x576xf32, #tpu.memory_space<vmem>>, vector<256x64xf32>
    tpu.vector_store %arg10[%c0_14, %c64], %30 {strides = array<i32>} : memref<256x576xf32, #tpu.memory_space<vmem>>, vector<256x64xf32>,
    %c9 = arith.constant 9 : index
    %c0_15 = arith.constant 0 : index
    %32 = vector.load %arg9[%c9, %c0_15] : memref<304x64xf32, #tpu.memory_space<vmem>>, vector<256x64xf32>
    %c1_i32_16 = arith.constant 1 : i32
    %33 = vector.broadcast %c1_i32_16 : i32 to vector<256x1xi32>
    %34 = arith.cmpi sge, %9, %33 : vector<256x1xi32>
    %c15_i32_17 = arith.constant 15 : i32
    %35 = vector.broadcast %c15_i32_17 : i32 to vector<256x1xi32>
    %36 = arith.cmpi slt, %11, %35 : vector<256x1xi32>
    %37 = arith.andi %34, %36 : vector<256x1xi1>
    %cst_18 = arith.constant 0.000000e+00 : f32
    %38 = vector.shape_cast %37 : vector<256x1xi1> to vector<256x1xi1>
    %39 = vector.broadcast %38 : vector<256x1xi1> to vector<256x64xi1>
    %40 = vector.broadcast %cst_18 : f32 to vector<256x64xf32>
    %41 = arith.select %39, %32, %40 : vector<256x64xi1>, vector<256x64xf32>
    %c0_19 = arith.constant 0 : index
    %c128 = arith.constant 128 : index
    %42 = vector.load %arg10[%c0_19, %c128] : memref<256x576xf32, #tpu.memory_space<vmem>>, vector<256x64xf32>
    tpu.vector_store %arg10[%c0_19, %c128], %41 {strides = array<i32>} : memref<256x576xf32, #tpu.memory_space<vmem>>, vector<256x64xf32>,
    %c23 = arith.constant 23 : index
    %c0_20 = arith.constant 0 : index
    %43 = vector.load %arg9[%c23, %c0_20] : memref<304x64xf32, #tpu.memory_space<vmem>>, vector<256x64xf32>
    %c1_i32_21 = arith.constant 1 : i32
    %44 = vector.broadcast %c1_i32_21 : i32 to vector<256x1xi32>
    %45 = arith.cmpi sge, %11, %44 : vector<256x1xi32>
    %cst_22 = arith.constant 0.000000e+00 : f32
    %46 = vector.shape_cast %45 : vector<256x1xi1> to vector<256x1xi1>
    %47 = vector.broadcast %46 : vector<256x1xi1> to vector<256x64xi1>
    %48 = vector.broadcast %cst_22 : f32 to vector<256x64xf32>
    %49 = arith.select %47, %43, %48 : vector<256x64xi1>, vector<256x64xf32>
    %c0_23 = arith.constant 0 : index
    %c192 = arith.constant 192 : index
    %50 = vector.load %arg10[%c0_23, %c192] : memref<256x576xf32, #tpu.memory_space<vmem>>, vector<256x64xf32>
    tpu.vector_store %arg10[%c0_23, %c192], %49 {strides = array<i32>} : memref<256x576xf32, #tpu.memory_space<vmem>>, vector<256x64xf32>,
    %c0_24 = arith.constant 0 : index
    %c256 = arith.constant 256 : index
    %51 = vector.load %arg10[%c0_24, %c256] : memref<256x576xf32, #tpu.memory_space<vmem>>, vector<256x64xf32>
    tpu.vector_store %arg10[%c0_24, %c256], %6 {strides = array<i32>} : memref<256x576xf32, #tpu.memory_space<vmem>>, vector<256x64xf32>,
    %c25 = arith.constant 25 : index
    %c0_25 = arith.constant 0 : index
    %52 = vector.load %arg9[%c25, %c0_25] : memref<304x64xf32, #tpu.memory_space<vmem>>, vector<256x64xf32>
    %c15_i32_26 = arith.constant 15 : i32
    %53 = vector.broadcast %c15_i32_26 : i32 to vector<256x1xi32>
    %54 = arith.cmpi slt, %11, %53 : vector<256x1xi32>
    %cst_27 = arith.constant 0.000000e+00 : f32
    %55 = vector.shape_cast %54 : vector<256x1xi1> to vector<256x1xi1>
    %56 = vector.broadcast %55 : vector<256x1xi1> to vector<256x64xi1>
    %57 = vector.broadcast %cst_27 : f32 to vector<256x64xf32>
    %58 = arith.select %56, %52, %57 : vector<256x64xi1>, vector<256x64xf32>
    %c0_28 = arith.constant 0 : index
    %c320 = arith.constant 320 : index
    %59 = vector.load %arg10[%c0_28, %c320] : memref<256x576xf32, #tpu.memory_space<vmem>>, vector<256x64xf32>
    tpu.vector_store %arg10[%c0_28, %c320], %58 {strides = array<i32>} : memref<256x576xf32, #tpu.memory_space<vmem>>, vector<256x64xf32>,
    %c39 = arith.constant 39 : index
    %c0_29 = arith.constant 0 : index
    %60 = vector.load %arg9[%c39, %c0_29] : memref<304x64xf32, #tpu.memory_space<vmem>>, vector<256x64xf32>
    %c15_i32_30 = arith.constant 15 : i32
    %61 = vector.broadcast %c15_i32_30 : i32 to vector<256x1xi32>
    %62 = arith.cmpi slt, %9, %61 : vector<256x1xi32>
    %c1_i32_31 = arith.constant 1 : i32
    %63 = vector.broadcast %c1_i32_31 : i32 to vector<256x1xi32>
    %64 = arith.cmpi sge, %11, %63 : vector<256x1xi32>
    %65 = arith.andi %62, %64 : vector<256x1xi1>
    %cst_32 = arith.constant 0.000000e+00 : f32
    %66 = vector.shape_cast %65 : vector<256x1xi1> to vector<256x1xi1>
    %67 = vector.broadcast %66 : vector<256x1xi1> to vector<256x64xi1>
    %68 = vector.broadcast %cst_32 : f32 to vector<256x64xf32>
    %69 = arith.select %67, %60, %68 : vector<256x64xi1>, vector<256x64xf32>
    %c0_33 = arith.constant 0 : index
    %c384 = arith.constant 384 : index
    %70 = vector.load %arg10[%c0_33, %c384] : memref<256x576xf32, #tpu.memory_space<vmem>>, vector<256x64xf32>
    tpu.vector_store %arg10[%c0_33, %c384], %69 {strides = array<i32>} : memref<256x576xf32, #tpu.memory_space<vmem>>, vector<256x64xf32>,
    %c40 = arith.constant 40 : index
    %c0_34 = arith.constant 0 : index
    %71 = vector.load %arg9[%c40, %c0_34] : memref<304x64xf32, #tpu.memory_space<vmem>>, vector<256x64xf32>
    %c15_i32_35 = arith.constant 15 : i32
    %72 = vector.broadcast %c15_i32_35 : i32 to vector<256x1xi32>
    %73 = arith.cmpi slt, %9, %72 : vector<256x1xi32>
    %cst_36 = arith.constant 0.000000e+00 : f32
    %74 = vector.shape_cast %73 : vector<256x1xi1> to vector<256x1xi1>
    %75 = vector.broadcast %74 : vector<256x1xi1> to vector<256x64xi1>
    %76 = vector.broadcast %cst_36 : f32 to vector<256x64xf32>
    %77 = arith.select %75, %71, %76 : vector<256x64xi1>, vector<256x64xf32>
    %c0_37 = arith.constant 0 : index
    %c448 = arith.constant 448 : index
    %78 = vector.load %arg10[%c0_37, %c448] : memref<256x576xf32, #tpu.memory_space<vmem>>, vector<256x64xf32>
    tpu.vector_store %arg10[%c0_37, %c448], %77 {strides = array<i32>} : memref<256x576xf32, #tpu.memory_space<vmem>>, vector<256x64xf32>,
    %c41 = arith.constant 41 : index
    %c0_38 = arith.constant 0 : index
    %79 = vector.load %arg9[%c41, %c0_38] : memref<304x64xf32, #tpu.memory_space<vmem>>, vector<256x64xf32>
    %c15_i32_39 = arith.constant 15 : i32
    %80 = vector.broadcast %c15_i32_39 : i32 to vector<256x1xi32>
    %81 = arith.cmpi slt, %9, %80 : vector<256x1xi32>
    %c15_i32_40 = arith.constant 15 : i32
    %82 = vector.broadcast %c15_i32_40 : i32 to vector<256x1xi32>
    %83 = arith.cmpi slt, %11, %82 : vector<256x1xi32>
    %84 = arith.andi %81, %83 : vector<256x1xi1>
    %cst_41 = arith.constant 0.000000e+00 : f32
    %85 = vector.shape_cast %84 : vector<256x1xi1> to vector<256x1xi1>
    %86 = vector.broadcast %85 : vector<256x1xi1> to vector<256x64xi1>
    %87 = vector.broadcast %cst_41 : f32 to vector<256x64xf32>
    %88 = arith.select %86, %79, %87 : vector<256x64xi1>, vector<256x64xf32>
    %c0_42 = arith.constant 0 : index
    %c512 = arith.constant 512 : index
    %89 = vector.load %arg10[%c0_42, %c512] : memref<256x576xf32, #tpu.memory_space<vmem>>, vector<256x64xf32>
    tpu.vector_store %arg10[%c0_42, %c512], %88 {strides = array<i32>} : memref<256x576xf32, #tpu.memory_space<vmem>>, vector<256x64xf32>,
    %c0_43 = arith.constant 0 : index
    %c0_44 = arith.constant 0 : index
    %90 = vector.load %arg10[%c0_43, %c0_44] : memref<256x576xf32, #tpu.memory_space<vmem>>, vector<256x576xf32>
    %c0_45 = arith.constant 0 : index
    %c0_46 = arith.constant 0 : index
    %91 = vector.load %arg4[%c0_45, %c0_46] : memref<576x32xf32, #tpu.memory_space<vmem>>, vector<576x32xf32>
    %cst_47 = arith.constant dense<0.000000e+00> : vector<256x32xf32>
    %92 = tpu.matmul %90, %91, %cst_47 {dimension_numbers = #tpu.dot_dimension_numbers<[1], [0], [0], [1], [0, 0, 1, 1], [], []>} : vector<256x576xf32>, vector<576x32xf32>, vector<256x32xf32> -> vector<256x32xf32>
    %c0_48 = arith.constant 0 : index
    %c0_49 = arith.constant 0 : index
    %93 = vector.load %arg5[%c0_48, %c0_49] : memref<1x32xf32, #tpu.memory_space<vmem>>, vector<1x32xf32>
    %94 = vector.broadcast %93 : vector<1x32xf32> to vector<256x32xf32>
    %95 = arith.addf %92, %94 : vector<256x32xf32>
    %96 = math.tanh %95 : vector<256x32xf32>
    %97 = tpu.iota {dimensions = array<i32: 0>} : vector<256x1xi32>
    %c4_i32_50 = arith.constant 4 : i32
    %98 = vector.broadcast %c4_i32_50 : i32 to vector<256x1xi32>
    %99 = arith.shrsi %97, %98 : vector<256x1xi32>
    %c15_i32_51 = arith.constant 15 : i32
    %100 = vector.broadcast %c15_i32_51 : i32 to vector<256x1xi32>
    %101 = arith.andi %97, %100 : vector<256x1xi32>
    %c24_52 = arith.constant 24 : index
    %c0_53 = arith.constant 0 : index
    %102 = vector.load %arg11[%c24_52, %c0_53] : memref<304x32xf32, #tpu.memory_space<vmem>>, vector<256x32xf32>
    tpu.vector_store %arg11[%c24_52, %c0_53], %96 {strides = array<i32>} : memref<304x32xf32, #tpu.memory_space<vmem>>, vector<256x32xf32>,
    %c7_54 = arith.constant 7 : index
    %c0_55 = arith.constant 0 : index
    %103 = vector.load %arg11[%c7_54, %c0_55] : memref<304x32xf32, #tpu.memory_space<vmem>>, vector<256x32xf32>
    %c1_i32_56 = arith.constant 1 : i32
    %104 = vector.broadcast %c1_i32_56 : i32 to vector<256x1xi32>
    %105 = arith.cmpi sge, %99, %104 : vector<256x1xi32>
    %c1_i32_57 = arith.constant 1 : i32
    %106 = vector.broadcast %c1_i32_57 : i32 to vector<256x1xi32>
    %107 = arith.cmpi sge, %101, %106 : vector<256x1xi32>
    %108 = arith.andi %105, %107 : vector<256x1xi1>
    %cst_58 = arith.constant 0.000000e+00 : f32
    %109 = vector.shape_cast %108 : vector<256x1xi1> to vector<256x1xi1>
    %110 = vector.broadcast %109 : vector<256x1xi1> to vector<256x32xi1>
    %111 = vector.broadcast %cst_58 : f32 to vector<256x32xf32>
    %112 = arith.select %110, %103, %111 : vector<256x32xi1>, vector<256x32xf32>
    %c0_59 = arith.constant 0 : index
    %c0_60 = arith.constant 0 : index
    %113 = vector.load %arg12[%c0_59, %c0_60] : memref<256x288xf32, #tpu.memory_space<vmem>>, vector<256x32xf32>
    tpu.vector_store %arg12[%c0_59, %c0_60], %112 {strides = array<i32>} : memref<256x288xf32, #tpu.memory_space<vmem>>, vector<256x32xf32>,
    %c8_61 = arith.constant 8 : index
    %c0_62 = arith.constant 0 : index
    %114 = vector.load %arg11[%c8_61, %c0_62] : memref<304x32xf32, #tpu.memory_space<vmem>>, vector<256x32xf32>
    %c1_i32_63 = arith.constant 1 : i32
    %115 = vector.broadcast %c1_i32_63 : i32 to vector<256x1xi32>
    %116 = arith.cmpi sge, %99, %115 : vector<256x1xi32>
    %cst_64 = arith.constant 0.000000e+00 : f32
    %117 = vector.shape_cast %116 : vector<256x1xi1> to vector<256x1xi1>
    %118 = vector.broadcast %117 : vector<256x1xi1> to vector<256x32xi1>
    %119 = vector.broadcast %cst_64 : f32 to vector<256x32xf32>
    %120 = arith.select %118, %114, %119 : vector<256x32xi1>, vector<256x32xf32>
    %c0_65 = arith.constant 0 : index
    %c32 = arith.constant 32 : index
    %121 = vector.load %arg12[%c0_65, %c32] : memref<256x288xf32, #tpu.memory_space<vmem>>, vector<256x32xf32>
    tpu.vector_store %arg12[%c0_65, %c32], %120 {strides = array<i32>} : memref<256x288xf32, #tpu.memory_space<vmem>>, vector<256x32xf32>,
    %c9_66 = arith.constant 9 : index
    %c0_67 = arith.constant 0 : index
    %122 = vector.load %arg11[%c9_66, %c0_67] : memref<304x32xf32, #tpu.memory_space<vmem>>, vector<256x32xf32>
    %c1_i32_68 = arith.constant 1 : i32
    %123 = vector.broadcast %c1_i32_68 : i32 to vector<256x1xi32>
    %124 = arith.cmpi sge, %99, %123 : vector<256x1xi32>
    %c15_i32_69 = arith.constant 15 : i32
    %125 = vector.broadcast %c15_i32_69 : i32 to vector<256x1xi32>
    %126 = arith.cmpi slt, %101, %125 : vector<256x1xi32>
    %127 = arith.andi %124, %126 : vector<256x1xi1>
    %cst_70 = arith.constant 0.000000e+00 : f32
    %128 = vector.shape_cast %127 : vector<256x1xi1> to vector<256x1xi1>
    %129 = vector.broadcast %128 : vector<256x1xi1> to vector<256x32xi1>
    %130 = vector.broadcast %cst_70 : f32 to vector<256x32xf32>
    %131 = arith.select %129, %122, %130 : vector<256x32xi1>, vector<256x32xf32>
    %c0_71 = arith.constant 0 : index
    %c64_72 = arith.constant 64 : index
    %132 = vector.load %arg12[%c0_71, %c64_72] : memref<256x288xf32, #tpu.memory_space<vmem>>, vector<256x32xf32>
    tpu.vector_store %arg12[%c0_71, %c64_72], %131 {strides = array<i32>} : memref<256x288xf32, #tpu.memory_space<vmem>>, vector<256x32xf32>,
    %c23_73 = arith.constant 23 : index
    %c0_74 = arith.constant 0 : index
    %133 = vector.load %arg11[%c23_73, %c0_74] : memref<304x32xf32, #tpu.memory_space<vmem>>, vector<256x32xf32>
    %c1_i32_75 = arith.constant 1 : i32
    %134 = vector.broadcast %c1_i32_75 : i32 to vector<256x1xi32>
    %135 = arith.cmpi sge, %101, %134 : vector<256x1xi32>
    %cst_76 = arith.constant 0.000000e+00 : f32
    %136 = vector.shape_cast %135 : vector<256x1xi1> to vector<256x1xi1>
    %137 = vector.broadcast %136 : vector<256x1xi1> to vector<256x32xi1>
    %138 = vector.broadcast %cst_76 : f32 to vector<256x32xf32>
    %139 = arith.select %137, %133, %138 : vector<256x32xi1>, vector<256x32xf32>
    %c0_77 = arith.constant 0 : index
    %c96 = arith.constant 96 : index
    %140 = vector.load %arg12[%c0_77, %c96] : memref<256x288xf32, #tpu.memory_space<vmem>>, vector<256x32xf32>
    tpu.vector_store %arg12[%c0_77, %c96], %139 {strides = array<i32>} : memref<256x288xf32, #tpu.memory_space<vmem>>, vector<256x32xf32>,
    %c0_78 = arith.constant 0 : index
    %c128_79 = arith.constant 128 : index
    %141 = vector.load %arg12[%c0_78, %c128_79] : memref<256x288xf32, #tpu.memory_space<vmem>>, vector<256x32xf32>
    tpu.vector_store %arg12[%c0_78, %c128_79], %96 {strides = array<i32>} : memref<256x288xf32, #tpu.memory_space<vmem>>, vector<256x32xf32>,
    %c25_80 = arith.constant 25 : index
    %c0_81 = arith.constant 0 : index
    %142 = vector.load %arg11[%c25_80, %c0_81] : memref<304x32xf32, #tpu.memory_space<vmem>>, vector<256x32xf32>
    %c15_i32_82 = arith.constant 15 : i32
    %143 = vector.broadcast %c15_i32_82 : i32 to vector<256x1xi32>
    %144 = arith.cmpi slt, %101, %143 : vector<256x1xi32>
    %cst_83 = arith.constant 0.000000e+00 : f32
    %145 = vector.shape_cast %144 : vector<256x1xi1> to vector<256x1xi1>
    %146 = vector.broadcast %145 : vector<256x1xi1> to vector<256x32xi1>
    %147 = vector.broadcast %cst_83 : f32 to vector<256x32xf32>
    %148 = arith.select %146, %142, %147 : vector<256x32xi1>, vector<256x32xf32>
    %c0_84 = arith.constant 0 : index
    %c160 = arith.constant 160 : index
    %149 = vector.load %arg12[%c0_84, %c160] : memref<256x288xf32, #tpu.memory_space<vmem>>, vector<256x32xf32>
    tpu.vector_store %arg12[%c0_84, %c160], %148 {strides = array<i32>} : memref<256x288xf32, #tpu.memory_space<vmem>>, vector<256x32xf32>,
    %c39_85 = arith.constant 39 : index
    %c0_86 = arith.constant 0 : index
    %150 = vector.load %arg11[%c39_85, %c0_86] : memref<304x32xf32, #tpu.memory_space<vmem>>, vector<256x32xf32>
    %c15_i32_87 = arith.constant 15 : i32
    %151 = vector.broadcast %c15_i32_87 : i32 to vector<256x1xi32>
    %152 = arith.cmpi slt, %99, %151 : vector<256x1xi32>
    %c1_i32_88 = arith.constant 1 : i32
    %153 = vector.broadcast %c1_i32_88 : i32 to vector<256x1xi32>
    %154 = arith.cmpi sge, %101, %153 : vector<256x1xi32>
    %155 = arith.andi %152, %154 : vector<256x1xi1>
    %cst_89 = arith.constant 0.000000e+00 : f32
    %156 = vector.shape_cast %155 : vector<256x1xi1> to vector<256x1xi1>
    %157 = vector.broadcast %156 : vector<256x1xi1> to vector<256x32xi1>
    %158 = vector.broadcast %cst_89 : f32 to vector<256x32xf32>
    %159 = arith.select %157, %150, %158 : vector<256x32xi1>, vector<256x32xf32>
    %c0_90 = arith.constant 0 : index
    %c192_91 = arith.constant 192 : index
    %160 = vector.load %arg12[%c0_90, %c192_91] : memref<256x288xf32, #tpu.memory_space<vmem>>, vector<256x32xf32>
    tpu.vector_store %arg12[%c0_90, %c192_91], %159 {strides = array<i32>} : memref<256x288xf32, #tpu.memory_space<vmem>>, vector<256x32xf32>,
    %c40_92 = arith.constant 40 : index
    %c0_93 = arith.constant 0 : index
    %161 = vector.load %arg11[%c40_92, %c0_93] : memref<304x32xf32, #tpu.memory_space<vmem>>, vector<256x32xf32>
    %c15_i32_94 = arith.constant 15 : i32
    %162 = vector.broadcast %c15_i32_94 : i32 to vector<256x1xi32>
    %163 = arith.cmpi slt, %99, %162 : vector<256x1xi32>
    %cst_95 = arith.constant 0.000000e+00 : f32
    %164 = vector.shape_cast %163 : vector<256x1xi1> to vector<256x1xi1>
    %165 = vector.broadcast %164 : vector<256x1xi1> to vector<256x32xi1>
    %166 = vector.broadcast %cst_95 : f32 to vector<256x32xf32>
    %167 = arith.select %165, %161, %166 : vector<256x32xi1>, vector<256x32xf32>
    %c0_96 = arith.constant 0 : index
    %c224 = arith.constant 224 : index
    %168 = vector.load %arg12[%c0_96, %c224] : memref<256x288xf32, #tpu.memory_space<vmem>>, vector<256x32xf32>
    tpu.vector_store %arg12[%c0_96, %c224], %167 {strides = array<i32>} : memref<256x288xf32, #tpu.memory_space<vmem>>, vector<256x32xf32>,
    %c41_97 = arith.constant 41 : index
    %c0_98 = arith.constant 0 : index
    %169 = vector.load %arg11[%c41_97, %c0_98] : memref<304x32xf32, #tpu.memory_space<vmem>>, vector<256x32xf32>
    %c15_i32_99 = arith.constant 15 : i32
    %170 = vector.broadcast %c15_i32_99 : i32 to vector<256x1xi32>
    %171 = arith.cmpi slt, %99, %170 : vector<256x1xi32>
    %c15_i32_100 = arith.constant 15 : i32
    %172 = vector.broadcast %c15_i32_100 : i32 to vector<256x1xi32>
    %173 = arith.cmpi slt, %101, %172 : vector<256x1xi32>
    %174 = arith.andi %171, %173 : vector<256x1xi1>
    %cst_101 = arith.constant 0.000000e+00 : f32
    %175 = vector.shape_cast %174 : vector<256x1xi1> to vector<256x1xi1>
    %176 = vector.broadcast %175 : vector<256x1xi1> to vector<256x32xi1>
    %177 = vector.broadcast %cst_101 : f32 to vector<256x32xf32>
    %178 = arith.select %176, %169, %177 : vector<256x32xi1>, vector<256x32xf32>
    %c0_102 = arith.constant 0 : index
    %c256_103 = arith.constant 256 : index
    %179 = vector.load %arg12[%c0_102, %c256_103] : memref<256x288xf32, #tpu.memory_space<vmem>>, vector<256x32xf32>
    tpu.vector_store %arg12[%c0_102, %c256_103], %178 {strides = array<i32>} : memref<256x288xf32, #tpu.memory_space<vmem>>, vector<256x32xf32>,
    %c0_104 = arith.constant 0 : index
    %c0_105 = arith.constant 0 : index
    %180 = vector.load %arg12[%c0_104, %c0_105] : memref<256x288xf32, #tpu.memory_space<vmem>>, vector<256x288xf32>
    %c0_106 = arith.constant 0 : index
    %c0_107 = arith.constant 0 : index
    %181 = vector.load %arg6[%c0_106, %c0_107] : memref<288x16xf32, #tpu.memory_space<vmem>>, vector<288x16xf32>
    %cst_108 = arith.constant dense<0.000000e+00> : vector<256x16xf32>
    %182 = tpu.matmul %180, %181, %cst_108 {dimension_numbers = #tpu.dot_dimension_numbers<[1], [0], [0], [1], [0, 0, 1, 1], [], []>} : vector<256x288xf32>, vector<288x16xf32>, vector<256x16xf32> -> vector<256x16xf32>
    %c0_109 = arith.constant 0 : index
    %c0_110 = arith.constant 0 : index
    %183 = vector.load %arg7[%c0_109, %c0_110] : memref<1x16xf32, #tpu.memory_space<vmem>>, vector<1x16xf32>
    %184 = vector.broadcast %183 : vector<1x16xf32> to vector<256x16xf32>
    %185 = arith.addf %182, %184 : vector<256x16xf32>
    %cst_111 = arith.constant 5.000000e-01 : f32
    %186 = vector.broadcast %cst_111 : f32 to vector<256x16xf32>
    %187 = arith.mulf %186, %185 : vector<256x16xf32>
    %188 = math.tanh %187 : vector<256x16xf32>
    %cst_112 = arith.constant 5.000000e-01 : f32
    %189 = vector.broadcast %cst_112 : f32 to vector<256x16xf32>
    %190 = arith.mulf %189, %188 : vector<256x16xf32>
    %cst_113 = arith.constant 5.000000e-01 : f32
    %191 = vector.broadcast %cst_113 : f32 to vector<256x16xf32>
    %192 = arith.addf %190, %191 : vector<256x16xf32>
    %c0_114 = arith.constant 0 : index
    %c0_115 = arith.constant 0 : index
    %193 = vector.load %arg8[%c0_114, %c0_115] : memref<256x16xf32, #tpu.memory_space<vmem>>, vector<256x16xf32>
    tpu.vector_store %arg8[%c0_114, %c0_115], %192 {strides = array<i32>} : memref<256x16xf32, #tpu.memory_space<vmem>>, vector<256x16xf32>,
    return
  }
  func.func @transform_0(%arg0: i32) -> (i32, i32) {
    %c0_i32 = arith.constant 0 : i32
    %c0_i32_0 = arith.constant 0 : i32
    return %arg0, %c0_i32 : i32, i32
  }
  func.func @transform_1(%arg0: i32) -> (i32, i32) {
    %c0_i32 = arith.constant 0 : i32
    %c0_i32_0 = arith.constant 0 : i32
    %c0_i32_1 = arith.constant 0 : i32
    return %c0_i32, %c0_i32_0 : i32, i32
  }
  func.func @transform_2(%arg0: i32) -> (i32, i32) {
    %c0_i32 = arith.constant 0 : i32
    %c0_i32_0 = arith.constant 0 : i32
    %c0_i32_1 = arith.constant 0 : i32
    return %c0_i32, %c0_i32_0 : i32, i32
  }
  func.func @transform_3(%arg0: i32) -> (i32, i32) {
    %c0_i32 = arith.constant 0 : i32
    %c0_i32_0 = arith.constant 0 : i32
    %c0_i32_1 = arith.constant 0 : i32
    return %c0_i32, %c0_i32_0 : i32, i32
  }
  func.func @transform_4(%arg0: i32) -> (i32, i32) {
    %c0_i32 = arith.constant 0 : i32
    %c0_i32_0 = arith.constant 0 : i32
    %c0_i32_1 = arith.constant 0 : i32
    return %c0_i32, %c0_i32_0 : i32, i32
  }
  func.func @transform_5(%arg0: i32) -> (i32, i32) {
    %c0_i32 = arith.constant 0 : i32
    %c0_i32_0 = arith.constant 0 : i32
    %c0_i32_1 = arith.constant 0 : i32
    return %c0_i32, %c0_i32_0 : i32, i32
  }
  func.func @transform_6(%arg0: i32) -> (i32, i32) {
    %c0_i32 = arith.constant 0 : i32
    %c0_i32_0 = arith.constant 0 : i32
    %c0_i32_1 = arith.constant 0 : i32
    return %c0_i32, %c0_i32_0 : i32, i32
  }
  func.func @transform_7(%arg0: i32) -> (i32, i32) {
    %c0_i32 = arith.constant 0 : i32
    %c0_i32_0 = arith.constant 0 : i32
    return %arg0, %c0_i32 : i32, i32
  }
}

</mosaic_0001>

<bundles_post_ra>
// kernel: espcn_forward.1
= control target key start
LH: loop header
LB: loop body
LE: loop exit
PB: predicated region body
PF: predicated region fallthrough
CT: control target
= control target key end

     0   :  { %s7428_s24 = smov 0   ;;  %s12006_s0 = inlined_call_operand.vmem [shape: f32[512,32], index: 0, kind: input, shape index: {}]   ;;  %s12007_s1 = inlined_call_operand.vmem [shape: f32[32,64], index: 1, kind: input, shape index: {}]   ;;  %s12008_s2 = inlined_call_operand.vmem [shape: f32[1,64], index: 2, kind: input, shape index: {}]   ;;  %s12009_s3 = inlined_call_operand.vmem [shape: f32[576,32], index: 3, kind: input, shape index: {}]   ;;  %s12010_s4 = inlined_call_operand.vmem [shape: f32[1,32], index: 4, kind: input, shape index: {}]   ;;  %s12011_s5 = inlined_call_operand.vmem [shape: f32[288,16], index: 5, kind: input, shape index: {}]   ;;  %s12012_s6 = inlined_call_operand.vmem [shape: f32[1,16], index: 6, kind: input, shape index: {}]   ;;  %s12013_s7 = inlined_call_operand.vmem [shape: f32[512,16], index: 7, kind: output, shape index: {}]  }
   0x1 LB: > { %s6437_s25 = sadd.s32 4294967295, %s7382_s24   ;;  %p6441_p0 = scmp.ge.s32.totalorder %s7382_s24, 1  ;;  %s7382_s24 = sphi %s7428_s24, %s17_s24  }
   0x2   : > { %p238_p1 = scmp.lt.s32.totalorder %s7382_s24, 3 }
   0x4   : > { %p239_p2 = pnand %p6441_p0, %p238_p1 }
   0x6   : > { %242 = sbr.rel (%p239_p2) target bundleno = 1775 (0x6ef), region = 48 }
   0xd   : > { %v314_v0 = vld [vmem:[%s12007_s1] sm:$0xff]  ;;  %v315_v1 = vld [vmem:[%s12007_s1 + $0x8] sm:$0xff]  ;;  %v316_v2 = vld [vmem:[%s12007_s1 + $0x10] sm:$0xff]  ;;  %s6442_s9 = sshll.u32 %s6437_s25, 5  ;;  %vm12015_vm0 = vcmask 261120   ;;  %v679_v38 = vlaneseq  ;;  %v12447_v43 = vmov 0 }
   0xe   : > { %v6835_v3 = vpack.c.bf16 %v315_v1, %v314_v0  ;;  %v317_v4 = vld [vmem:[%s12007_s1 + $0x18] sm:$0xff]  ;;  %p271_p3 = scmp.lt.s32.totalorder %s6442_s9, 63  ;;  %v1066_v44 = vld [vmem:[#allocation2 + $0x10] sm:$0xff]  ;;  %v12450_v46 = vmov 0  ;;  %v1065_v47 = vld [vmem:[#allocation2 + $0x8] sm:$0xff]  ;;  %s7384_s16 = smov 64  }
   0xf   : > { %v6839_v5 = vpack.c.bf16 %v317_v4, %v316_v2  ;;  %v7522_v39 = vshrl.u32 %v679_v38, 7  ;;  %v3114_v49 = vld [vmem:[%s12009_s3 + $0x200] sm:$0xff]  ;;  %v3115_v50 = vld [vmem:[%s12009_s3 + $0x208] sm:$0xff]  ;;  %v3116_v52 = vld [vmem:[%s12009_s3 + $0x210] sm:$0xff]  ;;  %v12039_v63 = vmov 0.0|0.0   ;;  %vm12016_vm4 = vcmask 1048064  }
  0x10   : > { %6836 = vmatprep.subr.bf16.mxu0 %v6835_v3  ;;  %s13989_s9 = smov (!%p271_p3, %s6442_s9), 63  ;;  %v6939_v51 = vpack.c.bf16 %v3115_v50, %v3114_v49  ;;  %v3117_v53 = vld [vmem:[%s12009_s3 + $0x218] sm:$0xff]  ;;  %v3118_v55 = vld [vmem:[%s12009_s3 + $0x220] sm:$0xff]  ;;  %v3119_v56 = vld [vmem:[%s12009_s3 + $0x228] sm:$0xff]  ;;  %6843 = vmatprep.subr.bf16.mxu1 %v12039_v63  ;;  %vm12028_vm6 = vcmask 523264   ;;  %s7386_s11 = smov 32  }
  0x11   : > { %6838 = vmatpush3.bf16.msra.mxu0 %v6835_v3  ;;  %s6443_s12 = sshll.u32 %s13989_s9, 3  ;;  %v7525_v40 = vadd.s32 8, %v7522_v39  ;;  %v712_v42 = vshra.s32 %v7522_v39, 4  ;;  %v6943_v54 = vpack.c.bf16 %v3117_v53, %v3116_v52  ;;  %v6947_v57 = vpack.c.bf16 %v3119_v56, %v3118_v55  ;;  %v3120_v58 = vld [vmem:[%s12009_s3 + $0x230] sm:$0xff]  ;;  %v3121_v59 = vld [vmem:[%s12009_s3 + $0x238] sm:$0xff]  ;;  %v3050_v61 = vld [vmem:[%s12009_s3] sm:$0xff] }
  0x12   : > { %6840 = vmatprep.subr.bf16.mxu0 %v6839_v5  ;;  %s7456_s15 = scalar_lea.vmem %s12006_s0, %s6443_s12  ;;  %v6951_v60 = vpack.c.bf16 %v3121_v59, %v3120_v58  ;;  %v3051_v62 = vld [vmem:[%s12009_s3 + $0x8] sm:$0xff]  ;;  %v3052_v1 = vld [vmem:[%s12009_s3 + $0x10] sm:$0xff]  ;;  %v3053_v2 = vld [vmem:[%s12009_s3 + $0x18] sm:$0xff]  ;;  %s7387_s29 = smov 96  }
  0x13   : > { %v282_v6 = vld [vmem:[%s7456_s15] sm:$0xff]  ;;  %v283_v7 = vld [vmem:[%s7456_s15 + $0x8] sm:$0xff]  ;;  %v284_v8 = vld [vmem:[%s7456_s15 + $0x10] sm:$0xff]  ;;  %v713_v41 = vshra.s32 %v7525_v40, 4  ;;  %vm7539_vm2 = vcmp.ge.s32.totalorder %v712_v42, 1  ;;  %v6844_v0 = vpack.c.bf16 %v3051_v62, %v3050_v61  ;;  %v6847_v3 = vpack.c.bf16 %v3053_v2, %v3052_v1  ;;  %s11893_s21 = scalar_lea.vmem %s12013_s7, %s6443_s12 }
  0x14   : > { %6667 = vmatprep.mubr.msk.f32.mxu0 %vm12015_vm0, %v282_v6  ;;  %v285_v9 = vld [vmem:[%s7456_s15 + $0x18] sm:$0xff]  ;;  %v286_v10 = vld [vmem:[%s7456_s15 + $0x20] sm:$0xff]  ;;  %v287_v11 = vld [vmem:[%s7456_s15 + $0x28] sm:$0xff]  ;;  %v12451_v46 = vsel %vm7539_vm2, 4294967295, %v12450_v46  ;;  %v1161_v48 = vsel %vm7539_vm2, %v1065_v47, 0.0  ;;  %vm7774_vm11 = vcmp.lt.s32.totalorder %v712_v42, 15 }
  0x15   : > { %6842 = vmatpush3.bf16.msra.mxu0 %v6839_v5  ;;  %v288_v12 = vld [vmem:[%s7456_s15 + $0x30] sm:$0xff]  ;;  %v289_v13 = vld [vmem:[%s7456_s15 + $0x38] sm:$0xff]  ;;  %v290_v14 = vld [vmem:[%s7456_s15 + $0x40] sm:$0xff]  ;;  %vm7531_vm1 = vcmp.ge.s32.totalorder %v713_v41, 1  ;;  %12452 = vst [vmem:[#allocation7_spill] sm:$0xff] %v12451_v46  ;;  %1225 = vrot.lane.b32.xlu0 %v1161_v48, %s7384_s16  ;;  %vm7787_vm13 = vcmp.lt.s32.totalorder %v713_v41, 15 }
  0x16   : > { %v291_v15 = vld [vmem:[%s7456_s15 + $0x48] sm:$0xff]  ;;  %v292_v16 = vld [vmem:[%s7456_s15 + $0x50] sm:$0xff]  ;;  %v293_v17 = vld [vmem:[%s7456_s15 + $0x58] sm:$0xff]  ;;  %v12448_v43 = vsel %vm7531_vm1, 4294967295, %v12447_v43  ;;  %v1162_v45 = vsel %vm7531_vm1, %v1066_v44, 0.0  ;;  %6940 = vmatprep.subr.bf16.mxu0 %v6939_v51  ;;  %6845 = vmatpush1.bf16.msra.mxu1 %v6844_v0  ;;  %v7700_v0 = vadd.s32 24, %v7522_v39 }
  0x17   : > { %v294_v18 = vld [vmem:[%s7456_s15 + $0x60] sm:$0xff]  ;;  %v295_v19 = vld [vmem:[%s7456_s15 + $0x68] sm:$0xff]  ;;  %v296_v20 = vld [vmem:[%s7456_s15 + $0x70] sm:$0xff]  ;;  %12449 = vst [vmem:[#allocation6_spill] sm:$0xff] %v12448_v43  ;;  %1227 = vrot.lane.b32.xlu1 %v1162_v45, %s7384_s16  ;;  %6846 = vmatprep.subr.bf16.mxu1 %v12039_v63  ;;  %v12453_v45 = vmov 0  ;;  %v12477_v42 = vmov 0 }
  0x18   : > { %6668 = vmatmul.mubr.msk.f32.vlgmr.msra.gmra.mrb[0].mxu0 %vm12015_vm0, %v283_v7  ;;  %v297_v21 = vld [vmem:[%s7456_s15 + $0x78] sm:$0xff]  ;;  %v298_v22 = vld [vmem:[%s7456_s15 + $0x80] sm:$0xff]  ;;  %v299_v23 = vld [vmem:[%s7456_s15 + $0x88] sm:$0xff] }
  0x19   : > { %6670 = vmatprep.mubr.msk.f32.mxu0 %vm12015_vm0, %v284_v8  ;;  %v300_v24 = vld [vmem:[%s7456_s15 + $0x90] sm:$0xff]  ;;  %v301_v25 = vld [vmem:[%s7456_s15 + $0x98] sm:$0xff]  ;;  %v302_v26 = vld [vmem:[%s7456_s15 + $0xa0] sm:$0xff]  ;;  %6942 = vmatpush3.bf16.msra.mxu0 %v6939_v51 }
  0x1a   : > { %v303_v27 = vld [vmem:[%s7456_s15 + $0xa8] sm:$0xff]  ;;  %v304_v28 = vld [vmem:[%s7456_s15 + $0xb0] sm:$0xff]  ;;  %v305_v29 = vld [vmem:[%s7456_s15 + $0xb8] sm:$0xff]  ;;  %6944 = vmatprep.subr.bf16.mxu0 %v6943_v54  ;;  %6848 = vmatpush1.bf16.msra.mxu1 %v6847_v3 }
  0x1b   : > { %v306_v30 = vld [vmem:[%s7456_s15 + $0xc0] sm:$0xff]  ;;  %v307_v31 = vld [vmem:[%s7456_s15 + $0xc8] sm:$0xff]  ;;  %v308_v32 = vld [vmem:[%s7456_s15 + $0xd0] sm:$0xff]  ;;  %6849 = vmatprep.subr.bf16.mxu1 %v12039_v63 }
  0x1c   : > { %6671 = vmatmul.mubr.msk.f32.gmra.mrb[2].mxu0 %vm12015_vm0, %v285_v9  ;;  %v309_v33 = vld [vmem:[%s7456_s15 + $0xd8] sm:$0xff]  ;;  %v310_v34 = vld [vmem:[%s7456_s15 + $0xe0] sm:$0xff]  ;;  %v311_v35 = vld [vmem:[%s7456_s15 + $0xe8] sm:$0xff] }
  0x1d   : > { %6673 = vmatprep.mubr.msk.f32.mxu0 %vm12015_vm0, %v286_v10  ;;  %v312_v36 = vld [vmem:[%s7456_s15 + $0xf0] sm:$0xff]  ;;  %v313_v37 = vld [vmem:[%s7456_s15 + $0xf8] sm:$0xff]  ;;  %6946 = vmatpush3.bf16.msra.mxu0 %v6943_v54  ;;  %v3054_v4 = vld [vmem:[%s12009_s3 + $0x20] sm:$0xff] }
  0x1e   : > { %6948 = vmatprep.subr.bf16.mxu0 %v6947_v57  ;;  %v3055_v5 = vld [vmem:[%s12009_s3 + $0x28] sm:$0xff]  ;;  %v3056_v7 = vld [vmem:[%s12009_s3 + $0x30] sm:$0xff]  ;;  %v3057_v8 = vld [vmem:[%s12009_s3 + $0x38] sm:$0xff] }
  0x1f   : > { %v6850_v6 = vpack.c.bf16 %v3055_v5, %v3054_v4  ;;  %v6853_v9 = vpack.c.bf16 %v3057_v8, %v3056_v7  ;;  %v3058_v10 = vld [vmem:[%s12009_s3 + $0x40] sm:$0xff]  ;;  %v3075_v48 = vld [vmem:[%s12009_s3 + $0xc8] sm:$0xff]  ;;  %v3077_v61 = vld [vmem:[%s12009_s3 + $0xd8] sm:$0xff]  ;;  %v745_v8 = vand.u32 15, %v7525_v40  ;;  %v12483_v40 = vmov 0 }
  0x20   : > { %6674 = vmatmul.mubr.msk.f32.gmra.mrb[4].mxu0 %vm12015_vm0, %v287_v11  ;;  %v3059_v11 = vld [vmem:[%s12009_s3 + $0x48] sm:$0xff]  ;;  %v3074_v47 = vld [vmem:[%s12009_s3 + $0xc0] sm:$0xff] }
  0x21   : > { %6676 = vmatprep.mubr.msk.f32.mxu0 %vm12015_vm0, %v288_v12  ;;  %6950 = vmatpush3.bf16.msra.mxu0 %v6947_v57  ;;  %v6856_v12 = vpack.c.bf16 %v3059_v11, %v3058_v10  ;;  %v6880_v50 = vpack.c.bf16 %v3075_v48, %v3074_v47  ;;  %v810_v51 = vld [vmem:[#allocation2 + $0xf] sm:$0xff]  ;;  %v809_v52 = vld [vmem:[#allocation2 + $0x7] sm:$0xff]  ;;  %vm7733_vm7 = vcmp.lt.s32.totalorder %v745_v8, 15  ;;  %v12465_v48 = vmov 0 }
  0x22   : > { %6952 = vmatprep.subr.bf16.mxu0 %v6951_v60  ;;  %6851 = vmatpush1.bf16.msra.mxu1 %v6850_v6  ;;  %v1002_v55 = vsel %vm7531_vm1, %v810_v51, 0.0  ;;  %v1354_v4 = vld [vmem:[#allocation2 + $0x9] sm:$0xff]  ;;  %v7705_v6 = vadd.s32 16, %v7522_v39  ;;  %v12471_v51 = vmov 0 }
  0x23   : > { %6852 = vmatprep.subr.bf16.mxu1 %v12039_v63  ;;  %1034 = vst.msk [vmem:[#allocation3 + $0x28] sm:$0xff] %vm12028_vm6, %v1002_v55  ;;  %v1514_v7 = vsel %vm7539_vm2, %v1354_v4, 0.0  ;;  %v3079_v10 = vld [vmem:[%s12009_s3 + $0xe8] sm:$0xff]  ;;  %v12480_v55 = vmov 0 }
  0x24   : > { %6677 = vmatmul.mubr.msk.f32.gmra.mrb[6].mxu0 %vm12015_vm0, %v289_v13  ;;  %v3060_v13 = vld [vmem:[%s12009_s3 + $0x50] sm:$0xff]  ;;  %1546 = vst.msk [vmem:[#allocation3 + $0x8] sm:$0xff] %vm12028_vm6, %v1514_v7 }
  0x25   : > { %6679 = vmatprep.mubr.msk.f32.mxu0 %vm12015_vm0, %v290_v14  ;;  %6954 = vmatpush3.bf16.msra.mxu0 %v6951_v60  ;;  %v3061_v14 = vld [vmem:[%s12009_s3 + $0x58] sm:$0xff]  ;;  %v3076_v60 = vld [vmem:[%s12009_s3 + $0xd0] sm:$0xff] }
  0x26   : > { %6955 = vmatprep.subr.bf16.mxu0 %v12039_v63  ;;  %6854 = vmatpush1.bf16.msra.mxu1 %v6853_v9  ;;  %v6883_v1 = vpack.c.bf16 %v3077_v61, %v3076_v60  ;;  %v3078_v9 = vld [vmem:[%s12009_s3 + $0xe0] sm:$0xff] }
  0x27   : > { %6855 = vmatprep.subr.bf16.mxu1 %v12039_v63 }
  0x28   : > { %6680 = vmatmul.mubr.msk.f32.gmra.mrb[8].mxu0 %vm12015_vm0, %v291_v15  ;;  %v6859_v15 = vpack.c.bf16 %v3061_v14, %v3060_v13  ;;  %v7720_v13 = vadd.s32 32, %v7522_v39  ;;  %v6886_v14 = vpack.c.bf16 %v3079_v10, %v3078_v9 }
  0x29   : > { %6682 = vmatprep.mubr.msk.f32.mxu0 %vm12015_vm0, %v292_v16  ;;  %v3062_v16 = vld [vmem:[%s12009_s3 + $0x60] sm:$0xff] }
  0x2a   : > { %6857 = vmatpush1.bf16.msra.mxu1 %v6856_v12  ;;  %v715_v12 = vshra.s32 %v7700_v0, 4 }
  0x2b   : > { %6858 = vmatprep.subr.bf16.mxu1 %v12039_v63 }
  0x2c   : > { %6683 = vmatmul.mubr.msk.f32.gmra.mrb[10].mxu0 %vm12015_vm0, %v293_v17  ;;  %v3063_v17 = vld [vmem:[%s12009_s3 + $0x68] sm:$0xff]  ;;  %vm7741_vm8 = vcmp.ge.s32.totalorder %v715_v12, 1 }
  0x2d   : > { %6685 = vmatprep.mubr.msk.f32.mxu0 %vm12015_vm0, %v294_v18  ;;  %v6862_v18 = vpack.c.bf16 %v3063_v17, %v3062_v16 }
  0x2e   : > { %6860 = vmatpush1.bf16.msra.mxu1 %v6859_v15 }
  0x2f   : > { %6861 = vmatprep.subr.bf16.mxu1 %v12039_v63 }
  0x30   : > { %6686 = vmatmul.mubr.msk.f32.gmra.mrb[12].mxu0 %vm12015_vm0, %v295_v19  ;;  %v3064_v19 = vld [vmem:[%s12009_s3 + $0x70] sm:$0xff] }
  0x31   : > { %6688 = vmatprep.mubr.msk.f32.mxu0 %vm12015_vm0, %v296_v20  ;;  %v3065_v20 = vld [vmem:[%s12009_s3 + $0x78] sm:$0xff] }
  0x32   : > { %6863 = vmatpush1.bf16.msra.mxu1 %v6862_v18  ;;  %v7724_v18 = vadd.s32 40, %v7522_v39 }
  0x33   : > { %6864 = vmatprep.subr.bf16.mxu1 %v12039_v63 }
  0x34   : > { %6689 = vmatmul.mubr.msk.f32.gmra.mrb[14].mxu0 %vm12015_vm0, %v297_v21  ;;  %v6865_v21 = vpack.c.bf16 %v3065_v20, %v3064_v19 }
  0x35   : > { %6691 = vmatprep.mubr.msk.f32.mxu0 %vm12015_vm0, %v298_v22  ;;  %v3066_v22 = vld [vmem:[%s12009_s3 + $0x80] sm:$0xff] }
  0x36   : > { %6866 = vmatpush1.bf16.msra.mxu1 %v6865_v21  ;;  %v714_v21 = vshra.s32 %v7705_v6, 4 }
  0x37   : > { %6867 = vmatprep.subr.bf16.mxu1 %v12039_v63 }
  0x38   : > { %6692 = vmatmul.mubr.msk.f32.gmra.mrb[16].mxu0 %vm12015_vm0, %v299_v23  ;;  %v3067_v23 = vld [vmem:[%s12009_s3 + $0x88] sm:$0xff]  ;;  %vm7760_vm9 = vcmp.ge.s32.totalorder %v714_v21, 1 }
  0x39   : > { %6694 = vmatprep.mubr.msk.f32.mxu0 %vm12015_vm0, %v300_v24  ;;  %v6868_v24 = vpack.c.bf16 %v3067_v23, %v3066_v22  ;;  %v746_v22 = vand.u32 15, %v7705_v6  ;;  %v12456_v23 = vmov 0 }
  0x3a   : > { %v12457_v23 = vsel %vm7733_vm7, 4294967295, %v12456_v23 }
  0x3b   : > { %6869 = vmatpush1.bf16.msra.mxu1 %v6868_v24  ;;  %12458 = vst [vmem:[#allocation9_spill] sm:$0xff] %v12457_v23  ;;  %v747_v24 = vand.u32 15, %v7700_v0  ;;  %vm7765_vm10 = vcmp.ge.s32.totalorder %v746_v22, 1  ;;  %v12500_v0 = vmov 0 }
  0x3c   : > { %6695 = vmatmul.mubr.msk.f32.gmra.mrb[18].mxu0 %vm12015_vm0, %v301_v25  ;;  %6870 = vmatprep.subr.bf16.mxu1 %v12039_v63  ;;  %v3068_v25 = vld [vmem:[%s12009_s3 + $0x90] sm:$0xff]  ;;  %v12466_v48 = vsel %vm7765_vm10, 4294967295, %v12465_v48 }
  0x3d   : > { %6697 = vmatprep.mubr.msk.f32.mxu0 %vm12015_vm0, %v302_v26  ;;  %v3069_v26 = vld [vmem:[%s12009_s3 + $0x98] sm:$0xff]  ;;  %12467 = vst [vmem:[#allocation12_spill] sm:$0xff] %v12466_v48  ;;  %vm7778_vm12 = vcmp.lt.s32.totalorder %v747_v24, 15 }
  0x3e   : > { %v12472_v51 = vsel %vm7778_vm12, 4294967295, %v12471_v51 }
  0x3f   : > { %12473 = vst [vmem:[#allocation14_spill] sm:$0xff] %v12472_v51 }
  0x40   : > { %6698 = vmatmul.mubr.msk.f32.gmra.mrb[20].mxu0 %vm12015_vm0, %v303_v27  ;;  %v6871_v27 = vpack.c.bf16 %v3069_v26, %v3068_v25  ;;  %v12459_v25 = vmov 0 }
  0x41   : > { %6700 = vmatprep.mubr.msk.f32.mxu0 %vm12015_vm0, %v304_v28  ;;  %v3070_v28 = vld [vmem:[%s12009_s3 + $0xa0] sm:$0xff]  ;;  %v12460_v25 = vsel %vm7741_vm8, 4294967295, %v12459_v25 }
  0x42   : > { %6872 = vmatpush1.bf16.msra.mxu1 %v6871_v27  ;;  %12461 = vst [vmem:[#allocation10_spill] sm:$0xff] %v12460_v25  ;;  %v716_v27 = vshra.s32 %v7720_v13, 4 }
  0x43   : > { %6873 = vmatprep.subr.bf16.mxu1 %v12039_v63 }
  0x44   : > { %6701 = vmatmul.mubr.msk.f32.gmra.mrb[22].mxu0 %vm12015_vm0, %v305_v29  ;;  %v3071_v29 = vld [vmem:[%s12009_s3 + $0xa8] sm:$0xff]  ;;  %vm7793_vm14 = vcmp.ge.s32.totalorder %v716_v27, 1 }
  0x45   : > { %6703 = vmatprep.mubr.msk.f32.mxu0 %vm12015_vm0, %v306_v30  ;;  %v6874_v30 = vpack.c.bf16 %v3071_v29, %v3070_v28  ;;  %v748_v28 = vand.u32 15, %v7720_v13  ;;  %v3080_v29 = vld [vmem:[%s12009_s3 + $0xf0] sm:$0xff]  ;;  %v12478_v42 = vsel %vm7793_vm14, 4294967295, %v12477_v42 }
  0x46   : > { %12479 = vst [vmem:[#allocation16_spill] sm:$0xff] %v12478_v42  ;;  %v12603_v42 = vmov 0 }
  0x47   : > { %6875 = vmatpush1.bf16.msra.mxu1 %v6874_v30  ;;  %v3081_v30 = vld [vmem:[%s12009_s3 + $0xf8] sm:$0xff]  ;;  %vm7797_vm15 = vcmp.ge.s32.totalorder %v748_v28, 1 }
  0x48   : > { %6704 = vmatmul.mubr.msk.f32.gmra.mrb[24].mxu0 %vm12015_vm0, %v307_v31  ;;  %v7652_v31 = vld [vmem:[%s12008_s2] ss:$0 sm:$0xff]  ;;  %6876 = vmatprep.subr.bf16.mxu1 %v12039_v63  ;;  %v12481_v55 = vsel %vm7797_vm15, 4294967295, %v12480_v55 }
  0x49   : > { %6706 = vmatprep.mubr.msk.f32.mxu0 %vm12015_vm0, %v308_v32  ;;  %v744_v32 = vand.u32 15, %v7522_v39  ;;  %12482 = vst [vmem:[#allocation17_spill] sm:$0xff] %v12481_v55 }
  0x4b   : > { %vm7664_vm3 = vcmp.ge.s32.totalorder %v744_v32, 1 }
  0x4c   : > { %6707 = vmatmul.mubr.msk.f32.gmra.mrb[26].mxu0 %vm12015_vm0, %v309_v33  ;;  %v3072_v33 = vld [vmem:[%s12009_s3 + $0xb0] sm:$0xff]  ;;  %v12454_v45 = vsel %vm7664_vm3, 4294967295, %v12453_v45  ;;  %vm12014_vm5 = vmand %vm7539_vm2, %vm7664_vm3 }
  0x4d   : > { %6709 = vmatprep.mubr.msk.f32.mxu0 %vm12015_vm0, %v310_v34  ;;  %v3073_v34 = vld [vmem:[%s12009_s3 + $0xb8] sm:$0xff]  ;;  %12455 = vst [vmem:[#allocation8_spill] sm:$0xff] %v12454_v45  ;;  %v1001_v56 = vsel %vm12014_vm5, %v809_v52, 0.0  ;;  %v7783_v52 = vadd.s32 56, %v7522_v39  ;;  %v12659_v45 = vmov 0 }
  0x4e   : > { %1033 = vst.msk [vmem:[#allocation3] sm:$0xff] %vm12028_vm6, %v1001_v56 }
  0x4f   : > { %v719_v7 = vshra.s32 %v7783_v52, 4  ;;  %v751_v8 = vand.u32 15, %v7783_v52 }
  0x50   : > { %6710 = vmatmul.mubr.msk.f32.gmra.mrb[28].mxu0 %vm12015_vm0, %v311_v35 }
  0x51   : > { %6712 = vmatprep.mubr.msk.f32.mxu0 %vm12015_vm0, %v312_v36  ;;  %v6877_v36 = vpack.c.bf16 %v3073_v34, %v3072_v33 }
  0x53   : > { %6878 = vmatpush1.bf16.msra.mxu1 %v6877_v36  ;;  %v7756_v36 = vadd.s32 48, %v7522_v39 }
  0x54   : > { %6713 = vmatmul.mubr.msk.f32.gmra.mrb[30].mxu0 %vm12015_vm0, %v313_v37  ;;  %6879 = vmatprep.subr.bf16.mxu1 %v12039_v63  ;;  %vm12492_vm0 = vmand %vm7531_vm1, %vm7733_vm7 }
  0x55   : > { %v750_v4 = vand.u32 15, %v7756_v36  ;;  %vm12493_vm1 = vmand %vm7760_vm9, %vm7765_vm10  ;;  %vm7897_vm10 = vcmp.lt.s32.totalorder %v715_v12, 15 }
  0x57   : > { %6881 = vmatpush1.bf16.msra.mxu1 %v6880_v50  ;;  %v12468_v50 = vmov 0 }
  0x58   : > { %6882 = vmatprep.subr.bf16.mxu1 %v12039_v63  ;;  %v12469_v50 = vsel %vm7774_vm11, 4294967295, %v12468_v50 }
  0x59   : > { %12470 = vst [vmem:[#allocation13_spill] sm:$0xff] %v12469_v50 }
  0x5b   : > { %6884 = vmatpush1.bf16.msra.mxu1 %v6883_v1  ;;  %v12486_v1 = vmov 0 }
  0x5c   : > { %6885 = vmatprep.subr.bf16.mxu1 %v12039_v63 }
  0x5f   : > { %6887 = vmatpush1.bf16.msra.mxu1 %v6886_v14  ;;  %v7842_v14 = vadd.s32 72, %v7522_v39 }
  0x60   : > { %6888 = vmatprep.subr.bf16.mxu1 %v12039_v63 }
  0x61   : > { %v12053_v12 = vshra.s32 %v7842_v14, 4 }
  0x87   : > { %v1226_v59 = vpop.permute.xlu0 %1225 }
  0x88   : > { %1322 = vst.msk [vmem:[#allocation3] sm:$0xff] %vm12016_vm4, %v1226_v59  ;;  %v7811_v59 = vadd.s32 64, %v7522_v39 }
  0x89   : > { %v1228_v58 = vpop.permute.xlu1 %1227 }
  0x8a   : > { %1323 = vst.msk [vmem:[#allocation3 + $0x28] sm:$0xff] %vm12016_vm4, %v1228_v58  ;;  %v718_v58 = vshra.s32 %v7756_v36, 4  ;;  %vm7819_vm4 = vcmp.lt.s32.totalorder %v714_v21, 15  ;;  %v12051_v24 = vshra.s32 %v7811_v59, 4 }
  0x8b   : > { %v12487_v1 = vsel %vm7819_vm4, 4294967295, %v12486_v1 }
  0x8c   : > { %12488 = vst [vmem:[#allocation19_spill] sm:$0xff] %v12487_v1 }
  0xeb   : > { %v6669_v35 = vpop.f32.mrb[0].mxu0 }
  0xec   : > { %v494_v37 = vadd.f32 %v6669_v35, %v7652_v31  ;;  %v488_v38 = vpop.f32.mrb[1].mxu0  ;;  %v717_v35 = vshra.s32 %v7724_v18, 4 }
  0xed   : > { %v489_v44 = vadd.f32 %v7652_v31, %v488_v38 }
  0xee   : > { %7151 = vtanh.f32 %v494_v37  ;;  %v6889_v37 = vpack.c.bf16 %v3081_v30, %v3080_v29  ;;  %vm7804_vm5 = vcmp.ge.s32.totalorder %v717_v35, 1 }
  0xef   : > { %7153 = vtanh.f32 %v489_v44  ;;  %v6672_v49 = vpop.f32.mrb[2].mxu0  ;;  %v12462_v44 = vmov 0  ;;  %v12484_v40 = vsel %vm7804_vm5, 4294967295, %v12483_v40 }
  0xf0   : > { %v504_v53 = vadd.f32 %v6672_v49, %v7652_v31  ;;  %v498_v54 = vpop.f32.mrb[3].mxu0  ;;  %v12463_v44 = vsel %vm7760_vm9, 4294967295, %v12462_v44  ;;  %v749_v49 = vand.u32 15, %v7724_v18  ;;  %6890 = vmatpush1.bf16.msra.mxu1 %v6889_v37  ;;  %12485 = vst [vmem:[#allocation18_spill] sm:$0xff] %v12484_v40 }
  0xf1   : > { %v499_v57 = vadd.f32 %v7652_v31, %v498_v54  ;;  %12464 = vst [vmem:[#allocation11_spill] sm:$0xff] %v12463_v44  ;;  %6891 = vmatprep.subr.bf16.mxu1 %v12039_v63 }
  0xf2   : > { %7155 = vtanh.f32 %v504_v53  ;;  %v12474_v53 = vmov 0  ;;  %vm7823_vm2 = vcmp.lt.s32.totalorder %v749_v49, 15  ;;  %v12494_v49 = vmov 0 }
  0xf3   : > { %7157 = vtanh.f32 %v499_v57  ;;  %v6675_v62 = vpop.f32.mrb[4].mxu0  ;;  %v12475_v53 = vsel %vm7787_vm13, 4294967295, %v12474_v53 }
  0xf4   : > { %v514_v2 = vadd.f32 %v6675_v62, %v7652_v31  ;;  %v508_v3 = vpop.f32.mrb[5].mxu0  ;;  %12476 = vst [vmem:[#allocation15_spill] sm:$0xff] %v12475_v53 }
  0xf5   : > { %v509_v5 = vadd.f32 %v7652_v31, %v508_v3 }
  0xf6   : > { %7159 = vtanh.f32 %v514_v2  ;;  %v12489_v2 = vmov 0 }
  0xf7   : > { %7161 = vtanh.f32 %v509_v5  ;;  %v6678_v11 = vpop.f32.mrb[6].mxu0  ;;  %v12490_v2 = vsel %vm7823_vm2, 4294967295, %v12489_v2 }
  0xf8   : > { %v7152_v15 = vpop.eup %7151  ;;  %v524_v16 = vadd.f32 %v6678_v11, %v7652_v31  ;;  %v518_v17 = vpop.f32.mrb[7].mxu0  ;;  %12491 = vst [vmem:[#allocation20_spill] sm:$0xff] %v12490_v2 }
  0xf9   : > { %v7154_v19 = vpop.eup %7153  ;;  %778 = vst.msk [vmem:[#allocation2 + $0x20] sm:$0xff] %vm12028_vm6, %v7152_v15  ;;  %1867 = vst.msk [vmem:[#allocation3 + $0x38] sm:$0xff] %vm12028_vm6, %v7152_v15  ;;  %v519_v20 = vadd.f32 %v7652_v31, %v518_v17 }
  0xfa   : > { %777 = vst.msk [vmem:[#allocation2 + $0x18] sm:$0xff] %vm12028_vm6, %v7154_v19  ;;  %1866 = vst.msk [vmem:[#allocation3 + $0x10] sm:$0xff] %vm12028_vm6, %v7154_v19  ;;  %7163 = vtanh.f32 %v524_v16 }
  0xfb   : > { %7165 = vtanh.f32 %v519_v20  ;;  %v6681_v26 = vpop.f32.mrb[8].mxu0 }
  0xfc   : > { %v7156_v32 = vpop.eup %7155  ;;  %v534_v33 = vadd.f32 %v6681_v26, %v7652_v31  ;;  %v528_v34 = vpop.f32.mrb[9].mxu0 }
  0xfd   : > { %v7158_v38 = vpop.eup %7157  ;;  %780 = vst.msk [vmem:[#allocation2 + $0x30] sm:$0xff] %vm12028_vm6, %v7156_v32  ;;  %1869 = vst.msk [vmem:[#allocation3 + $0x88] sm:$0xff] %vm12028_vm6, %v7156_v32  ;;  %v529_v47 = vadd.f32 %v7652_v31, %v528_v34 }
  0xfe   : > { %779 = vst.msk [vmem:[#allocation2 + $0x28] sm:$0xff] %vm12028_vm6, %v7158_v38  ;;  %1868 = vst.msk [vmem:[#allocation3 + $0x60] sm:$0xff] %vm12028_vm6, %v7158_v38  ;;  %7167 = vtanh.f32 %v534_v33  ;;  %v7875_v38 = vadd.s32 80, %v7522_v39 }
  0xff   : > { %7169 = vtanh.f32 %v529_v47  ;;  %v6684_v54 = vpop.f32.mrb[10].mxu0 }
 0x100   : > { %v7160_v56 = vpop.eup %7159  ;;  %v544_v41 = vadd.f32 %v6684_v54, %v7652_v31  ;;  %v538_v57 = vpop.f32.mrb[11].mxu0  ;;  %v1068_v6 = vld [vmem:[#allocation2 + $0x20] sm:$0xff]  ;;  %v12497_v54 = vmov 0 }
 0x101   : > { %v7162_v60 = vpop.eup %7161  ;;  %782 = vst.msk [vmem:[#allocation2 + $0x40] sm:$0xff] %vm12028_vm6, %v7160_v56  ;;  %1871 = vst.msk [vmem:[#allocation3 + $0xd8] sm:$0xff] %vm12028_vm6, %v7160_v56  ;;  %v1579_v61 = vld [vmem:[#allocation2 + $0x1f] sm:$0xff]  ;;  %v1578_v62 = vld [vmem:[#allocation2 + $0x17] sm:$0xff]  ;;  %v539_v3 = vadd.f32 %v7652_v31, %v538_v57  ;;  %v1164_v32 = vsel %vm7741_vm8, %v1068_v6, 0.0  ;;  %v12498_v54 = vsel %vm7897_vm10, 4294967295, %v12497_v54 }
 0x102   : > { %781 = vst.msk [vmem:[#allocation2 + $0x38] sm:$0xff] %vm12028_vm6, %v7162_v60  ;;  %1870 = vst.msk [vmem:[#allocation3 + $0xb0] sm:$0xff] %vm12028_vm6, %v7162_v60  ;;  %1740 = vrot.lane.b32.xlu1 %v1579_v61, %s7384_s16  ;;  %v1674_v5 = vsel %vm7664_vm3, %v1578_v62, 0.0  ;;  %7171 = vtanh.f32 %v544_v41  ;;  %v1355_v9 = vld [vmem:[#allocation2 + $0x11] sm:$0xff]  ;;  %v812_v10 = vld [vmem:[#allocation2 + $0x1f] sm:$0xff] }
 0x103   : > { %1738 = vrot.lane.b32.xlu0 %v1674_v5, %s7384_s16  ;;  %7173 = vtanh.f32 %v539_v3  ;;  %v6687_v11 = vpop.f32.mrb[12].mxu0  ;;  %v1515_v15 = vsel %vm12492_vm0, %v1355_v9, 0.0  ;;  %v1004_v16 = vsel %vm7741_vm8, %v812_v10, 0.0  ;;  %v811_v17 = vld [vmem:[#allocation2 + $0x17] sm:$0xff]  ;;  %vm7891_vm0 = vcmp.lt.s32.totalorder %v716_v27, 15  ;;  %12499 = vst [vmem:[#allocation22_spill] sm:$0xff] %v12498_v54 }
 0x104   : > { %v1356_v19 = vld [vmem:[#allocation2 + $0x19] sm:$0xff]  ;;  %v7164_v20 = vpop.eup %7163  ;;  %v554_v21 = vadd.f32 %v6687_v11, %v7652_v31  ;;  %v548_v22 = vpop.f32.mrb[13].mxu0  ;;  %1547 = vst.msk [vmem:[#allocation3 + $0x30] sm:$0xff] %vm12028_vm6, %v1515_v15  ;;  %1036 = vst.msk [vmem:[#allocation3 + $0x78] sm:$0xff] %vm12028_vm6, %v1004_v16  ;;  %v1003_v26 = vsel %vm12493_vm1, %v811_v17, 0.0  ;;  %v12495_v49 = vsel %vm7891_vm0, 4294967295, %v12494_v49 }
 0x105   : > { %v1516_v28 = vsel %vm7760_vm9, %v1356_v19, 0.0  ;;  %v7166_v29 = vpop.eup %7165  ;;  %784 = vst.msk [vmem:[#allocation2 + $0x50] sm:$0xff] %vm12028_vm6, %v7164_v20  ;;  %1873 = vst.msk [vmem:[#allocation3 + $0x128] sm:$0xff] %vm12028_vm6, %v7164_v20  ;;  %v7868_v30 = vld [vmem:[#allocation2 + $0x29] sm:$0xff]  ;;  %v549_v34 = vadd.f32 %v7652_v31, %v548_v22  ;;  %v7901_v56 = vld [vmem:[#allocation2 + $0x21] sm:$0xff]  ;;  %vm7917_vm9 = vcmp.ge.s32.totalorder %v719_v7, 1 }
 0x106   : > { %v1581_v33 = vld [vmem:[#allocation2 + $0x2f] sm:$0xff]  ;;  %1035 = vst.msk [vmem:[#allocation3 + $0x50] sm:$0xff] %vm12028_vm6, %v1003_v26  ;;  %1548 = vst.msk [vmem:[#allocation3 + $0x58] sm:$0xff] %vm12028_vm6, %v1516_v28  ;;  %v2826_v47 = vsel %vm7774_vm11, %v7868_v30, 0.0  ;;  %1231 = vrot.lane.b32.xlu1 %v1164_v32, %s7384_s16  ;;  %7175 = vtanh.f32 %v554_v21  ;;  %v12501_v0 = vsel %vm7917_vm9, 4294967295, %v12500_v0  ;;  %v753_v27 = vand.u32 15, %v7842_v14 }
 0x107   : > { %783 = vst.msk [vmem:[#allocation2 + $0x48] sm:$0xff] %vm12028_vm6, %v7166_v29  ;;  %1872 = vst.msk [vmem:[#allocation3 + $0x100] sm:$0xff] %vm12028_vm6, %v7166_v29  ;;  %v2187_v41 = vld [vmem:[#allocation2 + $0x2f] sm:$0xff]  ;;  %1744 = vrot.lane.b32.xlu0 %v1581_v33, %s7384_s16  ;;  %7177 = vtanh.f32 %v549_v34  ;;  %v6690_v57 = vpop.f32.mrb[14].mxu0  ;;  %v2186_v60 = vld [vmem:[#allocation2 + $0x27] sm:$0xff]  ;;  %v7946_v19 = vadd.s32 88, %v7522_v39 }
 0x108   : > { %12496 = vst [vmem:[#allocation21_spill] sm:$0xff] %v12495_v49  ;;  %2858 = vst.msk [vmem:[#allocation3 + $0x20] sm:$0xff] %vm12028_vm6, %v2826_v47  ;;  %v7909_v13 = vld [vmem:[#allocation2 + $0x30] sm:$0xff]  ;;  %v7168_v61 = vpop.eup %7167  ;;  %v564_v62 = vadd.f32 %v6690_v57, %v7652_v31  ;;  %v558_v3 = vpop.f32.mrb[15].mxu0  ;;  %v2347_v6 = vsel %vm7787_vm13, %v2187_v41, 0.0  ;;  %v1006_v9 = vsel %vm7804_vm5, %v2187_v41, 0.0 }
 0x109   : > { %12502 = vst [vmem:[#allocation23_spill] sm:$0xff] %v12501_v0  ;;  %vm12503_vm1 = vmand %vm7741_vm8, %vm7778_vm12  ;;  %v7170_v10 = vpop.eup %7169  ;;  %v1898_v11 = vld [vmem:[#allocation2 + $0x19] sm:$0xff]  ;;  %v7938_v15 = vld [vmem:[#allocation2 + $0x31] sm:$0xff]  ;;  %v559_v17 = vadd.f32 %v7652_v31, %v558_v3  ;;  %v12057_v20 = vshra.s32 %v7875_v38, 4  ;;  %v2507_v22 = vsel %vm7787_vm13, %v7909_v13, 0.0  ;;  %v12506_v32 = vmov 0 }
 0x10a   : > { %v1517_v5 = vsel %vm12503_vm1, %v7901_v56, 0.0  ;;  %786 = vst.msk [vmem:[#allocation2 + $0x60] sm:$0xff] %vm12028_vm6, %v7168_v61  ;;  %1875 = vst.msk [vmem:[#allocation3 + $0x178] sm:$0xff] %vm12028_vm6, %v7168_v61  ;;  %v7942_v16 = vld [vmem:[#allocation2 + $0x39] sm:$0xff]  ;;  %2058 = vrot.lane.b32.xlu1 %v1898_v11, %s7384_s16  ;;  %7179 = vtanh.f32 %v564_v62  ;;  %v1359_v33 = vld [vmem:[#allocation2 + $0x31] sm:$0xff]  ;;  %v7994_v57 = vadd.s32 96, %v7522_v39 }
 0x10b   : > { %1549 = vst.msk [vmem:[#allocation3 + $0x80] sm:$0xff] %vm12028_vm6, %v1517_v5  ;;  %2379 = vst.msk [vmem:[#allocation3 + $0x40] sm:$0xff] %vm12028_vm6, %v2347_v6  ;;  %v1067_v28 = vld [vmem:[#allocation2 + $0x18] sm:$0xff]  ;;  %v2828_v29 = vsel %vm7819_vm4, %v7942_v16, 0.0  ;;  %2572 = vrot.lane.b32.xlu0 %v2507_v22, %s7384_s16  ;;  %v1580_v34 = vld [vmem:[#allocation2 + $0x27] sm:$0xff]  ;;  %7181 = vtanh.f32 %v559_v17  ;;  %v6693_v47 = vpop.f32.mrb[16].mxu0 }
 0x10c   : > { %1038 = vst.msk [vmem:[#allocation3 + $0xc8] sm:$0xff] %vm12028_vm6, %v1006_v9  ;;  %vm12504_vm1 = vmand %vm7774_vm11, %vm7664_vm3  ;;  %v7996_v61 = vld [vmem:[#allocation2 + $0x3f] sm:$0xff]  ;;  %v7172_v62 = vpop.eup %7171  ;;  %v12512_v3 = vmov 0  ;;  %v574_v18 = vadd.f32 %v6693_v47, %v7652_v31  ;;  %vm12517_vm3 = vnez %v12463_v44  ;;  %v1166_v52 = vsel %vm7804_vm5, %v7909_v13, 0.0  ;;  %v8095_v63 = vld [vmem:[#allocation2 + $0x37] sm:$0xff] }
 0x10d   : > { %v2346_v21 = vsel %vm12504_vm1, %v2186_v60, 0.0  ;;  %vm12505_vm0 = vmand %vm7787_vm13, %vm7733_vm7  ;;  %785 = vst.msk [vmem:[#allocation2 + $0x58] sm:$0xff] %vm12028_vm6, %v7170_v10  ;;  %vm7974_vm1 = vcmp.lt.s32.totalorder %v751_v8, 15  ;;  %vm7988_vm13 = vcmp.lt.s32.totalorder %v717_v35, 15  ;;  %v12509_v8 = vmov 0  ;;  %v568_v35 = vpop.f32.mrb[17].mxu0  ;;  %v7174_v9 = vpop.eup %7173 }
 0x10e   : > { %v2827_v26 = vsel %vm12505_vm0, %v7938_v15, 0.0  ;;  %1874 = vst.msk [vmem:[#allocation3 + $0x150] sm:$0xff] %vm12028_vm6, %v7170_v10  ;;  %v12507_v32 = vsel %vm7974_vm1, 4294967295, %v12506_v32  ;;  %2378 = vst.msk [vmem:[#allocation3 + $0x18] sm:$0xff] %vm12028_vm6, %v2346_v21  ;;  %v12510_v8 = vsel %vm7988_vm13, 4294967295, %v12509_v8  ;;  %v1163_v10 = vsel %vm12517_vm3, %v1067_v28, 0.0 }
 0x10f   : > { %12508 = vst [vmem:[#allocation24_spill] sm:$0xff] %v12507_v32  ;;  %2859 = vst.msk [vmem:[#allocation3 + $0x48] sm:$0xff] %vm12028_vm6, %v2827_v26  ;;  %v8017_v11 = vld [vmem:[#allocation2 + $0x49] sm:$0xff]  ;;  %v8019_v17 = vld [vmem:[#allocation2 + $0x41] sm:$0xff]  ;;  %vm12519_vm7 = vcmask 523264   ;;  %v12058_v21 = vshra.s32 %v7946_v19, 4  ;;  %v569_v22 = vadd.f32 %v7652_v31, %v568_v35  ;;  %1229 = vrot.lane.b32.xlu1 %v1163_v10, %s7384_s16  ;;  %7183 = vtanh.f32 %v574_v18 }
 0x110   : > { %2860 = vst.msk [vmem:[#allocation3 + $0x70] sm:$0xff] %vm12028_vm6, %v2828_v29  ;;  %12511 = vst [vmem:[#allocation25_spill] sm:$0xff] %v12510_v8  ;;  %vm8000_vm6 = vcmp.lt.s32.totalorder %v718_v58, 15  ;;  %v1358_v26 = vld [vmem:[#allocation2 + $0x29] sm:$0xff]  ;;  %vm8046_vm3 = vcmp.lt.s32.totalorder %v753_v27, 15  ;;  %v755_v27 = vand.u32 15, %v7946_v19 }
 0x111   : > { %v12513_v3 = vsel %vm8000_vm6, 4294967295, %v12512_v3  ;;  %vm12515_vm0 = vmand %vm7804_vm5, %vm7823_vm2  ;;  %12518 = vst [vmem:[#allocation27_spill] sm:$0xff] %v8019_v17  ;;  %v2894_v28 = vld [vmem:[#allocation3 + $0x20] sm:$0xff]  ;;  %7185 = vtanh.f32 %v569_v22  ;;  %v8063_v18 = vadd.s32 104, %v7522_v39  ;;  %v1518_v22 = vsel %vm7793_vm14, %v1358_v26, 0.0  ;;  %v1361_v41 = vld [vmem:[#allocation2 + $0x41] sm:$0xff] }
 0x112   : > { %12514 = vst [vmem:[#allocation26_spill] sm:$0xff] %v12513_v3  ;;  %v1519_v5 = vsel %vm12515_vm0, %v1359_v33, 0.0  ;;  %vm12516_vm8 = vmand %vm7793_vm14, %vm7797_vm15  ;;  %v8089_v26 = vadd.s32 112, %v7522_v39  ;;  %v8359_v0 = vadd.s32 160, %v7522_v39 }
 0x113   : > { %v1005_v6 = vsel %vm12516_vm8, %v2186_v60, 0.0  ;;  %788 = vst.msk [vmem:[#allocation2 + $0x70] sm:$0xff] %vm12519_vm7, %v7172_v62  ;;  %vm12520_vm1 = vmmov %vm12519_vm7  ;;  %v2349_v60 = vsel %vm7897_vm10, %v7996_v61, 0.0  ;;  %vm12523_vm7 = vnez %v12466_v48  ;;  %vm12524_vm8 = vnez %v12495_v49  ;;  %1235 = vrot.lane.b32.xlu1 %v1166_v52, %s7384_s16 }
 0x114   : > { %1877 = vst.msk [vmem:[#allocation3 + $0x1c8] sm:$0xff] %vm12520_vm1, %v7172_v62  ;;  %vm12521_vm0 = vmmov %vm12520_vm1  ;;  %v1676_v29 = vsel %vm12523_vm7, %v1580_v34, 0.0  ;;  %v2830_v33 = vsel %vm12524_vm8, %v8017_v11, 0.0  ;;  %v12527_v62 = vmov 0  ;;  %v8053_v34 = vld [vmem:[#allocation2 + $0x28] sm:$0xff]  ;;  %v757_v36 = vand.u32 15, %v8063_v18 }
 0x115   : > { %1551 = vst.msk [vmem:[#allocation3 + $0xd0] sm:$0xff] %vm12521_vm0, %v1519_v5  ;;  %vm12522_vm15 = vmmov %vm12521_vm0  ;;  %v12528_v62 = vsel %vm8046_vm3, 4294967295, %v12527_v62  ;;  %1742 = vrot.lane.b32.xlu0 %v1676_v29, %s7384_s16  ;;  %v6696_v5 = vpop.f32.mrb[18].mxu0 }
 0x116   : > { %1037 = vst.msk [vmem:[#allocation3 + $0xa0] sm:$0xff] %vm12522_vm15, %v1005_v6  ;;  %vm12525_vm15 = vmand %vm7897_vm10, %vm7778_vm12  ;;  %v7176_v6 = vpop.eup %7175  ;;  %v584_v10 = vadd.f32 %v6696_v5, %v7652_v31  ;;  %v1008_v5 = vsel %vm7917_vm9, %v7996_v61, 0.0  ;;  %v2899_v13 = vld [vmem:[#allocation3 + $0x48] sm:$0xff] }
 0x117   : > { %v2829_v47 = vsel %vm12525_vm15, %v8019_v17, 0.0  ;;  %vm12526_vm1 = vmmov %vm12521_vm0  ;;  %1876 = vst.msk [vmem:[#allocation3 + $0x1a0] sm:$0xff] %vm12521_vm0, %v7174_v9  ;;  %v7178_v29 = vpop.eup %7177  ;;  %2062 = vrot.lane.b32.xlu1 %v7868_v30, %s7384_s16  ;;  %v8186_v30 = vld [vmem:[#allocation2 + $0x40] sm:$0xff]  ;;  %v12765_v17 = vmov 0 }
 0x118   : > { %787 = vst.msk [vmem:[#allocation2 + $0x68] sm:$0xff] %vm12526_vm1, %v7174_v9  ;;  %12529 = vst [vmem:[#allocation28_spill] sm:$0xff] %v12528_v62  ;;  %v12534_v9 = vmov 0  ;;  %7187 = vtanh.f32 %v584_v10  ;;  %v12550_v10 = vmov 0  ;;  %v7180_v52 = vpop.eup %7179 }
 0x119   : > { %vm12530_vm6 = vmmov %vm12521_vm0  ;;  %1550 = vst.msk [vmem:[#allocation3 + $0xa8] sm:$0xff] %vm12521_vm0, %v1518_v22  ;;  %v12545_v22 = vmov 0 }
 0x11a   : > { %2381 = vst.msk [vmem:[#allocation3 + $0x90] sm:$0xff] %vm12530_vm6, %v2349_v60  ;;  %vm12531_vm8 = vmmov %vm12521_vm0  ;;  %vm8068_vm6 = vcmp.lt.s32.totalorder %v719_v7, 15  ;;  %v578_v60 = vpop.f32.mrb[19].mxu0  ;;  %v2704_v7 = vld [vmem:[#allocation2 + $0x59] sm:$0xff] }
 0x11b   : > { %6731 = vmatprep.mubr.msk.f32.mxu0 %vm12531_vm8, %v2894_v28  ;;  %vm12532_vm15 = vmmov %vm12521_vm0  ;;  %v12535_v9 = vsel %vm8068_vm6, 4294967295, %v12534_v9  ;;  %v2904_v28 = vld [vmem:[#allocation3 + $0x70] sm:$0xff] }
 0x11c   : > { %2862 = vst.msk [vmem:[#allocation3 + $0xc0] sm:$0xff] %vm12532_vm15, %v2830_v33  ;;  %vm12533_vm1 = vmmov %vm12521_vm0  ;;  %v8083_v33 = vld [vmem:[#allocation2 + $0x51] sm:$0xff] }
 0x11d   : > { %2861 = vst.msk [vmem:[#allocation3 + $0x98] sm:$0xff] %vm12533_vm1, %v2829_v47  ;;  %12536 = vst [vmem:[#allocation29_spill] sm:$0xff] %v12535_v9  ;;  %v579_v47 = vadd.f32 %v7652_v31, %v578_v60 }
 0x11e   : > { %12537 = vst [vmem:[#allocation30_spill] sm:$0xff] %v8083_v33  ;;  %vm12538_vm15 = vmmov %vm12521_vm0 }
 0x11f   : > { %790 = vst.msk [vmem:[#allocation2 + $0x80] sm:$0xff] %vm12538_vm15, %v7176_v6  ;;  %vm12539_vm1 = vmmov %vm12521_vm0  ;;  %vm12540_vm15 = vnez %v12513_v3  ;;  %7189 = vtanh.f32 %v579_v47 }
 0x120   : > { %1879 = vst.msk [vmem:[#allocation3 + $0x218] sm:$0xff] %vm12539_vm1, %v7176_v6  ;;  %v2506_v6 = vsel %vm7774_vm11, %v8053_v34, 0.0  ;;  %v2832_v60 = vsel %vm12540_vm15, %v2704_v7, 0.0  ;;  %vm12541_vm0 = vmand %vm7988_vm13, %vm7823_vm2  ;;  %vm8116_vm11 = vcmp.ge.s32.totalorder %v718_v58, 1  ;;  %v12556_v58 = vmov 0  ;;  %v1583_v7 = vld [vmem:[#allocation2 + $0x3f] sm:$0xff] }
 0x121   : > { %v2831_v61 = vsel %vm12541_vm0, %v8083_v33, 0.0  ;;  %789 = vst.msk [vmem:[#allocation2 + $0x78] sm:$0xff] %vm12539_vm1, %v7178_v29  ;;  %vm12542_vm8 = vmmov %vm12539_vm1  ;;  %2570 = vrot.lane.b32.xlu0 %v2506_v6, %s7384_s16  ;;  %v12546_v22 = vsel %vm8116_vm11, 4294967295, %v12545_v22  ;;  %vm8146_vm2 = vcmp.lt.s32.totalorder %v12053_v12, 15 }
 0x122   : > { %1878 = vst.msk [vmem:[#allocation3 + $0x1f0] sm:$0xff] %vm12542_vm8, %v7178_v29  ;;  %vm12543_vm5 = vmmov %vm12539_vm1  ;;  %vm8124_vm8 = vcmp.ge.s32.totalorder %v750_v4, 1  ;;  %v12553_v29 = vmov 0  ;;  %v6699_v4 = vpop.f32.mrb[20].mxu0 }
 0x123   : > { %1040 = vst.msk [vmem:[#allocation3 + $0x118] sm:$0xff] %vm12543_vm5, %v1008_v5  ;;  %vm12544_vm12 = vmmov %vm12539_vm1  ;;  %v12551_v10 = vsel %vm8124_vm8, 4294967295, %v12550_v10  ;;  %vm8130_vm5 = vcmp.lt.s32.totalorder %v12051_v24, 15  ;;  %v12559_v5 = vmov 0  ;;  %v588_v6 = vpop.f32.mrb[21].mxu0  ;;  %v8166_v24 = vadd.s32 128, %v7522_v39 }
 0x124   : > { %6732 = vmatmul.mubr.msk.f32.vlgmr.msra.gmra.mrb[32].mxu0 %vm12544_vm12, %v2899_v13  ;;  %12547 = vst [vmem:[#allocation31_spill] sm:$0xff] %v12546_v22  ;;  %vm12548_vm15 = vmmov %vm12539_vm1  ;;  %v12554_v29 = vsel %vm8130_vm5, 4294967295, %v12553_v29  ;;  %vm12555_vm12 = vnez %v12507_v32  ;;  %v12560_v5 = vsel %vm8146_vm2, 4294967295, %v12559_v5  ;;  %v8151_v13 = vadd.s32 120, %v7522_v39  ;;  %v2914_v12 = vld [vmem:[#allocation3 + $0xc0] sm:$0xff] }
 0x125   : > { %2864 = vst.msk [vmem:[#allocation3 + $0x110] sm:$0xff] %vm12548_vm15, %v2832_v60  ;;  %vm12549_vm0 = vmmov %vm12539_vm1  ;;  %vm8138_vm15 = vcmp.lt.s32.totalorder %v755_v27, 15  ;;  %v594_v27 = vadd.f32 %v6699_v4, %v7652_v31  ;;  %v2706_v60 = vld [vmem:[#allocation2 + $0x69] sm:$0xff]  ;;  %v589_v4 = vadd.f32 %v7652_v31, %v588_v6  ;;  %1748 = vrot.lane.b32.xlu0 %v1583_v7, %s7384_s16  ;;  %v12573_v7 = vmov 0 }
 0x126   : > { %2863 = vst.msk [vmem:[#allocation3 + $0xe8] sm:$0xff] %vm12549_vm0, %v2831_v61  ;;  %12552 = vst [vmem:[#allocation32_spill] sm:$0xff] %v12551_v10  ;;  %v12557_v58 = vsel %vm8138_vm15, 4294967295, %v12556_v58  ;;  %6734 = vmatprep.mubr.msk.f32.mxu0 %vm12549_vm0, %v2904_v28  ;;  %v7182_v28 = vpop.eup %7181  ;;  %v2705_v61 = vld [vmem:[#allocation2 + $0x61] sm:$0xff]  ;;  %v2834_v37 = vsel %vm8130_vm5, %v2706_v60, 0.0  ;;  %v12570_v60 = vmov 0 }
 0x127   : > { %12558 = vst [vmem:[#allocation33_spill] sm:$0xff] %v12557_v58  ;;  %12561 = vst [vmem:[#allocation34_spill] sm:$0xff] %v12560_v5  ;;  %7191 = vtanh.f32 %v594_v27  ;;  %v6702_v27 = vpop.f32.mrb[22].mxu0  ;;  %v12606_v50 = vshra.s32 %v8151_v13, 4  ;;  %v12799_v32 = vmov 0 }
 0x128   : > { %vm12562_vm1 = vmand %vm7819_vm4, %vm12523_vm7  ;;  %792 = vst.msk [vmem:[#allocation2 + $0x90] sm:$0xff] %vm12549_vm0, %v7180_v52  ;;  %7193 = vtanh.f32 %v589_v4  ;;  %v598_v4 = vpop.f32.mrb[23].mxu0  ;;  %v2708_v35 = vld [vmem:[#allocation2 + $0x79] sm:$0xff] }
 0x129   : > { %v2348_v47 = vsel %vm12562_vm1, %v8095_v63, 0.0  ;;  %vm12563_vm13 = vmmov %vm12549_vm0  ;;  %1880 = vst.msk [vmem:[#allocation3 + $0x240] sm:$0xff] %vm12549_vm0, %v7182_v28 }
 0x12a   : > { %1881 = vst.msk [vmem:[#allocation3 + $0x268] sm:$0xff] %vm12563_vm13, %v7180_v52  ;;  %vm12564_vm11 = vmmov %vm12549_vm0  ;;  %v2909_v52 = vld [vmem:[#allocation3 + $0x98] sm:$0xff] }
 0x12b   : > { %2380 = vst.msk [vmem:[#allocation3 + $0x68] sm:$0xff] %vm12564_vm11, %v2348_v47  ;;  %vm12565_vm13 = vmand %vm8068_vm6, %vm12555_vm12 }
 0x12c   : > { %v2833_v6 = vsel %vm12565_vm13, %v2705_v61, 0.0  ;;  %vm12566_vm11 = vmmov %vm12549_vm0  ;;  %vm8193_vm13 = vcmp.lt.s32.totalorder %v12057_v20, 15  ;;  %v12577_v61 = vmov 0  ;;  %v1165_v20 = vsel %vm7793_vm14, %v8053_v34, 0.0  ;;  %v2924_v40 = vld [vmem:[#allocation3 + $0x110] sm:$0xff] }
 0x12d   : > { %791 = vst.msk [vmem:[#allocation2 + $0x88] sm:$0xff] %vm12566_vm11, %v7182_v28  ;;  %vm12567_vm1 = vmmov %vm12549_vm0  ;;  %v12571_v60 = vsel %vm8193_vm13, 4294967295, %v12570_v60  ;;  %v7184_v28 = vpop.eup %7183  ;;  %1233 = vrot.lane.b32.xlu1 %v1165_v20, %s7384_s16  ;;  %v2509_v34 = vsel %vm7897_vm10, %v8186_v30, 0.0  ;;  %v2919_v53 = vld [vmem:[#allocation3 + $0xe8] sm:$0xff] }
 0x12e   : > { %6735 = vmatmul.mubr.msk.f32.gmra.mrb[34].mxu0 %vm12567_vm1, %v2909_v52  ;;  %vm12568_vm7 = vmmov %vm12549_vm0  ;;  %12572 = vst [vmem:[#allocation35_spill] sm:$0xff] %v12571_v60  ;;  %v7186_v47 = vpop.eup %7185  ;;  %2576 = vrot.lane.b32.xlu0 %v2509_v34, %s7384_s16  ;;  %v1582_v20 = vld [vmem:[#allocation2 + $0x37] sm:$0xff]  ;;  %v12594_v34 = vmov 0 }
 0x12f   : > { %2866 = vst.msk [vmem:[#allocation3 + $0x160] sm:$0xff] %vm12568_vm7, %v2834_v37  ;;  %vm12569_vm5 = vmmov %vm12549_vm0  ;;  %vm8201_vm0 = vcmp.lt.s32.totalorder %v757_v36, 15  ;;  %v8206_v37 = vadd.s32 136, %v7522_v39  ;;  %v759_v36 = vand.u32 15, %v8151_v13 }
 0x130   : > { %2865 = vst.msk [vmem:[#allocation3 + $0x138] sm:$0xff] %vm12569_vm5, %v2833_v6  ;;  %v12574_v7 = vsel %vm8201_vm0, 4294967295, %v12573_v7  ;;  %vm12576_vm7 = vmmov %vm12567_vm1  ;;  %vm8211_vm5 = vcmp.lt.s32.totalorder %v12058_v21, 15  ;;  %v604_v6 = vadd.f32 %v6702_v27, %v7652_v31  ;;  %v599_v21 = vadd.f32 %v7652_v31, %v598_v4 }
 0x131   : > { %12575 = vst [vmem:[#allocation36_spill] sm:$0xff] %v12574_v7  ;;  %6737 = vmatprep.mubr.msk.f32.mxu0 %vm12576_vm7, %v2914_v12  ;;  %v12578_v61 = vsel %vm8211_vm5, 4294967295, %v12577_v61  ;;  %v2707_v12 = vld [vmem:[#allocation2 + $0x71] sm:$0xff]  ;;  %794 = vst.msk [vmem:[#allocation2 + $0xa0] sm:$0xff] %vm12567_vm1, %v7184_v28 }
 0x132   : > { %12579 = vst [vmem:[#allocation37_spill] sm:$0xff] %v12578_v61  ;;  %vm12580_vm7 = vmmov %vm12567_vm1  ;;  %7195 = vtanh.f32 %v604_v6  ;;  %v6705_v6 = vpop.f32.mrb[24].mxu0  ;;  %v8516_v61 = vld [vmem:[#allocation2 + $0x47] sm:$0xff] }
 0x133   : > { %1883 = vst.msk [vmem:[#allocation3 + $0x2b8] sm:$0xff] %vm12580_vm7, %v7184_v28  ;;  %vm12581_vm11 = vmand %vm7917_vm9, %vm12555_vm12  ;;  %v2836_v28 = vsel %vm8193_vm13, %v2708_v35, 0.0  ;;  %v12589_v35 = vmov 0  ;;  %7197 = vtanh.f32 %v599_v21  ;;  %v8272_v21 = vadd.s32 144, %v7522_v39 }
 0x134   : > { %v1521_v27 = vsel %vm12581_vm11, %v1361_v41, 0.0  ;;  %vm12582_vm1 = vmand %vm8146_vm2, %vm8046_vm3  ;;  %793 = vst.msk [vmem:[#allocation2 + $0x98] sm:$0xff] %vm12580_vm7, %v7186_v47  ;;  %v12588_v41 = vshra.s32 %v7994_v57, 4  ;;  %v2710_v54 = vld [vmem:[#allocation2 + $0x89] sm:$0xff] }
 0x135   : > { %v2835_v4 = vsel %vm12582_vm1, %v2707_v12, 0.0  ;;  %vm12583_vm11 = vmmov %vm12580_vm7  ;;  %v7188_v12 = vpop.eup %7187 }
 0x136   : > { %1882 = vst.msk [vmem:[#allocation3 + $0x290] sm:$0xff] %vm12583_vm11, %v7186_v47  ;;  %vm12584_vm14 = vmmov %vm12580_vm7  ;;  %vm8250_vm2 = vcmp.lt.s32.totalorder %v12588_v41, 15  ;;  %v761_v47 = vand.u32 15, %v8206_v37  ;;  %v8269_v41 = vadd.s32 152, %v7522_v39  ;;  %v7190_v52 = vpop.eup %7189 }
 0x137   : > { %1553 = vst.msk [vmem:[#allocation3 + $0x120] sm:$0xff] %vm12584_vm14, %v1521_v27  ;;  %vm12585_vm10 = vmmov %vm12580_vm7  ;;  %v12590_v35 = vsel %vm8250_vm2, 4294967295, %v12589_v35  ;;  %v12593_v27 = vshra.s32 %v8063_v18, 4  ;;  %vm8291_vm14 = vcmp.lt.s32.totalorder %v12606_v50, 15  ;;  %v2929_v25 = vld [vmem:[#allocation3 + $0x138] sm:$0xff] }
 0x138   : > { %6738 = vmatmul.mubr.msk.f32.gmra.mrb[36].mxu0 %vm12585_vm10, %v2919_v53  ;;  %vm12586_vm12 = vmmov %vm12580_vm7  ;;  %12591 = vst [vmem:[#allocation38_spill] sm:$0xff] %v12590_v35  ;;  %v12598_v53 = vshra.s32 %v7842_v14, 4 }
 0x139   : > { %2868 = vst.msk [vmem:[#allocation3 + $0x1b0] sm:$0xff] %vm12586_vm12, %v2836_v28  ;;  %vm12587_vm13 = vmmov %vm12580_vm7  ;;  %vm8263_vm12 = vcmp.lt.s32.totalorder %v12593_v27, 15  ;;  %v614_v28 = vadd.f32 %v6705_v6, %v7652_v31  ;;  %v12599_v27 = vmov 0  ;;  %v2709_v6 = vld [vmem:[#allocation2 + $0x81] sm:$0xff] }
 0x13a   : > { %2867 = vst.msk [vmem:[#allocation3 + $0x188] sm:$0xff] %vm12587_vm13, %v2835_v4  ;;  %vm12592_vm10 = vmmov %vm12580_vm7  ;;  %v12595_v34 = vsel %vm8263_vm12, 4294967295, %v12594_v34  ;;  %v608_v4 = vpop.f32.mrb[25].mxu0  ;;  %vm12597_vm13 = vnez %v12457_v23  ;;  %vm8279_vm1 = vcmp.ge.s32.totalorder %v12598_v53, 1  ;;  %v2934_v23 = vld [vmem:[#allocation3 + $0x160] sm:$0xff] }
 0x13b   : > { %6740 = vmatprep.mubr.msk.f32.mxu0 %vm12592_vm10, %v2924_v40  ;;  %12596 = vst [vmem:[#allocation39_spill] sm:$0xff] %v12595_v34  ;;  %v1995_v40 = vsel %vm12597_vm13, %v7901_v56, 0.0  ;;  %v12600_v27 = vsel %vm8279_vm1, 4294967295, %v12599_v27  ;;  %796 = vst.msk [vmem:[#allocation2 + $0xb0] sm:$0xff] %vm12580_vm7, %v7188_v12  ;;  %vm8285_vm10 = vcmp.lt.s32.totalorder %v759_v36, 15  ;;  %v12607_v56 = vmov 0 }
 0x13c   : > { %12601 = vst [vmem:[#allocation40_spill] sm:$0xff] %v12600_v27  ;;  %vm12602_vm11 = vmmov %vm12580_vm7  ;;  %v12604_v42 = vsel %vm8285_vm10, 4294967295, %v12603_v42  ;;  %v12608_v56 = vsel %vm8291_vm14, 4294967295, %v12607_v56  ;;  %v609_v14 = vadd.f32 %v7652_v31, %v608_v4  ;;  %2060 = vrot.lane.b32.xlu1 %v1995_v40, %s7384_s16  ;;  %vm12610_vm13 = vnez %v12481_v55  ;;  %v7192_v4 = vpop.eup %7191  ;;  %v2711_v48 = vld [vmem:[#allocation2 + $0x91] sm:$0xff] }
 0x13d   : > { %1885 = vst.msk [vmem:[#allocation3 + $0x308] sm:$0xff] %vm12602_vm11, %v7188_v12  ;;  %12605 = vst [vmem:[#allocation41_spill] sm:$0xff] %v12604_v42  ;;  %v1678_v53 = vsel %vm12610_vm13, %v1582_v20, 0.0  ;;  %v2838_v36 = vsel %vm8250_vm2, %v2710_v54, 0.0  ;;  %7199 = vtanh.f32 %v614_v28  ;;  %vm12613_vm1 = vnez %v12546_v22  ;;  %v8313_v20 = vld [vmem:[#allocation2 + $0x38] sm:$0xff] }
 0x13e   : > { %12609 = vst [vmem:[#allocation42_spill] sm:$0xff] %v12608_v56  ;;  %vm12611_vm7 = vmand %vm8211_vm5, %vm8138_vm15  ;;  %1746 = vrot.lane.b32.xlu0 %v1678_v53, %s7384_s16  ;;  %v12617_v54 = vshra.s32 %v8089_v26, 4  ;;  %v12621_v28 = vmov 0  ;;  %7201 = vtanh.f32 %v609_v14  ;;  %v12624_v14 = vshra.s32 %v7811_v59, 4 }
 0x13f   : > { %v2837_v50 = vsel %vm12611_vm7, %v2709_v6, 0.0  ;;  %795 = vst.msk [vmem:[#allocation2 + $0xa8] sm:$0xff] %vm12602_vm11, %v7190_v52  ;;  %vm12612_vm6 = vmmov %vm12602_vm11  ;;  %vm8329_vm11 = vcmp.lt.s32.totalorder %v761_v47, 15  ;;  %v763_v6 = vand.u32 15, %v8269_v41  ;;  %v1168_v47 = vsel %vm7917_vm9, %v8186_v30, 0.0 }
 0x140   : > { %1884 = vst.msk [vmem:[#allocation3 + $0x2e0] sm:$0xff] %vm12612_vm6, %v7190_v52  ;;  %vm12097_vm3 = vmand %vm12613_vm1, %vm8124_vm8  ;;  %vm8320_vm7 = vcmp.lt.s32.totalorder %v12617_v54, 15  ;;  %v12618_v52 = vmov 0  ;;  %v12622_v28 = vsel %vm8329_vm11, 4294967295, %v12621_v28  ;;  %v7194_v54 = vpop.eup %7193  ;;  %v12625_v12 = vmov 0  ;;  %1239 = vrot.lane.b32.xlu1 %v1168_v47, %s7384_s16  ;;  %v1360_v47 = vld [vmem:[#allocation2 + $0x39] sm:$0xff] }
 0x141   : > { %vm12614_vm2 = vmmov %vm12612_vm6  ;;  %v12619_v52 = vsel %vm8320_vm7, 4294967295, %v12618_v52  ;;  %12623 = vst [vmem:[#allocation44_spill] sm:$0xff] %v12622_v28  ;;  %v1520_v46 = vsel %vm12613_vm1, %v1360_v47, 0.0  ;;  %v12716_v22 = vshra.s32 %v8359_v0, 4 }
 0x142   : > { %6741 = vmatmul.mubr.msk.f32.gmra.mrb[38].mxu0 %vm12614_vm2, %v2929_v25  ;;  %vm12615_vm13 = vmmov %vm12614_vm2  ;;  %12620 = vst [vmem:[#allocation43_spill] sm:$0xff] %v12619_v52  ;;  %v6708_v25 = vpop.f32.mrb[26].mxu0 }
 0x143   : > { %2870 = vst.msk [vmem:[#allocation3 + $0x200] sm:$0xff] %vm12615_vm13, %v2838_v36  ;;  %vm12616_vm5 = vmmov %vm12614_vm2  ;;  %6743 = vmatprep.mubr.msk.f32.mxu0 %vm12614_vm2, %v2934_v23  ;;  %v624_v40 = vadd.f32 %v6708_v25, %v7652_v31  ;;  %v618_v53 = vpop.f32.mrb[27].mxu0  ;;  %v12628_v23 = vand.u32 15, %v7811_v59  ;;  %v12629_v25 = vmov 0  ;;  %v2712_v36 = vld [vmem:[#allocation2 + $0x99] sm:$0xff]  ;;  %v1007_v59 = vsel %vm12097_vm3, %v8095_v63, 0.0 }
 0x144   : > { %2869 = vst.msk [vmem:[#allocation3 + $0x1d8] sm:$0xff] %vm12616_vm5, %v2837_v50  ;;  %v8338_v50 = vadd.s32 168, %v7522_v39  ;;  %vm8345_vm5 = vcmp.ge.s32.totalorder %v12624_v14, 1  ;;  %vm12632_vm6 = vmmov %vm12614_vm2  ;;  %v619_v30 = vadd.f32 %v7652_v31, %v618_v53  ;;  %v8367_v14 = vld [vmem:[#allocation2 + $0x4f] sm:$0xff]  ;;  %v2944_v53 = vld [vmem:[#allocation3 + $0x1b0] sm:$0xff]  ;;  %v2840_v44 = vsel %vm8320_vm7, %v2712_v36, 0.0  ;;  %2066 = vrot.lane.b32.xlu1 %v7942_v16, %s7384_s16 }
 0x145   : > { %v12626_v12 = vsel %vm8345_vm5, 4294967295, %v12625_v12  ;;  %vm8351_vm13 = vcmp.ge.s32.totalorder %v12628_v23, 1  ;;  %798 = vst.msk [vmem:[#allocation2 + $0xc0] sm:$0xff] %vm12614_vm2, %v7192_v4  ;;  %v2939_v23 = vld [vmem:[#allocation3 + $0x188] sm:$0xff]  ;;  %1886 = vst.msk [vmem:[#allocation3 + $0x330] sm:$0xff] %vm12614_vm2, %v7194_v54  ;;  %7203 = vtanh.f32 %v624_v40  ;;  %v12638_v36 = vshra.s32 %v8206_v37, 4 }
 0x146   : > { %12627 = vst [vmem:[#allocation45_spill] sm:$0xff] %v12626_v12  ;;  %v12630_v25 = vsel %vm8351_vm13, 4294967295, %v12629_v25  ;;  %1887 = vst.msk [vmem:[#allocation3 + $0x358] sm:$0xff] %vm12632_vm6, %v7192_v4  ;;  %v2508_v4 = vsel %vm7819_vm4, %v8313_v20, 0.0  ;;  %7205 = vtanh.f32 %v619_v30  ;;  %v765_v1 = vand.u32 15, %v8338_v50  ;;  %v2713_v40 = vld [vmem:[#allocation2 + $0xa1] sm:$0xff] }
 0x147   : > { %12631 = vst [vmem:[#allocation46_spill] sm:$0xff] %v12630_v25  ;;  %vm12633_vm6 = vmmov %vm12614_vm2  ;;  %2574 = vrot.lane.b32.xlu0 %v2508_v4, %s7384_s16  ;;  %v7196_v4 = vpop.eup %7195  ;;  %v12687_v56 = vshra.s32 %v8338_v50, 4 }
 0x148   : > { %797 = vst.msk [vmem:[#allocation2 + $0xb8] sm:$0xff] %vm12633_vm6, %v7194_v54  ;;  %vm12634_vm3 = vmand %vm8263_vm12, %vm8201_vm0  ;;  %v7198_v54 = vpop.eup %7197  ;;  %vm8413_vm6 = vcmp.lt.s32.totalorder %v763_v6, 15  ;;  %vm12653_vm0 = vnez %v12481_v55  ;;  %v8428_v6 = vld [vmem:[#allocation2 + $0x50] sm:$0xff]  ;;  %v12717_v55 = vmov 0 }
 0x149   : > { %v2839_v63 = vsel %vm12634_vm3, %v2711_v48, 0.0  ;;  %vm12635_vm9 = vmmov %vm12614_vm2  ;;  %2872 = vst.msk [vmem:[#allocation3 + $0x250] sm:$0xff] %vm12614_vm2, %v2840_v44  ;;  %vm8393_vm3 = vcmp.lt.s32.totalorder %v12638_v36, 15  ;;  %v12639_v48 = vmov 0  ;;  %v12643_v44 = vshra.s32 %v8166_v24, 4 }
 0x14a   : > { %1039 = vst.msk [vmem:[#allocation3 + $0xf0] sm:$0xff] %vm12635_vm9, %v1007_v59  ;;  %vm12636_vm4 = vmmov %vm12614_vm2  ;;  %v12640_v48 = vsel %vm8393_vm3, 4294967295, %v12639_v48  ;;  %v6711_v59 = vpop.f32.mrb[28].mxu0 }
 0x14b   : > { %6744 = vmatmul.mubr.msk.f32.gmra.mrb[40].mxu0 %vm12636_vm4, %v2939_v23  ;;  %vm12637_vm7 = vmmov %vm12614_vm2  ;;  %12641 = vst [vmem:[#allocation47_spill] sm:$0xff] %v12640_v48  ;;  %v1585_v23 = vld [vmem:[#allocation2 + $0x4f] sm:$0xff]  ;;  %vm8402_vm9 = vcmp.lt.s32.totalorder %v12643_v44, 15  ;;  %v634_v36 = vadd.f32 %v6711_v59, %v7652_v31  ;;  %v628_v43 = vpop.f32.mrb[29].mxu0  ;;  %v12649_v44 = vmov 0 }
 0x14c   : > { %2871 = vst.msk [vmem:[#allocation3 + $0x228] sm:$0xff] %vm12637_vm7, %v2839_v63  ;;  %vm12642_vm4 = vmmov %vm12614_vm2  ;;  %v12644_v63 = vmov 0  ;;  %vm12647_vm7 = vnez %v12510_v8  ;;  %v12650_v44 = vsel %vm8413_vm6, 4294967295, %v12649_v44  ;;  %v629_v59 = vadd.f32 %v7652_v31, %v628_v43  ;;  %v2954_v31 = vld [vmem:[#allocation3 + $0x200] sm:$0xff]  ;;  %1752 = vrot.lane.b32.xlu0 %v1585_v23, %s7384_s16 }
 0x14d   : > { %6746 = vmatprep.mubr.msk.f32.mxu0 %vm12642_vm4, %v2944_v53  ;;  %v12645_v63 = vsel %vm8402_vm9, 4294967295, %v12644_v63  ;;  %v2351_v30 = vsel %vm12647_vm7, %v8367_v14, 0.0  ;;  %800 = vst.msk [vmem:[#allocation2 + $0xd0] sm:$0xff] %vm12614_vm2, %v7196_v4  ;;  %vm12648_vm4 = vmmov %vm12614_vm2  ;;  %v2714_v53 = vld [vmem:[#allocation2 + $0xa9] sm:$0xff]  ;;  %7207 = vtanh.f32 %v634_v36  ;;  %v12669_v23 = vmov 0 }
 0x14e   : > { %12646 = vst [vmem:[#allocation48_spill] sm:$0xff] %v12645_v63  ;;  %1889 = vst.msk [vmem:[#allocation3 + $0x3a8] sm:$0xff] %vm12648_vm4, %v7196_v4  ;;  %v2949_v4 = vld [vmem:[#allocation3 + $0x1d8] sm:$0xff]  ;;  %v2842_v47 = vsel %vm8402_vm9, %v2714_v53, 0.0  ;;  %v12673_v36 = vmov 0  ;;  %7209 = vtanh.f32 %v629_v59  ;;  %v12681_v59 = vmov 0 }
 0x14f   : > { %12651 = vst [vmem:[#allocation49_spill] sm:$0xff] %v12650_v44  ;;  %vm12652_vm12 = vmmov %vm12614_vm2  ;;  %vm12654_vm2 = vnez %v12495_v49  ;;  %v8496_v53 = vadd.s32 184, %v7522_v39  ;;  %v12688_v63 = vmov 0  ;;  %v12775_v49 = vshra.s32 %v8272_v21, 4 }
 0x150   : > { %2383 = vst.msk [vmem:[#allocation3 + $0xe0] sm:$0xff] %vm12652_vm12, %v2351_v30  ;;  %vm12655_vm4 = vmand %vm8291_vm14, %vm8285_vm10  ;;  %v12658_v30 = vshra.s32 %v7875_v38, 4 }
 0x151   : > { %v2841_v43 = vsel %vm12655_vm4, %v2713_v40, 0.0  ;;  %799 = vst.msk [vmem:[#allocation2 + $0xc8] sm:$0xff] %vm12652_vm12, %v7198_v54  ;;  %vm12656_vm5 = vmmov %vm12652_vm12  ;;  %v12662_v40 = vand.u32 15, %v7875_v38  ;;  %v12672_v38 = vshra.s32 %v8272_v21, 4 }
 0x152   : > { %1888 = vst.msk [vmem:[#allocation3 + $0x380] sm:$0xff] %vm12656_vm5, %v7198_v54  ;;  %vm12657_vm15 = vmmov %vm12656_vm5  ;;  %vm8444_vm13 = vcmp.ge.s32.totalorder %v12658_v30, 1  ;;  %v12663_v54 = vmov 0  ;;  %6747 = vmatmul.mubr.msk.f32.gmra.mrb[42].mxu0 %vm12656_vm5, %v2949_v4  ;;  %v6714_v4 = vpop.f32.mrb[30].mxu0  ;;  %v8477_v30 = vld [vmem:[#allocation2 + $0x47] sm:$0xff] }
 0x153   : > { %1552 = vst.msk [vmem:[#allocation3 + $0xf8] sm:$0xff] %vm12657_vm15, %v1520_v46  ;;  %v12660_v45 = vsel %vm8444_vm13, 4294967295, %v12659_v45  ;;  %vm8450_vm4 = vcmp.ge.s32.totalorder %v12662_v40, 1  ;;  %vm12666_vm12 = vmmov %vm12656_vm5  ;;  %v12668_v46 = vshra.s32 %v8269_v41, 4  ;;  %vm8469_vm10 = vcmp.lt.s32.totalorder %v12672_v38, 15  ;;  %v8479_v40 = vld [vmem:[#allocation2 + $0x48] sm:$0xff] }
 0x154   : > { %12661 = vst [vmem:[#allocation50_spill] sm:$0xff] %v12660_v45  ;;  %v12664_v54 = vsel %vm8450_vm4, 4294967295, %v12663_v54  ;;  %2873 = vst.msk [vmem:[#allocation3 + $0x278] sm:$0xff] %vm12666_vm12, %v2841_v43  ;;  %v12674_v36 = vsel %vm8469_vm10, 4294967295, %v12673_v36  ;;  %v7200_v43 = vpop.eup %7199  ;;  %v12678_v38 = vmov 0  ;;  %6749 = vmatprep.mubr.msk.f32.mxu0 %vm12666_vm12, %v2954_v31  ;;  %vm8488_vm15 = vcmp.lt.s32.totalorder %v765_v1, 15 }
 0x155   : > { %12665 = vst [vmem:[#allocation51_spill] sm:$0xff] %v12664_v54  ;;  %vm12667_vm14 = vmmov %vm12656_vm5  ;;  %vm8463_vm9 = vcmp.lt.s32.totalorder %v12668_v46, 15  ;;  %v12677_v46 = vshra.s32 %v7946_v19, 4  ;;  %v12682_v59 = vsel %vm8488_vm15, 4294967295, %v12681_v59  ;;  %vm12685_vm13 = vnez %v12600_v27  ;;  %v7202_v19 = vpop.eup %7201  ;;  %v2959_v8 = vld [vmem:[#allocation3 + $0x228] sm:$0xff] }
 0x156   : > { %2874 = vst.msk [vmem:[#allocation3 + $0x2a0] sm:$0xff] %vm12667_vm14, %v2842_v47  ;;  %v12670_v23 = vsel %vm8463_vm9, 4294967295, %v12669_v23  ;;  %12675 = vst [vmem:[#allocation53_spill] sm:$0xff] %v12674_v36  ;;  %vm12676_vm14 = vnez %v12472_v51  ;;  %v638_v51 = vpop.f32.mrb[31].mxu0  ;;  %v1167_v1 = vsel %vm12613_vm1, %v8313_v20, 0.0  ;;  %v2511_v31 = vsel %vm12647_vm7, %v8428_v6, 0.0 }
 0x157   : > { %12671 = vst [vmem:[#allocation52_spill] sm:$0xff] %v12670_v23  ;;  %v1997_v47 = vsel %vm12676_vm14, %v7938_v15, 0.0  ;;  %vm8483_vm5 = vcmp.ge.s32.totalorder %v12677_v46, 1  ;;  %12683 = vst [vmem:[#allocation55_spill] sm:$0xff] %v12682_v59  ;;  %v7343_v15 = vld [vmem:[%s12008_s2] ss:$0 sm:$0xff]  ;;  %vm12684_vm14 = vnez %v12528_v62  ;;  %1237 = vrot.lane.b32.xlu1 %v1167_v1, %s7384_s16  ;;  %2580 = vrot.lane.b32.xlu0 %v2511_v31, %s7384_s16 }
 0x158   : > { %v12679_v38 = vsel %vm8483_vm5, 4294967295, %v12678_v38  ;;  %v644_v16 = vadd.f32 %v7343_v15, %v6714_v4  ;;  %v2715_v46 = vld [vmem:[#allocation2 + $0xb1] sm:$0xff]  ;;  %802 = vst.msk [vmem:[#allocation2 + $0xe0] sm:$0xff] %vm12666_vm12, %v7200_v43  ;;  %vm12686_vm4 = vmmov %vm12666_vm12  ;;  %v2716_v4 = vld [vmem:[#allocation2 + $0xb9] sm:$0xff]  ;;  %vm8512_vm15 = vcmp.lt.s32.totalorder %v12687_v56, 15  ;;  %v639_v34 = vadd.f32 %v7343_v15, %v638_v51 }
 0x159   : > { %12680 = vst [vmem:[#allocation54_spill] sm:$0xff] %v12679_v38  ;;  %1891 = vst.msk [vmem:[#allocation3 + $0x3f8] sm:$0xff] %vm12686_vm4, %v7200_v43  ;;  %v12689_v63 = vsel %vm8512_vm15, 4294967295, %v12688_v63  ;;  %v2964_v51 = vld [vmem:[#allocation3 + $0x250] sm:$0xff]  ;;  %v2844_v56 = vsel %vm8469_vm10, %v2716_v4, 0.0  ;;  %v1363_v15 = vld [vmem:[#allocation2 + $0x51] sm:$0xff] }
 0x15a   : > { %12690 = vst [vmem:[#allocation56_spill] sm:$0xff] %v12689_v63  ;;  %vm12691_vm4 = vmand %vm8393_vm3, %vm8329_vm11  ;;  %7211 = vtanh.f32 %v644_v16  ;;  %v1680_v1 = vsel %vm8124_vm8, %v8477_v30, 0.0  ;;  %v12694_v20 = vshra.s32 %v8063_v18, 4  ;;  %v12698_v4 = vshra.s32 %v7994_v57, 4  ;;  %v2718_v48 = vld [vmem:[#allocation2 + $0xc9] sm:$0xff] }
 0x15b   : > { %v2843_v43 = vsel %vm12691_vm4, %v2715_v46, 0.0  ;;  %801 = vst.msk [vmem:[#allocation2 + $0xd8] sm:$0xff] %vm12666_vm12, %v7202_v19  ;;  %vm12692_vm5 = vmmov %vm12666_vm12  ;;  %v12699_v16 = vmov 0  ;;  %v12701_v31 = vand.u32 15, %v7994_v57  ;;  %v12702_v30 = vmov 0  ;;  %v7204_v57 = vpop.eup %7203  ;;  %v2717_v46 = vld [vmem:[#allocation2 + $0xc1] sm:$0xff]  ;;  %2064 = vrot.lane.b32.xlu1 %v1997_v47, %s7384_s16  ;;  %1750 = vrot.lane.b32.xlu0 %v1680_v1, %s7384_s16 }
 0x15c   : > { %1890 = vst.msk [vmem:[#allocation3 + $0x3d0] sm:$0xff] %vm12692_vm5, %v7202_v19  ;;  %vm8540_vm4 = vcmp.ge.s32.totalorder %v12694_v20, 1  ;;  %v12695_v19 = vmov 0  ;;  %vm8546_vm5 = vcmp.ge.s32.totalorder %v12698_v4, 1  ;;  %vm12704_vm1 = vcmask 523264   ;;  %v8566_v20 = vld [vmem:[#allocation2 + $0x60] sm:$0xff] }
 0x15d   : > { %v12696_v19 = vsel %vm8540_vm4, 4294967295, %v12695_v19  ;;  %v12700_v16 = vsel %vm8546_vm5, 4294967295, %v12699_v16  ;;  %vm8552_vm12 = vcmp.ge.s32.totalorder %v12701_v31, 1  ;;  %6750 = vmatmul.mubr.msk.f32.gmra.mrb[44].mxu0 %vm12704_vm1, %v2959_v8  ;;  %vm12705_vm3 = vmmov %vm12704_vm1  ;;  %7213 = vtanh.f32 %v639_v34  ;;  %v2974_v47 = vld [vmem:[#allocation3 + $0x2a0] sm:$0xff] }
 0x15e   : > { %12697 = vst [vmem:[#allocation57_spill] sm:$0xff] %v12696_v19  ;;  %v12703_v30 = vsel %vm8552_vm12, 4294967295, %v12702_v30  ;;  %2875 = vst.msk [vmem:[#allocation3 + $0x2c8] sm:$0xff] %vm12705_vm3, %v2843_v43  ;;  %v8564_v18 = vadd.s32 176, %v7522_v39  ;;  %v767_v8 = vand.u32 15, %v8496_v53  ;;  %v8571_v43 = vadd.s32 200, %v7522_v39 }
 0x15f   : > { %vm12706_vm7 = vmmov %vm12704_vm1  ;;  %v1010_v4 = vsel %vm12685_vm13, %v8367_v14, 0.0  ;;  %vm12709_vm3 = vnez %v12630_v25  ;;  %v12711_v31 = vshra.s32 %v8151_v13, 4  ;;  %v12712_v14 = vmov 0 }
 0x160   : > { %2876 = vst.msk [vmem:[#allocation3 + $0x2f0] sm:$0xff] %vm12706_vm7, %v2844_v56  ;;  %vm12707_vm11 = vmmov %vm12704_vm1  ;;  %v2969_v56 = vld [vmem:[#allocation3 + $0x278] sm:$0xff]  ;;  %v12753_v62 = vand.u32 15, %v8166_v24  ;;  %v12754_v23 = vmov 0  ;;  %v12798_v33 = vshra.s32 %v8571_v43, 4 }
 0x161   : > { %6752 = vmatprep.mubr.msk.f32.mxu0 %vm12707_vm11, %v2964_v51  ;;  %vm12708_vm1 = vmand %vm12654_vm2, %vm12653_vm0  ;;  %vm12710_vm11 = vnez %v12626_v12  ;;  %v7206_v51 = vpop.eup %7205  ;;  %vm8591_vm10 = vcmp.ge.s32.totalorder %v12711_v31, 1  ;;  %v8610_v31 = vld [vmem:[#allocation2 + $0x5f] sm:$0xff] }
 0x162   : > { %v2350_v34 = vsel %vm12708_vm1, %v8516_v61, 0.0  ;;  %v12713_v14 = vsel %vm8591_vm10, 4294967295, %v12712_v14  ;;  %vm12714_vm5 = vmmov %vm12706_vm7  ;;  %vm8599_vm1 = vcmp.lt.s32.totalorder %v12716_v22, 15  ;;  %v12723_v22 = vshra.s32 %v8089_v26, 4 }
 0x163   : > { %804 = vst.msk [vmem:[#allocation2 + $0xf0] sm:$0xff] %vm12714_vm5, %v7204_v57  ;;  %vm12715_vm0 = vmmov %vm12714_vm5  ;;  %v12718_v55 = vsel %vm8599_vm1, 4294967295, %v12717_v55 }
 0x164   : > { %1893 = vst.msk [vmem:[#allocation3 + $0x448] sm:$0xff] %vm12715_vm0, %v7204_v57  ;;  %12719 = vst [vmem:[#allocation58_spill] sm:$0xff] %v12718_v55  ;;  %v12724_v57 = vmov 0  ;;  %v12759_v55 = vmov 0 }
 0x165   : > { %vm12720_vm7 = vmmov %vm12715_vm0  ;;  %v2979_v36 = vld [vmem:[#allocation3 + $0x2c8] sm:$0xff] }
 0x166   : > { %1042 = vst.msk [vmem:[#allocation3 + $0x168] sm:$0xff] %vm12720_vm7, %v1010_v4  ;;  %vm12721_vm12 = vmmov %vm12715_vm0  ;;  %vm8615_vm0 = vcmp.ge.s32.totalorder %v12723_v22, 1  ;;  %v12726_v4 = vand.u32 15, %v8089_v26  ;;  %v2846_v22 = vsel %vm8599_vm1, %v2718_v48, 0.0  ;;  %v12168_v26 = vshra.s32 %v8496_v53, 4 }
 0x167   : > { %2382 = vst.msk [vmem:[#allocation3 + $0xb8] sm:$0xff] %vm12721_vm12, %v2350_v34  ;;  %vm12722_vm10 = vmand %vm12685_vm13, %vm12684_vm14  ;;  %v12725_v57 = vsel %vm8615_vm0, 4294967295, %v12724_v57  ;;  %v12727_v34 = vmov 0  ;;  %v12750_v48 = vshra.s32 %v8166_v24, 4  ;;  %v8710_v24 = vadd.s32 232, %v7522_v39  ;;  %v2984_v27 = vld [vmem:[#allocation3 + $0x2f0] sm:$0xff] }
 0x168   : > { %v1523_v13 = vsel %vm12722_vm10, %v1363_v15, 0.0  ;;  %vm8621_vm5 = vcmp.ge.s32.totalorder %v12726_v4, 1  ;;  %vm12729_vm10 = vmand %vm8463_vm9, %vm8413_vm6  ;;  %1892 = vst.msk [vmem:[#allocation3 + $0x420] sm:$0xff] %vm12720_vm7, %v7206_v51  ;;  %v8636_v4 = vadd.s32 192, %v7522_v39  ;;  %vm12734_vm9 = vnez %v12682_v59 }
 0x169   : > { %v12728_v34 = vsel %vm8621_vm5, 4294967295, %v12727_v34  ;;  %v2845_v15 = vsel %vm12729_vm10, %v2717_v46, 0.0  ;;  %vm12730_vm12 = vmmov %vm12720_vm7  ;;  %vm12732_vm10 = vnez %v12535_v9  ;;  %v1362_v46 = vld [vmem:[#allocation2 + $0x49] sm:$0xff]  ;;  %v12808_v59 = vmov 0 }
 0x16a   : > { %803 = vst.msk [vmem:[#allocation2 + $0xe8] sm:$0xff] %vm12730_vm12, %v7206_v51  ;;  %vm12731_vm14 = vmmov %vm12720_vm7  ;;  %v769_v51 = vand.u32 15, %v8571_v43 }
 0x16b   : > { %1555 = vst.msk [vmem:[#allocation3 + $0x170] sm:$0xff] %vm12731_vm14, %v1523_v13  ;;  %vm12733_vm12 = vmmov %vm12720_vm7  ;;  %v7208_v13 = vpop.eup %7207 }
 0x16c   : > { %6753 = vmatmul.mubr.msk.f32.gmra.mrb[46].mxu0 %vm12733_vm12, %v2969_v56  ;;  %2877 = vst.msk [vmem:[#allocation3 + $0x318] sm:$0xff] %vm12720_vm7, %v2845_v15  ;;  %vm12735_vm14 = vmmov %vm12720_vm7  ;;  %v8660_v56 = vld [vmem:[#allocation2 + $0x57] sm:$0xff]  ;;  %v12738_v15 = vmov 0 }
 0x16d   : > { %2878 = vst.msk [vmem:[#allocation3 + $0x340] sm:$0xff] %vm12735_vm14, %v2846_v22  ;;  %vm12736_vm6 = vmand %vm12710_vm11, %vm12709_vm3  ;;  %vm8669_vm14 = vcmp.lt.s32.totalorder %v12168_v26, 15  ;;  %v12741_v22 = vmov 0  ;;  %v12747_v26 = vmov 0  ;;  %vm12850_vm3 = vnez %v12728_v34 }
 0x16e   : > { %v1009_v1 = vsel %vm12736_vm6, %v8516_v61, 0.0  ;;  %vm12737_vm12 = vmmov %vm12720_vm7  ;;  %vm8663_vm7 = vcmp.lt.s32.totalorder %v767_v8, 15  ;;  %v12742_v22 = vsel %vm8669_vm14, 4294967295, %v12741_v22  ;;  %v2353_v61 = vsel %vm12732_vm10, %v8610_v31, 0.0  ;;  %v7210_v8 = vpop.eup %7209 }
 0x16f   : > { %6755 = vmatprep.mubr.msk.f32.mxu0 %vm12737_vm12, %v2974_v47  ;;  %v12739_v15 = vsel %vm8663_vm7, 4294967295, %v12738_v15  ;;  %12743 = vst [vmem:[#allocation60_spill] sm:$0xff] %v12742_v22  ;;  %vm12744_vm1 = vmmov %vm12737_vm12  ;;  %vm12745_vm6 = vnez %v12513_v3  ;;  %v12746_v47 = vshra.s32 %v8206_v37, 4  ;;  %vm8696_vm10 = vcmp.ge.s32.totalorder %v12753_v62, 1  ;;  %v2719_v37 = vld [vmem:[#allocation2 + $0xd1] sm:$0xff]  ;;  %v7212_v63 = vpop.eup %7211 }
 0x170   : > { %12740 = vst [vmem:[#allocation59_spill] sm:$0xff] %v12739_v15  ;;  %1041 = vst.msk [vmem:[#allocation3 + $0x140] sm:$0xff] %vm12744_vm1, %v1009_v1  ;;  %vm8690_vm1 = vcmp.ge.s32.totalorder %v12750_v48, 1  ;;  %v12751_v1 = vmov 0  ;;  %v12755_v23 = vsel %vm8696_vm10, 4294967295, %v12754_v23  ;;  %v2720_v48 = vld [vmem:[#allocation2 + $0xd9] sm:$0xff] }
 0x171   : > { %vm8684_vm0 = vcmp.ge.s32.totalorder %v12746_v47, 1  ;;  %v12752_v1 = vsel %vm8690_vm1, 4294967295, %v12751_v1  ;;  %12756 = vst [vmem:[#allocation62_spill] sm:$0xff] %v12755_v23  ;;  %806 = vst.msk [vmem:[#allocation2 + $0x100] sm:$0xff] %vm12737_vm12, %v7208_v13  ;;  %v12758_v47 = vshra.s32 %v8564_v18, 4  ;;  %v8713_v62 = vld [vmem:[#allocation2 + $0x57] sm:$0xff] }
 0x172   : > { %v12748_v26 = vsel %vm8684_vm0, 4294967295, %v12747_v26  ;;  %vm12757_vm5 = vmmov %vm12737_vm12  ;;  %v12855_v22 = vmov 0 }
 0x173   : > { %12749 = vst [vmem:[#allocation61_spill] sm:$0xff] %v12748_v26  ;;  %1895 = vst.msk [vmem:[#allocation3 + $0x498] sm:$0xff] %vm12757_vm5, %v7208_v13  ;;  %vm8704_vm0 = vcmp.lt.s32.totalorder %v12758_v47, 15  ;;  %v12763_v13 = vsel %vm12685_vm13, %v8428_v6, 0.0  ;;  %v12764_v47 = vshra.s32 %v8269_v41, 4  ;;  %v8754_v41 = vld [vmem:[#allocation2 + $0x58] sm:$0xff] }
 0x174   : > { %v12760_v55 = vsel %vm8704_vm0, 4294967295, %v12759_v55  ;;  %vm12762_vm1 = vmmov %vm12757_vm5  ;;  %1243 = vrot.lane.b32.xlu1 %v12763_v13, %s7384_s16  ;;  %v2848_v6 = vsel %vm8704_vm0, %v2720_v48, 0.0  ;;  %v8737_v13 = vadd.s32 216, %v7522_v39  ;;  %v12780_v48 = vmov 0 }
 0x175   : > { %12761 = vst [vmem:[#allocation63_spill] sm:$0xff] %v12760_v55  ;;  %2385 = vst.msk [vmem:[#allocation3 + $0x130] sm:$0xff] %vm12762_vm1, %v2353_v61  ;;  %vm8722_vm5 = vcmp.ge.s32.totalorder %v12764_v47, 1  ;;  %v12776_v55 = vmov 0  ;;  %v12787_v47 = vmov 0 }
 0x176   : > { %v12766_v17 = vsel %vm8722_vm5, 4294967295, %v12765_v17  ;;  %vm12768_vm12 = vmand %vm8512_vm15, %vm12734_vm9  ;;  %805 = vst.msk [vmem:[#allocation2 + $0xf8] sm:$0xff] %vm12762_vm1, %v7210_v8  ;;  %v12230_v10 = vshra.s32 %v8737_v13, 4  ;;  %vm12842_vm5 = vnez %v12560_v5 }
 0x177   : > { %12767 = vst [vmem:[#allocation64_spill] sm:$0xff] %v12766_v17  ;;  %v2847_v61 = vsel %vm12768_vm12, %v2719_v37, 0.0  ;;  %vm12769_vm10 = vmmov %vm12762_vm1  ;;  %v12772_v37 = vsel %vm12654_vm2, %v8479_v40, 0.0  ;;  %vm8761_vm1 = vcmp.ge.s32.totalorder %v12775_v49, 1  ;;  %vm12783_vm2 = vcmask 523264  }
 0x178   : > { %1894 = vst.msk [vmem:[#allocation3 + $0x470] sm:$0xff] %vm12769_vm10, %v7210_v8  ;;  %2578 = vrot.lane.b32.xlu0 %v12772_v37, %s7384_s16  ;;  %v1587_v8 = vld [vmem:[#allocation2 + $0x5f] sm:$0xff]  ;;  %vm12773_vm10 = vnez %v12679_v38  ;;  %v12777_v55 = vsel %vm8761_vm1, 4294967295, %v12776_v55  ;;  %v12779_v37 = vand.u32 15, %v8272_v21  ;;  %6756 = vmatmul.mubr.msk.f32.gmra.mrb[48].mxu0 %vm12783_vm2, %v2979_v36  ;;  %vm12784_vm15 = vmmov %vm12783_vm2  ;;  %v8779_v49 = vadd.s32 208, %v7522_v39  ;;  %v8781_v21 = vld [vmem:[#allocation2 + $0x70] sm:$0xff] }
 0x179   : > { %12778 = vst [vmem:[#allocation65_spill] sm:$0xff] %v12777_v55  ;;  %2879 = vst.msk [vmem:[#allocation3 + $0x368] sm:$0xff] %vm12784_vm15, %v2847_v61  ;;  %v12790_v36 = vand.u32 15, %v8359_v0  ;;  %v12791_v61 = vmov 0  ;;  %vm8802_vm12 = vcmp.lt.s32.totalorder %v12798_v33, 15  ;;  %v12807_v33 = vshra.s32 %v8338_v50, 4  ;;  %2070 = vrot.lane.b32.xlu1 %v8017_v11, %s7384_s16 }
 0x17a   : > { %vm8767_vm4 = vcmp.ge.s32.totalorder %v12779_v37, 1  ;;  %vm12785_vm0 = vmmov %vm12783_vm2  ;;  %v12786_v37 = vshra.s32 %v8359_v0, 4  ;;  %v12800_v32 = vsel %vm8802_vm12, 4294967295, %v12799_v32  ;;  %v12803_v0 = vmov 0 }
 0x17b   : > { %v12781_v48 = vsel %vm8767_vm4, 4294967295, %v12780_v48  ;;  %2880 = vst.msk [vmem:[#allocation3 + $0x390] sm:$0xff] %vm12785_vm0, %v2848_v6  ;;  %vm8791_vm2 = vcmp.ge.s32.totalorder %v12790_v36, 1  ;;  %vm12794_vm15 = vmmov %vm12785_vm0  ;;  %vm8796_vm0 = vcmp.lt.s32.totalorder %v769_v51, 15  ;;  %v12795_v6 = vmov 0  ;;  %v7214_v51 = vpop.eup %7213 }
 0x17c   : > { %12782 = vst [vmem:[#allocation66_spill] sm:$0xff] %v12781_v48  ;;  %vm8785_vm9 = vcmp.ge.s32.totalorder %v12786_v37, 1  ;;  %v12792_v61 = vsel %vm8791_vm2, 4294967295, %v12791_v61  ;;  %6758 = vmatprep.mubr.msk.f32.mxu0 %vm12794_vm15, %v2984_v27  ;;  %v12796_v6 = vsel %vm8796_vm0, 4294967295, %v12795_v6  ;;  %12801 = vst [vmem:[#allocation70_spill] sm:$0xff] %v12800_v32  ;;  %v12802_v37 = vshra.s32 %v8636_v4, 4  ;;  %1756 = vrot.lane.b32.xlu0 %v1587_v8, %s7384_s16 }
 0x17d   : > { %v12788_v47 = vsel %vm8785_vm9, 4294967295, %v12787_v47  ;;  %12793 = vst [vmem:[#allocation68_spill] sm:$0xff] %v12792_v61  ;;  %12797 = vst [vmem:[#allocation69_spill] sm:$0xff] %v12796_v6  ;;  %v1522_v36 = vsel %vm12710_vm11, %v1362_v46, 0.0  ;;  %v1365_v27 = vld [vmem:[#allocation2 + $0x61] sm:$0xff]  ;;  %vm8820_vm1 = vcmp.ge.s32.totalorder %v12807_v33, 1 }
 0x17e   : > { %12789 = vst [vmem:[#allocation67_spill] sm:$0xff] %v12788_v47  ;;  %vm8808_vm9 = vcmp.lt.s32.totalorder %v12802_v37, 15  ;;  %v12809_v59 = vsel %vm8820_vm1, 4294967295, %v12808_v59  ;;  %vm12811_vm4 = vcmask 523264   ;;  %v2721_v37 = vld [vmem:[#allocation2 + $0xe1] sm:$0xff]  ;;  %v2722_v47 = vld [vmem:[#allocation2 + $0xe9] sm:$0xff] }
 0x17f   : > { %v12804_v0 = vsel %vm8808_vm9, 4294967295, %v12803_v0  ;;  %12810 = vst [vmem:[#allocation72_spill] sm:$0xff] %v12809_v59  ;;  %808 = vst.msk [vmem:[#allocation2 + $0x110] sm:$0xff] %vm12811_vm4, %v7212_v63  ;;  %v773_v61 = vand.u32 15, %v8710_v24  ;;  %v1012_v50 = vsel %vm12773_vm10, %v8610_v31, 0.0  ;;  %vm12817_vm1 = vcmask 523264  }
 0x180   : > { %12805 = vst [vmem:[#allocation71_spill] sm:$0xff] %v12804_v0  ;;  %vm12812_vm13 = vmmov %vm12811_vm4  ;;  %v2850_v46 = vsel %vm8808_vm9, %v2722_v47, 0.0  ;;  %v771_v59 = vand.u32 15, %v8737_v13  ;;  %v12231_v47 = vshra.s32 %v8779_v49, 4  ;;  %v12829_v8 = vmov 0  ;;  %v1368_v0 = vld [vmem:[#allocation2 + $0x79] sm:$0xff] }
 0x181   : > { %1897 = vst.msk [vmem:[#allocation3 + $0x4e8] sm:$0xff] %vm12812_vm13, %v7212_v63  ;;  %vm12813_vm11 = vmmov %vm12811_vm4  ;;  %v2989_v63 = vld [vmem:[#allocation3 + $0x318] sm:$0xff]  ;;  %v12846_v11 = vmov 0  ;;  %vm12852_vm13 = vnez %v12626_v12  ;;  %v1367_v12 = vld [vmem:[#allocation2 + $0x71] sm:$0xff] }
 0x182   : > { %1554 = vst.msk [vmem:[#allocation3 + $0x148] sm:$0xff] %vm12813_vm11, %v1522_v36  ;;  %vm12814_vm4 = vmand %vm12745_vm6, %vm8124_vm8  ;;  %v2994_v36 = vld [vmem:[#allocation3 + $0x340] sm:$0xff]  ;;  %vm12838_vm6 = vnez %v12664_v54  ;;  %vm12849_vm8 = vcmask 523264  }
 0x183   : > { %v2352_v33 = vsel %vm12814_vm4, %v8713_v62, 0.0  ;;  %vm12816_vm11 = vmand %vm8669_vm14, %vm8663_vm7  ;;  %807 = vst.msk [vmem:[#allocation2 + $0x108] sm:$0xff] %vm12817_vm1, %v7214_v51 }
 0x184   : > { %v2849_v31 = vsel %vm12816_vm11, %v2721_v37, 0.0  ;;  %vm12818_vm15 = vmmov %vm12817_vm1  ;;  %vm12822_vm11 = vnez %v12696_v19  ;;  %v8884_v37 = vadd.s32 224, %v7522_v39  ;;  %v9124_v19 = vld [vmem:[#allocation2 + $0x8f] sm:$0xff] }
 0x185   : > { %1896 = vst.msk [vmem:[#allocation3 + $0x4c0] sm:$0xff] %vm12818_vm15, %v7214_v51  ;;  %vm12819_vm4 = vmmov %vm12817_vm1  ;;  %v12828_v51 = vshra.s32 %v8710_v24, 4 }
 0x186   : > { %1044 = vst.msk [vmem:[#allocation3 + $0x1b8] sm:$0xff] %vm12819_vm4, %v1012_v50  ;;  %vm12820_vm2 = vmmov %vm12817_vm1  ;;  %v2724_v50 = vld [vmem:[#allocation2 + $0xf9] sm:$0xff] }
 0x187   : > { %2384 = vst.msk [vmem:[#allocation3 + $0x108] sm:$0xff] %vm12820_vm2, %v2352_v33  ;;  %vm12825_vm9 = vmmov %vm12820_vm2  ;;  %vm8879_vm7 = vcmp.lt.s32.totalorder %v12828_v51, 15  ;;  %v766_v33 = vand.u32 15, %v8564_v18  ;;  %v2723_v51 = vld [vmem:[#allocation2 + $0xf1] sm:$0xff] }
 0x188   : > { %6759 = vmatmul.mubr.msk.f32.gmra.mrb[50].mxu0 %vm12825_vm9, %v2989_v63  ;;  %vm12826_vm4 = vmmov %vm12820_vm2  ;;  %v12830_v8 = vsel %vm8879_vm7, 4294967295, %v12829_v8 }
 0x189   : > { %2881 = vst.msk [vmem:[#allocation3 + $0x3b8] sm:$0xff] %vm12826_vm4, %v2849_v31  ;;  %vm12827_vm14 = vmmov %vm12820_vm2  ;;  %vm12836_vm4 = vnez %v12557_v58  ;;  %v8902_v31 = vld [vmem:[#allocation2 + $0x6f] sm:$0xff]  ;;  %v3004_v58 = vld [vmem:[#allocation3 + $0x390] sm:$0xff] }
 0x18a   : > { %2882 = vst.msk [vmem:[#allocation3 + $0x3e0] sm:$0xff] %vm12827_vm14, %v2850_v46  ;;  %12831 = vst [vmem:[#allocation73_spill] sm:$0xff] %v12830_v8  ;;  %vm8893_vm14 = vcmp.lt.s32.totalorder %v12230_v10, 15  ;;  %v12833_v46 = vmov 0  ;;  %v1364_v10 = vld [vmem:[#allocation2 + $0x59] sm:$0xff] }
 0x18b   : > { %vm12832_vm9 = vmmov %vm12820_vm2  ;;  %v12834_v46 = vsel %vm8893_vm14, 4294967295, %v12833_v46 }
 0x18c   : > { %6761 = vmatprep.mubr.msk.f32.mxu0 %vm12832_vm9, %v2994_v36  ;;  %12835 = vst [vmem:[#allocation74_spill] sm:$0xff] %v12834_v46  ;;  %vm12837_vm2 = vmand %vm12773_vm10, %vm12836_vm4  ;;  %vm8921_vm4 = vcmp.lt.s32.totalorder %v773_v61, 15  ;;  %v12853_v36 = vsel %vm12852_vm13, %v8479_v40, 0.0  ;;  %vm8943_vm10 = vcmp.lt.s32.totalorder %v771_v59, 15  ;;  %vm12858_vm13 = vnez %v12535_v9 }
 0x18d   : > { %v1525_v63 = vsel %vm12837_vm2, %v1365_v27, 0.0  ;;  %vm8917_vm2 = vcmp.lt.s32.totalorder %v12231_v47, 15  ;;  %v12843_v27 = vmov 0  ;;  %v12847_v11 = vsel %vm8921_vm4, 4294967295, %v12846_v11  ;;  %1241 = vrot.lane.b32.xlu1 %v12853_v36, %s7384_s16  ;;  %v2999_v47 = vld [vmem:[#allocation3 + $0x368] sm:$0xff] }
 0x18e   : > { %v12844_v27 = vsel %vm8917_vm2, 4294967295, %v12843_v27  ;;  %12848 = vst [vmem:[#allocation76_spill] sm:$0xff] %v12847_v11  ;;  %1557 = vst.msk [vmem:[#allocation3 + $0x1c0] sm:$0xff] %vm12849_vm8, %v1525_v63  ;;  %v12856_v22 = vsel %vm8943_vm10, 4294967295, %v12855_v22  ;;  %v2852_v40 = vsel %vm8917_vm2, %v2724_v50, 0.0  ;;  %v12859_v36 = vsel %vm12858_vm13, %v8566_v20, 0.0 }
 0x18f   : > { %12845 = vst [vmem:[#allocation75_spill] sm:$0xff] %v12844_v27  ;;  %vm12854_vm8 = vmand %vm8802_vm12, %vm8796_vm0  ;;  %2584 = vrot.lane.b32.xlu0 %v12859_v36, %s7384_s16  ;;  %v12861_v59 = vmov 0  ;;  %v12864_v61 = vshra.s32 %v8564_v18, 4  ;;  %v12865_v50 = vmov 0  ;;  %vm12868_vm2 = vcmask 523264   ;;  %v2726_v36 = vld [vmem:[#allocation2 + $0x109] sm:$0xff] }
 0x190   : > { %v2851_v63 = vsel %vm12854_vm8, %v2723_v51, 0.0  ;;  %12857 = vst [vmem:[#allocation77_spill] sm:$0xff] %v12856_v22  ;;  %v12860_v51 = vshra.s32 %v8496_v53, 4  ;;  %6762 = vmatmul.mubr.msk.f32.gmra.mrb[52].mxu0 %vm12868_vm2, %v2999_v47  ;;  %vm12869_vm15 = vmmov %vm12868_vm2  ;;  %v768_v9 = vand.u32 15, %v8636_v4  ;;  %v12257_v53 = vshra.s32 %v8884_v37, 4  ;;  %v2727_v47 = vld [vmem:[#allocation2 + $0x111] sm:$0xff] }
 0x191   : > { %vm8966_vm12 = vcmp.ge.s32.totalorder %v12864_v61, 1  ;;  %2883 = vst.msk [vmem:[#allocation3 + $0x408] sm:$0xff] %vm12869_vm15, %v2851_v63  ;;  %vm12870_vm9 = vmmov %vm12868_vm2  ;;  %v12872_v18 = vmov 0  ;;  %v2355_v63 = vsel %vm12842_vm5, %v8902_v31, 0.0  ;;  %vm12886_vm13 = vcmask 523264   ;;  %v3014_v8 = vld [vmem:[#allocation3 + $0x3e0] sm:$0xff] }
 0x192   : > { %vm8960_vm8 = vcmp.ge.s32.totalorder %v12860_v51, 1  ;;  %v12866_v50 = vsel %vm8966_vm12, 4294967295, %v12865_v50  ;;  %2884 = vst.msk [vmem:[#allocation3 + $0x430] sm:$0xff] %vm12870_vm9, %v2852_v40  ;;  %vm12875_vm15 = vmmov %vm12868_vm2  ;;  %vm12876_vm2 = vnez %v12660_v45  ;;  %v2194_v40 = vld [vmem:[#allocation2 + $0x67] sm:$0xff]  ;;  %vm9014_vm5 = vcmp.lt.s32.totalorder %v12257_v53, 15  ;;  %v2197_v27 = vld [vmem:[#allocation2 + $0x7f] sm:$0xff] }
 0x193   : > { %v12862_v59 = vsel %vm8960_vm8, 4294967295, %v12861_v59  ;;  %12867 = vst [vmem:[#allocation79_spill] sm:$0xff] %v12866_v50  ;;  %vm8983_vm8 = vcmp.ge.s32.totalorder %v766_v33, 1  ;;  %6764 = vmatprep.mubr.msk.f32.mxu0 %vm12875_vm15, %v3004_v58  ;;  %vm12877_vm9 = vmand %vm12876_vm2, %vm12838_vm6  ;;  %v1524_v33 = vsel %vm12876_vm2, %v1364_v10, 0.0  ;;  %v2725_v58 = vld [vmem:[#allocation2 + $0x101] sm:$0xff]  ;;  %v12883_v10 = vmov 0 }
 0x194   : > { %12863 = vst [vmem:[#allocation78_spill] sm:$0xff] %v12862_v59  ;;  %v12873_v18 = vsel %vm8983_vm8, 4294967295, %v12872_v18  ;;  %v1011_v61 = vsel %vm12877_vm9, %v8713_v62, 0.0  ;;  %vm12882_vm9 = vmand %vm8879_vm7, %vm8921_vm4  ;;  %v12884_v10 = vsel %vm9014_vm5, 4294967295, %v12883_v10  ;;  %v9019_v51 = vadd.s32 248, %v7522_v39 }
 0x195   : > { %12874 = vst [vmem:[#allocation80_spill] sm:$0xff] %v12873_v18  ;;  %v2855_v62 = vsel %vm12882_vm9, %v2727_v47, 0.0  ;;  %12885 = vst [vmem:[#allocation81_spill] sm:$0xff] %v12884_v10  ;;  %vm12892_vm12 = vnez %v12490_v2  ;;  %v12893_v47 = vld [vmem:[#allocation27_spill] sm:$0xff]  ;;  %v770_v53 = vand.u32 15, %v8779_v49  ;;  %v2854_v32 = vsel %vm9014_vm5, %v2726_v36, 0.0 }
 0x196   : > { %1043 = vst.msk [vmem:[#allocation3 + $0x190] sm:$0xff] %vm12886_vm13, %v1011_v61  ;;  %vm12887_vm1 = vmmov %vm12886_vm13  ;;  %v12894_v61 = vsel %vm12892_vm12, %v12893_v47, 0.0  ;;  %vm12898_vm12 = vnez %v12630_v25  ;;  %v12904_v36 = vshra.s32 %v8636_v4, 4  ;;  %v12905_v2 = vmov 0  ;;  %v12914_v4 = vld [vmem:[#allocation68_spill] sm:$0xff]  ;;  %v12940_v25 = vld [vmem:[#allocation37_spill] sm:$0xff] }
 0x197   : > { %2387 = vst.msk [vmem:[#allocation3 + $0x180] sm:$0xff] %vm12887_vm1, %v2355_v63  ;;  %vm12888_vm2 = vmmov %vm12887_vm1  ;;  %2068 = vrot.lane.b32.xlu1 %v12894_v61, %s7384_s16  ;;  %v3009_v63 = vld [vmem:[#allocation3 + $0x3b8] sm:$0xff]  ;;  %v12899_v47 = vsel %vm12898_vm12, %v8660_v56, 0.0  ;;  %v12900_v61 = vshra.s32 %v8571_v43, 4  ;;  %vm9069_vm7 = vcmp.ge.s32.totalorder %v768_v9, 1  ;;  %v12908_v46 = vmov 0 }
 0x198   : > { %1556 = vst.msk [vmem:[#allocation3 + $0x198] sm:$0xff] %vm12888_vm2, %v1524_v33  ;;  %vm12895_vm13 = vmand %vm8893_vm14, %vm8943_vm10  ;;  %1754 = vrot.lane.b32.xlu0 %v12899_v47, %s7384_s16  ;;  %v12909_v46 = vsel %vm9069_vm7, 4294967295, %v12908_v46  ;;  %vm12911_vm14 = vcmask 523264   ;;  %v1014_v43 = vsel %vm12822_vm11, %v8902_v31, 0.0  ;;  %v1366_v56 = vld [vmem:[#allocation2 + $0x69] sm:$0xff]  ;;  %v12918_v9 = vshra.s32 %v8737_v13, 4 }
 0x199   : > { %v2853_v33 = vsel %vm12895_vm13, %v2725_v58, 0.0  ;;  %2887 = vst.msk [vmem:[#allocation3 + $0x4a8] sm:$0xff] %vm12887_vm1, %v2855_v62  ;;  %v9055_v58 = vld [vmem:[#allocation2 + $0x67] sm:$0xff]  ;;  %vm9059_vm13 = vcmp.ge.s32.totalorder %v12900_v61, 1  ;;  %v12901_v62 = vmov 0  ;;  %vm9065_vm1 = vcmp.ge.s32.totalorder %v12904_v36, 1  ;;  %6765 = vmatmul.mubr.msk.f32.gmra.mrb[54].mxu0 %vm12911_vm14, %v3009_v63  ;;  %vm12912_vm5 = vmmov %vm12911_vm14 }
 0x19a   : > { %v12902_v62 = vsel %vm9059_vm13, 4294967295, %v12901_v62  ;;  %v12906_v2 = vsel %vm9065_vm1, 4294967295, %v12905_v2  ;;  %12910 = vst [vmem:[#allocation83_spill] sm:$0xff] %v12909_v46  ;;  %2885 = vst.msk [vmem:[#allocation3 + $0x458] sm:$0xff] %vm12912_vm5, %v2853_v33  ;;  %v12916_v47 = vld [vmem:[#allocation67_spill] sm:$0xff]  ;;  %vm9085_vm2 = vcmp.ge.s32.totalorder %v12918_v9, 1  ;;  %vm12927_vm15 = vnez %v12554_v29 }
 0x19b   : > { %12903 = vst [vmem:[#allocation27_spill] sm:$0xff] %v12902_v62  ;;  %12907 = vst [vmem:[#allocation82_spill] sm:$0xff] %v12906_v2  ;;  %v12919_v61 = vmov 0  ;;  %v12922_v63 = vshra.s32 %v8779_v49, 4  ;;  %vm12929_vm8 = vnez %v12574_v7  ;;  %v2196_v31 = vld [vmem:[#allocation2 + $0x77] sm:$0xff]  ;;  %v1369_v33 = vld [vmem:[#allocation2 + $0x81] sm:$0xff]  ;;  %vm12994_vm7 = vnez %v12703_v30 }
 0x19c   : > { %vm12913_vm0 = vmmov %vm12912_vm5  ;;  %v12920_v61 = vsel %vm9085_vm2, 4294967295, %v12919_v61  ;;  %v12931_v36 = vld [vmem:[#allocation55_spill] sm:$0xff]  ;;  %v12933_v9 = vld [vmem:[#allocation72_spill] sm:$0xff]  ;;  %vm13001_vm13 = vcmask 523264  }
 0x19d   : > { %2886 = vst.msk [vmem:[#allocation3 + $0x480] sm:$0xff] %vm12913_vm0, %v2854_v32  ;;  %12921 = vst [vmem:[#allocation84_spill] sm:$0xff] %v12920_v61  ;;  %vm9091_vm5 = vcmp.ge.s32.totalorder %v12922_v63, 1  ;;  %v12923_v32 = vmov 0  ;;  %6767 = vmatprep.mubr.msk.f32.mxu0 %vm12913_vm0, %v3014_v8  ;;  %v9111_v8 = vld [vmem:[#allocation2 + $0x68] sm:$0xff]  ;;  %v12946_v63 = vmov 0 }
 0x19e   : > { %v12924_v32 = vsel %vm9091_vm5, 4294967295, %v12923_v32  ;;  %vm12926_vm14 = vmmov %vm12913_vm0  ;;  %vm12951_vm0 = vnez %v12713_v14 }
 0x19f   : > { %12925 = vst [vmem:[#allocation85_spill] sm:$0xff] %v12924_v32  ;;  %1046 = vst.msk [vmem:[#allocation3 + $0x208] sm:$0xff] %vm12926_vm14, %v1014_v43  ;;  %v772_v43 = vand.u32 15, %v8884_v37 }
 0x1a0   : > { %vm12928_vm9 = vmand %vm12927_vm15, %vm12898_vm12  ;;  %vm12937_vm12 = vnez %v12700_v16 }
 0x1a1   : > { %v2354_v13 = vsel %vm12928_vm9, %v2194_v40, 0.0  ;;  %vm12930_vm4 = vmand %vm12822_vm11, %vm12929_vm8  ;;  %vm12941_vm11 = vnez %v12940_v25  ;;  %v3024_v25 = vld [vmem:[#allocation3 + $0x430] sm:$0xff]  ;;  %v1526_v10 = vsel %vm12937_vm12, %v1366_v56, 0.0 }
 0x1a2   : > { %v1527_v49 = vsel %vm12930_vm4, %v1367_v12, 0.0  ;;  %vm12935_vm9 = vmmov %vm12926_vm14  ;;  %vm12938_vm4 = vnez %v12703_v30  ;;  %v2357_v7 = vsel %vm12941_vm11, %v2197_v27, 0.0 }
 0x1a3   : > { %2386 = vst.msk [vmem:[#allocation3 + $0x158] sm:$0xff] %vm12935_vm9, %v2354_v13  ;;  %vm12936_vm14 = vmmov %vm12935_vm9  ;;  %vm12944_vm9 = vnez %v12679_v38  ;;  %v1016_v38 = vsel %vm12951_vm0, %v2197_v27, 0.0  ;;  %v9163_v27 = vadd.s32 240, %v7522_v39  ;;  %v2198_v39 = vld [vmem:[#allocation2 + $0x87] sm:$0xff] }
 0x1a4   : > { %1559 = vst.msk [vmem:[#allocation3 + $0x210] sm:$0xff] %vm12936_vm14, %v1527_v49  ;;  %vm12939_vm8 = vmand %vm12937_vm12, %vm12938_vm4  ;;  %v12945_v13 = vsel %vm12944_vm9, %v8566_v20, 0.0  ;;  %v1589_v49 = vld [vmem:[#allocation2 + $0x6f] sm:$0xff]  ;;  %vm9135_vm14 = vcmp.ge.s32.totalorder %v770_v53, 1  ;;  %vm12960_vm12 = vnez %v12571_v60  ;;  %vm12962_vm4 = vnez %v12604_v42  ;;  %v9229_v42 = vld [vmem:[#allocation2 + $0x9f] sm:$0xff] }
 0x1a5   : > { %v1013_v12 = vsel %vm12939_vm8, %v2194_v40, 0.0  ;;  %1247 = vrot.lane.b32.xlu1 %v12945_v13, %s7384_s16  ;;  %v12947_v63 = vsel %vm9135_vm14, 4294967295, %v12946_v63  ;;  %v3019_v40 = vld [vmem:[#allocation3 + $0x408] sm:$0xff]  ;;  %vm12949_vm8 = vcmask 523264   ;;  %v12965_v13 = vmov 0  ;;  %v9236_v60 = vld [vmem:[#allocation2 + $0xa9] sm:$0xff] }
 0x1a6   : > { %12948 = vst [vmem:[#allocation86_spill] sm:$0xff] %v12947_v63  ;;  %1045 = vst.msk [vmem:[#allocation3 + $0x1e0] sm:$0xff] %vm12949_vm8, %v1013_v12  ;;  %6768 = vmatmul.mubr.msk.f32.gmra.mrb[56].mxu0 %vm12949_vm8, %v3019_v40  ;;  %v9165_v53 = vld [vmem:[#allocation2 + $0x91] sm:$0xff]  ;;  %v9193_v40 = vld [vmem:[#allocation2 + $0x99] sm:$0xff]  ;;  %v12984_v20 = vmov 0  ;;  %vm13017_vm9 = vnez %v12619_v52 }
 0x1a7   : > { %vm12950_vm11 = vmmov %vm12949_vm8  ;;  %12957 = vst [vmem:[#allocation87_spill] sm:$0xff] %v9165_v53 }
 0x1a8   : > { %2389 = vst.msk [vmem:[#allocation3 + $0x1d0] sm:$0xff] %vm12950_vm11, %v2357_v7  ;;  %vm12955_vm11 = vnez %v12513_v3  ;;  %vm12958_vm5 = vmmov %vm12949_vm8  ;;  %v1917_v3 = vld [vmem:[#allocation2 + $0xb1] sm:$0xff] }
 0x1a9   : > { %v12956_v7 = vsel %vm12955_vm11, %v8754_v41, 0.0  ;;  %1558 = vst.msk [vmem:[#allocation3 + $0x1e8] sm:$0xff] %vm12958_vm5, %v1526_v10  ;;  %vm12959_vm14 = vmmov %vm12958_vm5  ;;  %v12964_v10 = vshra.s32 %v8710_v24, 4  ;;  %v12973_v24 = vld [vmem:[#allocation39_spill] sm:$0xff] }
 0x1aa   : > { %2582 = vrot.lane.b32.xlu0 %v12956_v7, %s7384_s16  ;;  %1048 = vst.msk [vmem:[#allocation3 + $0x258] sm:$0xff] %vm12959_vm14, %v1016_v38  ;;  %vm12961_vm11 = vmand %vm12960_vm12, %vm12838_vm6  ;;  %v1370_v38 = vld [vmem:[#allocation2 + $0x89] sm:$0xff] }
 0x1ab   : > { %v2356_v56 = vsel %vm12961_vm11, %v2196_v31, 0.0  ;;  %vm12963_vm8 = vmand %vm12951_vm0, %vm12962_vm4  ;;  %vm9188_vm14 = vcmp.ge.s32.totalorder %v12964_v10, 1  ;;  %vm12974_vm0 = vnez %v12973_v24  ;;  %v3034_v24 = vld [vmem:[#allocation3 + $0x480] sm:$0xff]  ;;  %12991 = vst [vmem:[#allocation92_spill] sm:$0xff] %v9236_v60 }
 0x1ac   : > { %v1529_v12 = vsel %vm12963_vm8, %v1369_v33, 0.0  ;;  %v12966_v13 = vsel %vm9188_vm14, 4294967295, %v12965_v13  ;;  %vm12968_vm11 = vmmov %vm12958_vm5  ;;  %v1915_v33 = vld [vmem:[#allocation2 + $0xa1] sm:$0xff]  ;;  %v2359_v10 = vsel %vm12974_vm0, %v9124_v19, 0.0  ;;  %vm12987_vm0 = vcmask 523264  }
 0x1ad   : > { %12967 = vst [vmem:[#allocation88_spill] sm:$0xff] %v12966_v13  ;;  %6770 = vmatprep.mubr.msk.f32.mxu0 %vm12968_vm11, %v3024_v25  ;;  %vm12969_vm8 = vmmov %vm12958_vm5  ;;  %v12976_v25 = vshra.s32 %v8884_v37, 4  ;;  %vm12996_vm11 = vnez %v12622_v28 }
 0x1ae   : > { %2388 = vst.msk [vmem:[#allocation3 + $0x1a8] sm:$0xff] %vm12969_vm8, %v2356_v56  ;;  %vm12970_vm4 = vmmov %vm12958_vm5  ;;  %vm12971_vm5 = vnez %v12725_v57  ;;  %v12977_v56 = vmov 0  ;;  %1760 = vrot.lane.b32.xlu0 %v1589_v49, %s7384_s16 }
 0x1af   : > { %1561 = vst.msk [vmem:[#allocation3 + $0x260] sm:$0xff] %vm12970_vm4, %v1529_v12  ;;  %vm12972_vm12 = vmand %vm12971_vm5, %vm12850_vm3  ;;  %vm9211_vm8 = vcmp.ge.s32.totalorder %v12976_v25, 1  ;;  %vm9215_vm4 = vcmp.ge.s32.totalorder %v772_v43, 1  ;;  %v12980_v12 = vmov 0  ;;  %v1528_v37 = vsel %vm12971_vm5, %v1368_v0, 0.0  ;;  %v2200_v25 = vld [vmem:[#allocation2 + $0x97] sm:$0xff] }
 0x1b0   : > { %v1015_v7 = vsel %vm12972_vm12, %v2196_v31, 0.0  ;;  %v12978_v56 = vsel %vm9211_vm8, 4294967295, %v12977_v56  ;;  %v12981_v12 = vsel %vm9215_vm4, 4294967295, %v12980_v12  ;;  %v12983_v31 = vshra.s32 %v9019_v51, 4  ;;  %vm12988_vm15 = vmmov %vm12987_vm0  ;;  %v7344_v43 = vld [vmem:[#allocation2 + $0x59] sm:$0xff]  ;;  %1560 = vst.msk [vmem:[#allocation3 + $0x238] sm:$0xff] %vm12987_vm0, %v1528_v37 }
 0x1b1   : > { %12979 = vst [vmem:[#allocation89_spill] sm:$0xff] %v12978_v56  ;;  %12982 = vst [vmem:[#allocation90_spill] sm:$0xff] %v12981_v12  ;;  %2074 = vrot.lane.b32.xlu1 %v7344_v43, %s7384_s16  ;;  %vm12993_vm5 = vnez %v12590_v35  ;;  %v9253_v43 = vld [vmem:[#allocation2 + $0xaf] sm:$0xff]  ;;  %v774_v35 = vand.u32 15, %v9163_v27 }
 0x1b2   : > { %vm9221_vm12 = vcmp.ge.s32.totalorder %v12983_v31, 1  ;;  %1047 = vst.msk [vmem:[#allocation3 + $0x230] sm:$0xff] %vm12987_vm0, %v1015_v7  ;;  %v3029_v31 = vld [vmem:[#allocation3 + $0x458] sm:$0xff]  ;;  %vm12995_vm1 = vmand %vm12993_vm5, %vm12994_vm7  ;;  %vm12998_vm0 = vnez %v12755_v23  ;;  %v12999_v37 = vld [vmem:[#allocation48_spill] sm:$0xff]  ;;  %vm13005_vm5 = vnez %v12752_v1  ;;  %vm13011_vm7 = vnez %v12914_v4 }
 0x1b3   : > { %v12985_v20 = vsel %vm9221_vm12, 4294967295, %v12984_v20  ;;  %2391 = vst.msk [vmem:[#allocation3 + $0x220] sm:$0xff] %vm12988_vm15, %v2359_v10  ;;  %vm12992_vm15 = vnez %v12748_v26  ;;  %v2358_v7 = vsel %vm12995_vm1, %v2198_v39, 0.0  ;;  %6771 = vmatmul.mubr.msk.f32.gmra.mrb[58].mxu0 %vm13001_vm13, %v3029_v31  ;;  %v1919_v26 = vld [vmem:[#allocation2 + $0xc1] sm:$0xff]  ;;  %vm13002_vm1 = vmmov %vm13001_vm13  ;;  %v1530_v49 = vsel %vm13005_vm5, %v1370_v38, 0.0 }
 0x1b4   : > { %12986 = vst [vmem:[#allocation91_spill] sm:$0xff] %v12985_v20  ;;  %v1018_v0 = vsel %vm12992_vm15, %v9124_v19, 0.0  ;;  %vm12997_vm6 = vmand %vm12992_vm15, %vm12996_vm11  ;;  %v742_v19 = vshra.s32 %v9163_v27, 4  ;;  %v9273_v31 = vld [vmem:[#allocation2 + $0xa7] sm:$0xff]  ;;  %vm13007_vm13 = vnez %v12847_v11  ;;  %v13009_v27 = vld [vmem:[#allocation53_spill] sm:$0xff]  ;;  %vm13019_vm15 = vnez %v12766_v17 }
 0x1b5   : > { %v1531_v10 = vsel %vm12997_vm6, %v9165_v53, 0.0  ;;  %1050 = vst.msk [vmem:[#allocation3 + $0x2a8] sm:$0xff] %vm13002_vm1, %v1018_v0  ;;  %vm13003_vm11 = vmmov %vm13002_vm1  ;;  %v13012_v0 = vld [vmem:[#allocation58_spill] sm:$0xff]  ;;  %v9328_v17 = vld [vmem:[#allocation2 + $0xb7] sm:$0xff] }
 0x1b6   : > { %2390 = vst.msk [vmem:[#allocation3 + $0x1f8] sm:$0xff] %vm13003_vm11, %v2358_v7  ;;  %vm13004_vm6 = vmmov %vm13002_vm1  ;;  %vm13008_vm11 = vnez %v12781_v48  ;;  %v1020_v7 = vsel %vm13019_vm15, %v9229_v42, 0.0 }
 0x1b7   : > { %1563 = vst.msk [vmem:[#allocation3 + $0x2b0] sm:$0xff] %vm13004_vm6, %v1531_v10  ;;  %vm13006_vm12 = vmand %vm13005_vm5, %vm12998_vm0  ;;  %v9304_v10 = vld [vmem:[#allocation2 + $0xbf] sm:$0xff]  ;;  %vm13076_vm6 = vnez %v12909_v46 }
 0x1b8   : > { %v1017_v28 = vsel %vm13006_vm12, %v2198_v39, 0.0  ;;  %vm13014_vm10 = vmmov %vm13002_vm1  ;;  %v3039_v39 = vld [vmem:[#allocation3 + $0x4a8] sm:$0xff]  ;;  %vm13020_vm12 = vnez %v12650_v44 }
 0x1b9   : > { %6773 = vmatprep.mubr.msk.f32.mxu0 %vm13014_vm10, %v3034_v24  ;;  %vm13015_vm5 = vmmov %vm13002_vm1 }
 0x1ba   : > { %1049 = vst.msk [vmem:[#allocation3 + $0x280] sm:$0xff] %vm13015_vm5, %v1017_v28  ;;  %vm13016_vm2 = vmmov %vm13002_vm1  ;;  %v775_v28 = vand.u32 15, %v9019_v51  ;;  %vm13022_vm5 = vnez %v12873_v18 }
 0x1bb   : > { %1562 = vst.msk [vmem:[#allocation3 + $0x288] sm:$0xff] %vm13016_vm2, %v1530_v49  ;;  %vm13018_vm1 = vmand %vm13017_vm9, %vm12850_vm3  ;;  %v13023_v49 = vld [vmem:[#allocation63_spill] sm:$0xff] }
 0x1bc   : > { %v2360_v38 = vsel %vm13018_vm1, %v2200_v25, 0.0  ;;  %vm13021_vm10 = vmand %vm13019_vm15, %vm13020_vm12 }
 0x1bd   : > { %v1533_v24 = vsel %vm13021_vm10, %v1915_v33, 0.0  ;;  %vm13025_vm3 = vmmov %vm13016_vm2  ;;  %vm13028_vm10 = vnez %v12777_v55 }
 0x1be   : > { %2392 = vst.msk [vmem:[#allocation3 + $0x248] sm:$0xff] %vm13025_vm3, %v2360_v38  ;;  %vm13026_vm0 = vmmov %vm13016_vm2  ;;  %v1532_v44 = vsel %vm13028_vm10, %v9193_v40, 0.0  ;;  %vm13030_vm2 = vnez %v12933_v9  ;;  %v1376_v38 = vld [vmem:[#allocation2 + $0xb9] sm:$0xff]  ;;  %vm13031_vm3 = vnez %v12660_v45  ;;  %v1927_v45 = vld [vmem:[#allocation2 + $0x101] sm:$0xff] }
 0x1bf   : > { %1052 = vst.msk [vmem:[#allocation3 + $0x2f8] sm:$0xff] %vm13026_vm0, %v1020_v7  ;;  %vm13027_vm12 = vmmov %vm13026_vm0  ;;  %v1022_v53 = vsel %vm13030_vm2, %v9253_v43, 0.0  ;;  %v9330_v7 = vld [vmem:[#allocation2 + $0xcf] sm:$0xff]  ;;  %v9378_v9 = vld [vmem:[#allocation2 + $0xd7] sm:$0xff] }
 0x1c0   : > { %1565 = vst.msk [vmem:[#allocation3 + $0x300] sm:$0xff] %vm13027_vm12, %v1533_v24  ;;  %vm13029_vm15 = vmand %vm13028_vm10, %vm13008_vm11  ;;  %v13032_v24 = vsel %vm13031_vm3, %v8754_v41, 0.0  ;;  %vm13038_vm10 = vnez %v12931_v36  ;;  %vm13040_vm3 = vnez %v12916_v47  ;;  %v1381_v36 = vld [vmem:[#allocation2 + $0xe1] sm:$0xff]  ;;  %v1383_v47 = vld [vmem:[#allocation2 + $0xf1] sm:$0xff] }
 0x1c1   : > { %v1019_v33 = vsel %vm13029_vm15, %v2200_v25, 0.0  ;;  %1245 = vrot.lane.b32.xlu1 %v13032_v24, %s7384_s16  ;;  %vm9337_vm15 = vcmp.lt.s32.totalorder %v775_v28, 15  ;;  %v13033_v25 = vmov 0  ;;  %vm13036_vm12 = vmmov %vm13026_vm0  ;;  %v1379_v28 = vld [vmem:[#allocation2 + $0xd1] sm:$0xff]  ;;  %v9355_v24 = vld [vmem:[#allocation2 + $0xc7] sm:$0xff] }
 0x1c2   : > { %v13034_v25 = vsel %vm9337_vm15, 4294967295, %v13033_v25  ;;  %1051 = vst.msk [vmem:[#allocation3 + $0x2d0] sm:$0xff] %vm13026_vm0, %v1019_v33  ;;  %vm13037_vm9 = vmmov %vm13026_vm0  ;;  %v1378_v33 = vld [vmem:[#allocation2 + $0xc9] sm:$0xff]  ;;  %vm9362_vm0 = vcmp.ge.s32.totalorder %v742_v19, 1  ;;  %6774 = vmatmul.mubr.msk.f32.gmra.mrb[60].mxu0 %vm13036_vm12, %v3039_v39  ;;  %vm13088_vm15 = vnez %v12947_v63 }
 0x1c3   : > { %13035 = vst [vmem:[#allocation48_spill] sm:$0xff] %v13034_v25  ;;  %1564 = vst.msk [vmem:[#allocation3 + $0x2d8] sm:$0xff] %vm13036_vm12, %v1532_v44 }
 0x1c4   : > { %1054 = vst.msk [vmem:[#allocation3 + $0x348] sm:$0xff] %vm13037_vm9, %v1022_v53  ;;  %vm13039_vm1 = vmand %vm13030_vm2, %vm13038_vm10  ;;  %vm13042_vm9 = vnez %v12560_v5  ;;  %v13044_v53 = vmov 0  ;;  %v1534_v5 = vsel %vm13040_vm3, %v9236_v60, 0.0  ;;  %v9393_v60 = vld [vmem:[#allocation2 + $0xef] sm:$0xff] }
 0x1c5   : > { %v1535_v40 = vsel %vm13039_vm1, %v1917_v3, 0.0  ;;  %vm13041_vm11 = vmand %vm13040_vm3, %vm13011_vm7  ;;  %v13043_v44 = vsel %vm13042_vm9, %v8781_v21, 0.0  ;;  %v13045_v53 = vsel %vm9362_vm0, 4294967295, %v13044_v53  ;;  %vm9366_vm1 = vcmp.ge.s32.totalorder %v774_v35, 1 }
 0x1c6   : > { %v1021_v41 = vsel %vm13041_vm11, %v9273_v31, 0.0  ;;  %2588 = vrot.lane.b32.xlu0 %v13043_v44, %s7384_s16  ;;  %13046 = vst [vmem:[#allocation53_spill] sm:$0xff] %v13045_v53  ;;  %v13047_v3 = vmov 0  ;;  %vm13050_vm11 = vmmov %vm13036_vm12  ;;  %v9376_v44 = vld [vmem:[#allocation2 + $0xdf] sm:$0xff]  ;;  %vm9380_vm9 = vcmp.lt.s32.totalorder %v742_v19, 15  ;;  %v13052_v35 = vmov 0 }
 0x1c7   : > { %v13048_v3 = vsel %vm9366_vm1, 4294967295, %v13047_v3  ;;  %1567 = vst.msk [vmem:[#allocation3 + $0x350] sm:$0xff] %vm13050_vm11, %v1535_v40  ;;  %vm13051_vm10 = vmmov %vm13050_vm11  ;;  %v13053_v35 = vsel %vm9380_vm9, 4294967295, %v13052_v35  ;;  %vm13056_vm12 = vnez %v12862_v59 }
 0x1c8   : > { %13049 = vst [vmem:[#allocation93_spill] sm:$0xff] %v13048_v3  ;;  %1053 = vst.msk [vmem:[#allocation3 + $0x320] sm:$0xff] %vm13051_vm10, %v1021_v41  ;;  %v1024_v39 = vsel %vm13056_vm12, %v9304_v10, 0.0  ;;  %v1380_v41 = vld [vmem:[#allocation2 + $0xd9] sm:$0xff] }
 0x1c9   : > { %13054 = vst [vmem:[#allocation94_spill] sm:$0xff] %v13053_v35  ;;  %vm13055_vm2 = vmmov %vm13051_vm10  ;;  %vm13057_vm10 = vnez %v12739_v15  ;;  %v1382_v15 = vld [vmem:[#allocation2 + $0xe9] sm:$0xff] }
 0x1ca   : > { %1566 = vst.msk [vmem:[#allocation3 + $0x328] sm:$0xff] %vm13055_vm2, %v1534_v5  ;;  %vm13058_vm11 = vmand %vm13056_vm12, %vm13057_vm10  ;;  %vm13071_vm12 = vcmask 523264  }
 0x1cb   : > { %v1537_v40 = vsel %vm13058_vm11, %v1919_v26, 0.0  ;;  %vm13059_vm3 = vmmov %vm13055_vm2  ;;  %vm13063_vm11 = vnez %v12902_v62 }
 0x1cc   : > { %1056 = vst.msk [vmem:[#allocation3 + $0x398] sm:$0xff] %vm13059_vm3, %v1024_v39  ;;  %vm13060_vm7 = vmmov %vm13055_vm2  ;;  %vm13061_vm2 = vnez %v12866_v50  ;;  %v1026_v26 = vsel %vm13063_vm11, %v9330_v7, 0.0  ;;  %vm13064_vm3 = vnez %v12796_v6  ;;  %v13069_v50 = vld [vmem:[#allocation30_spill] sm:$0xff] }
 0x1cd   : > { %1569 = vst.msk [vmem:[#allocation3 + $0x3a0] sm:$0xff] %vm13060_vm7, %v1537_v40  ;;  %vm13062_vm9 = vmand %vm13061_vm2, %vm13022_vm5  ;;  %v1536_v19 = vsel %vm13061_vm2, %v1376_v38, 0.0  ;;  %v9413_v40 = vld [vmem:[#allocation2 + $0xe7] sm:$0xff]  ;;  %vm13066_vm7 = vnez %v12985_v20  ;;  %v13067_v38 = vld [vmem:[#allocation24_spill] sm:$0xff] }
 0x1ce   : > { %v1023_v5 = vsel %vm13062_vm9, %v9328_v17, 0.0  ;;  %vm13065_vm10 = vmand %vm13063_vm11, %vm13064_vm3  ;;  %vm13068_vm2 = vnez %v13067_v38  ;;  %vm13075_vm11 = vnez %v12906_v2 }
 0x1cf   : > { %v1539_v39 = vsel %vm13065_vm10, %v1379_v28, 0.0  ;;  %v13070_v59 = vsel %vm13068_vm2, %v13069_v50, 0.0  ;;  %1055 = vst.msk [vmem:[#allocation3 + $0x370] sm:$0xff] %vm13071_vm12, %v1023_v5  ;;  %vm13072_vm5 = vmmov %vm13071_vm12  ;;  %v1538_v38 = vsel %vm13075_vm11, %v1378_v33, 0.0  ;;  %vm13078_vm2 = vnez %v12920_v61  ;;  %v9444_v5 = vld [vmem:[#allocation2 + $0xff] sm:$0xff] }
 0x1d0   : > { %2072 = vrot.lane.b32.xlu1 %v13070_v59, %s7384_s16  ;;  %1568 = vst.msk [vmem:[#allocation3 + $0x378] sm:$0xff] %vm13072_vm5, %v1536_v19  ;;  %vm13073_vm3 = vmmov %vm13072_vm5  ;;  %v1028_v59 = vsel %vm13078_vm2, %v9376_v44, 0.0  ;;  %vm13079_vm5 = vnez %v12856_v22  ;;  %v839_v19 = vld [vmem:[#allocation2 + $0xf7] sm:$0xff] }
 0x1d1   : > { %1058 = vst.msk [vmem:[#allocation3 + $0x3e8] sm:$0xff] %vm13073_vm3, %v1026_v26  ;;  %vm13074_vm10 = vmmov %vm13073_vm3 }
 0x1d2   : > { %1571 = vst.msk [vmem:[#allocation3 + $0x3f0] sm:$0xff] %vm13074_vm10, %v1539_v39  ;;  %vm13077_vm9 = vmand %vm13075_vm11, %vm13076_vm6 }
 0x1d3   : > { %v1025_v28 = vsel %vm13077_vm9, %v9355_v24, 0.0  ;;  %vm13080_vm12 = vmand %vm13078_vm2, %vm13079_vm5  ;;  %vm13081_vm9 = vnez %v12664_v54  ;;  %vm13087_vm2 = vnez %v12924_v32 }
 0x1d4   : > { %v1541_v50 = vsel %vm13080_vm12, %v1381_v36, 0.0  ;;  %v13082_v33 = vsel %vm13081_vm9, %v9055_v58, 0.0  ;;  %vm13083_vm10 = vmmov %vm13073_vm3  ;;  %v1540_v26 = vsel %vm13087_vm2, %v1380_v41, 0.0  ;;  %v1030_v58 = vsel %vm9188_vm14, %v9393_v60, 0.0 }
 0x1d5   : > { %1758 = vrot.lane.b32.xlu0 %v13082_v33, %s7384_s16  ;;  %1057 = vst.msk [vmem:[#allocation3 + $0x3c0] sm:$0xff] %vm13083_vm10, %v1025_v28  ;;  %vm13084_vm11 = vmmov %vm13073_vm3  ;;  %v13091_v28 = vld [vmem:[#allocation71_spill] sm:$0xff]  ;;  %v1542_v41 = vsel %vm9211_vm8, %v1382_v15, 0.0 }
 0x1d6   : > { %1570 = vst.msk [vmem:[#allocation3 + $0x3c8] sm:$0xff] %vm13084_vm11, %v1538_v38  ;;  %vm13085_vm5 = vmmov %vm13073_vm3  ;;  %v1384_v38 = vld [vmem:[#allocation2 + $0xf9] sm:$0xff]  ;;  %v13100_v33 = vld [vmem:[#allocation75_spill] sm:$0xff] }
 0x1d7   : > { %1060 = vst.msk [vmem:[#allocation3 + $0x438] sm:$0xff] %vm13085_vm5, %v1028_v59  ;;  %vm13086_vm12 = vmmov %vm13073_vm3  ;;  %vm13092_vm5 = vnez %v13091_v28  ;;  %v1032_v59 = vsel %vm13066_vm7, %v9444_v5, 0.0 }
 0x1d8   : > { %1573 = vst.msk [vmem:[#allocation3 + $0x440] sm:$0xff] %vm13086_vm12, %v1541_v50  ;;  %vm13089_vm3 = vmand %vm13087_vm2, %vm13088_vm15 }
 0x1d9   : > { %v1027_v36 = vsel %vm13089_vm3, %v9378_v9, 0.0  ;;  %vm13090_vm11 = vmand %vm9188_vm14, %vm13007_vm13 }
 0x1da   : > { %v1543_v39 = vsel %vm13090_vm11, %v1383_v47, 0.0  ;;  %vm13093_vm3 = vmmov %vm13083_vm10 }
 0x1db   : > { %1059 = vst.msk [vmem:[#allocation3 + $0x410] sm:$0xff] %vm13093_vm3, %v1027_v36  ;;  %vm13094_vm12 = vmmov %vm13093_vm3  ;;  %v13106_v36 = vld [vmem:[#allocation42_spill] sm:$0xff] }
 0x1dc   : > { %1572 = vst.msk [vmem:[#allocation3 + $0x418] sm:$0xff] %vm13094_vm12, %v1540_v26  ;;  %vm13095_vm9 = vmmov %vm13093_vm3 }
 0x1dd   : > { %1062 = vst.msk [vmem:[#allocation3 + $0x488] sm:$0xff] %vm13095_vm9, %v1030_v58  ;;  %vm13096_vm2 = vmmov %vm13093_vm3  ;;  %vm13098_vm9 = vnez %v13034_v25 }
 0x1de   : > { %1575 = vst.msk [vmem:[#allocation3 + $0x490] sm:$0xff] %vm13096_vm2, %v1543_v39  ;;  %vm13097_vm11 = vmand %vm9211_vm8, %vm9215_vm4  ;;  %vm13101_vm2 = vnez %v13100_v33  ;;  %v2215_v39 = vld [vmem:[#allocation2 + $0x10f] sm:$0xff] }
 0x1df   : > { %v1029_v47 = vsel %vm13097_vm11, %v9413_v40, 0.0  ;;  %vm13099_vm3 = vmand %vm13066_vm7, %vm13098_vm9 }
 0x1e0   : > { %v1545_v50 = vsel %vm13099_vm3, %v1927_v45, 0.0  ;;  %1061 = vst.msk [vmem:[#allocation3 + $0x460] sm:$0xff] %vm13083_vm10, %v1029_v47  ;;  %vm13102_vm11 = vmmov %vm13083_vm10  ;;  %v1544_v45 = vsel %vm9362_vm0, %v1384_v38, 0.0  ;;  %vm13107_vm3 = vnez %v13106_v36  ;;  %v13111_v47 = vld [vmem:[#allocation81_spill] sm:$0xff] }
 0x1e1   : > { %1574 = vst.msk [vmem:[#allocation3 + $0x468] sm:$0xff] %vm13102_vm11, %v1542_v41  ;;  %vm13103_vm13 = vmmov %vm13083_vm10  ;;  %v2361_v26 = vsel %vm13107_vm3, %v9229_v42, 0.0  ;;  %v13113_v41 = vld [vmem:[#allocation57_spill] sm:$0xff]  ;;  %vm13116_vm3 = vcmask 523264   ;;  %v13120_v42 = vld [vmem:[#allocation47_spill] sm:$0xff] }
 0x1e2   : > { %1064 = vst.msk [vmem:[#allocation3 + $0x4d8] sm:$0xff] %vm13103_vm13, %v1032_v59  ;;  %vm13104_vm8 = vmmov %vm13083_vm10  ;;  %vm13108_vm10 = vnez %v12999_v37  ;;  %vm13109_vm13 = vnez %v12755_v23  ;;  %vm13114_vm12 = vnez %v13113_v41  ;;  %v13125_v59 = vld [vmem:[#allocation52_spill] sm:$0xff] }
 0x1e3   : > { %1577 = vst.msk [vmem:[#allocation3 + $0x4e0] sm:$0xff] %vm13104_vm8, %v1545_v50  ;;  %vm13105_vm14 = vmand %vm9362_vm0, %vm9366_vm1  ;;  %vm13112_vm8 = vnez %v13111_v47  ;;  %v13115_v38 = vsel %vm13114_vm12, %v8781_v21, 0.0  ;;  %vm13130_vm12 = vnez %v13053_v35 }
 0x1e4   : > { %v1031_v15 = vsel %vm13105_vm14, %v839_v19, 0.0  ;;  %vm13110_vm11 = vmand %vm13108_vm10, %vm13109_vm13  ;;  %1251 = vrot.lane.b32.xlu1 %v13115_v38, %s7384_s16  ;;  %vm13122_vm14 = vnez %v13009_v27  ;;  %vm13123_vm13 = vnez %v12781_v48 }
 0x1e5   : > { %v2362_v58 = vsel %vm13110_vm11, %v9273_v31, 0.0  ;;  %1063 = vst.msk [vmem:[#allocation3 + $0x4b0] sm:$0xff] %vm13116_vm3, %v1031_v15  ;;  %vm13117_vm0 = vmmov %vm13116_vm3  ;;  %vm13121_vm11 = vnez %v13120_v42  ;;  %vm13126_vm3 = vnez %v13125_v59 }
 0x1e6   : > { %1576 = vst.msk [vmem:[#allocation3 + $0x4b8] sm:$0xff] %vm13117_vm0, %v1544_v45  ;;  %vm13118_vm7 = vmmov %vm13117_vm0  ;;  %v2363_v31 = vsel %vm13121_vm11, %v9253_v43, 0.0  ;;  %v2365_v50 = vsel %vm13126_vm3, %v9304_v10, 0.0  ;;  %v2216_v45 = vld [vmem:[#allocation2 + $0x117] sm:$0xff]  ;;  %v2214_v43 = vld [vmem:[#allocation2 + $0x107] sm:$0xff]  ;;  %vm13133_vm3 = vcmask 523264   ;;  %vm13139_vm11 = vnez %v13023_v49 }
 0x1e7   : > { %2393 = vst.msk [vmem:[#allocation3 + $0x270] sm:$0xff] %vm13118_vm7, %v2361_v26  ;;  %vm13119_vm10 = vmmov %vm13117_vm0  ;;  %vm13127_vm0 = vnez %v13012_v0  ;;  %vm13128_vm7 = vnez %v12914_v4  ;;  %v13137_v10 = vld [vmem:[#allocation56_spill] sm:$0xff] }
 0x1e8   : > { %2394 = vst.msk [vmem:[#allocation3 + $0x298] sm:$0xff] %vm13119_vm10, %v2362_v58  ;;  %vm13124_vm9 = vmand %vm13122_vm14, %vm13123_vm13  ;;  %v13142_v58 = vld [vmem:[#allocation60_spill] sm:$0xff] }
 0x1e9   : > { %v2364_v21 = vsel %vm13124_vm9, %v9328_v17, 0.0  ;;  %vm13129_vm10 = vmand %vm13127_vm0, %vm13128_vm7  ;;  %vm13131_vm9 = vnez %v12554_v29  ;;  %2395 = vst.msk [vmem:[#allocation3 + $0x2c0] sm:$0xff] %vm13133_vm3, %v2363_v31  ;;  %vm13138_vm0 = vnez %v13137_v10  ;;  %vm13140_vm7 = vnez %v12873_v18  ;;  %v1591_v31 = vld [vmem:[#allocation2 + $0x7f] sm:$0xff] }
 0x1ea   : > { %v2366_v15 = vsel %vm13129_vm10, %v9355_v24, 0.0  ;;  %v13132_v17 = vsel %vm13131_vm9, %v9111_v8, 0.0  ;;  %vm13134_vm14 = vmmov %vm13133_vm3  ;;  %v2367_v24 = vsel %vm13138_vm0, %v9330_v7, 0.0 }
 0x1eb   : > { %2586 = vrot.lane.b32.xlu0 %v13132_v17, %s7384_s16  ;;  %2396 = vst.msk [vmem:[#allocation3 + $0x2e8] sm:$0xff] %vm13134_vm14, %v2364_v21  ;;  %vm13135_vm13 = vmmov %vm13133_vm3  ;;  %v7345_v17 = vld [vmem:[#allocation2 + $0x69] sm:$0xff] }
 0x1ec   : > { %2397 = vst.msk [vmem:[#allocation3 + $0x310] sm:$0xff] %vm13135_vm13, %v2365_v50  ;;  %vm13136_vm10 = vmmov %vm13133_vm3  ;;  %vm13143_vm3 = vnez %v13142_v58  ;;  %v13150_v50 = vld [vmem:[#allocation74_spill] sm:$0xff]  ;;  %2078 = vrot.lane.b32.xlu1 %v7345_v17, %s7384_s16  ;;  %v2423_v17 = vld [vmem:[#allocation2 + $0x90] sm:$0xff] }
 0x1ed   : > { %2398 = vst.msk [vmem:[#allocation3 + $0x338] sm:$0xff] %vm13136_vm10, %v2366_v15  ;;  %vm13141_vm4 = vmand %vm13139_vm11, %vm13140_vm7  ;;  %v2369_v38 = vsel %vm13143_vm3, %v9376_v44, 0.0 }
 0x1ee   : > { %v2368_v26 = vsel %vm13141_vm4, %v9378_v9, 0.0  ;;  %vm13144_vm14 = vmmov %vm13136_vm10  ;;  %2401 = vst.msk [vmem:[#allocation3 + $0x3b0] sm:$0xff] %vm13136_vm10, %v2369_v38  ;;  %v13147_v9 = vld [vmem:[#allocation70_spill] sm:$0xff] }
 0x1ef   : > { %2399 = vst.msk [vmem:[#allocation3 + $0x360] sm:$0xff] %vm13144_vm14, %v2367_v24  ;;  %vm13145_vm13 = vmmov %vm13136_vm10  ;;  %vm13148_vm4 = vnez %v13147_v9  ;;  %1764 = vrot.lane.b32.xlu0 %v1591_v31, %s7384_s16  ;;  %v13163_v24 = vld [vmem:[#allocation37_spill] sm:$0xff]  ;;  %v7346_v38 = vld [vmem:[#allocation2 + $0x61] sm:$0xff] }
 0x1f0   : > { %2400 = vst.msk [vmem:[#allocation3 + $0x388] sm:$0xff] %vm13145_vm13, %v2368_v26  ;;  %vm13146_vm9 = vmand %vm13092_vm5, %vm13076_vm6  ;;  %v2371_v21 = vsel %vm13148_vm4, %v9393_v60, 0.0  ;;  %vm13151_vm13 = vnez %v13150_v50  ;;  %v1590_v26 = vld [vmem:[#allocation2 + $0x77] sm:$0xff] }
 0x1f1   : > { %v2370_v7 = vsel %vm13146_vm9, %v9413_v40, 0.0  ;;  %vm13149_vm14 = vmand %vm13101_vm2, %vm13088_vm15  ;;  %v2373_v15 = vsel %vm13151_vm13, %v9444_v5, 0.0  ;;  %v13155_v40 = vld [vmem:[#allocation73_spill] sm:$0xff]  ;;  %vm13158_vm13 = vnez %v12981_v12 }
 0x1f2   : > { %v2372_v44 = vsel %vm13149_vm14, %v839_v19, 0.0  ;;  %2402 = vst.msk [vmem:[#allocation3 + $0x3d8] sm:$0xff] %vm13136_vm10, %v2370_v7  ;;  %vm13152_vm3 = vmmov %vm13136_vm10  ;;  %vm13156_vm4 = vnez %v13155_v40  ;;  %v13165_v7 = vld [vmem:[#allocation28_spill] sm:$0xff] }
 0x1f3   : > { %2403 = vst.msk [vmem:[#allocation3 + $0x400] sm:$0xff] %vm13152_vm3, %v2371_v21  ;;  %vm13153_vm5 = vmmov %vm13152_vm3  ;;  %v2375_v60 = vsel %vm13156_vm4, %v2215_v39, 0.0  ;;  %v2421_v39 = vld [vmem:[#allocation2 + $0x80] sm:$0xff] }
 0x1f4   : > { %2404 = vst.msk [vmem:[#allocation3 + $0x428] sm:$0xff] %vm13153_vm5, %v2372_v44  ;;  %vm13154_vm9 = vmmov %vm13152_vm3 }
 0x1f5   : > { %2405 = vst.msk [vmem:[#allocation3 + $0x450] sm:$0xff] %vm13154_vm9, %v2373_v15  ;;  %vm13157_vm14 = vmand %vm13130_vm12, %vm9366_vm1  ;;  %v13169_v15 = vld [vmem:[#allocation35_spill] sm:$0xff] }
 0x1f6   : > { %v2376_v19 = vsel %vm13157_vm14, %v2216_v45, 0.0  ;;  %vm13159_vm10 = vmand %vm13112_vm8, %vm13158_vm13  ;;  %vm13162_vm14 = vnez %v12700_v16  ;;  %vm13192_vm8 = vcmask 523264  }
 0x1f7   : > { %v2374_v5 = vsel %vm13159_vm10, %v2214_v43, 0.0  ;;  %vm13160_vm5 = vmmov %vm13152_vm3  ;;  %2408 = vst.msk [vmem:[#allocation3 + $0x4c8] sm:$0xff] %vm13152_vm3, %v2376_v19  ;;  %v1173_v45 = vsel %vm13162_vm14, %v9111_v8, 0.0  ;;  %vm13164_vm10 = vnez %v13163_v24  ;;  %v2420_v8 = vld [vmem:[#allocation2 + $0x78] sm:$0xff]  ;;  %v1593_v19 = vld [vmem:[#allocation2 + $0x8f] sm:$0xff] }
 0x1f8   : > { %2407 = vst.msk [vmem:[#allocation3 + $0x4a0] sm:$0xff] %vm13160_vm5, %v2375_v60  ;;  %vm13161_vm9 = vmmov %vm13152_vm3  ;;  %1249 = vrot.lane.b32.xlu1 %v1173_v45, %s7384_s16  ;;  %v2517_v43 = vsel %vm13164_vm10, %v2421_v39, 0.0  ;;  %vm13166_vm5 = vnez %v13165_v7  ;;  %vm13167_vm3 = vnez %v12703_v30  ;;  %vm13170_vm10 = vnez %v13169_v15  ;;  %v7350_v24 = vld [vmem:[#allocation2 + $0x81] sm:$0xff] }
 0x1f9   : > { %2406 = vst.msk [vmem:[#allocation3 + $0x478] sm:$0xff] %vm13161_vm9, %v2374_v5  ;;  %2592 = vrot.lane.b32.xlu0 %v2517_v43, %s7384_s16  ;;  %v2003_v21 = vsel %vm13166_vm5, %v7346_v38, 0.0  ;;  %v1686_v31 = vsel %vm13167_vm3, %v1590_v26, 0.0  ;;  %vm13168_vm9 = vnez %v12713_v14  ;;  %v2516_v60 = vsel %vm13170_vm10, %v2420_v8, 0.0  ;;  %v7347_v5 = vld [vmem:[#allocation2 + $0x79] sm:$0xff]  ;;  %v1592_v26 = vld [vmem:[#allocation2 + $0x87] sm:$0xff] }
 0x1fa   : > { %v1176_v44 = vsel %vm13168_vm9, %v2421_v39, 0.0  ;;  %vm13171_vm5 = vnez %v12725_v57  ;;  %v13172_v39 = vld [vmem:[#allocation39_spill] sm:$0xff]  ;;  %v7348_v38 = vld [vmem:[#allocation2 + $0x71] sm:$0xff]  ;;  %vm13176_vm3 = vnez %v12728_v34 }
 0x1fb   : > { %v1175_v45 = vsel %vm13171_vm5, %v2420_v8, 0.0  ;;  %vm13173_vm9 = vnez %v13172_v39  ;;  %v2422_v8 = vld [vmem:[#allocation2 + $0x88] sm:$0xff]  ;;  %v1741_v39 = vpop.permute.xlu1 %1740 }
 0x1fc   : > { %2076 = vrot.lane.b32.xlu1 %v2003_v21, %s7384_s16  ;;  %v2519_v43 = vsel %vm13173_vm9, %v2423_v17, 0.0  ;;  %v13174_v21 = vld [vmem:[#allocation33_spill] sm:$0xff] }
 0x1fd   : > { %1762 = vrot.lane.b32.xlu0 %v1686_v31, %s7384_s16  ;;  %vm13175_vm10 = vnez %v13174_v21 }
 0x1fe   : > { %v2005_v31 = vsel %vm13175_vm10, %v7348_v38, 0.0  ;;  %v5469_v38 = vld [vmem:[#allocation4 + $0x119] sm:$0xff]  ;;  %vm13181_vm10 = vcmask 1048064  }
 0x1ff   : > { %1835 = vst.msk [vmem:[#allocation3 + $0x30] sm:$0xff] %vm13181_vm10, %v1741_v39  ;;  %v1594_v39 = vld [vmem:[#allocation2 + $0x97] sm:$0xff] }
 0x200   : > { %1255 = vrot.lane.b32.xlu1 %v1176_v44, %s7384_s16  ;;  %v1688_v44 = vsel %vm13176_vm3, %v1592_v26, 0.0  ;;  %vm13183_vm3 = vcmask 261120  }
 0x201   : > { %2590 = vrot.lane.b32.xlu0 %v2516_v60, %s7384_s16  ;;  %v13177_v60 = vld [vmem:[#allocation61_spill] sm:$0xff] }
 0x202   : > { %vm13178_vm5 = vnez %v13177_v60 }
 0x204   : > { %2082 = vrot.lane.b32.xlu1 %v7347_v5, %s7384_s16  ;;  %v13179_v5 = vld [vmem:[#allocation38_spill] sm:$0xff] }
 0x205   : > { %1768 = vrot.lane.b32.xlu0 %v1593_v19, %s7384_s16  ;;  %v1178_v19 = vsel %vm13178_vm5, %v2423_v17, 0.0  ;;  %vm13180_vm9 = vnez %v13179_v5  ;;  %v1739_v17 = vpop.permute.xlu0 %1738  ;;  %vm13182_vm5 = vcmask 523264   ;;  %v13186_v5 = vmov 0 }
 0x208   : > { %1253 = vrot.lane.b32.xlu1 %v1175_v45, %s7384_s16  ;;  %v2518_v45 = vsel %vm13180_vm9, %v2422_v8, 0.0  ;;  %vm13184_vm9 = vmmov %vm13181_vm10  ;;  %vm13189_vm10 = vnez %v13034_v25 }
 0x209   : > { %2596 = vrot.lane.b32.xlu0 %v2519_v43, %s7384_s16  ;;  %v2728_v43 = vld [vmem:[#allocation2 + $0x119] sm:$0xff]  ;;  %1834 = vst.msk [vmem:[#allocation3 + $0x8] sm:$0xff] %vm13184_vm9, %v1739_v17 }
 0x20a   : > { %v2856_v26 = vsel %vm13130_vm12, %v2728_v43, 0.0  ;;  %v2729_v43 = vld [vmem:[#allocation2 + $0x121] sm:$0xff] }
 0x20b   : > { %2888 = vst.msk [vmem:[#allocation3 + $0x4d0] sm:$0xff] %vm13182_vm5, %v2856_v26  ;;  %v1232_v26 = vpop.permute.xlu1 %1231 }
 0x20c   : > { %2080 = vrot.lane.b32.xlu1 %v2005_v31, %s7384_s16  ;;  %v1595_v31 = vld [vmem:[#allocation2 + $0x9f] sm:$0xff] }
 0x20d   : > { %1766 = vrot.lane.b32.xlu0 %v1688_v44, %s7384_s16  ;;  %v5501_v44 = vsel %vm13130_vm12, %v5469_v38, 0.0  ;;  %v5470_v38 = vld [vmem:[#allocation4 + $0x121] sm:$0xff] }
 0x20e   : > { %5533 = vst.msk [vmem:[#allocation5 + $0x2e0] sm:$0xff] %vm13183_vm3, %v5501_v44  ;;  %vm13190_vm3 = vmmov %vm13184_vm9  ;;  %vm13191_vm9 = vnez %v12752_v1 }
 0x20f   : > { %1325 = vst.msk [vmem:[#allocation3 + $0x78] sm:$0xff] %vm13190_vm3, %v1232_v26  ;;  %vm13194_vm12 = vmmov %vm13190_vm3 }
 0x210   : > { %1259 = vrot.lane.b32.xlu1 %v1178_v19, %s7384_s16  ;;  %v7349_v19 = vld [vmem:[#allocation2 + $0x89] sm:$0xff]  ;;  %v2891_v21 = vld [vmem:[#allocation3 + $0x8] sm:$0xff] }
 0x211   : > { %2594 = vrot.lane.b32.xlu0 %v2518_v45, %s7384_s16  ;;  %v13185_v45 = vshra.s32 %v9019_v51, 4  ;;  %v1745_v51 = vpop.permute.xlu0 %1744  ;;  %3289 = vmatprep.mubr.f32.mxu1 %v2891_v21 }
 0x212   : > { %1837 = vst.msk [vmem:[#allocation3 + $0x80] sm:$0xff] %vm13194_vm12, %v1745_v51  ;;  %v3084_v51 = vld [vmem:[%s12009_s3 + $0x110] sm:$0xff]  ;;  %vm13198_vm12 = vmmov %vm13190_vm3 }
 0x213   : > { %vm9670_vm14 = vcmp.lt.s32.totalorder %v13185_v45, 15  ;;  %v3082_v45 = vld [vmem:[%s12009_s3 + $0x100] sm:$0xff] }
 0x214   : > { %2086 = vrot.lane.b32.xlu1 %v7349_v19, %s7384_s16  ;;  %v13187_v5 = vsel %vm9670_vm14, 4294967295, %v13186_v5  ;;  %vm2761_vm5 = vmand %vm9670_vm14, %vm13189_vm10  ;;  %v1177_v19 = vsel %vm13191_vm9, %v2422_v8, 0.0  ;;  %vm13193_vm10 = vcmask 261120   ;;  %v2424_v8 = vld [vmem:[#allocation2 + $0x98] sm:$0xff] }
 0x215   : > { %13188 = vst [vmem:[#allocation30_spill] sm:$0xff] %v13187_v5  ;;  %1772 = vrot.lane.b32.xlu0 %v1595_v31, %s7384_s16  ;;  %v2857_v44 = vsel %vm2761_vm5, %v2729_v43, 0.0  ;;  %v5502_v17 = vsel %vm2761_vm5, %v5470_v38, 0.0  ;;  %v3083_v31 = vld [vmem:[%s12009_s3 + $0x108] sm:$0xff]  ;;  %vm13195_vm5 = vnez %v12755_v23  ;;  %v2059_v38 = vpop.permute.xlu1 %2058  ;;  %v2573_v60 = vpop.permute.xlu0 %2572 }
 0x216   : > { %2889 = vst.msk [vmem:[#allocation3 + $0x4f8] sm:$0xff] %vm13192_vm8, %v2857_v44  ;;  %v1690_v43 = vsel %vm13195_vm5, %v1594_v39, 0.0  ;;  %v6892_v26 = vpack.c.bf16 %v3083_v31, %v3082_v45  ;;  %v13196_v44 = vld [vmem:[#allocation36_spill] sm:$0xff]  ;;  %v3085_v39 = vld [vmem:[%s12009_s3 + $0x118] sm:$0xff]  ;;  %v9708_v31 = vld [vmem:[#allocation2 + $0xa0] sm:$0xff]  ;;  %vm13417_vm5 = vcmask 261120  }
 0x217   : > { %5534 = vst.msk [vmem:[#allocation5 + $0x2f8] sm:$0xff] %vm13193_vm10, %v5502_v17  ;;  %vm13197_vm8 = vnez %v13196_v44  ;;  %vm13199_vm10 = vnez %v12619_v52  ;;  %v2890_v45 = vld [vmem:[#allocation3] sm:$0xff]  ;;  %v6895_v44 = vpack.c.bf16 %v3085_v39, %v3084_v51  ;;  %v13202_v52 = vmov 0.0|0.0   ;;  %v1596_v51 = vld [vmem:[#allocation2 + $0xa7] sm:$0xff]  ;;  %vm13418_vm9 = vmmov %vm13417_vm5 }
 0x218   : > { %1257 = vrot.lane.b32.xlu1 %v1177_v19, %s7384_s16  ;;  %2154 = vst.msk [vmem:[#allocation3 + $0x10] sm:$0xff] %vm13190_vm3, %v2059_v38  ;;  %v2007_v17 = vsel %vm13197_vm8, %v7350_v24, 0.0  ;;  %v2520_v19 = vsel %vm13199_vm10, %v2424_v8, 0.0  ;;  %3290 = vmatmul.mubr.f32.vlgmr.msra.gmra.mrb[0].mxu1 %v2890_v45  ;;  %v2896_v24 = vld [vmem:[#allocation3 + $0x30] sm:$0xff]  ;;  %v1597_v38 = vld [vmem:[#allocation2 + $0xaf] sm:$0xff]  ;;  %vm13203_vm10 = vmmov %vm13190_vm3 }
 0x219   : > { %1770 = vrot.lane.b32.xlu0 %v1690_v43, %s7384_s16  ;;  %2667 = vst.msk [vmem:[#allocation3 + $0x40] sm:$0xff] %vm13198_vm12, %v2573_v60  ;;  %3294 = vmatprep.mubr.f32.mxu1 %v2896_v24  ;;  %v1230_v43 = vpop.permute.xlu1 %1229  ;;  %v1743_v21 = vpop.permute.xlu0 %1742  ;;  %v13200_v60 = vld [vmem:[#allocation64_spill] sm:$0xff]  ;;  %v3087_v45 = vld [vmem:[%s12009_s3 + $0x128] sm:$0xff] }
 0x21a   : > { %6893 = vmatpush1.bf16.msra.mxu1 %v6892_v26  ;;  %1324 = vst.msk [vmem:[#allocation3 + $0x50] sm:$0xff] %vm13190_vm3, %v1230_v43  ;;  %vm13201_vm12 = vnez %v13200_v60  ;;  %v2895_v26 = vld [vmem:[#allocation3 + $0x28] sm:$0xff]  ;;  %v2438_v5 = vld [vmem:[#allocation2 + $0x108] sm:$0xff] }
 0x21b   : > { %6894 = vmatprep.subr.bf16.mxu1 %v13202_v52  ;;  %1836 = vst.msk [vmem:[#allocation3 + $0x58] sm:$0xff] %vm13203_vm10, %v1743_v21  ;;  %v3088_v21 = vld [vmem:[%s12009_s3 + $0x130] sm:$0xff]  ;;  %vm13205_vm10 = vmmov %vm13190_vm3 }
 0x21c   : > { %2084 = vrot.lane.b32.xlu1 %v2007_v17, %s7384_s16  ;;  %v1180_v17 = vsel %vm13201_vm12, %v9708_v31, 0.0  ;;  %3295 = vmatmul.mubr.f32.gmra.mrb[2].mxu1 %v2895_v26  ;;  %vm13204_vm12 = vnez %v12777_v55  ;;  %vm13207_vm8 = vmmov %vm13205_vm10  ;;  %v13208_v55 = vld [vmem:[#allocation72_spill] sm:$0xff] }
 0x21d   : > { %2598 = vrot.lane.b32.xlu0 %v2520_v19, %s7384_s16  ;;  %v3086_v19 = vld [vmem:[%s12009_s3 + $0x120] sm:$0xff]  ;;  %v1236_v39 = vpop.permute.xlu1 %1235  ;;  %v2571_v43 = vpop.permute.xlu0 %2570  ;;  %v1179_v60 = vsel %vm13204_vm12, %v2424_v8, 0.0 }
 0x21e   : > { %6896 = vmatpush1.bf16.msra.mxu1 %v6895_v44  ;;  %v6898_v24 = vpack.c.bf16 %v3087_v45, %v3086_v19  ;;  %1327 = vst.msk [vmem:[#allocation3 + $0xc8] sm:$0xff] %vm13190_vm3, %v1236_v39  ;;  %vm13206_vm3 = vnez %v12781_v48  ;;  %v1599_v19 = vld [vmem:[#allocation2 + $0xbf] sm:$0xff] }
 0x21f   : > { %6897 = vmatprep.subr.bf16.mxu1 %v13202_v52  ;;  %2666 = vst.msk [vmem:[#allocation3 + $0x18] sm:$0xff] %vm13205_vm10, %v2571_v43  ;;  %v1692_v44 = vsel %vm13206_vm3, %v1596_v51, 0.0  ;;  %vm13209_vm10 = vnez %v13208_v55  ;;  %v3091_v51 = vld [vmem:[%s12009_s3 + $0x148] sm:$0xff]  ;;  %vm13210_vm3 = vmmov %vm13207_vm8 }
 0x220   : > { %1263 = vrot.lane.b32.xlu1 %v1180_v17, %s7384_s16  ;;  %v9739_v17 = vld [vmem:[#allocation2 + $0xb0] sm:$0xff] }
 0x221   : > { %1776 = vrot.lane.b32.xlu0 %v1597_v38, %s7384_s16  ;;  %v3089_v38 = vld [vmem:[%s12009_s3 + $0x138] sm:$0xff]  ;;  %v2063_v8 = vpop.permute.xlu1 %2062  ;;  %v1749_v26 = vpop.permute.xlu0 %1748  ;;  %v1182_v43 = vsel %vm13209_vm10, %v9739_v17, 0.0 }
 0x222   : > { %6899 = vmatpush1.bf16.msra.mxu1 %v6898_v24  ;;  %v6901_v45 = vpack.c.bf16 %v3089_v38, %v3088_v21  ;;  %2156 = vst.msk [vmem:[#allocation3 + $0x60] sm:$0xff] %vm13207_vm8, %v2063_v8  ;;  %v2901_v39 = vld [vmem:[#allocation3 + $0x58] sm:$0xff]  ;;  %v2900_v24 = vld [vmem:[#allocation3 + $0x50] sm:$0xff]  ;;  %v2906_v38 = vld [vmem:[#allocation3 + $0x80] sm:$0xff] }
 0x223   : > { %6900 = vmatprep.subr.bf16.mxu1 %v13202_v52  ;;  %1839 = vst.msk [vmem:[#allocation3 + $0xd0] sm:$0xff] %vm13210_vm3, %v1749_v26  ;;  %3299 = vmatprep.mubr.f32.mxu1 %v2901_v39  ;;  %v9755_v21 = vld [vmem:[#allocation2 + $0xa8] sm:$0xff]  ;;  %vm13211_vm8 = vmmov %vm13210_vm3 }
 0x224   : > { %1261 = vrot.lane.b32.xlu1 %v1179_v60, %s7384_s16  ;;  %v3090_v60 = vld [vmem:[%s12009_s3 + $0x140] sm:$0xff]  ;;  %3300 = vmatmul.mubr.f32.gmra.mrb[4].mxu1 %v2900_v24  ;;  %v13212_v26 = vld [vmem:[#allocation67_spill] sm:$0xff]  ;;  %vm13214_vm10 = vmmov %vm13211_vm8 }
 0x225   : > { %1774 = vrot.lane.b32.xlu0 %v1692_v44, %s7384_s16  ;;  %v1598_v44 = vld [vmem:[#allocation2 + $0xb7] sm:$0xff]  ;;  %v1234_v8 = vpop.permute.xlu1 %1233  ;;  %3304 = vmatprep.mubr.f32.mxu1 %v2906_v38  ;;  %v6904_v55 = vpack.c.bf16 %v3091_v51, %v3090_v60  ;;  %v2577_v48 = vpop.permute.xlu0 %2576  ;;  %vm13213_vm3 = vnez %v13212_v26  ;;  %v2905_v60 = vld [vmem:[#allocation3 + $0x78] sm:$0xff]  ;;  %v9773_v51 = vld [vmem:[#allocation2 + $0xc0] sm:$0xff] }
 0x226   : > { %6902 = vmatpush1.bf16.msra.mxu1 %v6901_v45  ;;  %1326 = vst.msk [vmem:[#allocation3 + $0xa0] sm:$0xff] %vm13211_vm8, %v1234_v8  ;;  %v1181_v39 = vsel %vm13213_vm3, %v9755_v21, 0.0  ;;  %vm13215_vm8 = vnez %v12914_v4  ;;  %v1601_v38 = vld [vmem:[#allocation2 + $0xcf] sm:$0xff]  ;;  %vm13216_vm3 = vmmov %vm13214_vm10 }
 0x227   : > { %6903 = vmatprep.subr.bf16.mxu1 %v13202_v52  ;;  %2669 = vst.msk [vmem:[#allocation3 + $0x90] sm:$0xff] %vm13214_vm10, %v2577_v48  ;;  %v1694_v45 = vsel %vm13215_vm8, %v1598_v44, 0.0  ;;  %v13217_v48 = vld [vmem:[#allocation78_spill] sm:$0xff]  ;;  %vm13219_vm8 = vmmov %vm13216_vm3 }
 0x228   : > { %1267 = vrot.lane.b32.xlu1 %v1182_v43, %s7384_s16  ;;  %v3093_v43 = vld [vmem:[%s12009_s3 + $0x158] sm:$0xff]  ;;  %3305 = vmatmul.mubr.f32.gmra.mrb[6].mxu1 %v2905_v60  ;;  %vm13218_vm10 = vnez %v13217_v48  ;;  %v3094_v44 = vld [vmem:[%s12009_s3 + $0x160] sm:$0xff]  ;;  %v13220_v48 = vld [vmem:[#allocation79_spill] sm:$0xff] }
 0x229   : > { %1780 = vrot.lane.b32.xlu0 %v1599_v19, %s7384_s16  ;;  %v3092_v19 = vld [vmem:[%s12009_s3 + $0x150] sm:$0xff]  ;;  %v2061_v24 = vpop.permute.xlu1 %2060  ;;  %v1747_v26 = vpop.permute.xlu0 %1746 }
 0x22a   : > { %6905 = vmatpush1.bf16.msra.mxu1 %v6904_v55  ;;  %v6907_v8 = vpack.c.bf16 %v3093_v43, %v3092_v19  ;;  %2155 = vst.msk [vmem:[#allocation3 + $0x38] sm:$0xff] %vm13216_vm3, %v2061_v24  ;;  %v9789_v55 = vld [vmem:[#allocation2 + $0xb8] sm:$0xff]  ;;  %v1600_v19 = vld [vmem:[#allocation2 + $0xc7] sm:$0xff] }
 0x22b   : > { %6906 = vmatprep.subr.bf16.mxu1 %v13202_v52  ;;  %1838 = vst.msk [vmem:[#allocation3 + $0xa8] sm:$0xff] %vm13219_vm8, %v1747_v26  ;;  %v3096_v26 = vld [vmem:[%s12009_s3 + $0x170] sm:$0xff]  ;;  %vm13222_vm8 = vmmov %vm13216_vm3 }
 0x22c   : > { %1265 = vrot.lane.b32.xlu1 %v1181_v39, %s7384_s16  ;;  %v1184_v39 = vsel %vm13218_vm10, %v9773_v51, 0.0  ;;  %vm13221_vm10 = vnez %v13220_v48 }
 0x22d   : > { %1778 = vrot.lane.b32.xlu0 %v1694_v45, %s7384_s16  ;;  %v3095_v45 = vld [vmem:[%s12009_s3 + $0x168] sm:$0xff]  ;;  %v1240_v43 = vpop.permute.xlu1 %1239  ;;  %v2575_v24 = vpop.permute.xlu0 %2574  ;;  %v1183_v4 = vsel %vm13221_vm10, %v9789_v55, 0.0  ;;  %vm13223_vm10 = vnez %v12902_v62 }
 0x22e   : > { %6908 = vmatpush1.bf16.msra.mxu1 %v6907_v8  ;;  %v6910_v60 = vpack.c.bf16 %v3095_v45, %v3094_v44  ;;  %1329 = vst.msk [vmem:[#allocation3 + $0x118] sm:$0xff] %vm13216_vm3, %v1240_v43  ;;  %v1696_v8 = vsel %vm13140_vm7, %v1600_v19, 0.0  ;;  %v1603_v45 = vld [vmem:[#allocation2 + $0xdf] sm:$0xff]  ;;  %v3099_v19 = vld [vmem:[%s12009_s3 + $0x188] sm:$0xff] }
 0x22f   : > { %6909 = vmatprep.subr.bf16.mxu1 %v13202_v52  ;;  %2668 = vst.msk [vmem:[#allocation3 + $0x68] sm:$0xff] %vm13222_vm8, %v2575_v24  ;;  %vm13224_vm8 = vmmov %vm13216_vm3 }
 0x230   : > { %1271 = vrot.lane.b32.xlu1 %v1184_v39, %s7384_s16  ;;  %v9807_v39 = vld [vmem:[#allocation2 + $0xd0] sm:$0xff] }
 0x231   : > { %1784 = vrot.lane.b32.xlu0 %v1601_v38, %s7384_s16  ;;  %v3097_v38 = vld [vmem:[%s12009_s3 + $0x178] sm:$0xff]  ;;  %v2067_v44 = vpop.permute.xlu1 %2066  ;;  %v1753_v48 = vpop.permute.xlu0 %1752  ;;  %v1186_v24 = vsel %vm13223_vm10, %v9807_v39, 0.0  ;;  %vm13226_vm10 = vmmov %vm13216_vm3 }
 0x232   : > { %6911 = vmatpush1.bf16.msra.mxu1 %v6910_v60  ;;  %v6913_v43 = vpack.c.bf16 %v3097_v38, %v3096_v26  ;;  %2158 = vst.msk [vmem:[#allocation3 + $0xb0] sm:$0xff] %vm13216_vm3, %v2067_v44  ;;  %v2911_v23 = vld [vmem:[#allocation3 + $0xa8] sm:$0xff]  ;;  %v2910_v60 = vld [vmem:[#allocation3 + $0xa0] sm:$0xff]  ;;  %v9823_v26 = vld [vmem:[#allocation2 + $0xc8] sm:$0xff] }
 0x233   : > { %6912 = vmatprep.subr.bf16.mxu1 %v13202_v52  ;;  %1841 = vst.msk [vmem:[#allocation3 + $0x120] sm:$0xff] %vm13224_vm8, %v1753_v48  ;;  %3309 = vmatprep.mubr.f32.mxu1 %v2911_v23  ;;  %v2916_v38 = vld [vmem:[#allocation3 + $0xd0] sm:$0xff]  ;;  %vm13225_vm8 = vnez %v12906_v2  ;;  %v3100_v23 = vld [vmem:[%s12009_s3 + $0x190] sm:$0xff] }
 0x234   : > { %1269 = vrot.lane.b32.xlu1 %v1183_v4, %s7384_s16  ;;  %v3098_v4 = vld [vmem:[%s12009_s3 + $0x180] sm:$0xff]  ;;  %3310 = vmatmul.mubr.f32.gmra.mrb[8].mxu1 %v2910_v60  ;;  %v1185_v48 = vsel %vm13225_vm8, %v9823_v26, 0.0  ;;  %v1605_v60 = vld [vmem:[#allocation2 + $0xef] sm:$0xff]  ;;  %vm13249_vm8 = vnez %v13120_v42 }
 0x235   : > { %1782 = vrot.lane.b32.xlu0 %v1696_v8, %s7384_s16  ;;  %v1602_v8 = vld [vmem:[#allocation2 + $0xd7] sm:$0xff]  ;;  %v1238_v44 = vpop.permute.xlu1 %1237  ;;  %3314 = vmatprep.mubr.f32.mxu1 %v2916_v38  ;;  %v6916_v62 = vpack.c.bf16 %v3099_v19, %v3098_v4  ;;  %v2581_v18 = vpop.permute.xlu0 %2580  ;;  %v9841_v4 = vld [vmem:[#allocation2 + $0xe0] sm:$0xff] }
 0x236   : > { %6914 = vmatpush1.bf16.msra.mxu1 %v6913_v43  ;;  %1328 = vst.msk [vmem:[#allocation3 + $0xf0] sm:$0xff] %vm13216_vm3, %v1238_v44  ;;  %v1698_v43 = vsel %vm13076_vm6, %v1602_v8, 0.0  ;;  %v3102_v8 = vld [vmem:[%s12009_s3 + $0x1a0] sm:$0xff]  ;;  %vm13228_vm6 = vmmov %vm13216_vm3 }
 0x237   : > { %6915 = vmatprep.subr.bf16.mxu1 %v13202_v52  ;;  %2671 = vst.msk [vmem:[#allocation3 + $0xe0] sm:$0xff] %vm13226_vm10, %v2581_v18  ;;  %vm13227_vm10 = vnez %v12920_v61 }
 0x238   : > { %1275 = vrot.lane.b32.xlu1 %v1186_v24, %s7384_s16  ;;  %v2915_v24 = vld [vmem:[#allocation3 + $0xc8] sm:$0xff]  ;;  %v1188_v18 = vsel %vm13227_vm10, %v9841_v4, 0.0  ;;  %vm13229_vm10 = vnez %v12924_v32 }
 0x239   : > { %1788 = vrot.lane.b32.xlu0 %v1603_v45, %s7384_s16  ;;  %v3101_v45 = vld [vmem:[%s12009_s3 + $0x198] sm:$0xff]  ;;  %3315 = vmatmul.mubr.f32.gmra.mrb[10].mxu1 %v2915_v24  ;;  %v2065_v19 = vpop.permute.xlu1 %2064  ;;  %v1751_v44 = vpop.permute.xlu0 %1750 }
 0x23a   : > { %6917 = vmatpush1.bf16.msra.mxu1 %v6916_v62  ;;  %v6919_v38 = vpack.c.bf16 %v3101_v45, %v3100_v23  ;;  %2157 = vst.msk [vmem:[#allocation3 + $0x88] sm:$0xff] %vm13216_vm3, %v2065_v19  ;;  %v9857_v62 = vld [vmem:[#allocation2 + $0xd8] sm:$0xff]  ;;  %v1604_v23 = vld [vmem:[#allocation2 + $0xe7] sm:$0xff] }
 0x23b   : > { %6918 = vmatprep.subr.bf16.mxu1 %v13202_v52  ;;  %1840 = vst.msk [vmem:[#allocation3 + $0xf8] sm:$0xff] %vm13228_vm6, %v1751_v44  ;;  %v1187_v19 = vsel %vm13229_vm10, %v9857_v62, 0.0  ;;  %v3104_v44 = vld [vmem:[%s12009_s3 + $0x1b0] sm:$0xff]  ;;  %vm13230_vm6 = vmmov %vm13216_vm3  ;;  %vm13231_vm10 = vnez %v12966_v13 }
 0x23c   : > { %1273 = vrot.lane.b32.xlu1 %v1185_v48, %s7384_s16  ;;  %v3103_v48 = vld [vmem:[%s12009_s3 + $0x1a8] sm:$0xff] }
 0x23d   : > { %1786 = vrot.lane.b32.xlu0 %v1698_v43, %s7384_s16  ;;  %v1244_v45 = vpop.permute.xlu1 %1243  ;;  %v6922_v43 = vpack.c.bf16 %v3103_v48, %v3102_v8  ;;  %v2579_v24 = vpop.permute.xlu0 %2578  ;;  %v1607_v48 = vld [vmem:[#allocation2 + $0xff] sm:$0xff] }
 0x23e   : > { %6920 = vmatpush1.bf16.msra.mxu1 %v6919_v38  ;;  %1331 = vst.msk [vmem:[#allocation3 + $0x168] sm:$0xff] %vm13216_vm3, %v1244_v45  ;;  %v1700_v38 = vsel %vm13088_vm15, %v1604_v23, 0.0  ;;  %v3106_v23 = vld [vmem:[%s12009_s3 + $0x1c0] sm:$0xff]  ;;  %vm13246_vm15 = vmmov %vm13216_vm3 }
 0x23f   : > { %6921 = vmatprep.subr.bf16.mxu1 %v13202_v52  ;;  %2670 = vst.msk [vmem:[#allocation3 + $0xb8] sm:$0xff] %vm13230_vm6, %v2579_v24  ;;  %vm13232_vm6 = vmmov %vm13216_vm3 }
 0x240   : > { %1279 = vrot.lane.b32.xlu1 %v1188_v18, %s7384_s16  ;;  %v9875_v18 = vld [vmem:[#allocation2 + $0xf0] sm:$0xff] }
 0x241   : > { %1792 = vrot.lane.b32.xlu0 %v1605_v60, %s7384_s16  ;;  %v3105_v60 = vld [vmem:[%s12009_s3 + $0x1b8] sm:$0xff]  ;;  %v2071_v8 = vpop.permute.xlu1 %2070  ;;  %v1757_v61 = vpop.permute.xlu0 %1756  ;;  %v1190_v24 = vsel %vm13231_vm10, %v9875_v18, 0.0  ;;  %vm13234_vm10 = vmmov %vm13216_vm3 }
 0x242   : > { %6923 = vmatpush1.bf16.msra.mxu1 %v6922_v43  ;;  %v6925_v45 = vpack.c.bf16 %v3105_v60, %v3104_v44  ;;  %2160 = vst.msk [vmem:[#allocation3 + $0x100] sm:$0xff] %vm13216_vm3, %v2071_v8  ;;  %v2921_v32 = vld [vmem:[#allocation3 + $0xf8] sm:$0xff]  ;;  %v2920_v43 = vld [vmem:[#allocation3 + $0xf0] sm:$0xff]  ;;  %v2926_v60 = vld [vmem:[#allocation3 + $0x120] sm:$0xff] }
 0x243   : > { %6924 = vmatprep.subr.bf16.mxu1 %v13202_v52  ;;  %1843 = vst.msk [vmem:[#allocation3 + $0x170] sm:$0xff] %vm13232_vm6, %v1757_v61  ;;  %3319 = vmatprep.mubr.f32.mxu1 %v2921_v32  ;;  %v9891_v44 = vld [vmem:[#allocation2 + $0xe8] sm:$0xff]  ;;  %vm13233_vm6 = vnez %v12978_v56  ;;  %v3108_v32 = vld [vmem:[%s12009_s3 + $0x1d0] sm:$0xff] }
 0x244   : > { %1277 = vrot.lane.b32.xlu1 %v1187_v19, %s7384_s16  ;;  %v3107_v19 = vld [vmem:[%s12009_s3 + $0x1c8] sm:$0xff]  ;;  %3320 = vmatmul.mubr.f32.gmra.mrb[12].mxu1 %v2920_v43  ;;  %v1189_v61 = vsel %vm13233_vm6, %v9891_v44, 0.0  ;;  %vm13245_vm6 = vnez %v12999_v37 }
 0x245   : > { %1790 = vrot.lane.b32.xlu0 %v1700_v38, %s7384_s16  ;;  %v1606_v38 = vld [vmem:[#allocation2 + $0xf7] sm:$0xff]  ;;  %v1242_v8 = vpop.permute.xlu1 %1241  ;;  %3324 = vmatprep.mubr.f32.mxu1 %v2926_v60  ;;  %v6928_v13 = vpack.c.bf16 %v3107_v19, %v3106_v23  ;;  %v2585_v63 = vpop.permute.xlu0 %2584  ;;  %v9909_v23 = vld [vmem:[#allocation2 + $0x100] sm:$0xff]  ;;  %v1609_v43 = vld [vmem:[#allocation2 + $0x10f] sm:$0xff] }
 0x246   : > { %6926 = vmatpush1.bf16.msra.mxu1 %v6925_v45  ;;  %1330 = vst.msk [vmem:[#allocation3 + $0x140] sm:$0xff] %vm13216_vm3, %v1242_v8  ;;  %v1702_v45 = vsel %vm13158_vm13, %v1606_v38, 0.0  ;;  %v3110_v38 = vld [vmem:[%s12009_s3 + $0x1e0] sm:$0xff]  ;;  %vm13236_vm13 = vmmov %vm13216_vm3 }
 0x247   : > { %6927 = vmatprep.subr.bf16.mxu1 %v13202_v52  ;;  %2673 = vst.msk [vmem:[#allocation3 + $0x130] sm:$0xff] %vm13234_vm10, %v2585_v63  ;;  %vm13235_vm10 = vnez %v12985_v20  ;;  %v13240_v20 = vld [vmem:[#allocation41_spill] sm:$0xff] }
 0x248   : > { %1283 = vrot.lane.b32.xlu1 %v1190_v24, %s7384_s16  ;;  %v2925_v24 = vld [vmem:[#allocation3 + $0x118] sm:$0xff]  ;;  %v1192_v63 = vsel %vm13235_vm10, %v9909_v23, 0.0  ;;  %vm13237_vm10 = vnez %v13045_v53 }
 0x249   : > { %1796 = vrot.lane.b32.xlu0 %v1607_v48, %s7384_s16  ;;  %v3109_v48 = vld [vmem:[%s12009_s3 + $0x1d8] sm:$0xff]  ;;  %3325 = vmatmul.mubr.f32.gmra.mrb[14].mxu1 %v2925_v24  ;;  %v2069_v19 = vpop.permute.xlu1 %2068  ;;  %v1755_v8 = vpop.permute.xlu0 %1754 }
 0x24a   : > { %6929 = vmatpush1.bf16.msra.mxu1 %v6928_v13  ;;  %v6931_v60 = vpack.c.bf16 %v3109_v48, %v3108_v32  ;;  %2159 = vst.msk [vmem:[#allocation3 + $0xd8] sm:$0xff] %vm13216_vm3, %v2069_v19  ;;  %v9925_v13 = vld [vmem:[#allocation2 + $0xf8] sm:$0xff]  ;;  %v1608_v32 = vld [vmem:[#allocation2 + $0x107] sm:$0xff] }
 0x24b   : > { %6930 = vmatprep.subr.bf16.mxu1 %v13202_v52  ;;  %1842 = vst.msk [vmem:[#allocation3 + $0x148] sm:$0xff] %vm13236_vm13, %v1755_v8  ;;  %v1191_v19 = vsel %vm13237_vm10, %v9925_v13, 0.0  ;;  %v3112_v8 = vld [vmem:[%s12009_s3 + $0x1f0] sm:$0xff]  ;;  %vm13238_vm13 = vmmov %vm13216_vm3  ;;  %vm13241_vm10 = vnez %v13240_v20 }
 0x24c   : > { %1281 = vrot.lane.b32.xlu1 %v1189_v61, %s7384_s16  ;;  %v3111_v61 = vld [vmem:[%s12009_s3 + $0x1e8] sm:$0xff] }
 0x24d   : > { %1794 = vrot.lane.b32.xlu0 %v1702_v45, %s7384_s16  ;;  %v1248_v48 = vpop.permute.xlu1 %1247  ;;  %v6934_v45 = vpack.c.bf16 %v3111_v61, %v3110_v38  ;;  %v2583_v24 = vpop.permute.xlu0 %2582 }
 0x24e   : > { %6932 = vmatpush1.bf16.msra.mxu1 %v6931_v60  ;;  %1333 = vst.msk [vmem:[#allocation3 + $0x1b8] sm:$0xff] %vm13216_vm3, %v1248_v48  ;;  %v1704_v60 = vsel %vm9366_vm1, %v1608_v32, 0.0  ;;  %v13239_v48 = vld [vmem:[#allocation87_spill] sm:$0xff]  ;;  %vm13243_vm1 = vnez %v13106_v36 }
 0x24f   : > { %6933 = vmatprep.subr.bf16.mxu1 %v13202_v52  ;;  %2672 = vst.msk [vmem:[#allocation3 + $0x108] sm:$0xff] %vm13238_vm13, %v2583_v24  ;;  %v2009_v53 = vsel %vm13241_vm10, %v13239_v48, 0.0  ;;  %vm13242_vm13 = vmmov %vm13216_vm3  ;;  %v2521_v32 = vsel %vm13243_vm1, %v9708_v31, 0.0  ;;  %v2936_v24 = vld [vmem:[#allocation3 + $0x170] sm:$0xff]  ;;  %v2935_v31 = vld [vmem:[#allocation3 + $0x168] sm:$0xff] }
 0x250   : > { %1287 = vrot.lane.b32.xlu1 %v1192_v63, %s7384_s16 }
 0x251   : > { %1800 = vrot.lane.b32.xlu0 %v1609_v43, %s7384_s16  ;;  %v3113_v43 = vld [vmem:[%s12009_s3 + $0x1f8] sm:$0xff]  ;;  %v2075_v63 = vpop.permute.xlu1 %2074  ;;  %v1761_v61 = vpop.permute.xlu0 %1760 }
 0x252   : > { %6935 = vmatpush1.bf16.msra.mxu1 %v6934_v45  ;;  %v6937_v38 = vpack.c.bf16 %v3113_v43, %v3112_v8  ;;  %2162 = vst.msk [vmem:[#allocation3 + $0x150] sm:$0xff] %vm13216_vm3, %v2075_v63  ;;  %v2931_v12 = vld [vmem:[#allocation3 + $0x148] sm:$0xff]  ;;  %v2930_v45 = vld [vmem:[#allocation3 + $0x140] sm:$0xff]  ;;  %v7352_v63 = vld [vmem:[#allocation2 + $0xa1] sm:$0xff] }
 0x253   : > { %6936 = vmatprep.subr.bf16.mxu1 %v13202_v52  ;;  %1845 = vst.msk [vmem:[#allocation3 + $0x1c0] sm:$0xff] %vm13242_vm13, %v1761_v61  ;;  %3329 = vmatprep.mubr.f32.mxu1 %v2931_v12  ;;  %vm13244_vm13 = vmmov %vm13216_vm3  ;;  %v7351_v12 = vld [vmem:[#allocation2 + $0x99] sm:$0xff] }
 0x254   : > { %1285 = vrot.lane.b32.xlu1 %v1191_v19, %s7384_s16  ;;  %3330 = vmatmul.mubr.f32.gmra.mrb[16].mxu1 %v2930_v45  ;;  %vm13250_vm7 = vmmov %vm13244_vm13  ;;  %v13252_v45 = vld [vmem:[#allocation92_spill] sm:$0xff] }
 0x255   : > { %1798 = vrot.lane.b32.xlu0 %v1704_v60, %s7384_s16  ;;  %v1246_v19 = vpop.permute.xlu1 %1245  ;;  %3334 = vmatprep.mubr.f32.mxu1 %v2936_v24  ;;  %v2589_v8 = vpop.permute.xlu0 %2588 }
 0x256   : > { %6938 = vmatpush1.bf16.msra.mxu1 %v6937_v38  ;;  %1332 = vst.msk [vmem:[#allocation3 + $0x190] sm:$0xff] %vm13216_vm3, %v1246_v19  ;;  %v13247_v38 = vld [vmem:[#allocation44_spill] sm:$0xff] }
 0x257   : > { %7011 = vmatprep.subr.bf16.mxu1 %v13202_v52  ;;  %2675 = vst.msk [vmem:[#allocation3 + $0x180] sm:$0xff] %vm13244_vm13, %v2589_v8  ;;  %vm13248_vm3 = vnez %v13247_v38  ;;  %v7353_v8 = vld [vmem:[#allocation2 + $0xb1] sm:$0xff] }
 0x258   : > { %2088 = vrot.lane.b32.xlu1 %v2009_v53, %s7384_s16  ;;  %v2522_v53 = vsel %vm13245_vm6, %v9755_v21, 0.0  ;;  %3335 = vmatmul.mubr.f32.gmra.mrb[18].mxu1 %v2935_v31  ;;  %v2011_v61 = vsel %vm13248_vm3, %v7352_v63, 0.0  ;;  %v2523_v21 = vsel %vm13249_vm8, %v9739_v17, 0.0  ;;  %vm13254_vm3 = vmmov %vm13250_vm7 }
 0x259   : > { %2600 = vrot.lane.b32.xlu0 %v2521_v32, %s7384_s16  ;;  %v2073_v43 = vpop.permute.xlu1 %2072  ;;  %v1759_v60 = vpop.permute.xlu0 %1758 }
 0x25a   : > { %2161 = vst.msk [vmem:[#allocation3 + $0x128] sm:$0xff] %vm13246_vm15, %v2073_v43  ;;  %vm13251_vm15 = vmmov %vm13250_vm7 }
 0x25b   : > { %1844 = vst.msk [vmem:[#allocation3 + $0x198] sm:$0xff] %vm13244_vm13, %v1759_v60  ;;  %vm13253_vm13 = vnez %v13009_v27  ;;  %v2946_v60 = vld [vmem:[#allocation3 + $0x1c0] sm:$0xff] }
 0x25c   : > { %2090 = vrot.lane.b32.xlu1 %v7351_v12, %s7384_s16  ;;  %v2524_v24 = vsel %vm13253_vm13, %v9789_v55, 0.0  ;;  %v13255_v12 = vld [vmem:[#allocation49_spill] sm:$0xff] }
 0x25d   : > { %2602 = vrot.lane.b32.xlu0 %v2522_v53, %s7384_s16  ;;  %v1252_v48 = vpop.permute.xlu1 %1251  ;;  %v2587_v32 = vpop.permute.xlu0 %2586  ;;  %vm13256_vm8 = vnez %v13255_v12  ;;  %v2940_v43 = vld [vmem:[#allocation3 + $0x190] sm:$0xff] }
 0x25e   : > { %1335 = vst.msk [vmem:[#allocation3 + $0x208] sm:$0xff] %vm13250_vm7, %v1252_v48  ;;  %v2013_v53 = vsel %vm13256_vm8, %v7353_v8, 0.0  ;;  %vm13257_vm7 = vmmov %vm13254_vm3 }
 0x25f   : > { %2674 = vst.msk [vmem:[#allocation3 + $0x158] sm:$0xff] %vm13251_vm15, %v2587_v32  ;;  %vm13258_vm15 = vnez %v13125_v59  ;;  %vm13259_vm8 = vmmov %vm13254_vm3 }
 0x260   : > { %2092 = vrot.lane.b32.xlu1 %v2011_v61, %s7384_s16  ;;  %v2525_v55 = vsel %vm13258_vm15, %v9773_v51, 0.0  ;;  %v2945_v51 = vld [vmem:[#allocation3 + $0x1b8] sm:$0xff]  ;;  %vm13261_vm15 = vmmov %vm13254_vm3 }
 0x261   : > { %2604 = vrot.lane.b32.xlu0 %v2523_v21, %s7384_s16  ;;  %v2079_v19 = vpop.permute.xlu1 %2078  ;;  %v1765_v17 = vpop.permute.xlu0 %1764  ;;  %v7354_v21 = vld [vmem:[#allocation2 + $0xb9] sm:$0xff] }
 0x262   : > { %2164 = vst.msk [vmem:[#allocation3 + $0x1a0] sm:$0xff] %vm13254_vm3, %v2079_v19  ;;  %v2941_v31 = vld [vmem:[#allocation3 + $0x198] sm:$0xff] }
 0x263   : > { %1847 = vst.msk [vmem:[#allocation3 + $0x210] sm:$0xff] %vm13257_vm7, %v1765_v17  ;;  %3339 = vmatprep.mubr.f32.mxu1 %v2941_v31  ;;  %vm13260_vm7 = vnez %v13012_v0  ;;  %v13262_v19 = vld [vmem:[#allocation55_spill] sm:$0xff] }
 0x264   : > { %2094 = vrot.lane.b32.xlu1 %v13252_v45, %s7384_s16  ;;  %3340 = vmatmul.mubr.f32.gmra.mrb[20].mxu1 %v2940_v43  ;;  %v2526_v48 = vsel %vm13260_vm7, %v9823_v26, 0.0  ;;  %v2527_v26 = vsel %vm13138_vm0, %v9807_v39, 0.0  ;;  %vm13264_vm7 = vmmov %vm13259_vm8  ;;  %v7356_v31 = vld [vmem:[#allocation2 + $0xc9] sm:$0xff] }
 0x265   : > { %2606 = vrot.lane.b32.xlu0 %v2524_v24, %s7384_s16  ;;  %3344 = vmatprep.mubr.f32.mxu1 %v2946_v60  ;;  %v7355_v24 = vld [vmem:[#allocation2 + $0xc1] sm:$0xff]  ;;  %v7357_v60 = vld [vmem:[#allocation2 + $0xd1] sm:$0xff] }
 0x268   : > { %2096 = vrot.lane.b32.xlu1 %v2013_v53, %s7384_s16  ;;  %3345 = vmatmul.mubr.f32.gmra.mrb[22].mxu1 %v2945_v51 }
 0x269   : > { %2608 = vrot.lane.b32.xlu0 %v2525_v55, %s7384_s16  ;;  %v2528_v55 = vsel %vm13139_vm11, %v9857_v62, 0.0  ;;  %vm13275_vm11 = vnez %v13147_v9 }
 0x26a   : > { %v1250_v63 = vpop.permute.xlu1 %1249  ;;  %v2956_v51 = vld [vmem:[#allocation3 + $0x210] sm:$0xff] }
 0x26b   : > { %1334 = vst.msk [vmem:[#allocation3 + $0x1e0] sm:$0xff] %vm13254_vm3, %v1250_v63  ;;  %v2593_v61 = vpop.permute.xlu0 %2592  ;;  %vm13263_vm3 = vnez %v13262_v19  ;;  %v13267_v63 = vld [vmem:[#allocation59_spill] sm:$0xff] }
 0x26c   : > { %2677 = vst.msk [vmem:[#allocation3 + $0x1d0] sm:$0xff] %vm13259_vm8, %v2593_v61  ;;  %2098 = vrot.lane.b32.xlu1 %v7354_v21, %s7384_s16  ;;  %v2015_v17 = vsel %vm13263_vm3, %v7355_v24, 0.0  ;;  %vm13268_vm3 = vnez %v13267_v63  ;;  %v7358_v24 = vld [vmem:[#allocation2 + $0xd9] sm:$0xff] }
 0x26d   : > { %2610 = vrot.lane.b32.xlu0 %v2526_v48, %s7384_s16  ;;  %v2017_v61 = vsel %vm13268_vm3, %v7357_v60, 0.0  ;;  %vm13271_vm3 = vmmov %vm13264_vm7  ;;  %v7360_v60 = vld [vmem:[#allocation2 + $0xe9] sm:$0xff] }
 0x26e   : > { %v2077_v32 = vpop.permute.xlu1 %2076 }
 0x26f   : > { %2163 = vst.msk [vmem:[#allocation3 + $0x178] sm:$0xff] %vm13261_vm15, %v2077_v32  ;;  %v1763_v45 = vpop.permute.xlu0 %1762  ;;  %vm13265_vm15 = vmmov %vm13264_vm7 }
 0x270   : > { %1846 = vst.msk [vmem:[#allocation3 + $0x1e8] sm:$0xff] %vm13259_vm8, %v1763_v45  ;;  %2100 = vrot.lane.b32.xlu1 %v2015_v17, %s7384_s16  ;;  %vm13266_vm8 = vmmov %vm13264_vm7 }
 0x271   : > { %2612 = vrot.lane.b32.xlu0 %v2527_v26, %s7384_s16 }
 0x272   : > { %v1256_v8 = vpop.permute.xlu1 %1255  ;;  %v2950_v48 = vld [vmem:[#allocation3 + $0x1e0] sm:$0xff] }
 0x273   : > { %1337 = vst.msk [vmem:[#allocation3 + $0x258] sm:$0xff] %vm13264_vm7, %v1256_v8  ;;  %v2591_v53 = vpop.permute.xlu0 %2590 }
 0x274   : > { %2676 = vst.msk [vmem:[#allocation3 + $0x1a8] sm:$0xff] %vm13265_vm15, %v2591_v53  ;;  %2102 = vrot.lane.b32.xlu1 %v7356_v31, %s7384_s16  ;;  %vm13269_vm15 = vnez %v13142_v58  ;;  %v7359_v53 = vld [vmem:[#allocation2 + $0xe1] sm:$0xff] }
 0x275   : > { %2614 = vrot.lane.b32.xlu0 %v2528_v55, %s7384_s16  ;;  %v2529_v62 = vsel %vm13269_vm15, %v9841_v4, 0.0  ;;  %v2955_v4 = vld [vmem:[#allocation3 + $0x208] sm:$0xff]  ;;  %vm13273_vm15 = vmmov %vm13271_vm3 }
 0x276   : > { %v2083_v43 = vpop.permute.xlu1 %2082 }
 0x277   : > { %2166 = vst.msk [vmem:[#allocation3 + $0x1f0] sm:$0xff] %vm13266_vm8, %v2083_v43  ;;  %v1769_v39 = vpop.permute.xlu0 %1768  ;;  %v2951_v21 = vld [vmem:[#allocation3 + $0x1e8] sm:$0xff]  ;;  %vm13270_vm8 = vmmov %vm13264_vm7 }
 0x278   : > { %1849 = vst.msk [vmem:[#allocation3 + $0x260] sm:$0xff] %vm13264_vm7, %v1769_v39  ;;  %2104 = vrot.lane.b32.xlu1 %v2017_v61, %s7384_s16  ;;  %3349 = vmatprep.mubr.f32.mxu1 %v2951_v21  ;;  %vm13272_vm7 = vnez %v13091_v28  ;;  %v10039_v39 = vpop.f32.mrb[32].mxu0  ;;  %v2532_v61 = vsel %vm13101_vm2, %v9925_v13, 0.0  ;;  %vm13280_vm2 = vnez %v13150_v50 }
 0x279   : > { %2616 = vrot.lane.b32.xlu0 %v2529_v62, %s7384_s16  ;;  %3350 = vmatmul.mubr.f32.gmra.mrb[24].mxu1 %v2950_v48  ;;  %v2530_v17 = vsel %vm13272_vm7, %v9891_v44, 0.0  ;;  %v2531_v44 = vsel %vm13275_vm11, %v9875_v18, 0.0  ;;  %vm13276_vm7 = vmmov %vm13271_vm3  ;;  %v10045_v21 = vpop.f32.mrb[33].mxu0  ;;  %v7361_v48 = vld [vmem:[#allocation2 + $0xf1] sm:$0xff]  ;;  %v2533_v13 = vsel %vm13280_vm2, %v9909_v23, 0.0  ;;  %vm13288_vm11 = vcmask 261120  }
 0x27a   : > { %v1254_v32 = vpop.permute.xlu1 %1253  ;;  %3354 = vmatprep.mubr.f32.mxu1 %v2956_v51  ;;  %v13284_v23 = vld [vmem:[#allocation8_spill] sm:$0xff] }
 0x27b   : > { %1336 = vst.msk [vmem:[#allocation3 + $0x230] sm:$0xff] %vm13270_vm8, %v1254_v32  ;;  %v2597_v45 = vpop.permute.xlu0 %2596  ;;  %vm13274_vm8 = vnez %v12796_v6 }
 0x27c   : > { %2679 = vst.msk [vmem:[#allocation3 + $0x220] sm:$0xff] %vm13271_vm3, %v2597_v45  ;;  %2106 = vrot.lane.b32.xlu1 %v7358_v24, %s7384_s16  ;;  %v2019_v31 = vsel %vm13274_vm8, %v7359_v53, 0.0  ;;  %v2217_v45 = vld [vmem:[#allocation2 + $0x11f] sm:$0xff]  ;;  %vm13287_vm8 = vcmask 1048064  }
 0x27d   : > { %2618 = vrot.lane.b32.xlu0 %v2530_v17, %s7384_s16  ;;  %3355 = vmatmul.mubr.f32.gmra.mrb[26].mxu1 %v2955_v4  ;;  %v10056_v17 = vpop.f32.mrb[34].mxu0  ;;  %v2377_v4 = vsel %vm9670_vm14, %v2217_v45, 0.0  ;;  %vm13289_vm0 = vmmov %vm13287_vm8 }
 0x27e   : > { %v2081_v26 = vpop.permute.xlu1 %2080  ;;  %v10061_v53 = vpop.f32.mrb[35].mxu0 }
 0x27f   : > { %2165 = vst.msk [vmem:[#allocation3 + $0x1c8] sm:$0xff] %vm13273_vm15, %v2081_v26  ;;  %v1767_v8 = vpop.permute.xlu0 %1766  ;;  %vm13277_vm15 = vmmov %vm13271_vm3  ;;  %v2966_v26 = vld [vmem:[#allocation3 + $0x260] sm:$0xff] }
 0x280   : > { %1848 = vst.msk [vmem:[#allocation3 + $0x238] sm:$0xff] %vm13271_vm3, %v1767_v8  ;;  %2108 = vrot.lane.b32.xlu1 %v2019_v31, %s7384_s16  ;;  %v2439_v8 = vld [vmem:[#allocation2 + $0x110] sm:$0xff] }
 0x281   : > { %2620 = vrot.lane.b32.xlu0 %v2531_v44, %s7384_s16  ;;  %v3964_v31 = vld [vmem:[#allocation4 + $0x7] sm:$0xff] }
 0x282   : > { %v1260_v55 = vpop.permute.xlu1 %1259  ;;  %v2960_v24 = vld [vmem:[#allocation3 + $0x230] sm:$0xff] }
 0x283   : > { %1339 = vst.msk [vmem:[#allocation3 + $0x2a8] sm:$0xff] %vm13276_vm7, %v1260_v55  ;;  %v2595_v43 = vpop.permute.xlu0 %2594  ;;  %vm13278_vm7 = vnez %v12856_v22  ;;  %v13282_v55 = vld [vmem:[#allocation7_spill] sm:$0xff] }
 0x284   : > { %2678 = vst.msk [vmem:[#allocation3 + $0x1f8] sm:$0xff] %vm13277_vm15, %v2595_v43  ;;  %2110 = vrot.lane.b32.xlu1 %v7360_v60, %s7384_s16  ;;  %v2021_v51 = vsel %vm13278_vm7, %v7361_v48, 0.0  ;;  %vm13279_vm15 = vmmov %vm13271_vm3  ;;  %vm13285_vm7 = vnez %v13284_v23  ;;  %v2965_v48 = vld [vmem:[#allocation3 + $0x258] sm:$0xff] }
 0x285   : > { %2622 = vrot.lane.b32.xlu0 %v2532_v61, %s7384_s16  ;;  %v2440_v61 = vld [vmem:[#allocation2 + $0x118] sm:$0xff] }
 0x286   : > { %v2087_v18 = vpop.permute.xlu1 %2086 }
 0x287   : > { %2168 = vst.msk [vmem:[#allocation3 + $0x240] sm:$0xff] %vm13271_vm3, %v2087_v18  ;;  %v1773_v62 = vpop.permute.xlu0 %1772  ;;  %v2961_v32 = vld [vmem:[#allocation3 + $0x238] sm:$0xff]  ;;  %vm13281_vm3 = vcmask 523264   ;;  %v7362_v18 = vld [vmem:[#allocation2 + $0xf9] sm:$0xff] }
 0x288   : > { %1851 = vst.msk [vmem:[#allocation3 + $0x2b0] sm:$0xff] %vm13279_vm15, %v1773_v62  ;;  %2112 = vrot.lane.b32.xlu1 %v2021_v51, %s7384_s16  ;;  %3359 = vmatprep.mubr.f32.mxu1 %v2961_v32  ;;  %vm13283_vm15 = vnez %v13282_v55  ;;  %v2535_v62 = vsel %vm13156_vm4, %v2439_v8, 0.0  ;;  %v10075_v51 = vpop.f32.mrb[36].mxu0 }
 0x289   : > { %2624 = vrot.lane.b32.xlu0 %v2533_v13, %s7384_s16  ;;  %3360 = vmatmul.mubr.f32.gmra.mrb[28].mxu1 %v2960_v24  ;;  %2409 = vst.msk [vmem:[#allocation3 + $0x4f0] sm:$0xff] %vm13281_vm3, %v2377_v4  ;;  %vm13286_vm2 = vmand %vm13283_vm15, %vm13285_vm7  ;;  %v10078_v32 = vpop.f32.mrb[37].mxu0  ;;  %v2441_v4 = vld [vmem:[#allocation2 + $0x120] sm:$0xff] }
 0x28a   : > { %v1258_v44 = vpop.permute.xlu1 %1257  ;;  %3364 = vmatprep.mubr.f32.mxu1 %v2966_v26  ;;  %v3996_v43 = vsel %vm13286_vm2, %v3964_v31, 0.0  ;;  %vm13290_vm2 = vnez %v13053_v35  ;;  %v7363_v26 = vld [vmem:[#allocation2 + $0x109] sm:$0xff]  ;;  %v10085_v8 = vpop.f32.mrb[38].mxu0  ;;  %vm13294_vm3 = vmmov %vm13289_vm0 }
 0x28b   : > { %1338 = vst.msk [vmem:[#allocation3 + $0x280] sm:$0xff] %vm13287_vm8, %v1258_v44  ;;  %v1771_v60 = vpop.permute.xlu0 %1770  ;;  %v2536_v13 = vsel %vm13290_vm2, %v2440_v61, 0.0  ;;  %v10088_v31 = vpop.f32.mrb[39].mxu0  ;;  %v3965_v44 = vld [vmem:[#allocation4 + $0xf] sm:$0xff]  ;;  %vm13297_vm2 = vmmov %vm13294_vm3 }
 0x28c   : > { %4028 = vst.msk [vmem:[#allocation5] sm:$0xff] %vm13288_vm11, %v3996_v43  ;;  %2114 = vrot.lane.b32.xlu1 %v7362_v18, %s7384_s16  ;;  %vm13291_vm11 = vmmov %vm13289_vm0  ;;  %v4060_v61 = vld [vmem:[#allocation4 + $0x8] sm:$0xff]  ;;  %v13292_v18 = vld [vmem:[#allocation6_spill] sm:$0xff] }
 0x28d   : > { %1850 = vst.msk [vmem:[#allocation3 + $0x288] sm:$0xff] %vm13289_vm0, %v1771_v60  ;;  %2628 = vrot.lane.b32.xlu0 %v2535_v62, %s7384_s16  ;;  %3365 = vmatmul.mubr.f32.gmra.mrb[30].mxu1 %v2965_v48  ;;  %v2537_v60 = vsel %vm9670_vm14, %v2441_v4, 0.0  ;;  %vm13293_vm8 = vnez %v13292_v18  ;;  %v10100_v4 = vpop.f32.mrb[40].mxu0  ;;  %vm13302_vm14 = vmmov %vm13297_vm2 }
 0x28e   : > { %v2085_v45 = vpop.permute.xlu1 %2084  ;;  %v3997_v62 = vsel %vm13293_vm8, %v3965_v44, 0.0  ;;  %vm13328_vm4 = vmmov %vm13297_vm2 }
 0x28f   : > { %2167 = vst.msk [vmem:[#allocation3 + $0x218] sm:$0xff] %vm13291_vm11, %v2085_v45  ;;  %v2599_v24 = vpop.permute.xlu0 %2598  ;;  %v7364_v45 = vld [vmem:[#allocation2 + $0x111] sm:$0xff]  ;;  %vm13295_vm11 = vnez %v13034_v25  ;;  %v2976_v44 = vld [vmem:[#allocation3 + $0x2b0] sm:$0xff] }
 0x290   : > { %2680 = vst.msk [vmem:[#allocation3 + $0x248] sm:$0xff] %vm13289_vm0, %v2599_v24  ;;  %2118 = vrot.lane.b32.xlu1 %v7363_v26, %s7384_s16  ;;  %v2025_v24 = vsel %vm13295_vm11, %v7364_v45, 0.0  ;;  %vm13296_vm0 = vcmask 261120   ;;  %v10105_v45 = vpop.f32.mrb[41].mxu0  ;;  %vm13307_vm11 = vmmov %vm13297_vm2 }
 0x291   : > { %2630 = vrot.lane.b32.xlu0 %v2536_v13, %s7384_s16  ;;  %4029 = vst.msk [vmem:[#allocation5 + $0x18] sm:$0xff] %vm13296_vm0, %v3997_v62  ;;  %v4285_v62 = vld [vmem:[#allocation4 + $0x9] sm:$0xff]  ;;  %vm13299_vm0 = vnez %v13111_v47 }
 0x292   : > { %v1264_v43 = vpop.permute.xlu1 %1263  ;;  %v2970_v13 = vld [vmem:[#allocation3 + $0x280] sm:$0xff] }
 0x293   : > { %1341 = vst.msk [vmem:[#allocation3 + $0x2f8] sm:$0xff] %vm13294_vm3, %v1264_v43  ;;  %v1777_v48 = vpop.permute.xlu0 %1776  ;;  %v4092_v43 = vsel %vm13283_vm15, %v4060_v61, 0.0  ;;  %vm13298_vm3 = vmmov %vm13297_vm2  ;;  %v4317_v61 = vsel %vm13283_vm15, %v4285_v62, 0.0 }
 0x294   : > { %v2971_v26 = vld [vmem:[#allocation3 + $0x288] sm:$0xff]  ;;  %1853 = vst.msk [vmem:[#allocation3 + $0x300] sm:$0xff] %vm13297_vm2, %v1777_v48  ;;  %2120 = vrot.lane.b32.xlu1 %v2025_v24, %s7384_s16  ;;  %vm13301_vm15 = vmmov %vm13297_vm2 }
 0x295   : > { %3369 = vmatprep.mubr.f32.mxu1 %v2971_v26  ;;  %2632 = vrot.lane.b32.xlu0 %v2537_v60, %s7384_s16  ;;  %v2534_v60 = vsel %vm13299_vm0, %v2438_v5, 0.0  ;;  %v2975_v24 = vld [vmem:[#allocation3 + $0x2a8] sm:$0xff]  ;;  %v10112_v26 = vpop.f32.mrb[42].mxu0 }
 0x296   : > { %3370 = vmatmul.mubr.f32.gmra.mrb[32].mxu1 %v2970_v13  ;;  %v1262_v35 = vpop.permute.xlu1 %1261  ;;  %v10117_v13 = vpop.f32.mrb[43].mxu0 }
 0x297   : > { %3374 = vmatprep.mubr.f32.mxu1 %v2976_v44  ;;  %1340 = vst.msk [vmem:[#allocation3 + $0x2d0] sm:$0xff] %vm13297_vm2, %v1262_v35  ;;  %v1775_v48 = vpop.permute.xlu0 %1774  ;;  %v4061_v44 = vld [vmem:[#allocation4 + $0x10] sm:$0xff]  ;;  %v10122_v5 = vpop.f32.mrb[44].mxu0 }
 0x298   : > { %1852 = vst.msk [vmem:[#allocation3 + $0x2d8] sm:$0xff] %vm13298_vm3, %v1775_v48  ;;  %4156 = vrot.lane.b32.xlu1 %v4092_v43, %s7386_s11  ;;  %vm13300_vm3 = vmmov %vm13297_vm2  ;;  %v4093_v43 = vsel %vm13293_vm8, %v4061_v44, 0.0 }
 0x299   : > { %2626 = vrot.lane.b32.xlu0 %v2534_v60, %s7384_s16  ;;  %v10126_v60 = vpop.f32.mrb[45].mxu0 }
 0x29a   : > { %3375 = vmatmul.mubr.f32.gmra.mrb[34].mxu1 %v2975_v24  ;;  %v1268_v35 = vpop.permute.xlu1 %1267 }
 0x29b   : > { %1343 = vst.msk [vmem:[#allocation3 + $0x348] sm:$0xff] %vm13297_vm2, %v1268_v35  ;;  %v1781_v48 = vpop.permute.xlu0 %1780 }
 0x29c   : > { %1855 = vst.msk [vmem:[#allocation3 + $0x350] sm:$0xff] %vm13300_vm3, %v1781_v48  ;;  %4381 = vrot.lane.b32.xlu1 %v4317_v61, %s7384_s16  ;;  %v10131_v48 = vpop.f32.mrb[46].mxu0  ;;  %v2986_v61 = vld [vmem:[#allocation3 + $0x300] sm:$0xff]  ;;  %vm13303_vm3 = vnez %v12847_v11 }
 0x29d   : > { %v10133_v25 = vpop.f32.mrb[47].mxu0 }
 0x29e   : > { %v1266_v55 = vpop.permute.xlu1 %1265  ;;  %v2980_v35 = vld [vmem:[#allocation3 + $0x2d0] sm:$0xff] }
 0x29f   : > { %1342 = vst.msk [vmem:[#allocation3 + $0x320] sm:$0xff] %vm13301_vm15, %v1266_v55  ;;  %v1779_v62 = vpop.permute.xlu0 %1778  ;;  %v2981_v24 = vld [vmem:[#allocation3 + $0x2d8] sm:$0xff]  ;;  %vm13305_vm15 = vmmov %vm13297_vm2 }
 0x2a0   : > { %1854 = vst.msk [vmem:[#allocation3 + $0x328] sm:$0xff] %vm13302_vm14, %v1779_v62  ;;  %4158 = vrot.lane.b32.xlu1 %v4093_v43, %s7386_s11  ;;  %3379 = vmatprep.mubr.f32.mxu1 %v2981_v24  ;;  %v7365_v55 = vld [vmem:[#allocation2 + $0x101] sm:$0xff]  ;;  %vm13304_vm14 = vmmov %vm13297_vm2  ;;  %v10140_v62 = vpop.f32.mrb[48].mxu0 }
 0x2a1   : > { %3380 = vmatmul.mubr.f32.gmra.mrb[36].mxu1 %v2980_v35  ;;  %v2023_v47 = vsel %vm13303_vm3, %v7365_v55, 0.0  ;;  %v2985_v43 = vld [vmem:[#allocation3 + $0x2f8] sm:$0xff]  ;;  %v10142_v24 = vpop.f32.mrb[49].mxu0  ;;  %vm13319_vm3 = vmmov %vm13297_vm2 }
 0x2a2   : > { %v1272_v44 = vpop.permute.xlu1 %1271  ;;  %3384 = vmatprep.mubr.f32.mxu1 %v2986_v61  ;;  %v10146_v55 = vpop.f32.mrb[50].mxu0 }
 0x2a3   : > { %1345 = vst.msk [vmem:[#allocation3 + $0x398] sm:$0xff] %vm13297_vm2, %v1272_v44  ;;  %v1785_v40 = vpop.permute.xlu0 %1784 }
 0x2a4   : > { %1857 = vst.msk [vmem:[#allocation3 + $0x3a0] sm:$0xff] %vm13304_vm14, %v1785_v40  ;;  %2116 = vrot.lane.b32.xlu1 %v2023_v47, %s7384_s16  ;;  %v2996_v40 = vld [vmem:[#allocation3 + $0x350] sm:$0xff]  ;;  %v10148_v47 = vpop.f32.mrb[51].mxu0  ;;  %vm13306_vm14 = vmmov %vm13297_vm2 }
 0x2a5   : > { %3385 = vmatmul.mubr.f32.gmra.mrb[38].mxu1 %v2985_v43  ;;  %v10152_v50 = vpop.f32.mrb[52].mxu0 }
 0x2a6   : > { %v1270_v35 = vpop.permute.xlu1 %1269  ;;  %v2990_v11 = vld [vmem:[#allocation3 + $0x320] sm:$0xff] }
 0x2a7   : > { %1344 = vst.msk [vmem:[#allocation3 + $0x370] sm:$0xff] %vm13305_vm15, %v1270_v35  ;;  %v1783_v61 = vpop.permute.xlu0 %1782  ;;  %v2991_v44 = vld [vmem:[#allocation3 + $0x328] sm:$0xff]  ;;  %vm13308_vm15 = vmmov %vm13297_vm2 }
 0x2a8   : > { %1856 = vst.msk [vmem:[#allocation3 + $0x378] sm:$0xff] %vm13297_vm2, %v1783_v61  ;;  %3389 = vmatprep.mubr.f32.mxu1 %v2991_v44  ;;  %v2995_v35 = vld [vmem:[#allocation3 + $0x348] sm:$0xff]  ;;  %v10154_v61 = vpop.f32.mrb[53].mxu0 }
 0x2a9   : > { %3390 = vmatmul.mubr.f32.gmra.mrb[40].mxu1 %v2990_v11  ;;  %v10158_v6 = vpop.f32.mrb[54].mxu0 }
 0x2aa   : > { %v1276_v22 = vpop.permute.xlu1 %1275  ;;  %3394 = vmatprep.mubr.f32.mxu1 %v2996_v40 }
 0x2ab   : > { %1347 = vst.msk [vmem:[#allocation3 + $0x3e8] sm:$0xff] %vm13306_vm14, %v1276_v22  ;;  %v1789_v43 = vpop.permute.xlu0 %1788  ;;  %v3006_v22 = vld [vmem:[#allocation3 + $0x3a0] sm:$0xff]  ;;  %vm13310_vm14 = vmmov %vm13297_vm2 }
 0x2ac   : > { %1859 = vst.msk [vmem:[#allocation3 + $0x3f0] sm:$0xff] %vm13307_vm11, %v1789_v43  ;;  %v10160_v43 = vpop.f32.mrb[55].mxu0  ;;  %vm13309_vm11 = vmmov %vm13297_vm2 }
 0x2ad   : > { %3395 = vmatmul.mubr.f32.gmra.mrb[42].mxu1 %v2995_v35  ;;  %v10164_v3 = vpop.f32.mrb[56].mxu0 }
 0x2ae   : > { %v1274_v44 = vpop.permute.xlu1 %1273  ;;  %v3000_v40 = vld [vmem:[#allocation3 + $0x370] sm:$0xff] }
 0x2af   : > { %1346 = vst.msk [vmem:[#allocation3 + $0x3c0] sm:$0xff] %vm13308_vm15, %v1274_v44  ;;  %v1787_v11 = vpop.permute.xlu0 %1786  ;;  %v3001_v33 = vld [vmem:[#allocation3 + $0x378] sm:$0xff]  ;;  %vm13311_vm15 = vmmov %vm13297_vm2 }
 0x2b0   : > { %1858 = vst.msk [vmem:[#allocation3 + $0x3c8] sm:$0xff] %vm13297_vm2, %v1787_v11  ;;  %3399 = vmatprep.mubr.f32.mxu1 %v3001_v33  ;;  %v3005_v44 = vld [vmem:[#allocation3 + $0x398] sm:$0xff]  ;;  %v10166_v11 = vpop.f32.mrb[57].mxu0 }
 0x2b1   : > { %3400 = vmatmul.mubr.f32.gmra.mrb[44].mxu1 %v3000_v40  ;;  %v10170_v63 = vpop.f32.mrb[58].mxu0 }
 0x2b2   : > { %v1280_v9 = vpop.permute.xlu1 %1279  ;;  %3404 = vmatprep.mubr.f32.mxu1 %v3006_v22 }
 0x2b3   : > { %1349 = vst.msk [vmem:[#allocation3 + $0x438] sm:$0xff] %vm13309_vm11, %v1280_v9  ;;  %v1793_v35 = vpop.permute.xlu0 %1792  ;;  %v3016_v9 = vld [vmem:[#allocation3 + $0x3f0] sm:$0xff]  ;;  %vm13312_vm11 = vmmov %vm13297_vm2 }
 0x2b4   : > { %1861 = vst.msk [vmem:[#allocation3 + $0x440] sm:$0xff] %vm13310_vm14, %v1793_v35  ;;  %v10172_v35 = vpop.f32.mrb[59].mxu0  ;;  %vm13313_vm14 = vmmov %vm13297_vm2 }
 0x2b5   : > { %3405 = vmatmul.mubr.f32.gmra.mrb[46].mxu1 %v3005_v44  ;;  %v10176_v56 = vpop.f32.mrb[60].mxu0 }
 0x2b6   : > { %v1278_v33 = vpop.permute.xlu1 %1277  ;;  %v3010_v22 = vld [vmem:[#allocation3 + $0x3c0] sm:$0xff]  ;;  %13314 = vst [vmem:[#allocation42_spill] sm:$0xff] %v10176_v56 }
 0x2b7   : > { %1348 = vst.msk [vmem:[#allocation3 + $0x410] sm:$0xff] %vm13311_vm15, %v1278_v33  ;;  %v1791_v40 = vpop.permute.xlu0 %1790  ;;  %v3011_v28 = vld [vmem:[#allocation3 + $0x3c8] sm:$0xff]  ;;  %vm13316_vm15 = vmmov %vm13297_vm2 }
 0x2b8   : > { %1860 = vst.msk [vmem:[#allocation3 + $0x418] sm:$0xff] %vm13297_vm2, %v1791_v40  ;;  %3409 = vmatprep.mubr.f32.mxu1 %v3011_v28  ;;  %v3015_v33 = vld [vmem:[#allocation3 + $0x3e8] sm:$0xff]  ;;  %v10178_v40 = vpop.f32.mrb[61].mxu0 }
 0x2b9   : > { %3410 = vmatmul.mubr.f32.gmra.mrb[48].mxu1 %v3010_v22  ;;  %13315 = vst [vmem:[#allocation57_spill] sm:$0xff] %v10178_v40 }
 0x2ba   : > { %v1284_v58 = vpop.permute.xlu1 %1283  ;;  %3414 = vmatprep.mubr.f32.mxu1 %v3016_v9 }
 0x2bb   : > { %1351 = vst.msk [vmem:[#allocation3 + $0x488] sm:$0xff] %vm13312_vm11, %v1284_v58  ;;  %v1797_v44 = vpop.permute.xlu0 %1796  ;;  %v3026_v58 = vld [vmem:[#allocation3 + $0x440] sm:$0xff]  ;;  %vm13317_vm11 = vmmov %vm13297_vm2 }
 0x2bc   : > { %1863 = vst.msk [vmem:[#allocation3 + $0x490] sm:$0xff] %vm13313_vm14, %v1797_v44  ;;  %vm13318_vm14 = vmmov %vm13297_vm2 }
 0x2bd   : > { %3415 = vmatmul.mubr.f32.gmra.mrb[50].mxu1 %v3015_v33  ;;  %v3025_v33 = vld [vmem:[#allocation3 + $0x438] sm:$0xff] }
 0x2be   : > { %v1282_v28 = vpop.permute.xlu1 %1281  ;;  %v3020_v9 = vld [vmem:[#allocation3 + $0x410] sm:$0xff] }
 0x2bf   : > { %1350 = vst.msk [vmem:[#allocation3 + $0x460] sm:$0xff] %vm13316_vm15, %v1282_v28  ;;  %v1795_v22 = vpop.permute.xlu0 %1794  ;;  %v3021_v49 = vld [vmem:[#allocation3 + $0x418] sm:$0xff]  ;;  %vm13320_vm15 = vmmov %vm13297_vm2 }
 0x2c0   : > { %1862 = vst.msk [vmem:[#allocation3 + $0x468] sm:$0xff] %vm13297_vm2, %v1795_v22  ;;  %3419 = vmatprep.mubr.f32.mxu1 %v3021_v49 }
 0x2c1   : > { %3420 = vmatmul.mubr.f32.gmra.mrb[52].mxu1 %v3020_v9 }
 0x2c2   : > { %v1288_v19 = vpop.permute.xlu1 %1287  ;;  %3424 = vmatprep.mubr.f32.mxu1 %v3026_v58  ;;  %v3035_v58 = vld [vmem:[#allocation3 + $0x488] sm:$0xff] }
 0x2c3   : > { %1353 = vst.msk [vmem:[#allocation3 + $0x4d8] sm:$0xff] %vm13317_vm11, %v1288_v19  ;;  %v1801_v44 = vpop.permute.xlu0 %1800  ;;  %v3036_v22 = vld [vmem:[#allocation3 + $0x490] sm:$0xff]  ;;  %vm13321_vm11 = vmmov %vm13297_vm2 }
 0x2c4   : > { %1865 = vst.msk [vmem:[#allocation3 + $0x4e0] sm:$0xff] %vm13318_vm14, %v1801_v44  ;;  %vm13322_vm14 = vmmov %vm13297_vm2 }
 0x2c5   : > { %3425 = vmatmul.mubr.f32.gmra.mrb[54].mxu1 %v3025_v33 }
 0x2c6   : > { %v1286_v10 = vpop.permute.xlu1 %1285  ;;  %v3030_v49 = vld [vmem:[#allocation3 + $0x460] sm:$0xff] }
 0x2c7   : > { %1352 = vst.msk [vmem:[#allocation3 + $0x4b0] sm:$0xff] %vm13319_vm3, %v1286_v10  ;;  %v1799_v28 = vpop.permute.xlu0 %1798  ;;  %v3031_v56 = vld [vmem:[#allocation3 + $0x468] sm:$0xff]  ;;  %vm13323_vm3 = vmmov %vm13297_vm2 }
 0x2c8   : > { %1864 = vst.msk [vmem:[#allocation3 + $0x4b8] sm:$0xff] %vm13320_vm15, %v1799_v28  ;;  %3429 = vmatprep.mubr.f32.mxu1 %v3031_v56  ;;  %vm13324_vm15 = vcmask 523264  }
 0x2c9   : > { %3430 = vmatmul.mubr.f32.gmra.mrb[56].mxu1 %v3030_v49  ;;  %v3044_v49 = vld [vmem:[#allocation3 + $0x4d0] sm:$0xff] }
 0x2ca   : > { %v2089_v9 = vpop.permute.xlu1 %2088  ;;  %3434 = vmatprep.mubr.f32.mxu1 %v3036_v22  ;;  %v3049_v22 = vld [vmem:[#allocation3 + $0x4f8] sm:$0xff]  ;;  %6776 = vmatprep.mubr.msk.f32.mxu0 %vm13324_vm15, %v3044_v49 }
 0x2cb   : > { %2169 = vst.msk [vmem:[#allocation3 + $0x268] sm:$0xff] %vm13297_vm2, %v2089_v9  ;;  %v2601_v19 = vpop.permute.xlu0 %2600  ;;  %v3046_v28 = vld [vmem:[#allocation3 + $0x4e0] sm:$0xff]  ;;  %v2897_v49 = vld [vmem:[#allocation3 + $0x38] sm:$0xff] }
 0x2cc   : > { %2681 = vst.msk [vmem:[#allocation3 + $0x270] sm:$0xff] %vm13321_vm11, %v2601_v19  ;;  %vm13325_vm11 = vmmov %vm13324_vm15  ;;  %v3045_v19 = vld [vmem:[#allocation3 + $0x4d8] sm:$0xff] }
 0x2cd   : > { %3435 = vmatmul.mubr.f32.gmra.mrb[58].mxu1 %v3035_v58  ;;  %6777 = vmatmul.mubr.msk.f32.gmra.mrb[62].mxu0 %vm13325_vm11, %v3049_v22  ;;  %v2893_v58 = vld [vmem:[#allocation3 + $0x18] sm:$0xff]  ;;  %vm13329_vm15 = vmmov %vm13297_vm2  ;;  %v2903_v22 = vld [vmem:[#allocation3 + $0x68] sm:$0xff] }
 0x2ce   : > { %v2091_v44 = vpop.permute.xlu1 %2090  ;;  %v3040_v56 = vld [vmem:[#allocation3 + $0x4b0] sm:$0xff]  ;;  %vm13330_vm11 = vmmov %vm13297_vm2 }
 0x2cf   : > { %2170 = vst.msk [vmem:[#allocation3 + $0x290] sm:$0xff] %vm13322_vm14, %v2091_v44  ;;  %v2603_v10 = vpop.permute.xlu0 %2602  ;;  %v3041_v33 = vld [vmem:[#allocation3 + $0x4b8] sm:$0xff]  ;;  %vm13326_vm14 = vmmov %vm13297_vm2 }
 0x2d0   : > { %2682 = vst.msk [vmem:[#allocation3 + $0x298] sm:$0xff] %vm13323_vm3, %v2603_v10  ;;  %3439 = vmatprep.mubr.f32.mxu1 %v3041_v33  ;;  %vm13327_vm3 = vmmov %vm13297_vm2  ;;  %v2892_v33 = vld [vmem:[#allocation3 + $0x10] sm:$0xff] }
 0x2d1   : > { %3440 = vmatmul.mubr.f32.gmra.mrb[60].mxu1 %v3040_v56  ;;  %v2898_v56 = vld [vmem:[#allocation3 + $0x40] sm:$0xff] }
 0x2d2   : > { %v2093_v0 = vpop.permute.xlu1 %2092  ;;  %3444 = vmatprep.mubr.f32.mxu1 %v3046_v28 }
 0x2d3   : > { %2171 = vst.msk [vmem:[#allocation3 + $0x2b8] sm:$0xff] %vm13297_vm2, %v2093_v0  ;;  %v2605_v9 = vpop.permute.xlu0 %2604 }
 0x2d4   : > { %2683 = vst.msk [vmem:[#allocation3 + $0x2c0] sm:$0xff] %vm13326_vm14, %v2605_v9  ;;  %vm13331_vm14 = vmmov %vm13297_vm2 }
 0x2d5   : > { %3445 = vmatmul.mubr.f32.gmra.mrb[62].mxu1 %v3045_v19 }
 0x2d6   : > { %v2095_v44 = vpop.permute.xlu1 %2094  ;;  %3514 = vmatprep.mubr.f32.mxu1 %v2893_v58  ;;  %v2902_v58 = vld [vmem:[#allocation3 + $0x60] sm:$0xff] }
 0x2d7   : > { %2172 = vst.msk [vmem:[#allocation3 + $0x2e0] sm:$0xff] %vm13327_vm3, %v2095_v44  ;;  %v2607_v10 = vpop.permute.xlu0 %2606  ;;  %v2908_v44 = vld [vmem:[#allocation3 + $0x90] sm:$0xff]  ;;  %vm13333_vm3 = vmmov %vm13297_vm2 }
 0x2d8   : > { %2684 = vst.msk [vmem:[#allocation3 + $0x2e8] sm:$0xff] %vm13328_vm4, %v2607_v10  ;;  %vm13332_vm4 = vmmov %vm13297_vm2 }
 0x2d9   : > { %3515 = vmatmul.mubr.f32.vlgmr.msra.gmra.mrb[0].mxu1 %v2892_v33 }
 0x2da   : > { %v2097_v28 = vpop.permute.xlu1 %2096  ;;  %3519 = vmatprep.mubr.f32.mxu1 %v2898_v56  ;;  %v2907_v56 = vld [vmem:[#allocation3 + $0x88] sm:$0xff] }
 0x2db   : > { %2173 = vst.msk [vmem:[#allocation3 + $0x308] sm:$0xff] %vm13329_vm15, %v2097_v28  ;;  %v2609_v0 = vpop.permute.xlu0 %2608  ;;  %v2913_v28 = vld [vmem:[#allocation3 + $0xb8] sm:$0xff]  ;;  %vm13334_vm15 = vmmov %vm13297_vm2 }
 0x2dc   : > { %2685 = vst.msk [vmem:[#allocation3 + $0x310] sm:$0xff] %vm13297_vm2, %v2609_v0 }
 0x2dd   : > { %3520 = vmatmul.mubr.f32.gmra.mrb[2].mxu1 %v2897_v49 }
 0x2de   : > { %v2099_v9 = vpop.permute.xlu1 %2098  ;;  %3524 = vmatprep.mubr.f32.mxu1 %v2903_v22  ;;  %v2912_v22 = vld [vmem:[#allocation3 + $0xb0] sm:$0xff] }
 0x2df   : > { %2174 = vst.msk [vmem:[#allocation3 + $0x330] sm:$0xff] %vm13330_vm11, %v2099_v9  ;;  %v2611_v19 = vpop.permute.xlu0 %2610  ;;  %v2918_v9 = vld [vmem:[#allocation3 + $0xe0] sm:$0xff]  ;;  %vm13335_vm11 = vmmov %vm13297_vm2 }
 0x2e0   : > { %2686 = vst.msk [vmem:[#allocation3 + $0x338] sm:$0xff] %vm13331_vm14, %v2611_v19  ;;  %vm13336_vm14 = vmmov %vm13297_vm2 }
 0x2e1   : > { %3525 = vmatmul.mubr.f32.gmra.mrb[4].mxu1 %v2902_v58 }
 0x2e2   : > { %v2101_v10 = vpop.permute.xlu1 %2100  ;;  %3529 = vmatprep.mubr.f32.mxu1 %v2908_v44  ;;  %v2917_v44 = vld [vmem:[#allocation3 + $0xd8] sm:$0xff] }
 0x2e3   : > { %2175 = vst.msk [vmem:[#allocation3 + $0x358] sm:$0xff] %vm13332_vm4, %v2101_v10  ;;  %v2613_v33 = vpop.permute.xlu0 %2612  ;;  %v2923_v10 = vld [vmem:[#allocation3 + $0x108] sm:$0xff]  ;;  %vm13337_vm4 = vmmov %vm13297_vm2 }
 0x2e4   : > { %2687 = vst.msk [vmem:[#allocation3 + $0x360] sm:$0xff] %vm13333_vm3, %v2613_v33  ;;  %vm13338_vm3 = vmmov %vm13297_vm2 }
 0x2e5   : > { %3530 = vmatmul.mubr.f32.gmra.mrb[6].mxu1 %v2907_v56 }
 0x2e6   : > { %v2103_v0 = vpop.permute.xlu1 %2102  ;;  %3534 = vmatprep.mubr.f32.mxu1 %v2913_v28  ;;  %v2922_v28 = vld [vmem:[#allocation3 + $0x100] sm:$0xff] }
 0x2e7   : > { %2176 = vst.msk [vmem:[#allocation3 + $0x380] sm:$0xff] %vm13334_vm15, %v2103_v0  ;;  %v2615_v49 = vpop.permute.xlu0 %2614  ;;  %v2928_v0 = vld [vmem:[#allocation3 + $0x130] sm:$0xff]  ;;  %vm13339_vm15 = vmmov %vm13297_vm2 }
 0x2e8   : > { %2688 = vst.msk [vmem:[#allocation3 + $0x388] sm:$0xff] %vm13297_vm2, %v2615_v49 }
 0x2e9   : > { %3535 = vmatmul.mubr.f32.gmra.mrb[8].mxu1 %v2912_v22 }
 0x2ea   : > { %v2105_v19 = vpop.permute.xlu1 %2104  ;;  %3539 = vmatprep.mubr.f32.mxu1 %v2918_v9  ;;  %v2927_v9 = vld [vmem:[#allocation3 + $0x128] sm:$0xff] }
 0x2eb   : > { %2177 = vst.msk [vmem:[#allocation3 + $0x3a8] sm:$0xff] %vm13335_vm11, %v2105_v19  ;;  %v2617_v58 = vpop.permute.xlu0 %2616  ;;  %v2933_v19 = vld [vmem:[#allocation3 + $0x158] sm:$0xff]  ;;  %vm13340_vm11 = vmmov %vm13297_vm2 }
 0x2ec   : > { %2689 = vst.msk [vmem:[#allocation3 + $0x3b0] sm:$0xff] %vm13336_vm14, %v2617_v58  ;;  %vm13341_vm14 = vmmov %vm13297_vm2 }
 0x2ed   : > { %3540 = vmatmul.mubr.f32.gmra.mrb[10].mxu1 %v2917_v44 }
 0x2ee   : > { %v2107_v33 = vpop.permute.xlu1 %2106  ;;  %3544 = vmatprep.mubr.f32.mxu1 %v2923_v10  ;;  %v2932_v10 = vld [vmem:[#allocation3 + $0x150] sm:$0xff] }
 0x2ef   : > { %2178 = vst.msk [vmem:[#allocation3 + $0x3d0] sm:$0xff] %vm13337_vm4, %v2107_v33  ;;  %v2619_v56 = vpop.permute.xlu0 %2618  ;;  %v2938_v33 = vld [vmem:[#allocation3 + $0x180] sm:$0xff]  ;;  %vm13342_vm4 = vmmov %vm13297_vm2 }
 0x2f0   : > { %2690 = vst.msk [vmem:[#allocation3 + $0x3d8] sm:$0xff] %vm13338_vm3, %v2619_v56  ;;  %vm13343_vm3 = vmmov %vm13297_vm2 }
 0x2f1   : > { %3545 = vmatmul.mubr.f32.gmra.mrb[12].mxu1 %v2922_v28 }
 0x2f2   : > { %v2109_v49 = vpop.permute.xlu1 %2108  ;;  %3549 = vmatprep.mubr.f32.mxu1 %v2928_v0  ;;  %v2937_v0 = vld [vmem:[#allocation3 + $0x178] sm:$0xff] }
 0x2f3   : > { %2179 = vst.msk [vmem:[#allocation3 + $0x3f8] sm:$0xff] %vm13339_vm15, %v2109_v49  ;;  %v2621_v22 = vpop.permute.xlu0 %2620  ;;  %v2943_v49 = vld [vmem:[#allocation3 + $0x1a8] sm:$0xff]  ;;  %vm13344_vm15 = vmmov %vm13297_vm2 }
 0x2f4   : > { %2691 = vst.msk [vmem:[#allocation3 + $0x400] sm:$0xff] %vm13297_vm2, %v2621_v22 }
 0x2f5   : > { %3550 = vmatmul.mubr.f32.gmra.mrb[14].mxu1 %v2927_v9 }
 0x2f6   : > { %v2111_v58 = vpop.permute.xlu1 %2110  ;;  %3554 = vmatprep.mubr.f32.mxu1 %v2933_v19  ;;  %v2942_v19 = vld [vmem:[#allocation3 + $0x1a0] sm:$0xff] }
 0x2f7   : > { %2180 = vst.msk [vmem:[#allocation3 + $0x420] sm:$0xff] %vm13340_vm11, %v2111_v58  ;;  %v2623_v44 = vpop.permute.xlu0 %2622  ;;  %v2948_v58 = vld [vmem:[#allocation3 + $0x1d0] sm:$0xff]  ;;  %vm13345_vm11 = vmmov %vm13297_vm2 }
 0x2f8   : > { %2692 = vst.msk [vmem:[#allocation3 + $0x428] sm:$0xff] %vm13341_vm14, %v2623_v44  ;;  %vm13346_vm14 = vmmov %vm13297_vm2 }
 0x2f9   : > { %3555 = vmatmul.mubr.f32.gmra.mrb[16].mxu1 %v2932_v10 }
 0x2fa   : > { %v2113_v56 = vpop.permute.xlu1 %2112  ;;  %3559 = vmatprep.mubr.f32.mxu1 %v2938_v33  ;;  %v2947_v33 = vld [vmem:[#allocation3 + $0x1c8] sm:$0xff] }
 0x2fb   : > { %2181 = vst.msk [vmem:[#allocation3 + $0x448] sm:$0xff] %vm13342_vm4, %v2113_v56  ;;  %v2625_v28 = vpop.permute.xlu0 %2624  ;;  %v2953_v56 = vld [vmem:[#allocation3 + $0x1f8] sm:$0xff]  ;;  %vm13347_vm4 = vmmov %vm13297_vm2 }
 0x2fc   : > { %2693 = vst.msk [vmem:[#allocation3 + $0x450] sm:$0xff] %vm13343_vm3, %v2625_v28  ;;  %vm13348_vm3 = vmmov %vm13297_vm2 }
 0x2fd   : > { %3560 = vmatmul.mubr.f32.gmra.mrb[18].mxu1 %v2937_v0 }
 0x2fe   : > { %v2115_v22 = vpop.permute.xlu1 %2114  ;;  %3564 = vmatprep.mubr.f32.mxu1 %v2943_v49  ;;  %v2952_v49 = vld [vmem:[#allocation3 + $0x1f0] sm:$0xff] }
 0x2ff   : > { %2182 = vst.msk [vmem:[#allocation3 + $0x470] sm:$0xff] %vm13344_vm15, %v2115_v22  ;;  %v2629_v9 = vpop.permute.xlu0 %2628  ;;  %vm12433_vm15 = vcmask 523520   ;;  %v2958_v22 = vld [vmem:[#allocation3 + $0x220] sm:$0xff] }
 0x300   : > { %2695 = vst.msk [vmem:[#allocation3 + $0x4a0] sm:$0xff] %vm13297_vm2, %v2629_v9 }
 0x301   : > { %3565 = vmatmul.mubr.f32.gmra.mrb[20].mxu1 %v2942_v19 }
 0x302   : > { %v2119_v44 = vpop.permute.xlu1 %2118  ;;  %3569 = vmatprep.mubr.f32.mxu1 %v2948_v58  ;;  %v2957_v58 = vld [vmem:[#allocation3 + $0x218] sm:$0xff] }
 0x303   : > { %2184 = vst.msk [vmem:[#allocation3 + $0x4c0] sm:$0xff] %vm13345_vm11, %v2119_v44  ;;  %v2631_v10 = vpop.permute.xlu0 %2630  ;;  %vm12432_vm11 = vcmask 785920   ;;  %v2963_v44 = vld [vmem:[#allocation3 + $0x248] sm:$0xff] }
 0x304   : > { %2696 = vst.msk [vmem:[#allocation3 + $0x4c8] sm:$0xff] %vm13346_vm14, %v2631_v10  ;;  %vm13349_vm14 = vmmov %vm13297_vm2 }
 0x305   : > { %3570 = vmatmul.mubr.f32.gmra.mrb[22].mxu1 %v2947_v33  ;;  %v2962_v33 = vld [vmem:[#allocation3 + $0x240] sm:$0xff] }
 0x306   : > { %v2121_v28 = vpop.permute.xlu1 %2120  ;;  %3574 = vmatprep.mubr.f32.mxu1 %v2953_v56  ;;  %v2968_v56 = vld [vmem:[#allocation3 + $0x270] sm:$0xff] }
 0x307   : > { %2185 = vst.msk [vmem:[#allocation3 + $0x4e8] sm:$0xff] %vm13347_vm4, %v2121_v28  ;;  %v2633_v0 = vpop.permute.xlu0 %2632  ;;  %vm13352_vm4 = vcmask 261120  }
 0x308   : > { %2697 = vst.msk [vmem:[#allocation3 + $0x4f0] sm:$0xff] %vm13348_vm3, %v2633_v0  ;;  %v2967_v0 = vld [vmem:[#allocation3 + $0x268] sm:$0xff]  ;;  %vm13353_vm3 = vmmov %vm13352_vm4 }
 0x309   : > { %3575 = vmatmul.mubr.f32.gmra.mrb[24].mxu1 %v2952_v49  ;;  %v2973_v49 = vld [vmem:[#allocation3 + $0x298] sm:$0xff] }
 0x30a   : > { %v4157_v9 = vpop.permute.xlu1 %4156  ;;  %3579 = vmatprep.mubr.f32.mxu1 %v2958_v22 }
 0x30b   : > { %4253 = vst.msk [vmem:[#allocation5] sm:$0xff] %vm12433_vm15, %v4157_v9  ;;  %v2627_v19 = vpop.permute.xlu0 %2626  ;;  %v2972_v9 = vld [vmem:[#allocation3 + $0x290] sm:$0xff] }
 0x30c   : > { %2694 = vst.msk [vmem:[#allocation3 + $0x478] sm:$0xff] %vm13297_vm2, %v2627_v19  ;;  %v2978_v19 = vld [vmem:[#allocation3 + $0x2c0] sm:$0xff]  ;;  %vm13354_vm2 = vmmov %vm13353_vm3 }
 0x30d   : > { %3580 = vmatmul.mubr.f32.gmra.mrb[26].mxu1 %v2957_v58  ;;  %v2977_v58 = vld [vmem:[#allocation3 + $0x2b8] sm:$0xff] }
 0x30e   : > { %v4382_v10 = vpop.permute.xlu1 %4381  ;;  %3584 = vmatprep.mubr.f32.mxu1 %v2963_v44  ;;  %v2983_v44 = vld [vmem:[#allocation3 + $0x2e8] sm:$0xff] }
 0x30f   : > { %4478 = vst.msk [vmem:[#allocation5] sm:$0xff] %vm12432_vm11, %v4382_v10  ;;  %v2982_v10 = vld [vmem:[#allocation3 + $0x2e0] sm:$0xff] }
 0x311   : > { %3585 = vmatmul.mubr.f32.gmra.mrb[28].mxu1 %v2962_v33  ;;  %v2988_v33 = vld [vmem:[#allocation3 + $0x310] sm:$0xff] }
 0x312   : > { %v4159_v28 = vpop.permute.xlu1 %4158  ;;  %3589 = vmatprep.mubr.f32.mxu1 %v2968_v56  ;;  %v2987_v56 = vld [vmem:[#allocation3 + $0x308] sm:$0xff] }
 0x313   : > { %4254 = vst.msk [vmem:[#allocation5 + $0x18] sm:$0xff] %vm12433_vm15, %v4159_v28  ;;  %v2993_v28 = vld [vmem:[#allocation3 + $0x338] sm:$0xff] }
 0x315   : > { %3590 = vmatmul.mubr.f32.gmra.mrb[30].mxu1 %v2967_v0  ;;  %v2992_v0 = vld [vmem:[#allocation3 + $0x330] sm:$0xff] }
 0x316   : > { %v2117_v22 = vpop.permute.xlu1 %2116  ;;  %3594 = vmatprep.mubr.f32.mxu1 %v2973_v49  ;;  %v2998_v49 = vld [vmem:[#allocation3 + $0x360] sm:$0xff] }
 0x317   : > { %2183 = vst.msk [vmem:[#allocation3 + $0x498] sm:$0xff] %vm13349_vm14, %v2117_v22  ;;  %v2997_v22 = vld [vmem:[#allocation3 + $0x358] sm:$0xff]  ;;  %vm13355_vm14 = vmmov %vm13354_vm2 }
 0x319   : > { %3595 = vmatmul.mubr.f32.gmra.mrb[32].mxu1 %v2972_v9  ;;  %v3003_v9 = vld [vmem:[#allocation3 + $0x388] sm:$0xff] }
 0x31a   : > { %3599 = vmatprep.mubr.f32.mxu1 %v2978_v19  ;;  %v3002_v19 = vld [vmem:[#allocation3 + $0x380] sm:$0xff] }
 0x31d   : > { %3600 = vmatmul.mubr.f32.gmra.mrb[34].mxu1 %v2977_v58  ;;  %v3008_v58 = vld [vmem:[#allocation3 + $0x3b0] sm:$0xff] }
 0x31e   : > { %3604 = vmatprep.mubr.f32.mxu1 %v2983_v44  ;;  %v3007_v44 = vld [vmem:[#allocation3 + $0x3a8] sm:$0xff] }
 0x321   : > { %3605 = vmatmul.mubr.f32.gmra.mrb[36].mxu1 %v2982_v10  ;;  %v3013_v10 = vld [vmem:[#allocation3 + $0x3d8] sm:$0xff] }
 0x322   : > { %3609 = vmatprep.mubr.f32.mxu1 %v2988_v33  ;;  %v3012_v33 = vld [vmem:[#allocation3 + $0x3d0] sm:$0xff] }
 0x325   : > { %3610 = vmatmul.mubr.f32.gmra.mrb[38].mxu1 %v2987_v56  ;;  %v3018_v56 = vld [vmem:[#allocation3 + $0x400] sm:$0xff] }
 0x326   : > { %3614 = vmatprep.mubr.f32.mxu1 %v2993_v28  ;;  %v3017_v28 = vld [vmem:[#allocation3 + $0x3f8] sm:$0xff] }
 0x329   : > { %3615 = vmatmul.mubr.f32.gmra.mrb[40].mxu1 %v2992_v0  ;;  %v3023_v0 = vld [vmem:[#allocation3 + $0x428] sm:$0xff] }
 0x32a   : > { %3619 = vmatprep.mubr.f32.mxu1 %v2998_v49  ;;  %v3022_v49 = vld [vmem:[#allocation3 + $0x420] sm:$0xff] }
 0x32d   : > { %3620 = vmatmul.mubr.f32.gmra.mrb[42].mxu1 %v2997_v22  ;;  %v3028_v22 = vld [vmem:[#allocation3 + $0x450] sm:$0xff] }
 0x32e   : > { %3624 = vmatprep.mubr.f32.mxu1 %v3003_v9  ;;  %v3027_v9 = vld [vmem:[#allocation3 + $0x448] sm:$0xff] }
 0x331   : > { %3625 = vmatmul.mubr.f32.gmra.mrb[44].mxu1 %v3002_v19  ;;  %v3033_v19 = vld [vmem:[#allocation3 + $0x478] sm:$0xff] }
 0x332   : > { %3629 = vmatprep.mubr.f32.mxu1 %v3008_v58  ;;  %v3032_v58 = vld [vmem:[#allocation3 + $0x470] sm:$0xff] }
 0x335   : > { %3630 = vmatmul.mubr.f32.gmra.mrb[46].mxu1 %v3007_v44  ;;  %v3038_v44 = vld [vmem:[#allocation3 + $0x4a0] sm:$0xff] }
 0x336   : > { %3634 = vmatprep.mubr.f32.mxu1 %v3013_v10  ;;  %v3043_v10 = vld [vmem:[#allocation3 + $0x4c8] sm:$0xff] }
 0x339   : > { %3635 = vmatmul.mubr.f32.gmra.mrb[48].mxu1 %v3012_v33  ;;  %v3037_v33 = vld [vmem:[#allocation3 + $0x498] sm:$0xff] }
 0x33a   : > { %3639 = vmatprep.mubr.f32.mxu1 %v3018_v56  ;;  %v3048_v56 = vld [vmem:[#allocation3 + $0x4f0] sm:$0xff] }
 0x33d   : > { %3640 = vmatmul.mubr.f32.gmra.mrb[50].mxu1 %v3017_v28  ;;  %v3042_v28 = vld [vmem:[#allocation3 + $0x4c0] sm:$0xff] }
 0x33e   : > { %3644 = vmatprep.mubr.f32.mxu1 %v3023_v0  ;;  %v3047_v0 = vld [vmem:[#allocation3 + $0x4e8] sm:$0xff] }
 0x341   : > { %3645 = vmatmul.mubr.f32.gmra.mrb[52].mxu1 %v3022_v49  ;;  %v5631_v49 = vld [vmem:[%s12011_s5] sm:$0xff] }
 0x342   : > { %3649 = vmatprep.mubr.f32.mxu1 %v3028_v22  ;;  %v5632_v22 = vld [vmem:[%s12011_s5 + $0x8] sm:$0xff] }
 0x345   : > { %3650 = vmatmul.mubr.f32.gmra.mrb[54].mxu1 %v3027_v9  ;;  %v6956_v9 = vpack.c.bf16 %v5632_v22, %v5631_v49  ;;  %v10258_v22 = vld [vmem:[%s12010_s4] ss:$0 sm:$0xff] }
 0x346   : > { %3654 = vmatprep.mubr.f32.mxu1 %v3033_v19  ;;  %v5633_v19 = vld [vmem:[%s12011_s5 + $0x10] sm:$0xff] }
 0x347   : > { %6957 = vmatpush1.bf16.msra.mxu0 %v6956_v9  ;;  %7027 = vmatpush1.bf16.msra.mxu1 %v6956_v9 }
 0x348   : > { %6958 = vmatprep.subr.bf16.mxu0 %v13202_v52  ;;  %7012 = vmatprep.subr.bf16.mxu1 %v13202_v52 }
 0x349   : > { %3655 = vmatmul.mubr.f32.gmra.mrb[56].mxu1 %v3032_v58  ;;  %v5634_v58 = vld [vmem:[%s12011_s5 + $0x18] sm:$0xff] }
 0x34a   : > { %3659 = vmatprep.mubr.f32.mxu1 %v3038_v44  ;;  %v6959_v44 = vpack.c.bf16 %v5634_v58, %v5633_v19  ;;  %v5639_v19 = vld [vmem:[%s12011_s5 + $0x40] sm:$0xff]  ;;  %v5640_v58 = vld [vmem:[%s12011_s5 + $0x48] sm:$0xff] }
 0x34c   : > { %6960 = vmatpush1.bf16.msra.mxu0 %v6959_v44  ;;  %7028 = vmatpush1.bf16.msra.mxu1 %v6959_v44 }
 0x34d   : > { %3660 = vmatmul.mubr.f32.gmra.mrb[58].mxu1 %v3037_v33  ;;  %6961 = vmatprep.subr.bf16.mxu0 %v13202_v52  ;;  %v5636_v33 = vld [vmem:[%s12011_s5 + $0x28] sm:$0xff] }
 0x34e   : > { %3664 = vmatprep.mubr.f32.mxu1 %v3043_v10  ;;  %v5635_v10 = vld [vmem:[%s12011_s5 + $0x20] sm:$0xff]  ;;  %7013 = vmatprep.subr.bf16.mxu1 %v13202_v52 }
 0x351   : > { %3665 = vmatmul.mubr.f32.gmra.mrb[60].mxu1 %v3042_v28  ;;  %v5637_v28 = vld [vmem:[%s12011_s5 + $0x30] sm:$0xff] }
 0x352   : > { %3669 = vmatprep.mubr.f32.mxu1 %v3048_v56  ;;  %v6962_v56 = vpack.c.bf16 %v5636_v33, %v5635_v10  ;;  %v6968_v33 = vpack.c.bf16 %v5640_v58, %v5639_v19 }
 0x354   : > { %6963 = vmatpush1.bf16.msra.mxu0 %v6962_v56  ;;  %7029 = vmatpush1.bf16.msra.mxu1 %v6962_v56 }
 0x355   : > { %3670 = vmatmul.mubr.f32.gmra.mrb[62].mxu1 %v3047_v0  ;;  %6964 = vmatprep.subr.bf16.mxu0 %v13202_v52  ;;  %v5638_v0 = vld [vmem:[%s12011_s5 + $0x38] sm:$0xff] }
 0x356   : > { %7014 = vmatprep.subr.bf16.mxu1 %v13202_v52  ;;  %v6965_v49 = vpack.c.bf16 %v5638_v0, %v5637_v28  ;;  %v5641_v0 = vld [vmem:[%s12011_s5 + $0x50] sm:$0xff] }
 0x358   : > { %6966 = vmatpush1.bf16.msra.mxu0 %v6965_v49  ;;  %7030 = vmatpush1.bf16.msra.mxu1 %v6965_v49  ;;  %v5642_v49 = vld [vmem:[%s12011_s5 + $0x58] sm:$0xff] }
 0x359   : > { %6967 = vmatprep.subr.bf16.mxu0 %v13202_v52  ;;  %7015 = vmatprep.subr.bf16.mxu1 %v13202_v52  ;;  %v6971_v19 = vpack.c.bf16 %v5642_v49, %v5641_v0 }
 0x35c   : > { %6969 = vmatpush1.bf16.msra.mxu0 %v6968_v33  ;;  %7031 = vmatpush1.bf16.msra.mxu1 %v6968_v33  ;;  %v5643_v33 = vld [vmem:[%s12011_s5 + $0x60] sm:$0xff] }
 0x35d   : > { %6970 = vmatprep.subr.bf16.mxu0 %v13202_v52  ;;  %7016 = vmatprep.subr.bf16.mxu1 %v13202_v52 }
 0x360   : > { %6972 = vmatpush1.bf16.msra.mxu0 %v6971_v19  ;;  %7032 = vmatpush1.bf16.msra.mxu1 %v6971_v19  ;;  %v5646_v19 = vld [vmem:[%s12011_s5 + $0x78] sm:$0xff] }
 0x361   : > { %6973 = vmatprep.subr.bf16.mxu0 %v13202_v52  ;;  %7017 = vmatprep.subr.bf16.mxu1 %v13202_v52 }
 0x3a0   : > { %v10277_v40 = vpop.f32.mrb[62].mxu0 }
 0x3a1   : > { %13350 = vst [vmem:[#allocation47_spill] sm:$0xff] %v10277_v40  ;;  %v10281_v58 = vpop.f32.mrb[63].mxu0 }
 0x3a2   : > { %13351 = vst [vmem:[#allocation28_spill] sm:$0xff] %v10281_v58 }
 0x3ac   : > { %v3516_v9 = vpop.f32.mrb[0].mxu1 }
 0x3ad   : > { %v7043_v44 = vadd.f32 %v10258_v22, %v3516_v9  ;;  %v3518_v10 = vpop.f32.mrb[1].mxu1 }
 0x3af   : > { %v3742_v56 = vadd.f32 %v7043_v44, %v10045_v21 }
 0x3b0   : > { %v3521_v28 = vpop.f32.mrb[2].mxu1 }
 0x3b1   : > { %7215 = vtanh.f32 %v3742_v56  ;;  %v7044_v21 = vadd.f32 %v10258_v22, %v3521_v28  ;;  %v3523_v9 = vpop.f32.mrb[3].mxu1  ;;  %v5644_v56 = vld [vmem:[%s12011_s5 + $0x68] sm:$0xff] }
 0x3b2   : > { %v5645_v9 = vld [vmem:[%s12011_s5 + $0x70] sm:$0xff] }
 0x3b3   : > { %v3747_v44 = vadd.f32 %v7044_v21, %v10039_v39  ;;  %v6974_v39 = vpack.c.bf16 %v5644_v56, %v5643_v33  ;;  %v6977_v33 = vpack.c.bf16 %v5646_v19, %v5645_v9  ;;  %v5648_v56 = vld [vmem:[%s12011_s5 + $0x88] sm:$0xff] }
 0x3b4   : > { %v3526_v10 = vpop.f32.mrb[4].mxu1 }
 0x3b5   : > { %7217 = vtanh.f32 %v3747_v44  ;;  %v7045_v28 = vadd.f32 %v10258_v22, %v3526_v10  ;;  %v3528_v0 = vpop.f32.mrb[5].mxu1  ;;  %6975 = vmatpush1.bf16.msra.mxu0 %v6974_v39  ;;  %7033 = vmatpush1.bf16.msra.mxu1 %v6974_v39  ;;  %v5647_v44 = vld [vmem:[%s12011_s5 + $0x80] sm:$0xff] }
 0x3b6   : > { %6976 = vmatprep.subr.bf16.mxu0 %v13202_v52  ;;  %7018 = vmatprep.subr.bf16.mxu1 %v13202_v52  ;;  %v6980_v39 = vpack.c.bf16 %v5648_v56, %v5647_v44 }
 0x3b7   : > { %v3752_v49 = vadd.f32 %v7045_v28, %v10061_v53 }
 0x3b8   : > { %v3531_v21 = vpop.f32.mrb[6].mxu1 }
 0x3b9   : > { %7219 = vtanh.f32 %v3752_v49  ;;  %v7046_v53 = vadd.f32 %v10258_v22, %v3531_v21  ;;  %v3533_v10 = vpop.f32.mrb[7].mxu1  ;;  %6978 = vmatpush1.bf16.msra.mxu0 %v6977_v33  ;;  %7034 = vmatpush1.bf16.msra.mxu1 %v6977_v33  ;;  %v5649_v49 = vld [vmem:[%s12011_s5 + $0x90] sm:$0xff]  ;;  %v5650_v21 = vld [vmem:[%s12011_s5 + $0x98] sm:$0xff]  ;;  %v5651_v33 = vld [vmem:[%s12011_s5 + $0xa0] sm:$0xff] }
 0x3ba   : > { %6979 = vmatprep.subr.bf16.mxu0 %v13202_v52  ;;  %7019 = vmatprep.subr.bf16.mxu1 %v13202_v52 }
 0x3bb   : > { %v7216_v28 = vpop.eup %7215  ;;  %v3757_v0 = vadd.f32 %v7046_v53, %v10056_v17  ;;  %v6983_v53 = vpack.c.bf16 %v5650_v21, %v5649_v49 }
 0x3bc   : > { %3932 = vst.msk [vmem:[#allocation4 + $0x18] sm:$0xff] %vm13352_vm4, %v7216_v28  ;;  %v3536_v40 = vpop.f32.mrb[8].mxu1  ;;  %vm13356_vm4 = vmmov %vm13354_vm2 }
 0x3bd   : > { %4735 = vst.msk [vmem:[#allocation5 + $0x8] sm:$0xff] %vm13353_vm3, %v7216_v28  ;;  %7221 = vtanh.f32 %v3757_v0  ;;  %v7047_v17 = vadd.f32 %v10258_v22, %v3536_v40  ;;  %v3538_v9 = vpop.f32.mrb[9].mxu1  ;;  %6981 = vmatpush1.bf16.msra.mxu0 %v6980_v39  ;;  %7035 = vmatpush1.bf16.msra.mxu1 %v6980_v39  ;;  %v5652_v40 = vld [vmem:[%s12011_s5 + $0xa8] sm:$0xff]  ;;  %vm13357_vm3 = vmmov %vm13354_vm2 }
 0x3be   : > { %6982 = vmatprep.subr.bf16.mxu0 %v13202_v52  ;;  %7020 = vmatprep.subr.bf16.mxu1 %v13202_v52  ;;  %v6986_v49 = vpack.c.bf16 %v5652_v40, %v5651_v33  ;;  %v5653_v9 = vld [vmem:[%s12011_s5 + $0xb0] sm:$0xff]  ;;  %vm13364_vm11 = vmmov %vm13357_vm3 }
 0x3bf   : > { %v7218_v19 = vpop.eup %7217  ;;  %v3762_v44 = vadd.f32 %v7047_v17, %v10078_v32 }
 0x3c0   : > { %3933 = vst.msk [vmem:[#allocation4 + $0x20] sm:$0xff] %vm13354_vm2, %v7218_v19  ;;  %v3541_v10 = vpop.f32.mrb[10].mxu1 }
 0x3c1   : > { %4736 = vst.msk [vmem:[#allocation5 + $0x20] sm:$0xff] %vm13355_vm14, %v7218_v19  ;;  %7223 = vtanh.f32 %v3762_v44  ;;  %v7048_v32 = vadd.f32 %v10258_v22, %v3541_v10  ;;  %v3543_v56 = vpop.f32.mrb[11].mxu1  ;;  %6984 = vmatpush1.bf16.msra.mxu0 %v6983_v53  ;;  %7036 = vmatpush1.bf16.msra.mxu1 %v6983_v53  ;;  %v13358_v19 = vld [vmem:[#allocation11_spill] sm:$0xff]  ;;  %v13360_v44 = vld [vmem:[#allocation12_spill] sm:$0xff] }
 0x3c2   : > { %6985 = vmatprep.subr.bf16.mxu0 %v13202_v52  ;;  %vm13359_vm2 = vnez %v13358_v19  ;;  %vm13361_vm14 = vnez %v13360_v44  ;;  %7021 = vmatprep.subr.bf16.mxu1 %v13202_v52 }
 0x3c3   : > { %v7220_v28 = vpop.eup %7219  ;;  %v3767_v0 = vadd.f32 %v7048_v32, %v10075_v51  ;;  %v4510_v39 = vld [vmem:[#allocation4 + $0x17] sm:$0xff]  ;;  %v5654_v51 = vld [vmem:[%s12011_s5 + $0xb8] sm:$0xff] }
 0x3c4   : > { %3934 = vst.msk [vmem:[#allocation4 + $0x28] sm:$0xff] %vm13356_vm4, %v7220_v28  ;;  %v3546_v21 = vpop.f32.mrb[12].mxu1  ;;  %v4542_v17 = vsel %vm13285_vm7, %v4510_v39, 0.0  ;;  %vm13362_vm4 = vmand %vm13359_vm2, %vm13361_vm14  ;;  %v4286_v40 = vld [vmem:[#allocation4 + $0x11] sm:$0xff] }
 0x3c5   : > { %4737 = vst.msk [vmem:[#allocation5 + $0x38] sm:$0xff] %vm13357_vm3, %v7220_v28  ;;  %v3998_v53 = vsel %vm13362_vm4, %v4510_v39, 0.0  ;;  %7225 = vtanh.f32 %v3767_v0  ;;  %v7049_v10 = vadd.f32 %v10258_v22, %v3546_v21  ;;  %v3548_v33 = vpop.f32.mrb[13].mxu1  ;;  %4606 = vrot.lane.b32.xlu1 %v4542_v17, %s7387_s29  ;;  %6987 = vmatpush1.bf16.msra.mxu0 %v6986_v49  ;;  %v6989_v39 = vpack.c.bf16 %v5654_v51, %v5653_v9  ;;  %vm13363_vm4 = vmmov %vm13357_vm3  ;;  %v13365_v21 = vld [vmem:[#allocation9_spill] sm:$0xff]  ;;  %v5656_v17 = vld [vmem:[%s12011_s5 + $0xc8] sm:$0xff] }
 0x3c6   : > { %4030 = vst.msk [vmem:[#allocation5 + $0x30] sm:$0xff] %vm13357_vm3, %v3998_v53  ;;  %7037 = vmatpush1.bf16.msra.mxu1 %v6986_v49  ;;  %vm13366_vm3 = vnez %v13365_v21  ;;  %6988 = vmatprep.subr.bf16.mxu0 %v13202_v52  ;;  %v5655_v49 = vld [vmem:[%s12011_s5 + $0xc0] sm:$0xff] }
 0x3c7   : > { %v7222_v32 = vpop.eup %7221  ;;  %v3772_v56 = vadd.f32 %v7049_v10, %v10088_v31  ;;  %v10355_v28 = vld [vmem:[#allocation4 + $0x19] sm:$0xff]  ;;  %vm13367_vm15 = vmand %vm13293_vm8, %vm13366_vm3  ;;  %v13368_v9 = vld [vmem:[#allocation10_spill] sm:$0xff]  ;;  %7022 = vmatprep.subr.bf16.mxu1 %v13202_v52  ;;  %v6992_v12 = vpack.c.bf16 %v5656_v17, %v5655_v49 }
 0x3c8   : > { %v4511_v58 = vld [vmem:[#allocation4 + $0x1f] sm:$0xff]  ;;  %3935 = vst.msk [vmem:[#allocation4 + $0x30] sm:$0xff] %vm13363_vm4, %v7222_v32  ;;  %v3551_v0 = vpop.f32.mrb[14].mxu1  ;;  %4863 = vrot.lane.b32.xlu0 %v10355_v28, %s7386_s11  ;;  %v4318_v31 = vsel %vm13367_vm15, %v4286_v40, 0.0  ;;  %vm13370_vm8 = vmmov %vm13363_vm4  ;;  %v5658_v49 = vld [vmem:[%s12011_s5 + $0xd8] sm:$0xff] }
 0x3c9   : > { %4738 = vst.msk [vmem:[#allocation5 + $0x50] sm:$0xff] %vm13364_vm11, %v7222_v32  ;;  %vm13369_vm11 = vnez %v13368_v9  ;;  %7227 = vtanh.f32 %v3772_v56  ;;  %v7050_v18 = vadd.f32 %v10258_v22, %v3551_v0  ;;  %v3553_v53 = vpop.f32.mrb[15].mxu1  ;;  %4383 = vrot.lane.b32.xlu1 %v4318_v31, %s7384_s16  ;;  %v4062_v10 = vld [vmem:[#allocation4 + $0x18] sm:$0xff]  ;;  %6990 = vmatpush1.bf16.msra.mxu0 %v6989_v39  ;;  %vm13371_vm15 = vmmov %vm13363_vm4  ;;  %v13372_v0 = vld [vmem:[#allocation13_spill] sm:$0xff] }
 0x3ca   : > { %v3999_v51 = vsel %vm13369_vm11, %v4511_v58, 0.0  ;;  %7038 = vmatpush1.bf16.msra.mxu1 %v6989_v39  ;;  %vm13373_vm0 = vnez %v13372_v0  ;;  %6991 = vmatprep.subr.bf16.mxu0 %v13202_v52  ;;  %v5657_v39 = vld [vmem:[%s12011_s5 + $0xd0] sm:$0xff]  ;;  %v13377_v53 = vld [vmem:[#allocation17_spill] sm:$0xff] }
 0x3cb   : > { %4031 = vst.msk [vmem:[#allocation5 + $0x48] sm:$0xff] %vm13370_vm8, %v3999_v51  ;;  %v7224_v33 = vpop.eup %7223  ;;  %v3777_v40 = vadd.f32 %v7050_v18, %v10085_v8  ;;  %v10380_v32 = vld [vmem:[#allocation4 + $0x27] sm:$0xff]  ;;  %vm13374_vm8 = vmand %vm13373_vm0, %vm13285_vm7  ;;  %v4094_v8 = vsel %vm13359_vm2, %v4062_v10, 0.0  ;;  %7023 = vmatprep.subr.bf16.mxu1 %v13202_v52 }
 0x3cc   : > { %3936 = vst.msk [vmem:[#allocation4 + $0x38] sm:$0xff] %vm13371_vm15, %v7224_v33  ;;  %v3556_v56 = vpop.f32.mrb[16].mxu1  ;;  %v5023_v31 = vsel %vm13374_vm8, %v10380_v32, 0.0  ;;  %v10403_v51 = vld [vmem:[#allocation4 + $0x28] sm:$0xff]  ;;  %v13375_v18 = vld [vmem:[#allocation16_spill] sm:$0xff]  ;;  %vm13378_vm15 = vnez %v13377_v53  ;;  %vm13380_vm8 = vcmask 261120  }
 0x3cd   : > { %4739 = vst.msk [vmem:[#allocation5 + $0x68] sm:$0xff] %vm13363_vm4, %v7224_v33  ;;  %7229 = vtanh.f32 %v3777_v40  ;;  %v7051_v23 = vadd.f32 %v10258_v22, %v3556_v56  ;;  %v3558_v17 = vpop.f32.mrb[17].mxu1  ;;  %5087 = vrot.lane.b32.xlu0 %v5023_v31, %s7384_s16  ;;  %4160 = vrot.lane.b32.xlu1 %v4094_v8, %s7386_s11  ;;  %vm13376_vm7 = vnez %v13375_v18  ;;  %v6995_v56 = vpack.c.bf16 %v5658_v49, %v5657_v39  ;;  %vm13381_vm13 = vmmov %vm13380_vm8  ;;  %v5660_v39 = vld [vmem:[%s12011_s5 + $0xe8] sm:$0xff]  ;;  %v4063_v19 = vld [vmem:[#allocation4 + $0x20] sm:$0xff] }
 0x3ce   : > { %vm13379_vm4 = vmand %vm13376_vm7, %vm13378_vm15  ;;  %6993 = vmatpush1.bf16.msra.mxu0 %v6992_v12  ;;  %7039 = vmatpush1.bf16.msra.mxu1 %v6992_v12  ;;  %v5247_v8 = vsel %vm13373_vm0, %v10403_v51, 0.0  ;;  %v10431_v17 = vld [vmem:[#allocation4 + $0x21] sm:$0xff] }
 0x3cf   : > { %v4000_v10 = vsel %vm13379_vm4, %v10380_v32, 0.0  ;;  %v7226_v33 = vpop.eup %7225  ;;  %v3782_v59 = vadd.f32 %v7051_v23, %v10105_v45  ;;  %v10412_v40 = vld [vmem:[#allocation4 + $0x2f] sm:$0xff]  ;;  %vm13382_vm6 = vmmov %vm13380_vm8  ;;  %6994 = vmatprep.subr.bf16.mxu0 %v13202_v52  ;;  %7024 = vmatprep.subr.bf16.mxu1 %v13202_v52  ;;  %v4800_v0 = vsel %vm13366_vm3, %v10431_v17, 0.0  ;;  %v13456_v18 = vld [vmem:[#allocation24_spill] sm:$0xff] }
 0x3d0   : > { %4032 = vst.msk [vmem:[#allocation5 + $0x60] sm:$0xff] %vm13380_vm8, %v4000_v10  ;;  %v3561_v31 = vpop.f32.mrb[18].mxu1  ;;  %v5659_v45 = vld [vmem:[%s12011_s5 + $0xe0] sm:$0xff]  ;;  %vm13386_vm4 = vmmov %vm13380_vm8 }
 0x3d1   : > { %3937 = vst.msk [vmem:[#allocation4 + $0x40] sm:$0xff] %vm13381_vm13, %v7226_v33  ;;  %v5439_v12 = vld [vmem:[#allocation4 + $0x29] sm:$0xff]  ;;  %7231 = vtanh.f32 %v3782_v59  ;;  %v7052_v49 = vadd.f32 %v10258_v22, %v3561_v31  ;;  %v3563_v23 = vpop.f32.mrb[19].mxu1  ;;  %5311 = vrot.lane.b32.xlu0 %v5247_v8, %s7387_s29  ;;  %4608 = vrot.lane.b32.xlu1 %v4511_v58, %s7387_s29  ;;  %vm13385_vm13 = vmmov %vm13380_vm8  ;;  %v6998_v58 = vpack.c.bf16 %v5660_v39, %v5659_v45 }
 0x3d2   : > { %4740 = vst.msk [vmem:[#allocation5 + $0x80] sm:$0xff] %vm13382_vm6, %v7226_v33  ;;  %v13383_v10 = vld [vmem:[#allocation18_spill] sm:$0xff]  ;;  %v5471_v46 = vsel %vm13373_vm0, %v5439_v12, 0.0  ;;  %6996 = vmatpush1.bf16.msra.mxu0 %v6995_v56  ;;  %7040 = vmatpush1.bf16.msra.mxu1 %v6995_v56  ;;  %vm13387_vm8 = vmmov %vm13386_vm4  ;;  %v5662_v56 = vld [vmem:[%s12011_s5 + $0xf8] sm:$0xff] }
 0x3d3   : > { %vm13384_vm6 = vnez %v13383_v10  ;;  %5503 = vst.msk [vmem:[#allocation5 + $0x10] sm:$0xff] %vm13386_vm4, %v5471_v46  ;;  %v7228_v59 = vpop.eup %7227  ;;  %v3787_v31 = vadd.f32 %v7052_v49, %v10100_v4  ;;  %v10441_v23 = vld [vmem:[#allocation4 + $0x37] sm:$0xff]  ;;  %vm13388_vm10 = vmmov %vm13386_vm4  ;;  %v4319_v46 = vsel %vm13359_vm2, %v10355_v28, 0.0  ;;  %6997 = vmatprep.subr.bf16.mxu0 %v13202_v52  ;;  %v5661_v4 = vld [vmem:[%s12011_s5 + $0xf0] sm:$0xff]  ;;  %7025 = vmatprep.subr.bf16.mxu1 %v13202_v52 }
 0x3d4   : > { %v4001_v33 = vsel %vm13384_vm6, %v10412_v40, 0.0  ;;  %3938 = vst.msk [vmem:[#allocation4 + $0x48] sm:$0xff] %vm13387_vm8, %v7228_v59  ;;  %v3566_v8 = vpop.f32.mrb[20].mxu1  ;;  %v5440_v45 = vld [vmem:[#allocation4 + $0x31] sm:$0xff]  ;;  %v13391_v49 = vld [vmem:[#allocation32_spill] sm:$0xff]  ;;  %vm13397_vm1 = vmmov %vm13387_vm8 }
 0x3d5   : > { %4033 = vst.msk [vmem:[#allocation5 + $0x78] sm:$0xff] %vm13385_vm13, %v4001_v33  ;;  %7233 = vtanh.f32 %v3787_v31  ;;  %v7053_v39 = vadd.f32 %v10258_v22, %v3566_v8  ;;  %v3568_v12 = vpop.f32.mrb[21].mxu1  ;;  %4865 = vrot.lane.b32.xlu0 %v4800_v0, %s7386_s11  ;;  %4385 = vrot.lane.b32.xlu1 %v4319_v46, %s7384_s16  ;;  %v13389_v28 = vld [vmem:[#allocation31_spill] sm:$0xff]  ;;  %vm13392_vm0 = vnez %v13391_v49  ;;  %v7001_v46 = vpack.c.bf16 %v5662_v56, %v5661_v4  ;;  %v10480_v21 = vld [vmem:[#allocation4 + $0x29] sm:$0xff]  ;;  %vm13420_vm15 = vmmov %vm13417_vm5 }
 0x3d6   : > { %4741 = vst.msk [vmem:[#allocation5 + $0x98] sm:$0xff] %vm13388_vm10, %v7228_v59  ;;  %vm13390_vm10 = vnez %v13389_v28  ;;  %v13394_v59 = vld [vmem:[#allocation15_spill] sm:$0xff]  ;;  %6999 = vmatpush1.bf16.msra.mxu0 %v6998_v58  ;;  %7041 = vmatpush1.bf16.msra.mxu1 %v6998_v58 }
 0x3d7   : > { %vm13393_vm2 = vmand %vm13390_vm10, %vm13392_vm0  ;;  %vm13395_vm13 = vnez %v13394_v59  ;;  %v7230_v8 = vpop.eup %7229  ;;  %v3792_v12 = vadd.f32 %v7053_v39, %v10117_v13  ;;  %7000 = vmatprep.subr.bf16.mxu0 %v13202_v52  ;;  %7026 = vmatprep.subr.bf16.mxu1 %v13202_v52  ;;  %v13400_v58 = vld [vmem:[#allocation23_spill] sm:$0xff] }
 0x3d8   : > { %v4002_v33 = vsel %vm13393_vm2, %v10441_v23, 0.0  ;;  %vm13396_vm4 = vmand %vm13395_vm13, %vm13366_vm3  ;;  %v10474_v0 = vld [vmem:[#allocation4 + $0x3f] sm:$0xff]  ;;  %v3571_v2 = vpop.f32.mrb[22].mxu1 }
 0x3d9   : > { %v5472_v31 = vsel %vm13396_vm4, %v5440_v45, 0.0  ;;  %4034 = vst.msk [vmem:[#allocation5 + $0x90] sm:$0xff] %vm13387_vm8, %v4002_v33  ;;  %vm13398_vm0 = vmmov %vm13397_vm1  ;;  %v4095_v45 = vsel %vm13369_vm11, %v4063_v19, 0.0  ;;  %v5441_v13 = vld [vmem:[#allocation4 + $0x39] sm:$0xff]  ;;  %7235 = vtanh.f32 %v3792_v12  ;;  %v7054_v4 = vadd.f32 %v10258_v22, %v3571_v2  ;;  %v3573_v56 = vpop.f32.mrb[23].mxu1  ;;  %4867 = vrot.lane.b32.xlu0 %v10480_v21, %s7386_s11 }
 0x3da   : > { %5504 = vst.msk [vmem:[#allocation5 + $0x28] sm:$0xff] %vm13397_vm1, %v5472_v31  ;;  %vm13399_vm2 = vmmov %vm13398_vm0  ;;  %4162 = vrot.lane.b32.xlu1 %v4095_v45, %s7386_s11  ;;  %vm13401_vm1 = vnez %v13400_v58  ;;  %v13402_v33 = vld [vmem:[#allocation19_spill] sm:$0xff]  ;;  %7002 = vmatpush1.bf16.msra.mxu0 %v7001_v46  ;;  %v5024_v12 = vsel %vm13395_vm13, %v10412_v40, 0.0  ;;  %v4544_v45 = vsel %vm13361_vm14, %v10380_v32, 0.0  ;;  %v13407_v56 = vld [vmem:[#allocation45_spill] sm:$0xff] }
 0x3db   : > { %3939 = vst.msk [vmem:[#allocation4 + $0x50] sm:$0xff] %vm13398_vm0, %v7230_v8  ;;  %v4003_v39 = vsel %vm13401_vm1, %v10474_v0, 0.0  ;;  %vm13403_vm3 = vnez %v13402_v33  ;;  %vm13404_vm4 = vmmov %vm13398_vm0  ;;  %v7232_v52 = vpop.eup %7231  ;;  %v3797_v2 = vadd.f32 %v7054_v4, %v10112_v26  ;;  %v10498_v31 = vld [vmem:[#allocation4 + $0x47] sm:$0xff]  ;;  %7042 = vmatpush1.bf16.msra.mxu1 %v7001_v46  ;;  %v10511_v46 = vld [vmem:[#allocation4 + $0x30] sm:$0xff] }
 0x3dc   : > { %4742 = vst.msk [vmem:[#allocation5 + $0xb0] sm:$0xff] %vm13399_vm2, %v7230_v8  ;;  %v5473_v19 = vsel %vm13403_vm3, %v5441_v13, 0.0  ;;  %vm13405_vm8 = vmmov %vm13398_vm0  ;;  %v3576_v8 = vpop.f32.mrb[24].mxu1  ;;  %v5442_v13 = vld [vmem:[#allocation4 + $0x41] sm:$0xff]  ;;  %v13414_v32 = vld [vmem:[#allocation14_spill] sm:$0xff] }
 0x3dd   : > { %4035 = vst.msk [vmem:[#allocation5 + $0xa8] sm:$0xff] %vm13398_vm0, %v4003_v39  ;;  %vm13406_vm2 = vmmov %vm13398_vm0  ;;  %7237 = vtanh.f32 %v3797_v2  ;;  %v7055_v26 = vadd.f32 %v10258_v22, %v3576_v8  ;;  %v3578_v4 = vpop.f32.mrb[25].mxu1  ;;  %5089 = vrot.lane.b32.xlu0 %v5024_v12, %s7384_s16  ;;  %vm13408_vm0 = vnez %v13407_v56  ;;  %v13409_v39 = vld [vmem:[#allocation46_spill] sm:$0xff]  ;;  %vm13415_vm1 = vnez %v13414_v32 }
 0x3de   : > { %5505 = vst.msk [vmem:[#allocation5 + $0x40] sm:$0xff] %vm13404_vm4, %v5473_v19  ;;  %4610 = vrot.lane.b32.xlu1 %v4544_v45, %s7387_s29  ;;  %vm13410_vm4 = vnez %v13409_v39  ;;  %vm13419_vm10 = vmmov %vm13417_vm5  ;;  %v5248_v39 = vsel %vm13395_vm13, %v10511_v46, 0.0 }
 0x3df   : > { %3940 = vst.msk [vmem:[#allocation4 + $0x58] sm:$0xff] %vm13405_vm8, %v7232_v52  ;;  %vm13411_vm8 = vmand %vm13408_vm0, %vm13410_vm4  ;;  %v7234_v8 = vpop.eup %7233  ;;  %v3802_v12 = vadd.f32 %v7055_v26, %v10126_v60 }
 0x3e0   : > { %4743 = vst.msk [vmem:[#allocation5 + $0xc8] sm:$0xff] %vm13406_vm2, %v7232_v52  ;;  %v4004_v19 = vsel %vm13411_vm8, %v10498_v31, 0.0  ;;  %v13412_v52 = vld [vmem:[#allocation22_spill] sm:$0xff]  ;;  %v3581_v45 = vpop.f32.mrb[26].mxu1  ;;  %vm13428_vm13 = vmmov %vm13419_vm10 }
 0x3e1   : > { %vm13413_vm2 = vnez %v13412_v52  ;;  %4036 = vst.msk [vmem:[#allocation5 + $0xc0] sm:$0xff] %vm13417_vm5, %v4004_v19  ;;  %7239 = vtanh.f32 %v3802_v12  ;;  %v7056_v26 = vadd.f32 %v10258_v22, %v3581_v45  ;;  %v3583_v19 = vpop.f32.mrb[27].mxu1  ;;  %5313 = vrot.lane.b32.xlu0 %v5248_v39, %s7387_s29  ;;  %vm13429_vm8 = vmand %vm13403_vm3, %vm13361_vm14  ;;  %vm13432_vm14 = vnez %v12664_v54 }
 0x3e2   : > { %vm13416_vm12 = vmand %vm13413_vm2, %vm13415_vm1  ;;  %v10525_v4 = vld [vmem:[#allocation4 + $0x4f] sm:$0xff]  ;;  %3941 = vst.msk [vmem:[#allocation4 + $0x60] sm:$0xff] %vm13419_vm10, %v7234_v8 }
 0x3e3   : > { %v5474_v2 = vsel %vm13416_vm12, %v5442_v13, 0.0  ;;  %4744 = vst.msk [vmem:[#allocation5 + $0xe0] sm:$0xff] %vm13420_vm15, %v7234_v8  ;;  %vm13421_vm12 = vmand %vm13369_vm11, %vm13415_vm1  ;;  %v5443_v13 = vld [vmem:[#allocation4 + $0x49] sm:$0xff]  ;;  %v3807_v12 = vadd.f32 %v7056_v26, %v10122_v5 }
 0x3e4   : > { %5506 = vst.msk [vmem:[#allocation5 + $0x58] sm:$0xff] %vm13418_vm9, %v5474_v2  ;;  %v4320_v60 = vsel %vm13421_vm12, %v10431_v17, 0.0  ;;  %v13422_v2 = vld [vmem:[#allocation40_spill] sm:$0xff]  ;;  %v13424_v8 = vld [vmem:[#allocation21_spill] sm:$0xff]  ;;  %vm13426_vm15 = vmmov %vm13419_vm10  ;;  %v7236_v17 = vpop.eup %7235  ;;  %v3586_v39 = vpop.f32.mrb[28].mxu1 }
 0x3e5   : > { %4387 = vrot.lane.b32.xlu1 %v4320_v60, %s7384_s16  ;;  %vm13423_vm9 = vnez %v13422_v2  ;;  %vm13425_vm5 = vnez %v13424_v8  ;;  %vm13427_vm11 = vmmov %vm13419_vm10  ;;  %3942 = vst.msk [vmem:[#allocation4 + $0x68] sm:$0xff] %vm13419_vm10, %v7236_v17  ;;  %v5025_v60 = vsel %vm13429_vm8, %v10441_v23, 0.0  ;;  %7241 = vtanh.f32 %v3807_v12  ;;  %v3588_v26 = vpop.f32.mrb[29].mxu1 }
 0x3e6   : > { %v4005_v59 = vsel %vm13423_vm9, %v10525_v4, 0.0  ;;  %v5475_v9 = vsel %vm13425_vm5, %v5443_v13, 0.0  ;;  %v10551_v45 = vld [vmem:[#allocation4 + $0x57] sm:$0xff]  ;;  %4745 = vst.msk [vmem:[#allocation5 + $0xf8] sm:$0xff] %vm13428_vm13, %v7236_v17  ;;  %v4096_v13 = vsel %vm13376_vm7, %v10403_v51, 0.0  ;;  %v7057_v5 = vadd.f32 %v10258_v22, %v3586_v39  ;;  %5091 = vrot.lane.b32.xlu0 %v5025_v60, %s7384_s16  ;;  %v13434_v17 = vld [vmem:[#allocation25_spill] sm:$0xff] }
 0x3e7   : > { %4037 = vst.msk [vmem:[#allocation5 + $0xd8] sm:$0xff] %vm13426_vm15, %v4005_v59  ;;  %v5444_v19 = vld [vmem:[#allocation4 + $0x51] sm:$0xff]  ;;  %v13436_v51 = vld [vmem:[#allocation20_spill] sm:$0xff]  ;;  %v7238_v39 = vpop.eup %7237  ;;  %vm13439_vm8 = vcmask 261120  }
 0x3e8   : > { %5507 = vst.msk [vmem:[#allocation5 + $0x70] sm:$0xff] %vm13427_vm11, %v5475_v9  ;;  %v10567_v59 = vld [vmem:[#allocation4 + $0x38] sm:$0xff]  ;;  %v13430_v9 = vld [vmem:[#allocation50_spill] sm:$0xff]  ;;  %vm13435_vm11 = vnez %v13434_v17  ;;  %vm13437_vm10 = vnez %v13436_v51  ;;  %v3812_v60 = vadd.f32 %v7057_v5, %v10133_v25  ;;  %vm13440_vm4 = vmmov %vm13439_vm8 }
 0x3e9   : > { %4164 = vrot.lane.b32.xlu1 %v4096_v13, %s7386_s11  ;;  %vm13431_vm12 = vnez %v13430_v9  ;;  %vm13438_vm13 = vmand %vm13435_vm11, %vm13437_vm10  ;;  %v10581_v26 = vld [vmem:[#allocation4 + $0x5f] sm:$0xff]  ;;  %v3591_v13 = vpop.f32.mrb[30].mxu1  ;;  %v5249_v54 = vsel %vm13403_vm3, %v10567_v59, 0.0  ;;  %v10594_v5 = vld [vmem:[#allocation4 + $0x31] sm:$0xff] }
 0x3ea   : > { %vm13433_vm15 = vmand %vm13431_vm12, %vm13432_vm14  ;;  %v5476_v12 = vsel %vm13438_vm13, %v5444_v19, 0.0  ;;  %v5445_v9 = vld [vmem:[#allocation4 + $0x59] sm:$0xff]  ;;  %7243 = vtanh.f32 %v3812_v60  ;;  %v7058_v19 = vadd.f32 %v10258_v22, %v3591_v13  ;;  %v3593_v25 = vpop.f32.mrb[31].mxu1  ;;  %5315 = vrot.lane.b32.xlu0 %v5249_v54, %s7387_s29 }
 0x3eb   : > { %v4006_v44 = vsel %vm13433_vm15, %v10551_v45, 0.0  ;;  %5508 = vst.msk [vmem:[#allocation5 + $0x88] sm:$0xff] %vm13440_vm4, %v5476_v12  ;;  %vm13441_vm9 = vmmov %vm13440_vm4  ;;  %v7240_v60 = vpop.eup %7239  ;;  %v4802_v25 = vsel %vm13415_vm1, %v10594_v5, 0.0 }
 0x3ec   : > { %4038 = vst.msk [vmem:[#allocation5 + $0xf0] sm:$0xff] %vm13439_vm8, %v4006_v44  ;;  %vm13442_vm0 = vmmov %vm13440_vm4  ;;  %v13443_v44 = vld [vmem:[#allocation54_spill] sm:$0xff]  ;;  %v3817_v13 = vadd.f32 %v7058_v19, %v10131_v48  ;;  %v10604_v54 = vld [vmem:[#allocation4 + $0x67] sm:$0xff] }
 0x3ed   : > { %3943 = vst.msk [vmem:[#allocation4 + $0x70] sm:$0xff] %vm13441_vm9, %v7238_v39  ;;  %4612 = vrot.lane.b32.xlu1 %v10412_v40, %s7387_s29  ;;  %vm13447_vm3 = vmmov %vm13439_vm8  ;;  %v3596_v40 = vpop.f32.mrb[32].mxu1  ;;  %vm13451_vm8 = vnez %v12700_v16  ;;  %v13454_v19 = vld [vmem:[#allocation29_spill] sm:$0xff] }
 0x3ee   : > { %4746 = vst.msk [vmem:[#allocation5 + $0x110] sm:$0xff] %vm13442_vm0, %v7238_v39  ;;  %vm13444_vm0 = vnez %v13443_v44  ;;  %v13445_v39 = vld [vmem:[#allocation26_spill] sm:$0xff]  ;;  %vm13448_vm9 = vmmov %vm13447_vm3  ;;  %7245 = vtanh.f32 %v3817_v13  ;;  %v3598_v48 = vpop.f32.mrb[33].mxu1  ;;  %4869 = vrot.lane.b32.xlu0 %v4802_v25, %s7386_s11  ;;  %vm13455_vm1 = vnez %v13454_v19 }
 0x3ef   : > { %v4007_v12 = vsel %vm13444_vm0, %v10581_v26, 0.0  ;;  %vm13446_vm4 = vnez %v13445_v39  ;;  %vm13449_vm15 = vmmov %vm13447_vm3 }
 0x3f0   : > { %v5477_v33 = vsel %vm13446_vm4, %v5445_v9, 0.0  ;;  %4039 = vst.msk [vmem:[#allocation5 + $0x108] sm:$0xff] %vm13447_vm3, %v4007_v12  ;;  %vm13450_vm13 = vmmov %vm13447_vm3  ;;  %v4321_v9 = vsel %vm13376_vm7, %v10480_v21, 0.0  ;;  %v5446_v12 = vld [vmem:[#allocation4 + $0x61] sm:$0xff]  ;;  %vm13452_vm3 = vnez %v12703_v30  ;;  %vm13457_vm7 = vnez %v13456_v18  ;;  %v3601_v25 = vpop.f32.mrb[34].mxu1 }
 0x3f1   : > { %5509 = vst.msk [vmem:[#allocation5 + $0xa0] sm:$0xff] %vm13448_vm9, %v5477_v33  ;;  %v7059_v33 = vadd.f32 %v10258_v22, %v3596_v40  ;;  %4389 = vrot.lane.b32.xlu1 %v4321_v9, %s7384_s16  ;;  %vm13453_vm9 = vmand %vm13451_vm8, %vm13452_vm3  ;;  %v10635_v9 = vld [vmem:[#allocation4 + $0x39] sm:$0xff]  ;;  %vm13467_vm3 = vnez %v13377_v53  ;;  %v13488_v53 = vld [vmem:[#allocation62_spill] sm:$0xff] }
 0x3f2   : > { %3944 = vst.msk [vmem:[#allocation4 + $0x78] sm:$0xff] %vm13449_vm15, %v7240_v60  ;;  %v4008_v32 = vsel %vm13453_vm9, %v10604_v54, 0.0  ;;  %vm13458_vm15 = vmand %vm13455_vm1, %vm13457_vm7  ;;  %4871 = vrot.lane.b32.xlu0 %v10635_v9, %s7386_s11 }
 0x3f3   : > { %4747 = vst.msk [vmem:[#allocation5 + $0x128] sm:$0xff] %vm13450_vm13, %v7240_v60  ;;  %v5478_v21 = vsel %vm13458_vm15, %v5446_v12, 0.0  ;;  %v7242_v60 = vpop.eup %7241  ;;  %v3822_v13 = vadd.f32 %v7059_v33, %v10142_v24  ;;  %4040 = vst.msk [vmem:[#allocation5 + $0x120] sm:$0xff] %vm13450_vm13, %v4008_v32  ;;  %v4097_v12 = vsel %vm13384_vm6, %v10511_v46, 0.0  ;;  %v7060_v24 = vadd.f32 %v10258_v22, %v3601_v25  ;;  %v3603_v33 = vpop.f32.mrb[35].mxu1 }
 0x3f4   : > { %v10629_v40 = vld [vmem:[#allocation4 + $0x6f] sm:$0xff]  ;;  %vm13459_vm14 = vmmov %vm13450_vm13  ;;  %v7244_v46 = vpop.eup %7243  ;;  %v3606_v25 = vpop.f32.mrb[36].mxu1 }
 0x3f5   : > { %5510 = vst.msk [vmem:[#allocation5 + $0xb8] sm:$0xff] %vm13459_vm14, %v5478_v21  ;;  %vm13460_vm0 = vmmov %vm13450_vm13  ;;  %v5447_v48 = vld [vmem:[#allocation4 + $0x69] sm:$0xff]  ;;  %7247 = vtanh.f32 %v3822_v13  ;;  %4166 = vrot.lane.b32.xlu1 %v4097_v12, %s7386_s11  ;;  %vm13463_vm14 = vnez %v12554_v29  ;;  %v5026_v12 = vsel %vm13413_vm2, %v10474_v0, 0.0 }
 0x3f6   : > { %3945 = vst.msk [vmem:[#allocation4 + $0x80] sm:$0xff] %vm13460_vm0, %v7242_v60  ;;  %vm13461_vm12 = vmmov %vm13460_vm0  ;;  %v5479_v21 = vsel %vm13463_vm14, %v5447_v48, 0.0  ;;  %v4546_v48 = vsel %vm13467_vm3, %v10441_v23, 0.0  ;;  %5093 = vrot.lane.b32.xlu0 %v5026_v12, %s7384_s16  ;;  %vm13475_vm14 = vcmask 261120  }
 0x3f7   : > { %4748 = vst.msk [vmem:[#allocation5 + $0x140] sm:$0xff] %vm13461_vm12, %v7242_v60  ;;  %vm13462_vm12 = vnez %v13113_v41  ;;  %vm13464_vm9 = vmmov %vm13460_vm0  ;;  %v3827_v60 = vadd.f32 %v7060_v24, %v10140_v62  ;;  %v3608_v62 = vpop.f32.mrb[37].mxu1  ;;  %v10665_v24 = vld [vmem:[#allocation4 + $0x40] sm:$0xff] }
 0x3f8   : > { %v4009_v32 = vsel %vm13462_vm12, %v10629_v40, 0.0  ;;  %5511 = vst.msk [vmem:[#allocation5 + $0xd0] sm:$0xff] %vm13464_vm9, %v5479_v21  ;;  %vm13465_vm15 = vmmov %vm13460_vm0  ;;  %vm13469_vm9 = vnez %v12728_v34  ;;  %vm13473_vm12 = vnez %v13165_v7  ;;  %v5250_v62 = vsel %vm13413_vm2, %v10665_v24, 0.0  ;;  %v13656_v7 = vld [vmem:[#allocation69_spill] sm:$0xff] }
 0x3f9   : > { %4041 = vst.msk [vmem:[#allocation5 + $0x138] sm:$0xff] %vm13460_vm0, %v4009_v32  ;;  %v10652_v13 = vld [vmem:[#allocation4 + $0x77] sm:$0xff]  ;;  %vm13466_vm13 = vmmov %vm13460_vm0  ;;  %7249 = vtanh.f32 %v3827_v60  ;;  %v7061_v32 = vadd.f32 %v10258_v22, %v3606_v25  ;;  %4614 = vrot.lane.b32.xlu1 %v4546_v48, %s7387_s29  ;;  %vm13468_vm0 = vnez %v12725_v57  ;;  %v7246_v60 = vpop.eup %7245  ;;  %v3611_v48 = vpop.f32.mrb[38].mxu1  ;;  %vm13481_vm2 = vnez %v13169_v15 }
 0x3fa   : > { %3946 = vst.msk [vmem:[#allocation4 + $0x88] sm:$0xff] %vm13465_vm15, %v7244_v46  ;;  %v5448_v33 = vld [vmem:[#allocation4 + $0x71] sm:$0xff]  ;;  %vm13470_vm15 = vmand %vm13468_vm0, %vm13469_vm9  ;;  %5317 = vrot.lane.b32.xlu0 %v5250_v62, %s7387_s29  ;;  %vm13496_vm9 = vcmask 261120  }
 0x3fb   : > { %4749 = vst.msk [vmem:[#allocation5 + $0x158] sm:$0xff] %vm13466_vm13, %v7244_v46  ;;  %v4010_v21 = vsel %vm13470_vm15, %v10652_v13, 0.0  ;;  %v13471_v46 = vld [vmem:[#allocation34_spill] sm:$0xff]  ;;  %v3832_v25 = vadd.f32 %v7061_v32, %v10148_v47  ;;  %vm13476_vm1 = vmmov %vm13475_vm14  ;;  %v7062_v32 = vadd.f32 %v10258_v22, %v3611_v48 }
 0x3fc   : > { %vm13472_vm13 = vnez %v13471_v46  ;;  %4042 = vst.msk [vmem:[#allocation5 + $0x150] sm:$0xff] %vm13475_vm14, %v4010_v21  ;;  %vm13477_vm4 = vmmov %vm13476_vm1  ;;  %v3613_v21 = vpop.f32.mrb[39].mxu1  ;;  %v13688_v46 = vld [vmem:[#allocation76_spill] sm:$0xff] }
 0x3fd   : > { %vm13474_vm8 = vmand %vm13472_vm13, %vm13473_vm12  ;;  %v10679_v12 = vld [vmem:[#allocation4 + $0x7f] sm:$0xff]  ;;  %3947 = vst.msk [vmem:[#allocation4 + $0x90] sm:$0xff] %vm13477_vm4, %v7246_v60  ;;  %7251 = vtanh.f32 %v3832_v25  ;;  %vm13480_vm4 = vnez %v12713_v14  ;;  %v3616_v25 = vpop.f32.mrb[40].mxu1 }
 0x3fe   : > { %v5480_v23 = vsel %vm13474_vm8, %v5448_v33, 0.0  ;;  %vm13478_vm7 = vmmov %vm13476_vm1  ;;  %v5449_v33 = vld [vmem:[#allocation4 + $0x79] sm:$0xff]  ;;  %v4011_v52 = vsel %vm13480_vm4, %v10679_v12, 0.0 }
 0x3ff   : > { %5512 = vst.msk [vmem:[#allocation5 + $0xe8] sm:$0xff] %vm13476_vm1, %v5480_v23  ;;  %vm13479_vm8 = vmand %vm13384_vm6, %vm13437_vm10  ;;  %v5481_v10 = vsel %vm13481_vm2, %v5449_v33, 0.0  ;;  %v3837_v23 = vadd.f32 %v7062_v32, %v10146_v55  ;;  %v7063_v55 = vadd.f32 %v10258_v22, %v3616_v25  ;;  %v3618_v33 = vpop.f32.mrb[41].mxu1  ;;  %v10721_v32 = vld [vmem:[#allocation4 + $0x48] sm:$0xff] }
 0x400   : > { %4750 = vst.msk [vmem:[#allocation5 + $0x170] sm:$0xff] %vm13478_vm7, %v7246_v60  ;;  %v4322_v47 = vsel %vm13479_vm8, %v10594_v5, 0.0  ;;  %vm13482_vm6 = vmmov %vm13476_vm1  ;;  %v7248_v5 = vpop.eup %7247  ;;  %vm13486_vm8 = vnez %v13389_v28  ;;  %v13514_v28 = vld [vmem:[#allocation36_spill] sm:$0xff] }
 0x401   : > { %4391 = vrot.lane.b32.xlu1 %v4322_v47, %s7384_s16  ;;  %4043 = vst.msk [vmem:[#allocation5 + $0x168] sm:$0xff] %vm13476_vm1, %v4011_v52  ;;  %v10705_v60 = vld [vmem:[#allocation4 + $0x87] sm:$0xff]  ;;  %vm13483_vm7 = vmmov %vm13476_vm1  ;;  %v4098_v62 = vsel %vm13486_vm8, %v10567_v59, 0.0  ;;  %7253 = vtanh.f32 %v3837_v23  ;;  %v3842_v23 = vadd.f32 %v7063_v55, %v10154_v61 }
 0x402   : > { %5513 = vst.msk [vmem:[#allocation5 + $0x100] sm:$0xff] %vm13482_vm6, %v5481_v10  ;;  %vm13484_vm14 = vmmov %vm13476_vm1  ;;  %v5450_v47 = vld [vmem:[#allocation4 + $0x81] sm:$0xff]  ;;  %vm13487_vm1 = vnez %v12752_v1 }
 0x403   : > { %3948 = vst.msk [vmem:[#allocation4 + $0x98] sm:$0xff] %vm13483_vm7, %v7248_v5  ;;  %vm13485_vm15 = vmand %vm13425_vm5, %vm13467_vm3  ;;  %vm13489_vm3 = vnez %v13488_v53  ;;  %v13491_v52 = vld [vmem:[#allocation37_spill] sm:$0xff]  ;;  %7255 = vtanh.f32 %v3842_v23  ;;  %v13512_v53 = vld [vmem:[#allocation39_spill] sm:$0xff] }
 0x404   : > { %4751 = vst.msk [vmem:[#allocation5 + $0x188] sm:$0xff] %vm13484_vm14, %v7248_v5  ;;  %v5027_v48 = vsel %vm13485_vm15, %v10498_v31, 0.0  ;;  %vm13490_vm6 = vmand %vm13487_vm1, %vm13489_vm3  ;;  %vm13492_vm7 = vnez %v13491_v52  ;;  %v13493_v59 = vld [vmem:[#allocation33_spill] sm:$0xff]  ;;  %v7250_v5 = vpop.eup %7249 }
 0x405   : > { %5095 = vrot.lane.b32.xlu0 %v5027_v48, %s7384_s16  ;;  %4168 = vrot.lane.b32.xlu1 %v4098_v62, %s7386_s11  ;;  %v4012_v21 = vsel %vm13490_vm6, %v10705_v60, 0.0  ;;  %vm13494_vm14 = vnez %v13493_v59  ;;  %v10735_v25 = vld [vmem:[#allocation4 + $0x8f] sm:$0xff]  ;;  %vm13497_vm4 = vmmov %vm13496_vm9  ;;  %v3621_v48 = vpop.f32.mrb[42].mxu1  ;;  %v5251_v62 = vsel %vm13425_vm5, %v10721_v32, 0.0  ;;  %v10748_v55 = vld [vmem:[#allocation4 + $0x41] sm:$0xff] }
 0x406   : > { %vm13495_vm15 = vmand %vm13492_vm7, %vm13494_vm14  ;;  %4044 = vst.msk [vmem:[#allocation5 + $0x180] sm:$0xff] %vm13496_vm9, %v4012_v21  ;;  %v5451_v33 = vld [vmem:[#allocation4 + $0x89] sm:$0xff]  ;;  %v3623_v61 = vpop.f32.mrb[43].mxu1 }
 0x407   : > { %v5482_v10 = vsel %vm13495_vm15, %v5450_v47, 0.0  ;;  %vm13498_vm0 = vmmov %vm13497_vm4  ;;  %v7064_v47 = vadd.f32 %v10258_v22, %v3621_v48  ;;  %v13500_v21 = vld [vmem:[#allocation61_spill] sm:$0xff]  ;;  %v7252_v23 = vpop.eup %7251  ;;  %v4804_v61 = vsel %vm13437_vm10, %v10748_v55, 0.0  ;;  %vm13513_vm10 = vnez %v13512_v53 }
 0x408   : > { %5514 = vst.msk [vmem:[#allocation5 + $0x118] sm:$0xff] %vm13497_vm4, %v5482_v10  ;;  %vm13499_vm2 = vmmov %vm13498_vm0 }
 0x409   : > { %3949 = vst.msk [vmem:[#allocation4 + $0xa0] sm:$0xff] %vm13498_vm0, %v7250_v5  ;;  %5319 = vrot.lane.b32.xlu0 %v5251_v62, %s7387_s29  ;;  %4616 = vrot.lane.b32.xlu1 %v10474_v0, %s7387_s29  ;;  %vm13501_vm0 = vnez %v13500_v21  ;;  %vm13504_vm5 = vmmov %vm13499_vm2  ;;  %v3847_v48 = vadd.f32 %v7064_v47, %v10152_v50  ;;  %v3626_v0 = vpop.f32.mrb[44].mxu1  ;;  %v13507_v47 = vld [vmem:[#allocation65_spill] sm:$0xff] }
 0x40a   : > { %4752 = vst.msk [vmem:[#allocation5 + $0x1a0] sm:$0xff] %vm13499_vm2, %v7250_v5  ;;  %v4013_v10 = vsel %vm13501_vm0, %v10735_v25, 0.0  ;;  %v13502_v5 = vld [vmem:[#allocation38_spill] sm:$0xff]  ;;  %vm13505_vm4 = vmmov %vm13499_vm2  ;;  %v3628_v50 = vpop.f32.mrb[45].mxu1  ;;  %vm13508_vm15 = vnez %v13507_v47 }
 0x40b   : > { %vm13503_vm9 = vnez %v13502_v5  ;;  %4045 = vst.msk [vmem:[#allocation5 + $0x198] sm:$0xff] %vm13504_vm5, %v4013_v10  ;;  %v10758_v62 = vld [vmem:[#allocation4 + $0x97] sm:$0xff]  ;;  %vm13506_vm6 = vmmov %vm13499_vm2  ;;  %7257 = vtanh.f32 %v3847_v48  ;;  %v7254_v48 = vpop.eup %7253 }
 0x40c   : > { %v5483_v8 = vsel %vm13503_vm9, %v5451_v33, 0.0  ;;  %3950 = vst.msk [vmem:[#allocation4 + $0xa8] sm:$0xff] %vm13499_vm2, %v7252_v23  ;;  %v4323_v33 = vsel %vm13486_vm8, %v10635_v9, 0.0  ;;  %v5452_v10 = vld [vmem:[#allocation4 + $0x91] sm:$0xff]  ;;  %vm13515_vm8 = vnez %v13514_v28  ;;  %vm13518_vm3 = vmmov %vm13506_vm6 }
 0x40d   : > { %5515 = vst.msk [vmem:[#allocation5 + $0x130] sm:$0xff] %vm13505_vm4, %v5483_v8  ;;  %v7065_v8 = vadd.f32 %v10258_v22, %v3626_v0  ;;  %4873 = vrot.lane.b32.xlu0 %v4804_v61, %s7386_s11  ;;  %4393 = vrot.lane.b32.xlu1 %v4323_v33, %s7384_s16  ;;  %vm13516_vm2 = vmand %vm13513_vm10, %vm13515_vm8  ;;  %v3631_v61 = vpop.f32.mrb[46].mxu1  ;;  %v10789_v33 = vld [vmem:[#allocation4 + $0x49] sm:$0xff]  ;;  %vm13538_vm10 = vcmask 261120  }
 0x40e   : > { %4753 = vst.msk [vmem:[#allocation5 + $0x1b8] sm:$0xff] %vm13506_vm6, %v7252_v23  ;;  %v13509_v23 = vld [vmem:[#allocation66_spill] sm:$0xff]  ;;  %v5484_v9 = vsel %vm13516_vm2, %v5452_v10, 0.0  ;;  %vm13519_vm0 = vmmov %vm13518_vm3 }
 0x40f   : > { %vm13510_vm5 = vnez %v13509_v23  ;;  %v3852_v0 = vadd.f32 %v7065_v8, %v10160_v43  ;;  %5516 = vst.msk [vmem:[#allocation5 + $0x148] sm:$0xff] %vm13518_vm3, %v5484_v9  ;;  %vm13520_vm1 = vmmov %vm13519_vm0  ;;  %v7066_v43 = vadd.f32 %v10258_v22, %v3631_v61  ;;  %v3633_v8 = vpop.f32.mrb[47].mxu1 }
 0x410   : > { %vm13511_vm4 = vmand %vm13508_vm15, %vm13510_vm5  ;;  %v10783_v50 = vld [vmem:[#allocation4 + $0x9f] sm:$0xff]  ;;  %3951 = vst.msk [vmem:[#allocation4 + $0xb0] sm:$0xff] %vm13519_vm0, %v7254_v48  ;;  %v5028_v8 = vsel %vm13435_vm11, %v10525_v4, 0.0  ;;  %vm13536_vm15 = vnez %v13240_v20 }
 0x411   : > { %v4014_v51 = vsel %vm13511_vm4, %v10758_v62, 0.0  ;;  %13517 = vst [vmem:[#allocation35_spill] sm:$0xff] %v10783_v50  ;;  %4754 = vst.msk [vmem:[#allocation5 + $0x1d0] sm:$0xff] %vm13520_vm1, %v7254_v48  ;;  %vm13521_vm4 = vnez %v13400_v58  ;;  %v5453_v23 = vld [vmem:[#allocation4 + $0x99] sm:$0xff]  ;;  %7259 = vtanh.f32 %v3852_v0  ;;  %4875 = vrot.lane.b32.xlu0 %v10789_v33, %s7386_s11  ;;  %v3857_v0 = vadd.f32 %v7066_v43, %v10158_v6  ;;  %v10819_v43 = vld [vmem:[#allocation4 + $0x50] sm:$0xff] }
 0x412   : > { %4046 = vst.msk [vmem:[#allocation5 + $0x1b0] sm:$0xff] %vm13506_vm6, %v4014_v51  ;;  %v4099_v10 = vsel %vm13521_vm4, %v10665_v24, 0.0  ;;  %v13522_v51 = vld [vmem:[#allocation64_spill] sm:$0xff]  ;;  %v13524_v48 = vld [vmem:[#allocation43_spill] sm:$0xff]  ;;  %vm13526_vm2 = vmmov %vm13519_vm0  ;;  %v7256_v24 = vpop.eup %7255 }
 0x413   : > { %4170 = vrot.lane.b32.xlu1 %v4099_v10, %s7386_s11  ;;  %vm13523_vm1 = vnez %v13522_v51  ;;  %vm13525_vm3 = vnez %v13524_v48  ;;  %v10806_v61 = vld [vmem:[#allocation4 + $0xa7] sm:$0xff]  ;;  %vm13527_vm6 = vmmov %vm13519_vm0  ;;  %v3636_v10 = vpop.f32.mrb[48].mxu1  ;;  %7261 = vtanh.f32 %v3857_v0 }
 0x414   : > { %v4015_v9 = vsel %vm13523_vm1, %v10783_v50, 0.0  ;;  %v5485_v47 = vsel %vm13525_vm3, %v5453_v23, 0.0  ;;  %3952 = vst.msk [vmem:[#allocation4 + $0xb8] sm:$0xff] %vm13527_vm6, %v7256_v24  ;;  %vm13528_vm5 = vmmov %vm13519_vm0  ;;  %vm13529_vm1 = vnez %v13391_v49  ;;  %v3638_v6 = vpop.f32.mrb[49].mxu1  ;;  %v13532_v51 = vld [vmem:[#allocation68_spill] sm:$0xff]  ;;  %vm13535_vm6 = vnez %v13106_v36 }
 0x415   : > { %4047 = vst.msk [vmem:[#allocation5 + $0x1c8] sm:$0xff] %vm13519_vm0, %v4015_v9  ;;  %v4548_v23 = vsel %vm13529_vm1, %v10498_v31, 0.0  ;;  %v5454_v9 = vld [vmem:[#allocation4 + $0xa1] sm:$0xff]  ;;  %5097 = vrot.lane.b32.xlu0 %v5028_v8, %s7384_s16  ;;  %vm13533_vm0 = vnez %v13532_v51  ;;  %vm13537_vm3 = vmand %vm13535_vm6, %vm13536_vm15  ;;  %v7258_v0 = vpop.eup %7257  ;;  %v5252_v6 = vsel %vm13435_vm11, %v10819_v43, 0.0  ;;  %vm13546_vm11 = vnez %v12999_v37 }
 0x416   : > { %5517 = vst.msk [vmem:[#allocation5 + $0x160] sm:$0xff] %vm13526_vm2, %v5485_v47  ;;  %v7067_v47 = vadd.f32 %v10258_v22, %v3636_v10  ;;  %v5486_v31 = vsel %vm13537_vm3, %v5454_v9, 0.0  ;;  %vm13539_vm9 = vmmov %vm13538_vm10  ;;  %vm13542_vm3 = vnez %v13456_v18  ;;  %v13555_v49 = vld [vmem:[#allocation80_spill] sm:$0xff]  ;;  %v13574_v18 = vld [vmem:[#allocation83_spill] sm:$0xff] }
 0x417   : > { %4755 = vst.msk [vmem:[#allocation5 + $0x1e8] sm:$0xff] %vm13528_vm5, %v7256_v24  ;;  %4618 = vrot.lane.b32.xlu1 %v4548_v23, %s7387_s29  ;;  %v13530_v24 = vld [vmem:[#allocation67_spill] sm:$0xff]  ;;  %v10833_v8 = vld [vmem:[#allocation4 + $0xaf] sm:$0xff]  ;;  %vm13540_vm8 = vmmov %vm13539_vm9  ;;  %v3641_v23 = vpop.f32.mrb[50].mxu1 }
 0x418   : > { %vm13531_vm5 = vnez %v13530_v24  ;;  %v3862_v10 = vadd.f32 %v7067_v47, %v10166_v11  ;;  %5518 = vst.msk [vmem:[#allocation5 + $0x178] sm:$0xff] %vm13539_vm9, %v5486_v31  ;;  %vm13541_vm7 = vmmov %vm13540_vm8  ;;  %v5455_v9 = vld [vmem:[#allocation4 + $0xa9] sm:$0xff]  ;;  %v3643_v47 = vpop.f32.mrb[51].mxu1  ;;  %v13544_v31 = vld [vmem:[#allocation72_spill] sm:$0xff] }
 0x419   : > { %vm13534_vm2 = vmand %vm13531_vm5, %vm13533_vm0  ;;  %3953 = vst.msk [vmem:[#allocation4 + $0xc0] sm:$0xff] %vm13540_vm8, %v7258_v0  ;;  %5321 = vrot.lane.b32.xlu0 %v5252_v6, %s7387_s29  ;;  %v5487_v58 = vsel %vm13546_vm11, %v5455_v9, 0.0  ;;  %v10875_v47 = vld [vmem:[#allocation4 + $0x58] sm:$0xff]  ;;  %vm13561_vm5 = vcmask 261120  }
 0x41a   : > { %v4016_v50 = vsel %vm13534_vm2, %v10806_v61, 0.0  ;;  %4756 = vst.msk [vmem:[#allocation5 + $0x200] sm:$0xff] %vm13541_vm7, %v7258_v0  ;;  %vm13543_vm2 = vmand %vm13521_vm4, %vm13542_vm3  ;;  %7263 = vtanh.f32 %v3862_v10  ;;  %vm13545_vm7 = vnez %v13544_v31 }
 0x41b   : > { %4048 = vst.msk [vmem:[#allocation5 + $0x1e0] sm:$0xff] %vm13538_vm10, %v4016_v50  ;;  %v4324_v11 = vsel %vm13543_vm2, %v10748_v55, 0.0  ;;  %v7068_v50 = vadd.f32 %v10258_v22, %v3641_v23  ;;  %v4017_v17 = vsel %vm13545_vm7, %v10833_v8, 0.0  ;;  %vm13547_vm9 = vmmov %vm13540_vm8  ;;  %v7260_v55 = vpop.eup %7259  ;;  %v10859_v10 = vld [vmem:[#allocation4 + $0xb7] sm:$0xff]  ;;  %v3646_v23 = vpop.f32.mrb[52].mxu1  ;;  %vm13550_vm2 = vnez %v13445_v39 }
 0x41c   : > { %4395 = vrot.lane.b32.xlu1 %v4324_v11, %s7384_s16  ;;  %4049 = vst.msk [vmem:[#allocation5 + $0x1f8] sm:$0xff] %vm13547_vm9, %v4017_v17  ;;  %vm13548_vm10 = vmmov %vm13540_vm8  ;;  %vm13552_vm9 = vnez %v13407_v56  ;;  %v5456_v9 = vld [vmem:[#allocation4 + $0xb1] sm:$0xff] }
 0x41d   : > { %5519 = vst.msk [vmem:[#allocation5 + $0x190] sm:$0xff] %vm13548_vm10, %v5487_v58  ;;  %v3867_v0 = vadd.f32 %v7068_v50, %v10164_v3  ;;  %vm13549_vm4 = vmmov %vm13540_vm8  ;;  %v4100_v11 = vsel %vm13552_vm9, %v10721_v32, 0.0  ;;  %v7069_v3 = vadd.f32 %v10258_v22, %v3646_v23  ;;  %v3648_v50 = vpop.f32.mrb[53].mxu1  ;;  %v13553_v17 = vld [vmem:[#allocation79_spill] sm:$0xff] }
 0x41e   : > { %3954 = vst.msk [vmem:[#allocation4 + $0xc8] sm:$0xff] %vm13540_vm8, %v7260_v55  ;;  %vm13551_vm0 = vmand %vm13550_vm2, %vm13529_vm1  ;;  %vm13554_vm10 = vnez %v13553_v17  ;;  %vm13556_vm1 = vnez %v13555_v49  ;;  %vm13558_vm8 = vnez %v13120_v42 }
 0x41f   : > { %4757 = vst.msk [vmem:[#allocation5 + $0x218] sm:$0xff] %vm13549_vm4, %v7260_v55  ;;  %v5029_v6 = vsel %vm13551_vm0, %v10551_v45, 0.0  ;;  %7265 = vtanh.f32 %v3867_v0  ;;  %vm13557_vm0 = vmand %vm13554_vm10, %vm13556_vm1  ;;  %vm13559_vm4 = vnez %v13247_v38  ;;  %v7262_v55 = vpop.eup %7261  ;;  %v3872_v0 = vadd.f32 %v7069_v3, %v10172_v35  ;;  %v10902_v3 = vld [vmem:[#allocation4 + $0x51] sm:$0xff] }
 0x420   : > { %5099 = vrot.lane.b32.xlu0 %v5029_v6, %s7384_s16  ;;  %4172 = vrot.lane.b32.xlu1 %v4100_v11, %s7386_s11  ;;  %v4018_v58 = vsel %vm13557_vm0, %v10859_v10, 0.0  ;;  %vm13560_vm7 = vmand %vm13558_vm8, %vm13559_vm4  ;;  %v10889_v23 = vld [vmem:[#allocation4 + $0xbf] sm:$0xff]  ;;  %v3651_v6 = vpop.f32.mrb[54].mxu1  ;;  %v5253_v11 = vsel %vm13550_vm2, %v10875_v47, 0.0 }
 0x421   : > { %v5488_v32 = vsel %vm13560_vm7, %v5456_v9, 0.0  ;;  %4050 = vst.msk [vmem:[#allocation5 + $0x210] sm:$0xff] %vm13561_vm5, %v4018_v58  ;;  %vm13562_vm11 = vmmov %vm13561_vm5  ;;  %v5457_v50 = vld [vmem:[#allocation4 + $0xb9] sm:$0xff]  ;;  %7267 = vtanh.f32 %v3872_v0  ;;  %v7070_v9 = vadd.f32 %v10258_v22, %v3651_v6  ;;  %v3653_v35 = vpop.f32.mrb[55].mxu1  ;;  %v13565_v58 = vld [vmem:[#allocation78_spill] sm:$0xff]  ;;  %v4806_v6 = vsel %vm13542_vm3, %v10902_v3, 0.0 }
 0x422   : > { %5520 = vst.msk [vmem:[#allocation5 + $0x1a8] sm:$0xff] %vm13562_vm11, %v5488_v32  ;;  %vm13563_vm6 = vmmov %vm13561_vm5  ;;  %vm13575_vm3 = vnez %v13574_v18 }
 0x423   : > { %3955 = vst.msk [vmem:[#allocation4 + $0xd0] sm:$0xff] %vm13563_vm6, %v7262_v55  ;;  %vm13564_vm15 = vmmov %vm13561_vm5  ;;  %vm13567_vm5 = vnez %v13009_v27 }
 0x424   : > { %4758 = vst.msk [vmem:[#allocation5 + $0x230] sm:$0xff] %vm13564_vm15, %v7262_v55  ;;  %5323 = vrot.lane.b32.xlu0 %v5253_v11, %s7387_s29  ;;  %4620 = vrot.lane.b32.xlu1 %v10525_v4, %s7387_s29  ;;  %vm13566_vm15 = vnez %v13565_v58  ;;  %v5489_v39 = vsel %vm13567_vm5, %v5457_v50, 0.0  ;;  %vm13568_vm7 = vmmov %vm13563_vm6  ;;  %v7264_v22 = vpop.eup %7263  ;;  %v3877_v55 = vadd.f32 %v7070_v9, %v10170_v63  ;;  %v3656_v4 = vpop.f32.mrb[56].mxu1  ;;  %v4325_v11 = vsel %vm13552_vm9, %v10789_v33, 0.0  ;;  %v7366_v63 = vld [vmem:[%s12010_s4] ss:$0 sm:$0xff] }
 0x425   : > { %v4019_v32 = vsel %vm13566_vm15, %v10889_v23, 0.0  ;;  %5521 = vst.msk [vmem:[#allocation5 + $0x1c0] sm:$0xff] %vm13568_vm7, %v5489_v39  ;;  %v10912_v0 = vld [vmem:[#allocation4 + $0xc7] sm:$0xff]  ;;  %vm13570_vm11 = vmmov %vm13563_vm6  ;;  %v7071_v9 = vadd.f32 %v7366_v63, %v3656_v4  ;;  %v3658_v35 = vpop.f32.mrb[57].mxu1  ;;  %vm13610_vm5 = vcmask 261120  }
 0x426   : > { %4051 = vst.msk [vmem:[#allocation5 + $0x228] sm:$0xff] %vm13563_vm6, %v4019_v32  ;;  %13569 = vst [vmem:[#allocation87_spill] sm:$0xff] %v10912_v0  ;;  %v5458_v50 = vld [vmem:[#allocation4 + $0xc1] sm:$0xff]  ;;  %7269 = vtanh.f32 %v3877_v55  ;;  %v13572_v32 = vld [vmem:[#allocation82_spill] sm:$0xff] }
 0x427   : > { %3956 = vst.msk [vmem:[#allocation4 + $0xd8] sm:$0xff] %vm13570_vm11, %v7264_v22  ;;  %vm13571_vm2 = vmmov %vm13563_vm6  ;;  %vm13573_vm0 = vnez %v13572_v32  ;;  %v13577_v33 = vld [vmem:[#allocation52_spill] sm:$0xff]  ;;  %v13579_v39 = vld [vmem:[#allocation49_spill] sm:$0xff] }
 0x428   : > { %4759 = vst.msk [vmem:[#allocation5 + $0x248] sm:$0xff] %vm13571_vm2, %v7264_v22  ;;  %4877 = vrot.lane.b32.xlu0 %v4806_v6, %s7386_s11  ;;  %4397 = vrot.lane.b32.xlu1 %v4325_v11, %s7384_s16  ;;  %vm13576_vm6 = vmand %vm13573_vm0, %vm13575_vm3  ;;  %vm13578_vm9 = vnez %v13577_v33  ;;  %vm13580_vm7 = vnez %v13579_v39  ;;  %v13582_v4 = vld [vmem:[#allocation57_spill] sm:$0xff]  ;;  %v3661_v6 = vpop.f32.mrb[58].mxu1  ;;  %v10945_v11 = vld [vmem:[#allocation4 + $0x59] sm:$0xff] }
 0x429   : > { %v4020_v56 = vsel %vm13576_vm6, %v10912_v0, 0.0  ;;  %vm13581_vm11 = vmand %vm13578_vm9, %vm13580_vm7  ;;  %v7266_v55 = vpop.eup %7265  ;;  %v3882_v35 = vadd.f32 %v7071_v9, %v13582_v4  ;;  %vm13587_vm6 = vnez %v13422_v2  ;;  %v7072_v9 = vadd.f32 %v7366_v63, %v3661_v6  ;;  %v3663_v4 = vpop.f32.mrb[59].mxu1 }
 0x42a   : > { %v5490_v22 = vsel %vm13581_vm11, %v5458_v50, 0.0  ;;  %v10939_v49 = vld [vmem:[#allocation4 + $0xcf] sm:$0xff]  ;;  %4052 = vst.msk [vmem:[#allocation5 + $0x240] sm:$0xff] %vm13571_vm2, %v4020_v56  ;;  %vm13584_vm1 = vmmov %vm13571_vm2  ;;  %v4101_v50 = vsel %vm13587_vm6, %v10819_v43, 0.0  ;;  %v13588_v56 = vld [vmem:[#allocation27_spill] sm:$0xff] }
 0x42b   : > { %13583 = vst [vmem:[#allocation41_spill] sm:$0xff] %v10939_v49  ;;  %5522 = vst.msk [vmem:[#allocation5 + $0x1d8] sm:$0xff] %vm13584_vm1, %v5490_v22  ;;  %v5459_v18 = vld [vmem:[#allocation4 + $0xc9] sm:$0xff]  ;;  %7271 = vtanh.f32 %v3882_v35  ;;  %v7268_v43 = vpop.eup %7267 }
 0x42c   : > { %vm13585_vm15 = vmmov %vm13584_vm1  ;;  %4879 = vrot.lane.b32.xlu0 %v10945_v11, %s7386_s11  ;;  %4174 = vrot.lane.b32.xlu1 %v4101_v50, %s7386_s11  ;;  %v13594_v35 = vld [vmem:[#allocation42_spill] sm:$0xff]  ;;  %3958 = vst.msk [vmem:[#allocation4 + $0xe8] sm:$0xff] %vm13571_vm2, %v7268_v43  ;;  %v3666_v50 = vpop.f32.mrb[60].mxu1 }
 0x42d   : > { %3957 = vst.msk [vmem:[#allocation4 + $0xe0] sm:$0xff] %vm13585_vm15, %v7266_v55  ;;  %vm13586_vm10 = vmmov %vm13584_vm1  ;;  %vm13589_vm1 = vnez %v13588_v56  ;;  %v3887_v6 = vadd.f32 %v7072_v9, %v13594_v35  ;;  %v3668_v58 = vpop.f32.mrb[61].mxu1  ;;  %v10973_v9 = vld [vmem:[#allocation4 + $0x60] sm:$0xff]  ;;  %v13601_v35 = vld [vmem:[#allocation86_spill] sm:$0xff] }
 0x42e   : > { %4760 = vst.msk [vmem:[#allocation5 + $0x260] sm:$0xff] %vm13586_vm10, %v7266_v55  ;;  %v4021_v22 = vsel %vm13589_vm1, %v10939_v49, 0.0  ;;  %v13590_v55 = vld [vmem:[#allocation58_spill] sm:$0xff]  ;;  %vm13592_vm15 = vmmov %vm13571_vm2  ;;  %vm13596_vm1 = vnez %v13454_v19 }
 0x42f   : > { %vm13591_vm10 = vnez %v13590_v55  ;;  %4053 = vst.msk [vmem:[#allocation5 + $0x258] sm:$0xff] %vm13592_vm15, %v4021_v22  ;;  %vm13593_vm11 = vmmov %vm13571_vm2  ;;  %v10961_v4 = vld [vmem:[#allocation4 + $0xd7] sm:$0xff]  ;;  %v5030_v56 = vsel %vm13596_vm1, %v10581_v26, 0.0  ;;  %7273 = vtanh.f32 %v3887_v6  ;;  %vm13602_vm15 = vnez %v13601_v35  ;;  %v13604_v55 = vld [vmem:[#allocation56_spill] sm:$0xff] }
 0x430   : > { %v5491_v32 = vsel %vm13591_vm10, %v5459_v18, 0.0  ;;  %vm13595_vm3 = vmmov %vm13571_vm2  ;;  %v13597_v18 = vld [vmem:[#allocation46_spill] sm:$0xff]  ;;  %5101 = vrot.lane.b32.xlu0 %v5030_v56, %s7384_s16  ;;  %vm13605_vm2 = vnez %v13604_v55  ;;  %v7270_v58 = vpop.eup %7269  ;;  %v5254_v35 = vsel %vm13596_vm1, %v10973_v9, 0.0 }
 0x431   : > { %5523 = vst.msk [vmem:[#allocation5 + $0x1f0] sm:$0xff] %vm13593_vm11, %v5491_v32  ;;  %vm13598_vm0 = vnez %v13597_v18  ;;  %v5460_v49 = vld [vmem:[#allocation4 + $0xd1] sm:$0xff]  ;;  %v7073_v32 = vadd.f32 %v7366_v63, %v3666_v50  ;;  %v13609_v50 = vld [vmem:[#allocation28_spill] sm:$0xff]  ;;  %vm13611_vm7 = vmmov %vm13610_vm5 }
 0x432   : > { %4761 = vst.msk [vmem:[#allocation5 + $0x278] sm:$0xff] %vm13595_vm3, %v7268_v43  ;;  %v4550_v22 = vsel %vm13598_vm0, %v10551_v45, 0.0  ;;  %v13599_v43 = vld [vmem:[#allocation85_spill] sm:$0xff]  ;;  %v13606_v45 = vld [vmem:[#allocation55_spill] sm:$0xff]  ;;  %vm13612_vm8 = vmmov %vm13610_vm5 }
 0x433   : > { %4622 = vrot.lane.b32.xlu1 %v4550_v22, %s7387_s29  ;;  %vm13600_vm3 = vnez %v13599_v43  ;;  %vm13607_vm10 = vnez %v13606_v45  ;;  %v3892_v56 = vadd.f32 %v7073_v32, %v13609_v50  ;;  %3959 = vst.msk [vmem:[#allocation4 + $0xf0] sm:$0xff] %vm13612_vm8, %v7270_v58  ;;  %vm13613_vm4 = vmmov %vm13610_vm5  ;;  %v3671_v22 = vpop.f32.mrb[62].mxu1  ;;  %v13617_v50 = vld [vmem:[#allocation63_spill] sm:$0xff]  ;;  %v13793_v45 = vld [vmem:[#allocation78_spill] sm:$0xff] }
 0x434   : > { %vm13603_vm11 = vmand %vm13600_vm3, %vm13602_vm15  ;;  %v10987_v0 = vld [vmem:[#allocation4 + $0xdf] sm:$0xff]  ;;  %4762 = vst.msk [vmem:[#allocation5 + $0x290] sm:$0xff] %vm13613_vm4, %v7270_v58  ;;  %5325 = vrot.lane.b32.xlu0 %v5254_v35, %s7387_s29  ;;  %vm13618_vm4 = vnez %v13617_v50 }
 0x435   : > { %v4022_v17 = vsel %vm13603_vm11, %v10961_v4, 0.0  ;;  %vm13608_vm9 = vmand %vm13605_vm2, %vm13607_vm10  ;;  %v5461_v32 = vld [vmem:[#allocation4 + $0xd9] sm:$0xff]  ;;  %7275 = vtanh.f32 %v3892_v56  ;;  %v7272_v2 = vpop.eup %7271  ;;  %vm13623_vm11 = vnez %v12554_v29 }
 0x436   : > { %v5492_v6 = vsel %vm13608_vm9, %v5460_v49, 0.0  ;;  %4054 = vst.msk [vmem:[#allocation5 + $0x270] sm:$0xff] %vm13610_vm5, %v4022_v17  ;;  %vm13614_vm9 = vmand %vm13587_vm6, %vm13473_vm12  ;;  %v7074_v17 = vadd.f32 %v7366_v63, %v3671_v22  ;;  %v13615_v58 = vld [vmem:[#allocation84_spill] sm:$0xff]  ;;  %v5493_v43 = vsel %vm13618_vm4, %v5461_v32, 0.0  ;;  %v13625_v22 = vld [vmem:[#allocation50_spill] sm:$0xff] }
 0x437   : > { %5524 = vst.msk [vmem:[#allocation5 + $0x208] sm:$0xff] %vm13611_vm7, %v5492_v6  ;;  %v4326_v49 = vsel %vm13614_vm9, %v10902_v3, 0.0  ;;  %v3673_v6 = vpop.f32.mrb[63].mxu1  ;;  %vm13616_vm8 = vnez %v13615_v58  ;;  %vm13619_vm7 = vmmov %vm13610_vm5  ;;  %v13620_v3 = vld [vmem:[#allocation47_spill] sm:$0xff]  ;;  %v11012_v63 = vld [vmem:[#allocation4 + $0xe7] sm:$0xff] }
 0x438   : > { %4399 = vrot.lane.b32.xlu1 %v4326_v49, %s7384_s16  ;;  %v4023_v19 = vsel %vm13616_vm8, %v10987_v0, 0.0  ;;  %5525 = vst.msk [vmem:[#allocation5 + $0x220] sm:$0xff] %vm13619_vm7, %v5493_v43  ;;  %v3897_v56 = vadd.f32 %v7074_v17, %v13620_v3  ;;  %vm13621_vm6 = vmmov %vm13610_vm5  ;;  %v5462_v49 = vld [vmem:[#allocation4 + $0xe1] sm:$0xff]  ;;  %v13629_v6 = vld [vmem:[#allocation90_spill] sm:$0xff] }
 0x439   : > { %4055 = vst.msk [vmem:[#allocation5 + $0x288] sm:$0xff] %vm13610_vm5, %v4023_v19  ;;  %vm13622_vm1 = vmmov %vm13610_vm5  ;;  %vm13626_vm5 = vnez %v13625_v22  ;;  %v11027_v32 = vld [vmem:[#allocation4 + $0x68] sm:$0xff]  ;;  %v13633_v19 = vld [vmem:[#allocation60_spill] sm:$0xff]  ;;  %v7274_v3 = vpop.eup %7273  ;;  %v4607_v22 = vpop.permute.xlu1 %4606 }
 0x43a   : > { %3960 = vst.msk [vmem:[#allocation4 + $0xf8] sm:$0xff] %vm13621_vm6, %v7272_v2  ;;  %vm13624_vm9 = vmand %vm13623_vm11, %vm13598_vm0  ;;  %v4102_v43 = vsel %vm13626_vm5, %v10875_v47, 0.0  ;;  %7277 = vtanh.f32 %v3897_v56  ;;  %v13627_v17 = vld [vmem:[#allocation89_spill] sm:$0xff]  ;;  %vm13630_vm6 = vnez %v13629_v6  ;;  %vm13632_vm0 = vcmask 261120   ;;  %v13635_v47 = vld [vmem:[#allocation59_spill] sm:$0xff] }
 0x43b   : > { %4763 = vst.msk [vmem:[#allocation5 + $0x2a8] sm:$0xff] %vm13622_vm1, %v7272_v2  ;;  %v5031_v35 = vsel %vm13624_vm9, %v10604_v54, 0.0  ;;  %vm13628_vm7 = vnez %v13627_v17  ;;  %vm13634_vm9 = vnez %v13633_v19  ;;  %vm13636_vm15 = vnez %v13635_v47  ;;  %v5016_v56 = vld [vmem:[#allocation4 + $0xef] sm:$0xff]  ;;  %vm13638_vm3 = vmmov %vm13632_vm0  ;;  %v13643_v17 = vld [vmem:[#allocation71_spill] sm:$0xff] }
 0x43c   : > { %5103 = vrot.lane.b32.xlu0 %v5031_v35, %s7384_s16  ;;  %4176 = vrot.lane.b32.xlu1 %v4102_v43, %s7386_s11  ;;  %vm13631_vm1 = vmand %vm13628_vm7, %vm13630_vm6  ;;  %v5255_v35 = vsel %vm13623_vm11, %v11027_v32, 0.0  ;;  %v5463_v43 = vld [vmem:[#allocation4 + $0xe9] sm:$0xff]  ;;  %v13816_v47 = vld [vmem:[#allocation27_spill] sm:$0xff] }
 0x43d   : > { %v4024_v18 = vsel %vm13631_vm1, %v11012_v63, 0.0  ;;  %vm13637_vm8 = vmand %vm13634_vm9, %vm13636_vm15 }
 0x43e   : > { %4056 = vst.msk [vmem:[#allocation5 + $0x2a0] sm:$0xff] %vm13632_vm0, %v4024_v18  ;;  %v5494_v2 = vsel %vm13637_vm8, %v5462_v49, 0.0  ;;  %vm13639_vm4 = vmmov %vm13632_vm0  ;;  %v4776_v18 = vld [vmem:[#allocation4 + $0x61] sm:$0xff] }
 0x43f   : > { %5526 = vst.msk [vmem:[#allocation5 + $0x238] sm:$0xff] %vm13638_vm3, %v5494_v2  ;;  %vm13640_vm2 = vmmov %vm13632_vm0  ;;  %v13641_v49 = vld [vmem:[#allocation88_spill] sm:$0xff]  ;;  %vm13644_vm3 = vnez %v13643_v17 }
 0x440   : > { %3961 = vst.msk [vmem:[#allocation4 + $0x100] sm:$0xff] %vm13639_vm4, %v7274_v3  ;;  %5327 = vrot.lane.b32.xlu0 %v5255_v35, %s7387_s29  ;;  %4624 = vrot.lane.b32.xlu1 %v10581_v26, %s7387_s29  ;;  %vm13642_vm8 = vnez %v13641_v49  ;;  %v5495_v2 = vsel %vm13644_vm3, %v5463_v43, 0.0  ;;  %vm13645_vm4 = vmmov %vm13632_vm0  ;;  %v4808_v26 = vsel %vm13473_vm12, %v4776_v18, 0.0  ;;  %v13651_v43 = vld [vmem:[#allocation93_spill] sm:$0xff]  ;;  %vm13657_vm12 = vnez %v13656_v7 }
 0x441   : > { %4764 = vst.msk [vmem:[#allocation5 + $0x2c0] sm:$0xff] %vm13640_vm2, %v7274_v3  ;;  %v4025_v6 = vsel %vm13642_vm8, %v5016_v56, 0.0  ;;  %vm13646_vm2 = vmmov %vm13632_vm0  ;;  %v7276_v3 = vpop.eup %7275  ;;  %v5017_v29 = vld [vmem:[#allocation4 + $0xf7] sm:$0xff]  ;;  %v4327_v56 = vsel %vm13626_vm5, %v10945_v11, 0.0  ;;  %vm13662_vm3 = vcmask 1048320  }
 0x442   : > { %4057 = vst.msk [vmem:[#allocation5 + $0x2b8] sm:$0xff] %vm13645_vm4, %v4025_v6  ;;  %vm13647_vm11 = vmmov %vm13632_vm0  ;;  %v5464_v35 = vld [vmem:[#allocation4 + $0xf1] sm:$0xff]  ;;  %v13649_v6 = vld [vmem:[#allocation53_spill] sm:$0xff] }
 0x443   : > { %5527 = vst.msk [vmem:[#allocation5 + $0x250] sm:$0xff] %vm13646_vm2, %v5495_v2  ;;  %vm13648_vm1 = vmmov %vm13632_vm0  ;;  %vm13650_vm4 = vnez %v13649_v6  ;;  %vm13652_vm2 = vnez %v13651_v43  ;;  %v13666_v43 = vld [vmem:[#allocation75_spill] sm:$0xff]  ;;  %v4864_v6 = vpop.permute.xlu0 %4863 }
 0x444   : > { %3962 = vst.msk [vmem:[#allocation4 + $0x108] sm:$0xff] %vm13647_vm11, %v7276_v3  ;;  %4881 = vrot.lane.b32.xlu0 %v4808_v26, %s7386_s11  ;;  %4401 = vrot.lane.b32.xlu1 %v4327_v56, %s7384_s16  ;;  %vm13653_vm11 = vmand %vm13650_vm4, %vm13652_vm2  ;;  %v7278_v11 = vpop.eup %7277  ;;  %vm13680_vm2 = vcmask 785920   ;;  %vm13681_vm4 = vcmask 523520  }
 0x445   : > { %4765 = vst.msk [vmem:[#allocation5 + $0x2d8] sm:$0xff] %vm13648_vm1, %v7276_v3  ;;  %v4026_v2 = vsel %vm13653_vm11, %v5017_v29, 0.0  ;;  %v13654_v3 = vld [vmem:[#allocation70_spill] sm:$0xff]  ;;  %vm13659_vm8 = vmmov %vm13632_vm0  ;;  %vm13663_vm11 = vnez %v13443_v44 }
 0x446   : > { %vm13655_vm1 = vnez %v13654_v3  ;;  %4058 = vst.msk [vmem:[#allocation5 + $0x2d0] sm:$0xff] %vm13659_vm8, %v4026_v2  ;;  %vm13660_vm5 = vmmov %vm13632_vm0  ;;  %v11080_v29 = vld [vmem:[#allocation4 + $0x69] sm:$0xff]  ;;  %v4103_v56 = vsel %vm13663_vm11, %v10973_v9, 0.0  ;;  %vm13667_vm8 = vnez %v13666_v43  ;;  %v4384_v9 = vpop.permute.xlu1 %4383 }
 0x447   : > { %vm13658_vm6 = vmand %vm13655_vm1, %vm13657_vm12  ;;  %v5018_v26 = vld [vmem:[#allocation4 + $0xff] sm:$0xff]  ;;  %3963 = vst.msk [vmem:[#allocation4 + $0x110] sm:$0xff] %vm13632_vm0, %v7278_v11 }
 0x448   : > { %v5496_v49 = vsel %vm13658_vm6, %v5464_v35, 0.0  ;;  %vm13661_vm7 = vmmov %vm13632_vm0  ;;  %4703 = vst.msk [vmem:[#allocation5] sm:$0xff] %vm13662_vm3, %v4607_v22  ;;  %v5465_v35 = vld [vmem:[#allocation4 + $0xf9] sm:$0xff]  ;;  %4883 = vrot.lane.b32.xlu0 %v11080_v29, %s7386_s11  ;;  %4178 = vrot.lane.b32.xlu1 %v4103_v56, %s7386_s11  ;;  %v5032_v56 = vsel %vm13472_vm13, %v10629_v40, 0.0 }
 0x449   : > { %5528 = vst.msk [vmem:[#allocation5 + $0x268] sm:$0xff] %vm13660_vm5, %v5496_v49  ;;  %v13664_v49 = vld [vmem:[#allocation91_spill] sm:$0xff]  ;;  %vm13669_vm3 = vmmov %vm13632_vm0  ;;  %vm13671_vm5 = vcmask 785920  }
 0x44a   : > { %4766 = vst.msk [vmem:[#allocation5 + $0x2f0] sm:$0xff] %vm13661_vm7, %v7278_v11  ;;  %vm13665_vm6 = vnez %v13664_v49  ;;  %v5497_v11 = vsel %vm13667_vm8, %v5465_v35, 0.0  ;;  %vm13668_vm7 = vmmov %vm13632_vm0  ;;  %vm13670_vm0 = vcmask 523520   ;;  %v5224_v35 = vld [vmem:[#allocation4 + $0x70] sm:$0xff]  ;;  %v4161_v43 = vpop.permute.xlu1 %4160 }
 0x44b   : > { %v4027_v2 = vsel %vm13665_vm6, %v5018_v26, 0.0  ;;  %5529 = vst.msk [vmem:[#allocation5 + $0x280] sm:$0xff] %vm13669_vm3, %v5497_v11  ;;  %v4796_v22 = vld [vmem:[#allocation4 + $0x101] sm:$0xff]  ;;  %v13672_v26 = vld [vmem:[#allocation51_spill] sm:$0xff]  ;;  %vm13682_vm8 = vmand %vm13663_vm11, %vm13494_vm14  ;;  %vm13692_vm11 = vcmask 1048320  }
 0x44c   : > { %4059 = vst.msk [vmem:[#allocation5 + $0x2e8] sm:$0xff] %vm13668_vm7, %v4027_v2  ;;  %vm13673_vm6 = vnez %v13672_v26  ;;  %5105 = vrot.lane.b32.xlu0 %v5032_v56, %s7384_s16  ;;  %v13674_v2 = vld [vmem:[#allocation74_spill] sm:$0xff] }
 0x44d   : > { %4959 = vst.msk [vmem:[#allocation5 + $0x8] sm:$0xff] %vm13670_vm0, %v4864_v6  ;;  %v4552_v49 = vsel %vm13673_vm6, %v10604_v54, 0.0  ;;  %vm13675_vm7 = vnez %v13674_v2  ;;  %v13676_v6 = vld [vmem:[#allocation77_spill] sm:$0xff]  ;;  %v5256_v54 = vsel %vm13472_vm13, %v5224_v35, 0.0  ;;  %vm13689_vm13 = vnez %v13688_v46 }
 0x44e   : > { %4479 = vst.msk [vmem:[#allocation5 + $0x18] sm:$0xff] %vm13671_vm5, %v4384_v9  ;;  %4626 = vrot.lane.b32.xlu1 %v4552_v49, %s7387_s29  ;;  %vm13677_vm3 = vnez %v13676_v6  ;;  %vm13679_vm5 = vcmask 261120   ;;  %v5088_v9 = vpop.permute.xlu0 %5087  ;;  %v4797_v3 = vld [vmem:[#allocation4 + $0x109] sm:$0xff]  ;;  %v4328_v49 = vsel %vm13682_vm8, %v4776_v18, 0.0  ;;  %v4798_v56 = vld [vmem:[#allocation4 + $0x111] sm:$0xff]  ;;  %v4609_v18 = vpop.permute.xlu1 %4608  ;;  %vm13693_vm8 = vmmov %vm13692_vm11 }
 0x44f   : > { %vm13678_vm0 = vmand %vm13675_vm7, %vm13677_vm3  ;;  %5183 = vst.msk [vmem:[#allocation5 + $0x8] sm:$0xff] %vm13680_vm2, %v5088_v9  ;;  %vm13696_vm3 = vnez %v12700_v16  ;;  %v13881_v46 = vld [vmem:[#allocation93_spill] sm:$0xff] }
 0x450   : > { %v5498_v11 = vsel %vm13678_vm0, %v4796_v22, 0.0  ;;  %4255 = vst.msk [vmem:[#allocation5 + $0x30] sm:$0xff] %vm13681_vm4, %v4161_v43  ;;  %v13683_v22 = vld [vmem:[#allocation81_spill] sm:$0xff]  ;;  %5329 = vrot.lane.b32.xlu0 %v5256_v54, %s7387_s29  ;;  %vm13685_vm2 = vmmov %vm13679_vm5  ;;  %v4104_v54 = vsel %vm13696_vm3, %v11027_v32, 0.0  ;;  %v4778_v32 = vld [vmem:[#allocation4 + $0x71] sm:$0xff] }
 0x451   : > { %5530 = vst.msk [vmem:[#allocation5 + $0x298] sm:$0xff] %vm13679_vm5, %v5498_v11  ;;  %vm13684_vm0 = vnez %v13683_v22  ;;  %v13686_v43 = vld [vmem:[#allocation73_spill] sm:$0xff]  ;;  %vm13691_vm7 = vmmov %vm13685_vm2 }
 0x452   : > { %v5499_v11 = vsel %vm13684_vm0, %v4797_v3, 0.0  ;;  %4403 = vrot.lane.b32.xlu1 %v4328_v49, %s7384_s16  ;;  %vm13687_vm4 = vnez %v13686_v43  ;;  %v5312_v9 = vpop.permute.xlu0 %5311  ;;  %4704 = vst.msk [vmem:[#allocation5 + $0x18] sm:$0xff] %vm13693_vm8, %v4609_v18  ;;  %vm13694_vm0 = vnez %v13169_v15  ;;  %v5225_v49 = vld [vmem:[#allocation4 + $0x78] sm:$0xff]  ;;  %v4329_v15 = vsel %vm13696_vm3, %v11080_v29, 0.0 }
 0x453   : > { %5531 = vst.msk [vmem:[#allocation5 + $0x2b0] sm:$0xff] %vm13685_vm2, %v5499_v11  ;;  %vm13690_vm5 = vmand %vm13687_vm4, %vm13689_vm13  ;;  %v4386_v11 = vpop.permute.xlu1 %4385  ;;  %v5257_v26 = vsel %vm13694_vm0, %v5225_v49, 0.0 }
 0x454   : > { %v5500_v44 = vsel %vm13690_vm5, %v4798_v56, 0.0  ;;  %5407 = vst.msk [vmem:[#allocation5 + $0x8] sm:$0xff] %vm13692_vm11, %v5312_v9  ;;  %vm13695_vm2 = vmand %vm13694_vm0, %vm13673_vm6  ;;  %vm13698_vm5 = vcmask 785920  }
 0x455   : > { %5532 = vst.msk [vmem:[#allocation5 + $0x2c8] sm:$0xff] %vm13691_vm7, %v5500_v44  ;;  %v5033_v3 = vsel %vm13695_vm2, %v10652_v13, 0.0  ;;  %vm13697_vm7 = vcmask 523520   ;;  %vm13701_vm0 = vmmov %vm13698_vm5 }
 0x456   : > { %5107 = vrot.lane.b32.xlu0 %v5033_v3, %s7384_s16  ;;  %4180 = vrot.lane.b32.xlu1 %v4104_v54, %s7386_s11  ;;  %v4866_v56 = vpop.permute.xlu0 %4865  ;;  %4480 = vst.msk [vmem:[#allocation5 + $0x30] sm:$0xff] %vm13698_vm5, %v4386_v11  ;;  %vm13699_vm6 = vmmov %vm13697_vm7  ;;  %v4810_v3 = vsel %vm13494_vm14, %v4778_v32, 0.0  ;;  %v5535_v54 = vld [vmem:[#allocation5] sm:$0xff]  ;;  %v4779_v11 = vld [vmem:[#allocation4 + $0x79] sm:$0xff]  ;;  %vm13702_vm14 = vnez %v13113_v41  ;;  %vm13706_vm5 = vnez %v12703_v30 }
 0x457   : > { %4960 = vst.msk [vmem:[#allocation5 + $0x20] sm:$0xff] %vm13697_vm7, %v4866_v56  ;;  %v4163_v9 = vpop.permute.xlu1 %4162  ;;  %vm13700_vm11 = vmmov %vm13699_vm6  ;;  %v4105_v59 = vsel %vm13702_vm14, %v5224_v35, 0.0  ;;  %vm13705_vm7 = vnez %v13491_v52  ;;  %v4554_v29 = vsel %vm13706_vm5, %v10652_v13, 0.0 }
 0x458   : > { %4256 = vst.msk [vmem:[#allocation5 + $0x48] sm:$0xff] %vm13700_vm11, %v4163_v9  ;;  %vm13703_vm2 = vmmov %vm13693_vm8  ;;  %v5034_v16 = vsel %vm13705_vm7, %v10679_v12, 0.0  ;;  %v5226_v9 = vld [vmem:[#allocation4 + $0x80] sm:$0xff] }
 0x459   : > { %vm13704_vm3 = vmmov %vm13701_vm0  ;;  %v5538_v52 = vld [vmem:[#allocation5 + $0x18] sm:$0xff] }
 0x45a   : > { %5331 = vrot.lane.b32.xlu0 %v5257_v26, %s7387_s29  ;;  %4628 = vrot.lane.b32.xlu1 %v10629_v40, %s7387_s29  ;;  %v4868_v44 = vpop.permute.xlu0 %4867 }
 0x45b   : > { %v5536_v18 = vld [vmem:[#allocation5 + $0x8] sm:$0xff]  ;;  %4961 = vst.msk [vmem:[#allocation5 + $0x38] sm:$0xff] %vm13699_vm6, %v4868_v44  ;;  %v4611_v56 = vpop.permute.xlu1 %4610  ;;  %vm13707_vm6 = vmmov %vm13701_vm0 }
 0x45c   : > { %5834 = vmatprep.mubr.f32.mxu0 %v5536_v18  ;;  %4705 = vst.msk [vmem:[#allocation5 + $0x30] sm:$0xff] %vm13693_vm8, %v4611_v56  ;;  %v5227_v56 = vld [vmem:[#allocation4 + $0x88] sm:$0xff] }
 0x45d   : > { %5835 = vmatmul.mubr.f32.vlgmr.msra.gmra.mrb[64].mxu0 %v5535_v54 }
 0x45e   : > { %4885 = vrot.lane.b32.xlu0 %v4810_v3, %s7386_s11  ;;  %4405 = vrot.lane.b32.xlu1 %v4329_v15, %s7384_s16  ;;  %v5090_v40 = vpop.permute.xlu0 %5089  ;;  %v5258_v3 = vsel %vm13705_vm7, %v5226_v9, 0.0  ;;  %vm13711_vm7 = vnez %v13502_v5 }
 0x45f   : > { %5184 = vst.msk [vmem:[#allocation5 + $0x20] sm:$0xff] %vm13701_vm0, %v5090_v40  ;;  %v4388_v44 = vpop.permute.xlu1 %4387  ;;  %vm13708_vm0 = vnez %v13514_v28  ;;  %v5259_v30 = vsel %vm13711_vm7, %v5227_v56, 0.0 }
 0x460   : > { %4481 = vst.msk [vmem:[#allocation5 + $0x48] sm:$0xff] %vm13704_vm3, %v4388_v44  ;;  %vm13709_vm8 = vmand %vm13702_vm14, %vm13708_vm0  ;;  %vm13713_vm14 = vnez %v12725_v57  ;;  %v4780_v44 = vld [vmem:[#allocation4 + $0x81] sm:$0xff] }
 0x461   : > { %v4330_v13 = vsel %vm13709_vm8, %v4778_v32, 0.0  ;;  %vm13710_vm3 = vmmov %vm13703_vm2  ;;  %v4106_v32 = vsel %vm13713_vm14, %v5225_v49, 0.0  ;;  %vm13714_vm8 = vcmask 785920   ;;  %v4331_v5 = vsel %vm13713_vm14, %v4779_v11, 0.0 }
 0x462   : > { %4887 = vrot.lane.b32.xlu0 %v4779_v11, %s7386_s11  ;;  %4182 = vrot.lane.b32.xlu1 %v4105_v59, %s7386_s11  ;;  %v5314_v26 = vpop.permute.xlu0 %5313 }
 0x463   : > { %5408 = vst.msk [vmem:[#allocation5 + $0x20] sm:$0xff] %vm13703_vm2, %v5314_v26  ;;  %v4165_v18 = vpop.permute.xlu1 %4164 }
 0x464   : > { %4257 = vst.msk [vmem:[#allocation5 + $0x60] sm:$0xff] %vm13700_vm11, %v4165_v18  ;;  %v5541_v18 = vld [vmem:[#allocation5 + $0x30] sm:$0xff] }
 0x466   : > { %5109 = vrot.lane.b32.xlu0 %v5034_v16, %s7384_s16  ;;  %4630 = vrot.lane.b32.xlu1 %v4554_v29, %s7387_s29  ;;  %v5092_v35 = vpop.permute.xlu0 %5091 }
 0x467   : > { %5185 = vst.msk [vmem:[#allocation5 + $0x38] sm:$0xff] %vm13707_vm6, %v5092_v35  ;;  %v4613_v15 = vpop.permute.xlu1 %4612  ;;  %vm13712_vm6 = vmand %vm13711_vm7, %vm13706_vm5  ;;  %v4812_v35 = vsel %vm13708_vm0, %v4780_v44, 0.0  ;;  %vm13718_vm7 = vcmask 1048320   ;;  %vm13719_vm0 = vnez %v12713_v14 }
 0x468   : > { %4706 = vst.msk [vmem:[#allocation5 + $0x48] sm:$0xff] %vm13710_vm3, %v4613_v15  ;;  %v5035_v41 = vsel %vm13712_vm6, %v10705_v60, 0.0  ;;  %vm13715_vm5 = vmmov %vm13700_vm11  ;;  %v4107_v28 = vsel %vm13719_vm0, %v5226_v9, 0.0 }
 0x469   : > { %vm13717_vm3 = vmmov %vm13714_vm8 }
 0x46a   : > { %5333 = vrot.lane.b32.xlu0 %v5258_v3, %s7387_s29  ;;  %4407 = vrot.lane.b32.xlu1 %v4330_v13, %s7384_s16  ;;  %v5316_v54 = vpop.permute.xlu0 %5315  ;;  %v5539_v40 = vld [vmem:[#allocation5 + $0x20] sm:$0xff]  ;;  %vm13720_vm6 = vmmov %vm13718_vm7 }
 0x46b   : > { %5409 = vst.msk [vmem:[#allocation5 + $0x38] sm:$0xff] %vm13703_vm2, %v5316_v54  ;;  %5839 = vmatprep.mubr.f32.mxu0 %v5539_v40  ;;  %v4390_v26 = vpop.permute.xlu1 %4389  ;;  %vm13716_vm2 = vmmov %vm13715_vm5  ;;  %v4781_v13 = vld [vmem:[#allocation4 + $0x89] sm:$0xff] }
 0x46c   : > { %5840 = vmatmul.mubr.f32.gmra.mrb[66].mxu0 %v5538_v52  ;;  %4482 = vst.msk [vmem:[#allocation5 + $0x60] sm:$0xff] %vm13714_vm8, %v4390_v26  ;;  %vm13721_vm14 = vmmov %vm13717_vm3  ;;  %vm13723_vm8 = vnez %v12728_v34  ;;  %v5228_v40 = vld [vmem:[#allocation4 + $0x90] sm:$0xff] }
 0x46d   : > { %v4556_v15 = vsel %vm13723_vm8, %v10705_v60, 0.0 }
 0x46e   : > { %5111 = vrot.lane.b32.xlu0 %v5035_v41, %s7384_s16  ;;  %4184 = vrot.lane.b32.xlu1 %v4106_v32, %s7386_s11  ;;  %v4870_v59 = vpop.permute.xlu0 %4869 }
 0x46f   : > { %4962 = vst.msk [vmem:[#allocation5 + $0x50] sm:$0xff] %vm13700_vm11, %v4870_v59  ;;  %v4167_v16 = vpop.permute.xlu1 %4166  ;;  %vm13722_vm11 = vnez %v13512_v53  ;;  %v5544_v53 = vld [vmem:[#allocation5 + $0x48] sm:$0xff] }
 0x470   : > { %4258 = vst.msk [vmem:[#allocation5 + $0x78] sm:$0xff] %vm13716_vm2, %v4167_v16  ;;  %v5036_v11 = vsel %vm13722_vm11, %v10735_v25, 0.0  ;;  %v5260_v52 = vsel %vm13722_vm11, %v5228_v40, 0.0  ;;  %vm13728_vm11 = vnez %v13524_v48 }
 0x472   : > { %5335 = vrot.lane.b32.xlu0 %v5259_v30, %s7387_s29  ;;  %4632 = vrot.lane.b32.xlu1 %v10679_v12, %s7387_s29  ;;  %v4872_v49 = vpop.permute.xlu0 %4871  ;;  %v5542_v29 = vld [vmem:[#allocation5 + $0x38] sm:$0xff] }
 0x473   : > { %4963 = vst.msk [vmem:[#allocation5 + $0x68] sm:$0xff] %vm13715_vm5, %v4872_v49  ;;  %5844 = vmatprep.mubr.f32.mxu0 %v5542_v29  ;;  %v4615_v3 = vpop.permute.xlu1 %4614  ;;  %vm13724_vm5 = vmmov %vm13717_vm3  ;;  %v4782_v29 = vld [vmem:[#allocation4 + $0x91] sm:$0xff] }
 0x474   : > { %5845 = vmatmul.mubr.f32.gmra.mrb[68].mxu0 %v5541_v18  ;;  %4707 = vst.msk [vmem:[#allocation5 + $0x60] sm:$0xff] %vm13718_vm7, %v4615_v3 }
 0x476   : > { %4889 = vrot.lane.b32.xlu0 %v4812_v35, %s7386_s11  ;;  %4409 = vrot.lane.b32.xlu1 %v4331_v5, %s7384_s16  ;;  %v5094_v12 = vpop.permute.xlu0 %5093 }
 0x477   : > { %5186 = vst.msk [vmem:[#allocation5 + $0x50] sm:$0xff] %vm13717_vm3, %v5094_v12  ;;  %v4392_v57 = vpop.permute.xlu1 %4391  ;;  %vm13725_vm3 = vnez %v13240_v20 }
 0x478   : > { %4483 = vst.msk [vmem:[#allocation5 + $0x78] sm:$0xff] %vm13721_vm14, %v4392_v57  ;;  %vm13726_vm7 = vmand %vm13719_vm0, %vm13725_vm3  ;;  %vm13730_vm0 = vnez %v12752_v1  ;;  %v4814_v5 = vsel %vm13725_vm3, %v4782_v29, 0.0  ;;  %vm13736_vm3 = vnez %v13500_v21 }
 0x479   : > { %v4332_v60 = vsel %vm13726_vm7, %v4780_v44, 0.0  ;;  %vm13727_vm14 = vmmov %vm13720_vm6  ;;  %v4108_v30 = vsel %vm13730_vm0, %v5227_v56, 0.0  ;;  %v5229_v44 = vld [vmem:[#allocation4 + $0x98] sm:$0xff]  ;;  %vm13731_vm7 = vcmask 785920   ;;  %v4333_v48 = vsel %vm13730_vm0, %v4781_v13, 0.0 }
 0x47a   : > { %4891 = vrot.lane.b32.xlu0 %v4781_v13, %s7386_s11  ;;  %4186 = vrot.lane.b32.xlu1 %v4107_v28, %s7386_s11  ;;  %v5318_v54 = vpop.permute.xlu0 %5317  ;;  %v5261_v34 = vsel %vm13728_vm11, %v5229_v44, 0.0  ;;  %v4783_v28 = vld [vmem:[#allocation4 + $0x99] sm:$0xff]  ;;  %v4109_v20 = vsel %vm13736_vm3, %v5228_v40, 0.0  ;;  %vm13738_vm0 = vmmov %vm13731_vm7 }
 0x47b   : > { %5410 = vst.msk [vmem:[#allocation5 + $0x50] sm:$0xff] %vm13720_vm6, %v5318_v54  ;;  %v4169_v41 = vpop.permute.xlu1 %4168  ;;  %v5547_v12 = vld [vmem:[#allocation5 + $0x60] sm:$0xff]  ;;  %v13739_v13 = vld [vmem:[#allocation35_spill] sm:$0xff] }
 0x47c   : > { %4259 = vst.msk [vmem:[#allocation5 + $0x90] sm:$0xff] %vm13716_vm2, %v4169_v41 }
 0x47e   : > { %5113 = vrot.lane.b32.xlu0 %v5036_v11, %s7384_s16  ;;  %4634 = vrot.lane.b32.xlu1 %v4556_v15, %s7387_s29  ;;  %v5096_v9 = vpop.permute.xlu0 %5095  ;;  %v13741_v11 = vld [vmem:[#allocation62_spill] sm:$0xff] }
 0x47f   : > { %5187 = vst.msk [vmem:[#allocation5 + $0x68] sm:$0xff] %vm13724_vm5, %v5096_v9  ;;  %v4617_v59 = vpop.permute.xlu1 %4616  ;;  %vm13729_vm5 = vmand %vm13728_vm11, %vm13723_vm8  ;;  %vm13735_vm11 = vcmask 1048320   ;;  %v5230_v9 = vld [vmem:[#allocation4 + $0xa0] sm:$0xff] }
 0x480   : > { %4708 = vst.msk [vmem:[#allocation5 + $0x78] sm:$0xff] %vm13727_vm14, %v4617_v59  ;;  %v5037_v14 = vsel %vm13729_vm5, %v10758_v62, 0.0  ;;  %vm13732_vm8 = vmmov %vm13716_vm2 }
 0x481   : > { %vm13734_vm14 = vmmov %vm13731_vm7 }
 0x482   : > { %5337 = vrot.lane.b32.xlu0 %v5260_v52, %s7387_s29  ;;  %4411 = vrot.lane.b32.xlu1 %v4332_v60, %s7384_s16  ;;  %v5320_v32 = vpop.permute.xlu0 %5319  ;;  %v5545_v26 = vld [vmem:[#allocation5 + $0x50] sm:$0xff]  ;;  %vm13737_vm5 = vmmov %vm13735_vm11 }
 0x483   : > { %5411 = vst.msk [vmem:[#allocation5 + $0x68] sm:$0xff] %vm13720_vm6, %v5320_v32  ;;  %5849 = vmatprep.mubr.f32.mxu0 %v5545_v26  ;;  %v4394_v16 = vpop.permute.xlu1 %4393  ;;  %vm13733_vm6 = vmmov %vm13716_vm2  ;;  %v13749_v26 = vld [vmem:[#allocation65_spill] sm:$0xff] }
 0x484   : > { %5850 = vmatmul.mubr.f32.gmra.mrb[70].mxu0 %v5544_v53  ;;  %4484 = vst.msk [vmem:[#allocation5 + $0x90] sm:$0xff] %vm13731_vm7, %v4394_v16  ;;  %vm13742_vm7 = vnez %v13741_v11  ;;  %v5231_v53 = vld [vmem:[#allocation4 + $0xa8] sm:$0xff] }
 0x485   : > { %v4558_v15 = vsel %vm13742_vm7, %v10758_v62, 0.0 }
 0x486   : > { %5115 = vrot.lane.b32.xlu0 %v5037_v14, %s7384_s16  ;;  %4188 = vrot.lane.b32.xlu1 %v4108_v30, %s7386_s11  ;;  %v4874_v49 = vpop.permute.xlu0 %4873 }
 0x487   : > { %4964 = vst.msk [vmem:[#allocation5 + $0x80] sm:$0xff] %vm13716_vm2, %v4874_v49  ;;  %v4171_v35 = vpop.permute.xlu1 %4170  ;;  %vm13740_vm2 = vnez %v13106_v36  ;;  %v5550_v21 = vld [vmem:[#allocation5 + $0x78] sm:$0xff] }
 0x488   : > { %4260 = vst.msk [vmem:[#allocation5 + $0xa8] sm:$0xff] %vm13733_vm6, %v4171_v35  ;;  %v5038_v57 = vsel %vm13740_vm2, %v13739_v13, 0.0  ;;  %v5262_v52 = vsel %vm13740_vm2, %v5230_v9, 0.0  ;;  %vm13747_vm2 = vnez %v12999_v37 }
 0x489   : > { %v5263_v16 = vsel %vm13747_vm2, %v5231_v53, 0.0 }
 0x48a   : > { %5339 = vrot.lane.b32.xlu0 %v5261_v34, %s7387_s29  ;;  %4636 = vrot.lane.b32.xlu1 %v10735_v25, %s7387_s29  ;;  %v4876_v56 = vpop.permute.xlu0 %4875  ;;  %v5548_v18 = vld [vmem:[#allocation5 + $0x68] sm:$0xff]  ;;  %v4784_v34 = vld [vmem:[#allocation4 + $0xa1] sm:$0xff] }
 0x48b   : > { %4965 = vst.msk [vmem:[#allocation5 + $0x98] sm:$0xff] %vm13732_vm8, %v4876_v56  ;;  %5854 = vmatprep.mubr.f32.mxu0 %v5548_v18  ;;  %v4619_v3 = vpop.permute.xlu1 %4618  ;;  %vm13743_vm8 = vmmov %vm13738_vm0 }
 0x48c   : > { %5855 = vmatmul.mubr.f32.gmra.mrb[72].mxu0 %v5547_v12  ;;  %4709 = vst.msk [vmem:[#allocation5 + $0x90] sm:$0xff] %vm13735_vm11, %v4619_v3 }
 0x48e   : > { %4893 = vrot.lane.b32.xlu0 %v4814_v5, %s7386_s11  ;;  %4413 = vrot.lane.b32.xlu1 %v4333_v48, %s7384_s16  ;;  %v5098_v25 = vpop.permute.xlu0 %5097  ;;  %v4785_v48 = vld [vmem:[#allocation4 + $0xa9] sm:$0xff] }
 0x48f   : > { %5188 = vst.msk [vmem:[#allocation5 + $0x80] sm:$0xff] %vm13734_vm14, %v5098_v25  ;;  %v4396_v1 = vpop.permute.xlu1 %4395  ;;  %vm13744_vm14 = vnez %v13247_v38  ;;  %v13756_v38 = vld [vmem:[#allocation64_spill] sm:$0xff] }
 0x490   : > { %4485 = vst.msk [vmem:[#allocation5 + $0xa8] sm:$0xff] %vm13738_vm0, %v4396_v1  ;;  %vm13745_vm11 = vmand %vm13736_vm3, %vm13744_vm14  ;;  %vm13750_vm3 = vnez %v13749_v26  ;;  %v4816_v35 = vsel %vm13744_vm14, %v4784_v34, 0.0  ;;  %vm13757_vm14 = vnez %v13756_v38 }
 0x491   : > { %v4334_v62 = vsel %vm13745_vm11, %v4782_v29, 0.0  ;;  %vm13746_vm0 = vmmov %vm13737_vm5  ;;  %v4110_v14 = vsel %vm13750_vm3, %v5229_v44, 0.0  ;;  %vm13751_vm11 = vcmask 785920   ;;  %v4335_v37 = vsel %vm13750_vm3, %v4783_v28, 0.0 }
 0x492   : > { %4895 = vrot.lane.b32.xlu0 %v4783_v28, %s7386_s11  ;;  %4190 = vrot.lane.b32.xlu1 %v4109_v20, %s7386_s11  ;;  %v5322_v54 = vpop.permute.xlu0 %5321  ;;  %v4111_v25 = vsel %vm13757_vm14, %v5230_v9, 0.0 }
 0x493   : > { %5412 = vst.msk [vmem:[#allocation5 + $0x80] sm:$0xff] %vm13737_vm5, %v5322_v54  ;;  %v4173_v41 = vpop.permute.xlu1 %4172  ;;  %v5553_v18 = vld [vmem:[#allocation5 + $0x90] sm:$0xff]  ;;  %v13761_v54 = vld [vmem:[#allocation66_spill] sm:$0xff] }
 0x494   : > { %4261 = vst.msk [vmem:[#allocation5 + $0xc0] sm:$0xff] %vm13733_vm6, %v4173_v41 }
 0x496   : > { %5117 = vrot.lane.b32.xlu0 %v5038_v57, %s7384_s16  ;;  %4638 = vrot.lane.b32.xlu1 %v4558_v15, %s7387_s29  ;;  %v5100_v40 = vpop.permute.xlu0 %5099 }
 0x497   : > { %5189 = vst.msk [vmem:[#allocation5 + $0x98] sm:$0xff] %vm13743_vm8, %v5100_v40  ;;  %v4621_v32 = vpop.permute.xlu1 %4620  ;;  %vm13748_vm8 = vmand %vm13747_vm2, %vm13742_vm7  ;;  %vm13755_vm2 = vcmask 1048320  }
 0x498   : > { %4710 = vst.msk [vmem:[#allocation5 + $0xa8] sm:$0xff] %vm13746_vm0, %v4621_v32  ;;  %v5039_v36 = vsel %vm13748_vm8, %v10806_v61, 0.0  ;;  %vm13752_vm7 = vmmov %vm13733_vm6 }
 0x499   : > { %vm13754_vm0 = vmmov %vm13751_vm11 }
 0x49a   : > { %5341 = vrot.lane.b32.xlu0 %v5262_v52, %s7387_s29  ;;  %4415 = vrot.lane.b32.xlu1 %v4334_v62, %s7384_s16  ;;  %v5324_v60 = vpop.permute.xlu0 %5323  ;;  %v5551_v59 = vld [vmem:[#allocation5 + $0x80] sm:$0xff]  ;;  %vm13758_vm8 = vmmov %vm13755_vm2 }
 0x49b   : > { %5413 = vst.msk [vmem:[#allocation5 + $0x98] sm:$0xff] %vm13737_vm5, %v5324_v60  ;;  %5859 = vmatprep.mubr.f32.mxu0 %v5551_v59  ;;  %v4398_v49 = vpop.permute.xlu1 %4397  ;;  %vm13753_vm5 = vmmov %vm13733_vm6  ;;  %v5233_v60 = vld [vmem:[#allocation4 + $0xb8] sm:$0xff] }
 0x49c   : > { %5860 = vmatmul.mubr.f32.gmra.mrb[74].mxu0 %v5550_v21  ;;  %4486 = vst.msk [vmem:[#allocation5 + $0xc0] sm:$0xff] %vm13751_vm11, %v4398_v49  ;;  %vm13759_vm3 = vmmov %vm13754_vm0  ;;  %vm13762_vm11 = vnez %v13761_v54  ;;  %v4786_v21 = vld [vmem:[#allocation4 + $0xb1] sm:$0xff]  ;;  %v11413_v54 = vld [vmem:[#allocation4 + $0xc8] sm:$0xff] }
 0x49d   : > { %v4560_v1 = vsel %vm13762_vm11, %v10806_v61, 0.0 }
 0x49e   : > { %5119 = vrot.lane.b32.xlu0 %v5039_v36, %s7384_s16  ;;  %4192 = vrot.lane.b32.xlu1 %v4110_v14, %s7386_s11  ;;  %v4878_v30 = vpop.permute.xlu0 %4877 }
 0x49f   : > { %4966 = vst.msk [vmem:[#allocation5 + $0xb0] sm:$0xff] %vm13733_vm6, %v4878_v30  ;;  %v4175_v29 = vpop.permute.xlu1 %4174  ;;  %vm13760_vm6 = vnez %v13120_v42  ;;  %v5556_v52 = vld [vmem:[#allocation5 + $0xa8] sm:$0xff] }
 0x4a0   : > { %4262 = vst.msk [vmem:[#allocation5 + $0xd8] sm:$0xff] %vm13753_vm5, %v4175_v29  ;;  %v5040_v28 = vsel %vm13760_vm6, %v10833_v8, 0.0 }
 0x4a2   : > { %5343 = vrot.lane.b32.xlu0 %v5263_v16, %s7387_s29  ;;  %4640 = vrot.lane.b32.xlu1 %v13739_v13, %s7387_s29  ;;  %v4880_v44 = vpop.permute.xlu0 %4879  ;;  %v5554_v56 = vld [vmem:[#allocation5 + $0x98] sm:$0xff]  ;;  %v5232_v13 = vld [vmem:[#allocation4 + $0xb0] sm:$0xff] }
 0x4a3   : > { %4967 = vst.msk [vmem:[#allocation5 + $0xc8] sm:$0xff] %vm13752_vm7, %v4880_v44  ;;  %5864 = vmatprep.mubr.f32.mxu0 %v5554_v56  ;;  %vm13763_vm7 = vmmov %vm13754_vm0  ;;  %v5264_v15 = vsel %vm13760_vm6, %v5232_v13, 0.0  ;;  %vm13767_vm6 = vnez %v13009_v27 }
 0x4a4   : > { %5865 = vmatmul.mubr.f32.gmra.mrb[76].mxu0 %v5553_v18  ;;  %v5265_v36 = vsel %vm13767_vm6, %v5233_v60, 0.0 }
 0x4a5   : > { %v4623_v12 = vpop.permute.xlu1 %4622 }
 0x4a6   : > { %4897 = vrot.lane.b32.xlu0 %v4816_v35, %s7386_s11  ;;  %4417 = vrot.lane.b32.xlu1 %v4335_v37, %s7384_s16  ;;  %v5102_v5 = vpop.permute.xlu0 %5101  ;;  %4711 = vst.msk [vmem:[#allocation5 + $0xc0] sm:$0xff] %vm13755_vm2, %v4623_v12  ;;  %v5234_v35 = vld [vmem:[#allocation4 + $0xc0] sm:$0xff] }
 0x4a7   : > { %5190 = vst.msk [vmem:[#allocation5 + $0xb0] sm:$0xff] %vm13754_vm0, %v5102_v5  ;;  %vm13764_vm0 = vnez %v13579_v39 }
 0x4a8   : > { %vm13765_vm2 = vmand %vm13757_vm14, %vm13764_vm0  ;;  %vm13769_vm14 = vnez %v13530_v24  ;;  %v4818_v30 = vsel %vm13764_vm0, %v4786_v21, 0.0  ;;  %vm13775_vm0 = vnez %v13544_v31 }
 0x4a9   : > { %v4336_v61 = vsel %vm13765_vm2, %v4784_v34, 0.0  ;;  %v4112_v62 = vsel %vm13769_vm14, %v5231_v53, 0.0  ;;  %vm13770_vm2 = vcmask 785920   ;;  %v4337_v27 = vsel %vm13769_vm14, %v4785_v48, 0.0  ;;  %v4787_v34 = vld [vmem:[#allocation4 + $0xb9] sm:$0xff] }
 0x4aa   : > { %4899 = vrot.lane.b32.xlu0 %v4785_v48, %s7386_s11  ;;  %4194 = vrot.lane.b32.xlu1 %v4111_v25, %s7386_s11  ;;  %v5326_v3 = vpop.permute.xlu0 %5325  ;;  %v4400_v20 = vpop.permute.xlu1 %4399  ;;  %v4113_v39 = vsel %vm13775_vm0, %v5232_v13, 0.0  ;;  %vm13777_vm14 = vmmov %vm13770_vm2  ;;  %v13784_v25 = vld [vmem:[#allocation58_spill] sm:$0xff]  ;;  %v5664_v13 = vld [vmem:[%s12011_s5 + $0x108] sm:$0xff] }
 0x4ab   : > { %5414 = vst.msk [vmem:[#allocation5 + $0xb0] sm:$0xff] %vm13758_vm8, %v5326_v3 }
 0x4ac   : > { %4487 = vst.msk [vmem:[#allocation5 + $0xd8] sm:$0xff] %vm13759_vm3, %v4400_v20  ;;  %vm13766_vm3 = vmmov %vm13758_vm8  ;;  %v13787_v20 = vld [vmem:[#allocation79_spill] sm:$0xff] }
 0x4ad   : > { %v5559_v49 = vld [vmem:[#allocation5 + $0xc0] sm:$0xff] }
 0x4ae   : > { %5121 = vrot.lane.b32.xlu0 %v5040_v28, %s7384_s16  ;;  %4642 = vrot.lane.b32.xlu1 %v4560_v1, %s7387_s29  ;;  %v5104_v57 = vpop.permute.xlu0 %5103  ;;  %v4177_v11 = vpop.permute.xlu1 %4176  ;;  %v5663_v1 = vld [vmem:[%s12011_s5 + $0x100] sm:$0xff] }
 0x4af   : > { %5191 = vst.msk [vmem:[#allocation5 + $0xc8] sm:$0xff] %vm13763_vm7, %v5104_v57  ;;  %vm13768_vm7 = vmand %vm13767_vm6, %vm13762_vm11  ;;  %vm13774_vm6 = vcmask 1048320  }
 0x4b0   : > { %4263 = vst.msk [vmem:[#allocation5 + $0xf0] sm:$0xff] %vm13753_vm5, %v4177_v11  ;;  %v5041_v42 = vsel %vm13768_vm7, %v10859_v10, 0.0  ;;  %vm13771_vm11 = vmmov %vm13753_vm5 }
 0x4b1   : > { %vm13776_vm7 = vmmov %vm13774_vm6 }
 0x4b2   : > { %5345 = vrot.lane.b32.xlu0 %v5264_v15, %s7387_s29  ;;  %4419 = vrot.lane.b32.xlu1 %v4336_v61, %s7384_s16  ;;  %v5328_v9 = vpop.permute.xlu0 %5327  ;;  %v4625_v40 = vpop.permute.xlu1 %4624  ;;  %v5557_v41 = vld [vmem:[#allocation5 + $0xb0] sm:$0xff] }
 0x4b3   : > { %5415 = vst.msk [vmem:[#allocation5 + $0xc8] sm:$0xff] %vm13758_vm8, %v5328_v9  ;;  %5869 = vmatprep.mubr.f32.mxu0 %v5557_v41  ;;  %vm13772_vm8 = vmmov %vm13753_vm5  ;;  %v4788_v61 = vld [vmem:[#allocation4 + $0xc1] sm:$0xff] }
 0x4b4   : > { %4712 = vst.msk [vmem:[#allocation5 + $0xd8] sm:$0xff] %vm13766_vm3, %v4625_v40  ;;  %5870 = vmatmul.mubr.f32.gmra.mrb[78].mxu0 %v5556_v52  ;;  %vm13773_vm3 = vmmov %vm13770_vm2 }
 0x4b6   : > { %5123 = vrot.lane.b32.xlu0 %v5041_v42, %s7384_s16  ;;  %4196 = vrot.lane.b32.xlu1 %v4112_v62, %s7386_s11  ;;  %v4882_v32 = vpop.permute.xlu0 %4881  ;;  %v4402_v59 = vpop.permute.xlu1 %4401  ;;  %v4820_v42 = vsel %vm13607_vm10, %v4788_v61, 0.0 }
 0x4b7   : > { %4968 = vst.msk [vmem:[#allocation5 + $0xe0] sm:$0xff] %vm13753_vm5, %v4882_v32  ;;  %vm13778_vm5 = vnez %v13577_v33  ;;  %v13783_v33 = vld [vmem:[#allocation87_spill] sm:$0xff]  ;;  %v4789_v32 = vld [vmem:[#allocation4 + $0xc9] sm:$0xff] }
 0x4b8   : > { %4488 = vst.msk [vmem:[#allocation5 + $0xf0] sm:$0xff] %vm13770_vm2, %v4402_v59  ;;  %v5042_v29 = vsel %vm13778_vm5, %v10889_v23, 0.0  ;;  %vm13779_vm2 = vnez %v13532_v51  ;;  %v5266_v5 = vsel %vm13778_vm5, %v5234_v35, 0.0  ;;  %v7003_v51 = vpack.c.bf16 %v5664_v13, %v5663_v1 }
 0x4b9   : > { %v4562_v56 = vsel %vm13779_vm2, %v10859_v10, 0.0  ;;  %v5046_v13 = vsel %vm13634_vm9, %v10987_v0, 0.0 }
 0x4ba   : > { %5347 = vrot.lane.b32.xlu0 %v5265_v36, %s7387_s29  ;;  %4644 = vrot.lane.b32.xlu1 %v10833_v8, %s7387_s29  ;;  %v4884_v26 = vpop.permute.xlu0 %4883  ;;  %v4179_v14 = vpop.permute.xlu1 %4178  ;;  %v5560_v53 = vld [vmem:[#allocation5 + $0xc8] sm:$0xff] }
 0x4bb   : > { %4969 = vst.msk [vmem:[#allocation5 + $0xf8] sm:$0xff] %vm13771_vm11, %v4884_v26  ;;  %5874 = vmatprep.mubr.f32.mxu0 %v5560_v53  ;;  %vm13780_vm11 = vmmov %vm13773_vm3  ;;  %v5562_v3 = vld [vmem:[#allocation5 + $0xd8] sm:$0xff]  ;;  %7004 = vmatprep.subr.bf16.mxu0 %v7003_v51  ;;  %v13799_v53 = vld [vmem:[#allocation80_spill] sm:$0xff] }
 0x4bc   : > { %4264 = vst.msk [vmem:[#allocation5 + $0x108] sm:$0xff] %vm13772_vm8, %v4179_v14  ;;  %5875 = vmatmul.mubr.f32.gmra.mrb[80].mxu0 %v5559_v49  ;;  %v13796_v26 = vld [vmem:[#allocation41_spill] sm:$0xff]  ;;  %v5236_v49 = vld [vmem:[#allocation4 + $0xd0] sm:$0xff] }
 0x4bd   : > { %7006 = vmatpush3.bf16.msra.mxu0 %v7003_v51  ;;  %v7367_v51 = vld [vmem:[#allocation4 + $0xd7] sm:$0xff] }
 0x4be   : > { %4901 = vrot.lane.b32.xlu0 %v4818_v30, %s7386_s11  ;;  %4421 = vrot.lane.b32.xlu1 %v4337_v27, %s7384_s16  ;;  %v5106_v8 = vpop.permute.xlu0 %5105 }
 0x4bf   : > { %5192 = vst.msk [vmem:[#allocation5 + $0xe0] sm:$0xff] %vm13773_vm3, %v5106_v8  ;;  %vm13781_vm3 = vmand %vm13775_vm0, %vm13607_vm10  ;;  %vm13788_vm0 = vnez %v13787_v20  ;;  %vm13794_vm10 = vnez %v13793_v45  ;;  %v4791_v20 = vld [vmem:[#allocation4 + $0xd9] sm:$0xff] }
 0x4c0   : > { %v4627_v16 = vpop.permute.xlu1 %4626  ;;  %v4338_v10 = vsel %vm13781_vm3, %v4786_v21, 0.0  ;;  %v4114_v28 = vsel %vm13788_vm0, %v5233_v60, 0.0  ;;  %v4339_v62 = vsel %vm13788_vm0, %v4787_v34, 0.0  ;;  %v4115_v59 = vsel %vm13794_vm10, %v5234_v35, 0.0 }
 0x4c1   : > { %4713 = vst.msk [vmem:[#allocation5 + $0xf0] sm:$0xff] %vm13774_vm6, %v4627_v16 }
 0x4c2   : > { %4903 = vrot.lane.b32.xlu0 %v4787_v34, %s7386_s11  ;;  %4198 = vrot.lane.b32.xlu1 %v4113_v39, %s7386_s11  ;;  %v5330_v44 = vpop.permute.xlu0 %5329 }
 0x4c3   : > { %5416 = vst.msk [vmem:[#allocation5 + $0xe0] sm:$0xff] %vm13776_vm7, %v5330_v44  ;;  %vm13782_vm7 = vmmov %vm13774_vm6 }
 0x4c4   : > { %v4404_v24 = vpop.permute.xlu1 %4403 }
 0x4c5   : > { %4489 = vst.msk [vmem:[#allocation5 + $0x108] sm:$0xff] %vm13777_vm14, %v4404_v24  ;;  %vm13785_vm14 = vnez %v13784_v25 }
 0x4c6   : > { %5125 = vrot.lane.b32.xlu0 %v5042_v29, %s7384_s16  ;;  %4646 = vrot.lane.b32.xlu1 %v4562_v56, %s7387_s29  ;;  %vm13786_vm5 = vmand %vm13785_vm14, %vm13779_vm2  ;;  %v5267_v15 = vsel %vm13785_vm14, %v11413_v54, 0.0  ;;  %v13808_v56 = vld [vmem:[#allocation82_spill] sm:$0xff] }
 0x4c7   : > { %v5043_v31 = vsel %vm13786_vm5, %v13783_v33, 0.0  ;;  %vm13789_vm2 = vmmov %vm13772_vm8  ;;  %vm13797_vm5 = vnez %v13604_v55 }
 0x4c8   : > { %v5108_v18 = vpop.permute.xlu0 %5107  ;;  %v4181_v37 = vpop.permute.xlu1 %4180  ;;  %v5565_v52 = vld [vmem:[#allocation5 + $0xf0] sm:$0xff]  ;;  %vm13791_vm3 = vmmov %vm13789_vm2  ;;  %v5044_v14 = vsel %vm13797_vm5, %v13796_v26, 0.0  ;;  %v5268_v16 = vsel %vm13797_vm5, %v5236_v49, 0.0 }
 0x4c9   : > { %5193 = vst.msk [vmem:[#allocation5 + $0xf8] sm:$0xff] %vm13780_vm11, %v5108_v18  ;;  %vm13795_vm14 = vmmov %vm13782_vm7  ;;  %v5237_v18 = vld [vmem:[#allocation4 + $0xd8] sm:$0xff] }
 0x4ca   : > { %4265 = vst.msk [vmem:[#allocation5 + $0x120] sm:$0xff] %vm13772_vm8, %v4181_v37  ;;  %5349 = vrot.lane.b32.xlu0 %v5266_v5, %s7387_s29  ;;  %4423 = vrot.lane.b32.xlu1 %v4338_v10, %s7384_s16  ;;  %v5563_v38 = vld [vmem:[#allocation5 + $0xe0] sm:$0xff]  ;;  %vm13790_vm8 = vmmov %vm13789_vm2 }
 0x4cb   : > { %5879 = vmatprep.mubr.f32.mxu0 %v5563_v38  ;;  %v4790_v10 = vld [vmem:[#allocation4 + $0xd1] sm:$0xff] }
 0x4cc   : > { %v5332_v12 = vpop.permute.xlu0 %5331  ;;  %v4629_v48 = vpop.permute.xlu1 %4628  ;;  %5880 = vmatmul.mubr.f32.gmra.mrb[82].mxu0 %v5562_v3 }
 0x4cd   : > { %5417 = vst.msk [vmem:[#allocation5 + $0xf8] sm:$0xff] %vm13774_vm6, %v5332_v12  ;;  %vm13792_vm6 = vmmov %vm13780_vm11 }
 0x4ce   : > { %4714 = vst.msk [vmem:[#allocation5 + $0x108] sm:$0xff] %vm13782_vm7, %v4629_v48  ;;  %5127 = vrot.lane.b32.xlu0 %v5043_v31, %s7384_s16  ;;  %4200 = vrot.lane.b32.xlu1 %v4114_v28, %s7386_s11  ;;  %vm13798_vm0 = vmmov %vm13792_vm6 }
 0x4d0   : > { %v4886_v57 = vpop.permute.xlu0 %4885  ;;  %v4406_v11 = vpop.permute.xlu1 %4405 }
 0x4d1   : > { %4970 = vst.msk [vmem:[#allocation5 + $0x110] sm:$0xff] %vm13789_vm2, %v4886_v57  ;;  %vm13800_vm2 = vnez %v13799_v53  ;;  %v13820_v57 = vld [vmem:[#allocation83_spill] sm:$0xff] }
 0x4d2   : > { %4490 = vst.msk [vmem:[#allocation5 + $0x120] sm:$0xff] %vm13780_vm11, %v4406_v11  ;;  %5351 = vrot.lane.b32.xlu0 %v5267_v15, %s7387_s29  ;;  %4648 = vrot.lane.b32.xlu1 %v10889_v23, %s7387_s29  ;;  %v4564_v30 = vsel %vm13800_vm2, %v13783_v33, 0.0  ;;  %vm13801_vm11 = vmmov %vm13798_vm0  ;;  %v4822_v33 = vsel %vm13636_vm15, %v4790_v10, 0.0  ;;  %v5238_v15 = vld [vmem:[#allocation4 + $0xe0] sm:$0xff] }
 0x4d4   : > { %v4888_v9 = vpop.permute.xlu0 %4887  ;;  %v5566_v40 = vld [vmem:[#allocation5 + $0xf8] sm:$0xff]  ;;  %v4183_v41 = vpop.permute.xlu1 %4182 }
 0x4d5   : > { %4971 = vst.msk [vmem:[#allocation5 + $0x128] sm:$0xff] %vm13790_vm8, %v4888_v9  ;;  %5884 = vmatprep.mubr.f32.mxu0 %v5566_v40  ;;  %vm13802_vm8 = vmmov %vm13791_vm3  ;;  %v5568_v29 = vld [vmem:[#allocation5 + $0x108] sm:$0xff]  ;;  %v5270_v40 = vsel %vm13634_vm9, %v5238_v15, 0.0  ;;  %vm13825_vm9 = vnez %v13643_v17 }
 0x4d6   : > { %4266 = vst.msk [vmem:[#allocation5 + $0x138] sm:$0xff] %vm13791_vm3, %v4183_v41  ;;  %4905 = vrot.lane.b32.xlu0 %v4820_v42, %s7386_s11  ;;  %5885 = vmatmul.mubr.f32.gmra.mrb[84].mxu0 %v5565_v52  ;;  %vm13803_vm3 = vmand %vm13794_vm10, %vm13636_vm15  ;;  %vm13809_vm10 = vnez %v13808_v56  ;;  %vm13817_vm15 = vnez %v13816_v47  ;;  %v13851_v47 = vld [vmem:[#allocation89_spill] sm:$0xff] }
 0x4d7   : > { %4425 = vrot.lane.b32.xlu1 %v4339_v62, %s7384_s16  ;;  %v4340_v34 = vsel %vm13803_vm3, %v4788_v61, 0.0  ;;  %v4116_v35 = vsel %vm13809_vm10, %v11413_v54, 0.0  ;;  %v4117_v28 = vsel %vm13817_vm15, %v5236_v49, 0.0 }
 0x4d8   : > { %v5110_v23 = vpop.permute.xlu0 %5109  ;;  %v4631_v60 = vpop.permute.xlu1 %4630 }
 0x4d9   : > { %5194 = vst.msk [vmem:[#allocation5 + $0x110] sm:$0xff] %vm13792_vm6, %v5110_v23  ;;  %vm13804_vm6 = vmmov %vm13782_vm7  ;;  %v13828_v23 = vld [vmem:[#allocation85_spill] sm:$0xff] }
 0x4da   : > { %4715 = vst.msk [vmem:[#allocation5 + $0x120] sm:$0xff] %vm13782_vm7, %v4631_v60  ;;  %4907 = vrot.lane.b32.xlu0 %v4789_v32, %s7386_s11  ;;  %vm13805_vm7 = vnez %v13617_v50  ;;  %vm13807_vm5 = vmmov %vm13804_vm6  ;;  %v4341_v50 = vsel %vm13809_vm10, %v4789_v32, 0.0  ;;  %v11530_v32 = vld [vmem:[#allocation4 + $0xe8] sm:$0xff] }
 0x4db   : > { %4202 = vrot.lane.b32.xlu1 %v4115_v59, %s7386_s11 }
 0x4dc   : > { %v5334_v36 = vpop.permute.xlu0 %5333  ;;  %v4408_v21 = vpop.permute.xlu1 %4407 }
 0x4dd   : > { %5418 = vst.msk [vmem:[#allocation5 + $0x110] sm:$0xff] %vm13795_vm14, %v5334_v36  ;;  %vm13806_vm14 = vmand %vm13805_vm7, %vm13800_vm2  ;;  %v4792_v36 = vld [vmem:[#allocation4 + $0xe1] sm:$0xff] }
 0x4de   : > { %4491 = vst.msk [vmem:[#allocation5 + $0x138] sm:$0xff] %vm13798_vm0, %v4408_v21  ;;  %5129 = vrot.lane.b32.xlu0 %v5044_v14, %s7384_s16  ;;  %v5045_v55 = vsel %vm13806_vm14, %v10961_v4, 0.0  ;;  %vm13810_vm0 = vmmov %vm13802_vm8  ;;  %v5269_v4 = vsel %vm13805_vm7, %v5237_v18, 0.0  ;;  %v7368_v21 = vld [vmem:[#allocation4 + $0xdf] sm:$0xff] }
 0x4df   : > { %4650 = vrot.lane.b32.xlu1 %v4564_v30, %s7387_s29  ;;  %vm13811_vm2 = vmmov %vm13801_vm11  ;;  %v4824_v30 = vsel %vm13657_vm12, %v4792_v36, 0.0 }
 0x4e0   : > { %v5112_v27 = vpop.permute.xlu0 %5111  ;;  %v4185_v8 = vpop.permute.xlu1 %4184  ;;  %vm13814_vm3 = vmmov %vm13811_vm2 }
 0x4e1   : > { %5195 = vst.msk [vmem:[#allocation5 + $0x128] sm:$0xff] %vm13801_vm11, %v5112_v27  ;;  %vm13812_vm11 = vmmov %vm13810_vm0  ;;  %v5571_v25 = vld [vmem:[#allocation5 + $0x120] sm:$0xff] }
 0x4e2   : > { %4267 = vst.msk [vmem:[#allocation5 + $0x150] sm:$0xff] %vm13802_vm8, %v4185_v8  ;;  %5353 = vrot.lane.b32.xlu0 %v5268_v16, %s7387_s29  ;;  %vm13813_vm8 = vmmov %vm13810_vm0  ;;  %v4793_v16 = vld [vmem:[#allocation4 + $0xe9] sm:$0xff] }
 0x4e3   : > { %4427 = vrot.lane.b32.xlu1 %v4340_v34, %s7384_s16  ;;  %vm13818_vm7 = vmmov %vm13807_vm5  ;;  %v5665_v34 = vld [vmem:[%s12011_s5 + $0x110] sm:$0xff] }
 0x4e4   : > { %v5336_v39 = vpop.permute.xlu0 %5335  ;;  %v5569_v44 = vld [vmem:[#allocation5 + $0x110] sm:$0xff]  ;;  %v4633_v24 = vpop.permute.xlu1 %4632  ;;  %vm13819_vm14 = vmmov %vm13811_vm2 }
 0x4e5   : > { %5419 = vst.msk [vmem:[#allocation5 + $0x128] sm:$0xff] %vm13804_vm6, %v5336_v39  ;;  %5889 = vmatprep.mubr.f32.mxu0 %v5569_v44  ;;  %vm13815_vm6 = vmmov %vm13807_vm5  ;;  %v5666_v39 = vld [vmem:[%s12011_s5 + $0x118] sm:$0xff] }
 0x4e6   : > { %4716 = vst.msk [vmem:[#allocation5 + $0x138] sm:$0xff] %vm13807_vm5, %v4633_v24  ;;  %5131 = vrot.lane.b32.xlu0 %v5045_v55, %s7384_s16  ;;  %5890 = vmatmul.mubr.f32.gmra.mrb[86].mxu0 %v5568_v29  ;;  %vm13821_vm5 = vnez %v13820_v57  ;;  %vm13822_vm10 = vmmov %vm13811_vm2  ;;  %v7007_v44 = vpack.c.bf16 %v5666_v39, %v5665_v34  ;;  %v7369_v29 = vld [vmem:[#allocation4 + $0xef] sm:$0xff] }
 0x4e7   : > { %4204 = vrot.lane.b32.xlu1 %v4116_v35, %s7386_s11  ;;  %v4566_v11 = vsel %vm13821_vm5, %v7367_v51, 0.0  ;;  %v5048_v35 = vsel %vm13655_vm1, %v7369_v29, 0.0  ;;  %v4794_v57 = vld [vmem:[#allocation4 + $0xf1] sm:$0xff] }
 0x4e8   : > { %v4890_v37 = vpop.permute.xlu0 %4889  ;;  %v4410_v5 = vpop.permute.xlu1 %4409  ;;  %7008 = vmatprep.subr.bf16.mxu0 %v7007_v44 }
 0x4e9   : > { %4972 = vst.msk [vmem:[#allocation5 + $0x140] sm:$0xff] %vm13810_vm0, %v4890_v37  ;;  %v13840_v37 = vld [vmem:[#allocation86_spill] sm:$0xff]  ;;  %7010 = vmatpush3.bf16.msra.mxu0 %v7007_v44 }
 0x4ea   : > { %4492 = vst.msk [vmem:[#allocation5 + $0x150] sm:$0xff] %vm13811_vm2, %v4410_v5  ;;  %5355 = vrot.lane.b32.xlu0 %v5269_v4, %s7387_s29  ;;  %vm13823_vm2 = vmand %vm13817_vm15, %vm13657_vm12  ;;  %vm13836_vm12 = vnez %v13615_v58  ;;  %v5240_v4 = vld [vmem:[#allocation4 + $0xf0] sm:$0xff] }
 0x4eb   : > { %4652 = vrot.lane.b32.xlu1 %v13796_v26, %s7387_s29  ;;  %v4342_v0 = vsel %vm13823_vm2, %v4790_v10, 0.0  ;;  %vm13830_vm15 = vmmov %vm13810_vm0  ;;  %v4119_v7 = vsel %vm13836_vm12, %v5238_v15, 0.0 }
 0x4ec   : > { %v4892_v12 = vpop.permute.xlu0 %4891  ;;  %v5572_v48 = vld [vmem:[#allocation5 + $0x128] sm:$0xff]  ;;  %v4187_v38 = vpop.permute.xlu1 %4186 }
 0x4ed   : > { %4973 = vst.msk [vmem:[#allocation5 + $0x158] sm:$0xff] %vm13812_vm11, %v4892_v12  ;;  %5894 = vmatprep.mubr.f32.mxu0 %v5572_v48  ;;  %vm13824_vm11 = vmmov %vm13815_vm6  ;;  %v5574_v62 = vld [vmem:[#allocation5 + $0x138] sm:$0xff]  ;;  %v5272_v48 = vsel %vm13655_vm1, %v5240_v4, 0.0 }
 0x4ee   : > { %4268 = vst.msk [vmem:[#allocation5 + $0x168] sm:$0xff] %vm13813_vm8, %v4187_v38  ;;  %4909 = vrot.lane.b32.xlu0 %v4822_v33, %s7386_s11  ;;  %5895 = vmatmul.mubr.f32.gmra.mrb[88].mxu0 %v5571_v25  ;;  %vm13826_vm8 = vmand %vm13825_vm9, %vm13821_vm5 }
 0x4ef   : > { %4429 = vrot.lane.b32.xlu1 %v4341_v50, %s7384_s16  ;;  %v5047_v19 = vsel %vm13826_vm8, %v11012_v63, 0.0  ;;  %v5271_v63 = vsel %vm13825_vm9, %v11530_v32, 0.0  ;;  %vm13833_vm5 = vmmov %vm13810_vm0  ;;  %vm13841_vm9 = vnez %v13840_v37 }
 0x4f0   : > { %v5114_v31 = vpop.permute.xlu0 %5113  ;;  %v4635_v3 = vpop.permute.xlu1 %4634 }
 0x4f1   : > { %5196 = vst.msk [vmem:[#allocation5 + $0x140] sm:$0xff] %vm13814_vm3, %v5114_v31  ;;  %vm13827_vm3 = vmmov %vm13815_vm6  ;;  %v7371_v31 = vld [vmem:[#allocation4 + $0xf7] sm:$0xff] }
 0x4f2   : > { %4717 = vst.msk [vmem:[#allocation5 + $0x150] sm:$0xff] %vm13815_vm6, %v4635_v3  ;;  %4911 = vrot.lane.b32.xlu0 %v4791_v20, %s7386_s11  ;;  %vm13829_vm6 = vnez %v13828_v23  ;;  %v13847_v3 = vld [vmem:[#allocation75_spill] sm:$0xff] }
 0x4f3   : > { %4206 = vrot.lane.b32.xlu1 %v4117_v28, %s7386_s11  ;;  %v4118_v60 = vsel %vm13829_vm6, %v5237_v18, 0.0  ;;  %v4343_v17 = vsel %vm13829_vm6, %v4791_v20, 0.0  ;;  %v7370_v18 = vld [vmem:[#allocation4 + $0xe7] sm:$0xff]  ;;  %vm13844_vm6 = vnez %v13676_v6  ;;  %vm13848_vm1 = vnez %v13847_v3 }
 0x4f4   : > { %v5338_v54 = vpop.permute.xlu0 %5337  ;;  %v4412_v1 = vpop.permute.xlu1 %4411  ;;  %v4568_v5 = vsel %vm13841_vm9, %v7370_v18, 0.0  ;;  %v13859_v6 = vld [vmem:[#allocation88_spill] sm:$0xff] }
 0x4f5   : > { %5420 = vst.msk [vmem:[#allocation5 + $0x140] sm:$0xff] %vm13818_vm7, %v5338_v54  ;;  %vm13831_vm7 = vmmov %vm13822_vm10  ;;  %v5241_v54 = vld [vmem:[#allocation4 + $0xf8] sm:$0xff]  ;;  %v7373_v18 = vld [vmem:[#allocation4 + $0x101] sm:$0xff] }
 0x4f6   : > { %4493 = vst.msk [vmem:[#allocation5 + $0x168] sm:$0xff] %vm13819_vm14, %v4412_v1  ;;  %5133 = vrot.lane.b32.xlu0 %v5046_v13, %s7384_s16  ;;  %vm13832_vm14 = vmmov %vm13810_vm0  ;;  %v5273_v51 = vsel %vm13848_vm1, %v5241_v54, 0.0  ;;  %v4828_v37 = vsel %vm13689_vm13, %v7373_v18, 0.0 }
 0x4f7   : > { %4654 = vrot.lane.b32.xlu1 %v4566_v11, %s7387_s29  ;;  %vm13842_vm8 = vmmov %vm13831_vm7 }
 0x4f8   : > { %v5116_v61 = vpop.permute.xlu0 %5115  ;;  %v4189_v9 = vpop.permute.xlu1 %4188 }
 0x4f9   : > { %5197 = vst.msk [vmem:[#allocation5 + $0x158] sm:$0xff] %vm13822_vm10, %v5116_v61  ;;  %v5577_v49 = vld [vmem:[#allocation5 + $0x150] sm:$0xff]  ;;  %vm13834_vm10 = vmmov %vm13831_vm7 }
 0x4fa   : > { %4269 = vst.msk [vmem:[#allocation5 + $0x180] sm:$0xff] %vm13810_vm0, %v4189_v9  ;;  %5357 = vrot.lane.b32.xlu0 %v5270_v40, %s7387_s29  ;;  %vm13835_vm0 = vmmov %vm13827_vm3  ;;  %v4826_v9 = vsel %vm13844_vm6, %v4794_v57, 0.0 }
 0x4fb   : > { %4431 = vrot.lane.b32.xlu1 %v4342_v0, %s7384_s16  ;;  %vm13837_vm2 = vmmov %vm13835_vm0 }
 0x4fc   : > { %v5340_v41 = vpop.permute.xlu0 %5339  ;;  %v5575_v42 = vld [vmem:[#allocation5 + $0x140] sm:$0xff]  ;;  %v4637_v52 = vpop.permute.xlu1 %4636 }
 0x4fd   : > { %5421 = vst.msk [vmem:[#allocation5 + $0x158] sm:$0xff] %vm13824_vm11, %v5340_v41  ;;  %5899 = vmatprep.mubr.f32.mxu0 %v5575_v42  ;;  %vm13839_vm11 = vmmov %vm13831_vm7 }
 0x4fe   : > { %4718 = vst.msk [vmem:[#allocation5 + $0x168] sm:$0xff] %vm13827_vm3, %v4637_v52  ;;  %5135 = vrot.lane.b32.xlu0 %v5047_v19, %s7384_s16  ;;  %5900 = vmatmul.mubr.f32.gmra.mrb[90].mxu0 %v5574_v62  ;;  %vm13843_vm3 = vmmov %vm13833_vm5  ;;  %v4795_v52 = vld [vmem:[#allocation4 + $0xf9] sm:$0xff] }
 0x4ff   : > { %4208 = vrot.lane.b32.xlu1 %v4118_v60, %s7386_s11  ;;  %v7372_v60 = vld [vmem:[#allocation4 + $0xff] sm:$0xff] }
 0x500   : > { %v4894_v45 = vpop.permute.xlu0 %4893  ;;  %v4414_v59 = vpop.permute.xlu1 %4413 }
 0x501   : > { %4974 = vst.msk [vmem:[#allocation5 + $0x170] sm:$0xff] %vm13830_vm15, %v4894_v45  ;;  %vm13845_vm15 = vmand %vm13836_vm12, %vm13844_vm6  ;;  %v13864_v45 = vld [vmem:[#allocation90_spill] sm:$0xff] }
 0x502   : > { %4494 = vst.msk [vmem:[#allocation5 + $0x180] sm:$0xff] %vm13831_vm7, %v4414_v59  ;;  %5359 = vrot.lane.b32.xlu0 %v5271_v63, %s7387_s29  ;;  %v4344_v38 = vsel %vm13845_vm15, %v4792_v36, 0.0  ;;  %vm13846_vm7 = vmmov %vm13835_vm0  ;;  %vm13862_vm15 = vnez %v13674_v2  ;;  %v11618_v63 = vld [vmem:[#allocation4 + $0x100] sm:$0xff] }
 0x503   : > { %4656 = vrot.lane.b32.xlu1 %v7368_v21, %s7387_s29  ;;  %vm13854_vm12 = vmmov %vm13842_vm8 }
 0x504   : > { %v4896_v26 = vpop.permute.xlu0 %4895  ;;  %v5578_v14 = vld [vmem:[#allocation5 + $0x158] sm:$0xff]  ;;  %v4191_v53 = vpop.permute.xlu1 %4190 }
 0x505   : > { %4975 = vst.msk [vmem:[#allocation5 + $0x188] sm:$0xff] %vm13832_vm14, %v4896_v26  ;;  %5904 = vmatprep.mubr.f32.mxu0 %v5578_v14  ;;  %vm13849_vm14 = vmand %vm13848_vm1, %vm13841_vm9  ;;  %v5580_v58 = vld [vmem:[#allocation5 + $0x168] sm:$0xff]  ;;  %vm13865_vm1 = vnez %v13864_v45  ;;  %v5274_v26 = vsel %vm13862_vm15, %v11618_v63, 0.0 }
 0x506   : > { %4270 = vst.msk [vmem:[#allocation5 + $0x198] sm:$0xff] %vm13833_vm5, %v4191_v53  ;;  %4913 = vrot.lane.b32.xlu0 %v4824_v30, %s7386_s11  ;;  %5905 = vmatmul.mubr.f32.gmra.mrb[92].mxu0 %v5577_v49  ;;  %v5049_v20 = vsel %vm13849_vm14, %v7371_v31, 0.0  ;;  %vm13850_vm5 = vmmov %vm13835_vm0  ;;  %v4570_v59 = vsel %vm13865_vm1, %v7371_v31, 0.0  ;;  %v5019_v53 = vld [vmem:[#allocation4 + $0x107] sm:$0xff]  ;;  %v13885_v31 = vld [vmem:[#allocation91_spill] sm:$0xff] }
 0x507   : > { %4433 = vrot.lane.b32.xlu1 %v4343_v17, %s7384_s16  ;;  %vm13857_vm9 = vmmov %vm13842_vm8 }
 0x508   : > { %v5118_v27 = vpop.permute.xlu0 %5117  ;;  %v4639_v8 = vpop.permute.xlu1 %4638  ;;  %vm13861_vm6 = vmmov %vm13850_vm5 }
 0x509   : > { %5198 = vst.msk [vmem:[#allocation5 + $0x170] sm:$0xff] %vm13834_vm10, %v5118_v27  ;;  %vm13852_vm10 = vnez %v13851_v47 }
 0x50a   : > { %4719 = vst.msk [vmem:[#allocation5 + $0x180] sm:$0xff] %vm13835_vm0, %v4639_v8  ;;  %4915 = vrot.lane.b32.xlu0 %v4793_v16, %s7386_s11  ;;  %v4120_v28 = vsel %vm13852_vm10, %v11530_v32, 0.0  ;;  %vm13853_vm0 = vmmov %vm13843_vm3  ;;  %v4345_v0 = vsel %vm13852_vm10, %v4793_v16, 0.0  ;;  %v5050_v32 = vsel %vm13862_vm15, %v7372_v60, 0.0  ;;  %v13873_v8 = vld [vmem:[#allocation53_spill] sm:$0xff] }
 0x50b   : > { %4210 = vrot.lane.b32.xlu1 %v4119_v7, %s7386_s11  ;;  %v5243_v7 = vld [vmem:[#allocation4 + $0x108] sm:$0xff] }
 0x50c   : > { %v5342_v24 = vpop.permute.xlu0 %5341  ;;  %v4416_v55 = vpop.permute.xlu1 %4415 }
 0x50d   : > { %5422 = vst.msk [vmem:[#allocation5 + $0x170] sm:$0xff] %vm13837_vm2, %v5342_v24  ;;  %vm13855_vm2 = vmmov %vm13853_vm0 }
 0x50e   : > { %4495 = vst.msk [vmem:[#allocation5 + $0x198] sm:$0xff] %vm13839_vm11, %v4416_v55  ;;  %5137 = vrot.lane.b32.xlu0 %v5048_v35, %s7384_s16  ;;  %vm13856_vm11 = vmmov %vm13853_vm0 }
 0x50f   : > { %4658 = vrot.lane.b32.xlu1 %v4568_v5, %s7387_s29 }
 0x510   : > { %v5120_v10 = vpop.permute.xlu0 %5119  ;;  %v4193_v12 = vpop.permute.xlu1 %4192 }
 0x511   : > { %5199 = vst.msk [vmem:[#allocation5 + $0x188] sm:$0xff] %vm13842_vm8, %v5120_v10  ;;  %v5583_v40 = vld [vmem:[#allocation5 + $0x180] sm:$0xff]  ;;  %vm13858_vm8 = vmmov %vm13850_vm5 }
 0x512   : > { %4271 = vst.msk [vmem:[#allocation5 + $0x1b0] sm:$0xff] %vm13843_vm3, %v4193_v12  ;;  %5361 = vrot.lane.b32.xlu0 %v5272_v48, %s7387_s29  ;;  %vm13860_vm3 = vnez %v13859_v6  ;;  %v7374_v12 = vld [vmem:[#allocation4 + $0x109] sm:$0xff] }
 0x513   : > { %4435 = vrot.lane.b32.xlu1 %v4344_v38, %s7384_s16  ;;  %v4121_v19 = vsel %vm13860_vm3, %v5240_v4, 0.0  ;;  %vm13868_vm10 = vmand %vm13860_vm3, %vm13689_vm13  ;;  %vm13882_vm13 = vnez %v13881_v46  ;;  %v5020_v38 = vld [vmem:[#allocation4 + $0x10f] sm:$0xff] }
 0x514   : > { %v5344_v33 = vpop.permute.xlu0 %5343  ;;  %v5581_v25 = vld [vmem:[#allocation5 + $0x170] sm:$0xff]  ;;  %v4641_v50 = vpop.permute.xlu1 %4640  ;;  %v4346_v14 = vsel %vm13868_vm10, %v4794_v57, 0.0  ;;  %v4572_v48 = vsel %vm13882_vm13, %v5019_v53, 0.0  ;;  %vm13886_vm10 = vnez %v13885_v31  ;;  %v5021_v57 = vld [vmem:[#allocation4 + $0x117] sm:$0xff] }
 0x515   : > { %5423 = vst.msk [vmem:[#allocation5 + $0x188] sm:$0xff] %vm13846_vm7, %v5344_v33  ;;  %5909 = vmatprep.mubr.f32.mxu0 %v5581_v25  ;;  %vm13863_vm7 = vmmov %vm13857_vm9  ;;  %v4123_v3 = vsel %vm13886_vm10, %v11618_v63, 0.0 }
 0x516   : > { %4720 = vst.msk [vmem:[#allocation5 + $0x198] sm:$0xff] %vm13850_vm5, %v4641_v50  ;;  %5139 = vrot.lane.b32.xlu0 %v5049_v20, %s7384_s16  ;;  %5910 = vmatmul.mubr.f32.gmra.mrb[94].mxu0 %v5580_v58  ;;  %vm13866_vm14 = vmmov %vm13863_vm7  ;;  %v5052_v50 = vsel %vm13687_vm4, %v5020_v38, 0.0  ;;  %v5244_v20 = vld [vmem:[#allocation4 + $0x110] sm:$0xff] }
 0x517   : > { %4212 = vrot.lane.b32.xlu1 %v4120_v28, %s7386_s11  ;;  %vm13867_vm5 = vmmov %vm13853_vm0 }
 0x518   : > { %v4898_v1 = vpop.permute.xlu0 %4897  ;;  %v4418_v13 = vpop.permute.xlu1 %4417  ;;  %vm13876_vm3 = vmmov %vm13863_vm7 }
 0x519   : > { %4976 = vst.msk [vmem:[#allocation5 + $0x1a0] sm:$0xff] %vm13853_vm0, %v4898_v1  ;;  %vm13869_vm0 = vmmov %vm13861_vm6 }
 0x51a   : > { %4496 = vst.msk [vmem:[#allocation5 + $0x1b0] sm:$0xff] %vm13854_vm12, %v4418_v13  ;;  %5363 = vrot.lane.b32.xlu0 %v5273_v51, %s7387_s29  ;;  %vm13870_vm12 = vnez %v13683_v22  ;;  %vm13878_vm15 = vmmov %vm13867_vm5  ;;  %v13889_v13 = vld [vmem:[#allocation48_spill] sm:$0xff] }
 0x51b   : > { %4660 = vrot.lane.b32.xlu1 %v7369_v29, %s7387_s29  ;;  %v5275_v24 = vsel %vm13870_vm12, %v5243_v7, 0.0 }
 0x51c   : > { %v4900_v11 = vpop.permute.xlu0 %4899  ;;  %v5584_v15 = vld [vmem:[#allocation5 + $0x188] sm:$0xff]  ;;  %v4195_v61 = vpop.permute.xlu1 %4194 }
 0x51d   : > { %4977 = vst.msk [vmem:[#allocation5 + $0x1b8] sm:$0xff] %vm13855_vm2, %v4900_v11  ;;  %5914 = vmatprep.mubr.f32.mxu0 %v5584_v15  ;;  %vm13871_vm2 = vmand %vm13870_vm12, %vm13865_vm1  ;;  %v5586_v27 = vld [vmem:[#allocation5 + $0x198] sm:$0xff] }
 0x51e   : > { %4272 = vst.msk [vmem:[#allocation5 + $0x1c8] sm:$0xff] %vm13856_vm11, %v4195_v61  ;;  %4917 = vrot.lane.b32.xlu0 %v4826_v9, %s7386_s11  ;;  %5915 = vmatmul.mubr.f32.gmra.mrb[96].mxu0 %v5583_v40  ;;  %v5051_v2 = vsel %vm13871_vm2, %v5019_v53, 0.0  ;;  %vm13872_vm11 = vmmov %vm13869_vm0  ;;  %vm13890_vm2 = vnez %v13889_v13  ;;  %v5245_v61 = vld [vmem:[#allocation4 + $0x118] sm:$0xff]  ;;  %v13893_v9 = vld [vmem:[#allocation94_spill] sm:$0xff] }
 0x51f   : > { %4437 = vrot.lane.b32.xlu1 %v4345_v0, %s7384_s16  ;;  %vm13880_vm1 = vmmov %vm13869_vm0 }
 0x520   : > { %v5122_v41 = vpop.permute.xlu0 %5121  ;;  %v4643_v42 = vpop.permute.xlu1 %4642 }
 0x521   : > { %5200 = vst.msk [vmem:[#allocation5 + $0x1a0] sm:$0xff] %vm13857_vm9, %v5122_v41  ;;  %vm13874_vm9 = vnez %v13873_v8 }
 0x522   : > { %4721 = vst.msk [vmem:[#allocation5 + $0x1b0] sm:$0xff] %vm13858_vm8, %v4643_v42  ;;  %4919 = vrot.lane.b32.xlu0 %v4795_v52, %s7386_s11  ;;  %v4122_v16 = vsel %vm13874_vm9, %v5241_v54, 0.0  ;;  %vm13875_vm8 = vmmov %vm13867_vm5  ;;  %v4347_v22 = vsel %vm13874_vm9, %v4795_v52, 0.0  ;;  %v5276_v54 = vsel %vm13687_vm4, %v5244_v20, 0.0  ;;  %vm13894_vm4 = vnez %v13893_v9  ;;  %v5022_v52 = vld [vmem:[#allocation4 + $0x11f] sm:$0xff] }
 0x523   : > { %4214 = vrot.lane.b32.xlu1 %v4121_v19, %s7386_s11  ;;  %vm13892_vm9 = vmmov %vm13880_vm1  ;;  %v5277_v41 = vsel %vm13894_vm4, %v5245_v61, 0.0 }
 0x524   : > { %v5346_v62 = vpop.permute.xlu0 %5345  ;;  %v4420_v23 = vpop.permute.xlu1 %4419 }
 0x525   : > { %5424 = vst.msk [vmem:[#allocation5 + $0x1a0] sm:$0xff] %vm13861_vm6, %v5346_v62  ;;  %vm13877_vm6 = vmmov %vm13867_vm5 }
 0x526   : > { %4497 = vst.msk [vmem:[#allocation5 + $0x1c8] sm:$0xff] %vm13863_vm7, %v4420_v23  ;;  %5141 = vrot.lane.b32.xlu0 %v5050_v32, %s7384_s16  ;;  %vm13879_vm7 = vmmov %vm13876_vm3  ;;  %v13898_v23 = vld [vmem:[#allocation30_spill] sm:$0xff] }
 0x527   : > { %4662 = vrot.lane.b32.xlu1 %v4570_v59, %s7387_s29  ;;  %vm13888_vm12 = vmmov %vm13877_vm6 }
 0x528   : > { %v5124_v36 = vpop.permute.xlu0 %5123  ;;  %v4197_v21 = vpop.permute.xlu1 %4196 }
 0x529   : > { %5201 = vst.msk [vmem:[#allocation5 + $0x1b8] sm:$0xff] %vm13866_vm14, %v5124_v36  ;;  %v5589_v5 = vld [vmem:[#allocation5 + $0x1b0] sm:$0xff]  ;;  %vm13883_vm14 = vmmov %vm13869_vm0 }
 0x52a   : > { %4273 = vst.msk [vmem:[#allocation5 + $0x1e0] sm:$0xff] %vm13867_vm5, %v4197_v21  ;;  %5365 = vrot.lane.b32.xlu0 %v5274_v26, %s7387_s29  ;;  %vm13884_vm5 = vmmov %vm13876_vm3  ;;  %v5246_v21 = vld [vmem:[#allocation4 + $0x120] sm:$0xff] }
 0x52b   : > { %4439 = vrot.lane.b32.xlu1 %v4346_v14, %s7384_s16  ;;  %v7375_v14 = vld [vmem:[#allocation4 + $0x111] sm:$0xff] }
 0x52c   : > { %v5348_v30 = vpop.permute.xlu0 %5347  ;;  %v5587_v49 = vld [vmem:[#allocation5 + $0x1a0] sm:$0xff]  ;;  %v4645_v17 = vpop.permute.xlu1 %4644  ;;  %v4830_v53 = vsel %vm13890_vm2, %v7375_v14, 0.0 }
 0x52d   : > { %5425 = vst.msk [vmem:[#allocation5 + $0x1b8] sm:$0xff] %vm13869_vm0, %v5348_v30  ;;  %5919 = vmatprep.mubr.f32.mxu0 %v5587_v49  ;;  %vm13887_vm0 = vmmov %vm13876_vm3 }
 0x52e   : > { %4722 = vst.msk [vmem:[#allocation5 + $0x1c8] sm:$0xff] %vm13872_vm11, %v4645_v17  ;;  %5143 = vrot.lane.b32.xlu0 %v5051_v2, %s7384_s16  ;;  %5920 = vmatmul.mubr.f32.gmra.mrb[98].mxu0 %v5586_v27  ;;  %vm13891_vm11 = vmand %vm13886_vm10, %vm13890_vm2 }
 0x52f   : > { %4216 = vrot.lane.b32.xlu1 %v4122_v16, %s7386_s11  ;;  %v4348_v51 = vsel %vm13891_vm11, %v7373_v18, 0.0 }
 0x530   : > { %v4902_v34 = vpop.permute.xlu0 %4901  ;;  %v4422_v39 = vpop.permute.xlu1 %4421 }
 0x531   : > { %4978 = vst.msk [vmem:[#allocation5 + $0x1d0] sm:$0xff] %vm13875_vm8, %v4902_v34  ;;  %v11645_v44 = vpop.f32.mrb[64].mxu0  ;;  %vm13895_vm8 = vmand %vm13894_vm4, %vm13882_vm13 }
 0x532   : > { %4498 = vst.msk [vmem:[#allocation5 + $0x1e0] sm:$0xff] %vm13876_vm3, %v4422_v39  ;;  %5367 = vrot.lane.b32.xlu0 %v5275_v24, %s7387_s29  ;;  %v5838_v55 = vpop.f32.mrb[65].mxu0  ;;  %v5053_v40 = vsel %vm13895_vm8, %v5021_v57, 0.0  ;;  %vm13896_vm3 = vmmov %vm13880_vm1 }
 0x533   : > { %4664 = vrot.lane.b32.xlu1 %v7372_v60, %s7387_s29  ;;  %vm13904_vm10 = vmmov %vm13896_vm3 }
 0x534   : > { %v4904_v29 = vpop.permute.xlu0 %4903  ;;  %v5590_v56 = vld [vmem:[#allocation5 + $0x1b8] sm:$0xff]  ;;  %v4199_v35 = vpop.permute.xlu1 %4198  ;;  %vm13907_vm11 = vmmov %vm13896_vm3 }
 0x535   : > { %4979 = vst.msk [vmem:[#allocation5 + $0x1e8] sm:$0xff] %vm13877_vm6, %v4904_v29  ;;  %5924 = vmatprep.mubr.f32.mxu0 %v5590_v56  ;;  %v5592_v0 = vld [vmem:[#allocation5 + $0x1c8] sm:$0xff]  ;;  %vm13910_vm8 = vmmov %vm13887_vm0 }
 0x536   : > { %4274 = vst.msk [vmem:[#allocation5 + $0x1f8] sm:$0xff] %vm13878_vm15, %v4199_v35  ;;  %4921 = vrot.lane.b32.xlu0 %v4828_v37, %s7386_s11  ;;  %5925 = vmatmul.mubr.f32.gmra.mrb[100].mxu0 %v5589_v5  ;;  %vm13897_vm15 = vmmov %vm13887_vm0 }
 0x537   : > { %4441 = vrot.lane.b32.xlu1 %v4347_v22, %s7384_s16 }
 0x538   : > { %v5126_v4 = vpop.permute.xlu0 %5125  ;;  %v4647_v10 = vpop.permute.xlu1 %4646 }
 0x539   : > { %5202 = vst.msk [vmem:[#allocation5 + $0x1d0] sm:$0xff] %vm13879_vm7, %v5126_v4  ;;  %vm13899_vm7 = vnez %v13898_v23 }
 0x53a   : > { %4723 = vst.msk [vmem:[#allocation5 + $0x1e0] sm:$0xff] %vm13880_vm1, %v4647_v10  ;;  %4923 = vrot.lane.b32.xlu0 %v7374_v12, %s7386_s11  ;;  %v5054_v60 = vsel %vm13899_vm7, %v5022_v52, 0.0  ;;  %vm13900_vm1 = vmmov %vm13877_vm6  ;;  %v5278_v30 = vsel %vm13899_vm7, %v5246_v21, 0.0 }
 0x53b   : > { %4666 = vrot.lane.b32.xlu1 %v4572_v48, %s7387_s29  ;;  %vm13901_vm13 = vmmov %vm13900_vm1 }
 0x53c   : > { %v5350_v33 = vpop.permute.xlu0 %5349  ;;  %v4424_v25 = vpop.permute.xlu1 %4423  ;;  %vm13906_vm2 = vmmov %vm13900_vm1 }
 0x53d   : > { %5426 = vst.msk [vmem:[#allocation5 + $0x1d0] sm:$0xff] %vm13883_vm14, %v5350_v33  ;;  %vm13902_vm14 = vmmov %vm13887_vm0 }
 0x53e   : > { %4499 = vst.msk [vmem:[#allocation5 + $0x1f8] sm:$0xff] %vm13884_vm5, %v4424_v25  ;;  %5145 = vrot.lane.b32.xlu0 %v5052_v50, %s7384_s16  ;;  %vm13903_vm5 = vmmov %vm13896_vm3 }
 0x53f   : > { %4218 = vrot.lane.b32.xlu1 %v4123_v3, %s7386_s11  ;;  %v11676_v28 = vpop.f32.mrb[66].mxu0  ;;  %vm13909_vm4 = vmmov %vm13900_vm1 }
 0x540   : > { %v5128_v58 = vpop.permute.xlu0 %5127  ;;  %v4201_v47 = vpop.permute.xlu1 %4200  ;;  %vm13914_vm7 = vmmov %vm13903_vm5 }
 0x541   : > { %5203 = vst.msk [vmem:[#allocation5 + $0x1e8] sm:$0xff] %vm13887_vm0, %v5128_v58  ;;  %v5843_v1 = vpop.f32.mrb[67].mxu0  ;;  %v5595_v63 = vld [vmem:[#allocation5 + $0x1e0] sm:$0xff] }
 0x542   : > { %4275 = vst.msk [vmem:[#allocation5 + $0x210] sm:$0xff] %vm13888_vm12, %v4201_v47  ;;  %5369 = vrot.lane.b32.xlu0 %v5276_v54, %s7387_s29  ;;  %vm13905_vm12 = vmmov %vm13887_vm0 }
 0x543   : > { %4443 = vrot.lane.b32.xlu1 %v4348_v51, %s7384_s16 }
 0x544   : > { %v5352_v11 = vpop.permute.xlu0 %5351  ;;  %v5593_v15 = vld [vmem:[#allocation5 + $0x1d0] sm:$0xff]  ;;  %v4649_v43 = vpop.permute.xlu1 %4648 }
 0x545   : > { %5427 = vst.msk [vmem:[#allocation5 + $0x1e8] sm:$0xff] %vm13892_vm9, %v5352_v11  ;;  %5929 = vmatprep.mubr.f32.mxu0 %v5593_v15  ;;  %vm13908_vm9 = vmmov %vm13896_vm3 }
 0x546   : > { %4724 = vst.msk [vmem:[#allocation5 + $0x1f8] sm:$0xff] %vm13896_vm3, %v4649_v43  ;;  %5147 = vrot.lane.b32.xlu0 %v5053_v40, %s7384_s16  ;;  %5930 = vmatmul.mubr.f32.gmra.mrb[102].mxu0 %v5592_v0  ;;  %vm13911_vm3 = vmmov %vm13900_vm1 }
 0x547   : > { %4668 = vrot.lane.b32.xlu1 %v5020_v38, %s7387_s29  ;;  %v11700_v19 = vpop.f32.mrb[68].mxu0 }
 0x548   : > { %v4906_v42 = vpop.permute.xlu0 %4905  ;;  %v5848_v62 = vpop.f32.mrb[69].mxu0 }
 0x549   : > { %4980 = vst.msk [vmem:[#allocation5 + $0x200] sm:$0xff] %vm13877_vm6, %v4906_v42  ;;  %v4426_v6 = vpop.permute.xlu1 %4425  ;;  %vm13912_vm6 = vmmov %vm13900_vm1 }
 0x54a   : > { %4500 = vst.msk [vmem:[#allocation5 + $0x210] sm:$0xff] %vm13897_vm15, %v4426_v6  ;;  %5371 = vrot.lane.b32.xlu0 %v5277_v41, %s7387_s29  ;;  %vm13913_vm15 = vmmov %vm13887_vm0 }
 0x54c   : > { %v4908_v32 = vpop.permute.xlu0 %4907  ;;  %v5596_v45 = vld [vmem:[#allocation5 + $0x1e8] sm:$0xff] }
 0x54d   : > { %4981 = vst.msk [vmem:[#allocation5 + $0x218] sm:$0xff] %vm13900_vm1, %v4908_v32  ;;  %v4203_v59 = vpop.permute.xlu1 %4202  ;;  %5934 = vmatprep.mubr.f32.mxu0 %v5596_v45  ;;  %v5598_v24 = vld [vmem:[#allocation5 + $0x1f8] sm:$0xff]  ;;  %vm13915_vm1 = vmmov %vm13903_vm5 }
 0x54e   : > { %4276 = vst.msk [vmem:[#allocation5 + $0x228] sm:$0xff] %vm13901_vm13, %v4203_v59  ;;  %5149 = vrot.lane.b32.xlu0 %v5054_v60, %s7384_s16  ;;  %5935 = vmatmul.mubr.f32.gmra.mrb[104].mxu0 %v5595_v63  ;;  %vm13916_vm13 = vmmov %vm13887_vm0 }
 0x550   : > { %v5130_v36 = vpop.permute.xlu0 %5129 }
 0x551   : > { %5204 = vst.msk [vmem:[#allocation5 + $0x200] sm:$0xff] %vm13902_vm14, %v5130_v36  ;;  %v4651_v26 = vpop.permute.xlu1 %4650  ;;  %vm13917_vm14 = vmmov %vm13887_vm0 }
 0x552   : > { %4725 = vst.msk [vmem:[#allocation5 + $0x210] sm:$0xff] %vm13903_vm5, %v4651_v26  ;;  %4925 = vrot.lane.b32.xlu0 %v4830_v53, %s7386_s11  ;;  %vm13918_vm5 = vmmov %vm13906_vm2 }
 0x554   : > { %v5354_v49 = vpop.permute.xlu0 %5353 }
 0x555   : > { %5428 = vst.msk [vmem:[#allocation5 + $0x200] sm:$0xff] %vm13904_vm10, %v5354_v49  ;;  %v4428_v17 = vpop.permute.xlu1 %4427  ;;  %vm13919_vm10 = vmmov %vm13915_vm1 }
 0x556   : > { %4501 = vst.msk [vmem:[#allocation5 + $0x228] sm:$0xff] %vm13887_vm0, %v4428_v17  ;;  %5373 = vrot.lane.b32.xlu0 %v5278_v30, %s7387_s29  ;;  %vm13920_vm0 = vmmov %vm13915_vm1 }
 0x557   : > { %v11720_v8 = vpop.f32.mrb[70].mxu0 }
 0x558   : > { %v5132_v2 = vpop.permute.xlu0 %5131  ;;  %v5853_v16 = vpop.f32.mrb[71].mxu0 }
 0x559   : > { %5205 = vst.msk [vmem:[#allocation5 + $0x218] sm:$0xff] %vm13905_vm12, %v5132_v2  ;;  %v4205_v27 = vpop.permute.xlu1 %4204  ;;  %v5601_v22 = vld [vmem:[#allocation5 + $0x210] sm:$0xff]  ;;  %vm13921_vm12 = vmmov %vm13906_vm2 }
 0x55a   : > { %4277 = vst.msk [vmem:[#allocation5 + $0x240] sm:$0xff] %vm13906_vm2, %v4205_v27  ;;  %vm13922_vm2 = vmmov %vm13910_vm8 }
 0x55c   : > { %v5356_v7 = vpop.permute.xlu0 %5355  ;;  %v5599_v34 = vld [vmem:[#allocation5 + $0x200] sm:$0xff] }
 0x55d   : > { %5429 = vst.msk [vmem:[#allocation5 + $0x218] sm:$0xff] %vm13907_vm11, %v5356_v7  ;;  %v4653_v39 = vpop.permute.xlu1 %4652  ;;  %5939 = vmatprep.mubr.f32.mxu0 %v5599_v34  ;;  %vm13923_vm11 = vmmov %vm13911_vm3 }
 0x55e   : > { %4726 = vst.msk [vmem:[#allocation5 + $0x228] sm:$0xff] %vm13908_vm9, %v4653_v39  ;;  %5940 = vmatmul.mubr.f32.gmra.mrb[106].mxu0 %v5598_v24  ;;  %vm13924_vm9 = vmmov %vm13911_vm3 }
 0x55f   : > { %v11726_v56 = vpop.f32.mrb[72].mxu0 }
 0x560   : > { %v4910_v55 = vpop.permute.xlu0 %4909  ;;  %v5858_v35 = vpop.f32.mrb[73].mxu0 }
 0x561   : > { %4982 = vst.msk [vmem:[#allocation5 + $0x230] sm:$0xff] %vm13909_vm4, %v4910_v55  ;;  %v4430_v29 = vpop.permute.xlu1 %4429  ;;  %vm13925_vm4 = vmmov %vm13922_vm2 }
 0x562   : > { %4502 = vst.msk [vmem:[#allocation5 + $0x240] sm:$0xff] %vm13910_vm8, %v4430_v29  ;;  %vm13926_vm8 = vmmov %vm13920_vm0 }
 0x564   : > { %v4912_v18 = vpop.permute.xlu0 %4911  ;;  %v5602_v37 = vld [vmem:[#allocation5 + $0x218] sm:$0xff] }
 0x565   : > { %4983 = vst.msk [vmem:[#allocation5 + $0x248] sm:$0xff] %vm13911_vm3, %v4912_v18  ;;  %v4207_v5 = vpop.permute.xlu1 %4206  ;;  %5944 = vmatprep.mubr.f32.mxu0 %v5602_v37  ;;  %v5604_v20 = vld [vmem:[#allocation5 + $0x228] sm:$0xff]  ;;  %vm13927_vm3 = vmmov %vm13920_vm0 }
 0x566   : > { %4278 = vst.msk [vmem:[#allocation5 + $0x258] sm:$0xff] %vm13912_vm6, %v4207_v5  ;;  %5945 = vmatmul.mubr.f32.gmra.mrb[108].mxu0 %v5601_v22  ;;  %vm13928_vm6 = vmmov %vm13922_vm2 }
 0x568   : > { %v5134_v4 = vpop.permute.xlu0 %5133 }
 0x569   : > { %5206 = vst.msk [vmem:[#allocation5 + $0x230] sm:$0xff] %vm13913_vm15, %v5134_v4  ;;  %v4655_v10 = vpop.permute.xlu1 %4654  ;;  %vm13929_vm15 = vmmov %vm13922_vm2 }
 0x56a   : > { %4727 = vst.msk [vmem:[#allocation5 + $0x240] sm:$0xff] %vm13914_vm7, %v4655_v10  ;;  %vm13930_vm7 = vmmov %vm13918_vm5 }
 0x56c   : > { %v5358_v12 = vpop.permute.xlu0 %5357 }
 0x56d   : > { %5430 = vst.msk [vmem:[#allocation5 + $0x230] sm:$0xff] %vm13915_vm1, %v5358_v12  ;;  %v4432_v46 = vpop.permute.xlu1 %4431  ;;  %vm13931_vm1 = vmmov %vm13920_vm0 }
 0x56e   : > { %4503 = vst.msk [vmem:[#allocation5 + $0x258] sm:$0xff] %vm13916_vm13, %v4432_v46  ;;  %vm13932_vm13 = vmmov %vm13920_vm0 }
 0x56f   : > { %v11736_v33 = vpop.f32.mrb[74].mxu0 }
 0x570   : > { %v5136_v48 = vpop.permute.xlu0 %5135  ;;  %v5863_v25 = vpop.f32.mrb[75].mxu0 }
 0x571   : > { %5207 = vst.msk [vmem:[#allocation5 + $0x248] sm:$0xff] %vm13917_vm14, %v5136_v48  ;;  %v4209_v38 = vpop.permute.xlu1 %4208  ;;  %v5607_v11 = vld [vmem:[#allocation5 + $0x240] sm:$0xff]  ;;  %vm13933_vm14 = vmmov %vm13918_vm5 }
 0x572   : > { %4279 = vst.msk [vmem:[#allocation5 + $0x270] sm:$0xff] %vm13918_vm5, %v4209_v38  ;;  %vm13934_vm5 = vmmov %vm13922_vm2 }
 0x574   : > { %v5360_v50 = vpop.permute.xlu0 %5359  ;;  %v5605_v31 = vld [vmem:[#allocation5 + $0x230] sm:$0xff] }
 0x575   : > { %5431 = vst.msk [vmem:[#allocation5 + $0x248] sm:$0xff] %vm13919_vm10, %v5360_v50  ;;  %v4657_v3 = vpop.permute.xlu1 %4656  ;;  %5949 = vmatprep.mubr.f32.mxu0 %v5605_v31  ;;  %vm13935_vm10 = vmmov %vm13930_vm7 }
 0x576   : > { %4728 = vst.msk [vmem:[#allocation5 + $0x258] sm:$0xff] %vm13920_vm0, %v4657_v3  ;;  %5950 = vmatmul.mubr.f32.gmra.mrb[110].mxu0 %v5604_v20  ;;  %vm13936_vm0 = vmmov %vm13930_vm7 }
 0x577   : > { %v11742_v54 = vpop.f32.mrb[76].mxu0 }
 0x578   : > { %v4914_v58 = vpop.permute.xlu0 %4913  ;;  %v5868_v1 = vpop.f32.mrb[77].mxu0 }
 0x579   : > { %4984 = vst.msk [vmem:[#allocation5 + $0x260] sm:$0xff] %vm13921_vm12, %v4914_v58  ;;  %v4434_v47 = vpop.permute.xlu1 %4433  ;;  %vm13937_vm12 = vmmov %vm13922_vm2 }
 0x57a   : > { %4504 = vst.msk [vmem:[#allocation5 + $0x270] sm:$0xff] %vm13922_vm2, %v4434_v47  ;;  %vm13938_vm2 = vmmov %vm13931_vm1 }
 0x57c   : > { %v4916_v13 = vpop.permute.xlu0 %4915  ;;  %v5608_v51 = vld [vmem:[#allocation5 + $0x248] sm:$0xff] }
 0x57d   : > { %4985 = vst.msk [vmem:[#allocation5 + $0x278] sm:$0xff] %vm13923_vm11, %v4916_v13  ;;  %v4211_v57 = vpop.permute.xlu1 %4210  ;;  %5954 = vmatprep.mubr.f32.mxu0 %v5608_v51  ;;  %v5610_v23 = vld [vmem:[#allocation5 + $0x258] sm:$0xff]  ;;  %vm13939_vm11 = vmmov %vm13931_vm1 }
 0x57e   : > { %4280 = vst.msk [vmem:[#allocation5 + $0x288] sm:$0xff] %vm13924_vm9, %v4211_v57  ;;  %5955 = vmatmul.mubr.f32.gmra.mrb[112].mxu0 %v5607_v11  ;;  %vm13940_vm9 = vmmov %vm13925_vm4 }
 0x580   : > { %v5138_v15 = vpop.permute.xlu0 %5137 }
 0x581   : > { %5208 = vst.msk [vmem:[#allocation5 + $0x260] sm:$0xff] %vm13925_vm4, %v5138_v15  ;;  %v4659_v61 = vpop.permute.xlu1 %4658  ;;  %v5537_v15 = vld [vmem:[#allocation5 + $0x10] sm:$0xff] }
 0x582   : > { %4729 = vst.msk [vmem:[#allocation5 + $0x270] sm:$0xff] %vm13926_vm8, %v4659_v61  ;;  %vm13941_vm8 = vmmov %vm13936_vm0 }
 0x584   : > { %v5362_v43 = vpop.permute.xlu0 %5361 }
 0x585   : > { %5432 = vst.msk [vmem:[#allocation5 + $0x260] sm:$0xff] %vm13927_vm3, %v5362_v43  ;;  %v4436_v9 = vpop.permute.xlu1 %4435  ;;  %vm13942_vm3 = vmmov %vm13931_vm1  ;;  %v5540_v43 = vld [vmem:[#allocation5 + $0x28] sm:$0xff] }
 0x586   : > { %4505 = vst.msk [vmem:[#allocation5 + $0x288] sm:$0xff] %vm13928_vm6, %v4436_v9  ;;  %vm13943_vm6 = vmmov %vm13931_vm1  ;;  %v5543_v9 = vld [vmem:[#allocation5 + $0x40] sm:$0xff] }
 0x587   : > { %v11752_v41 = vpop.f32.mrb[78].mxu0 }
 0x588   : > { %v5140_v40 = vpop.permute.xlu0 %5139  ;;  %v5873_v42 = vpop.f32.mrb[79].mxu0 }
 0x589   : > { %5209 = vst.msk [vmem:[#allocation5 + $0x278] sm:$0xff] %vm13929_vm15, %v5140_v40  ;;  %v4213_v0 = vpop.permute.xlu1 %4212  ;;  %v5613_v26 = vld [vmem:[#allocation5 + $0x270] sm:$0xff]  ;;  %vm13944_vm15 = vmmov %vm13936_vm0  ;;  %v5546_v40 = vld [vmem:[#allocation5 + $0x58] sm:$0xff] }
 0x58a   : > { %4281 = vst.msk [vmem:[#allocation5 + $0x2a0] sm:$0xff] %vm13930_vm7, %v4213_v0  ;;  %vm13945_vm7 = vmmov %vm13925_vm4  ;;  %v5549_v0 = vld [vmem:[#allocation5 + $0x70] sm:$0xff] }
 0x58c   : > { %v5364_v52 = vpop.permute.xlu0 %5363  ;;  %v5611_v6 = vld [vmem:[#allocation5 + $0x260] sm:$0xff] }
 0x58d   : > { %5433 = vst.msk [vmem:[#allocation5 + $0x278] sm:$0xff] %vm13931_vm1, %v5364_v52  ;;  %v4661_v62 = vpop.permute.xlu1 %4660  ;;  %5959 = vmatprep.mubr.f32.mxu0 %v5611_v6  ;;  %vm13946_vm1 = vmmov %vm13936_vm0 }
 0x58e   : > { %4730 = vst.msk [vmem:[#allocation5 + $0x288] sm:$0xff] %vm13932_vm13, %v4661_v62  ;;  %5960 = vmatmul.mubr.f32.gmra.mrb[114].mxu0 %v5610_v23  ;;  %vm13947_vm13 = vmmov %vm13938_vm2  ;;  %v5552_v62 = vld [vmem:[#allocation5 + $0x88] sm:$0xff] }
 0x58f   : > { %v11758_v45 = vpop.f32.mrb[80].mxu0 }
 0x590   : > { %v4918_v60 = vpop.permute.xlu0 %4917  ;;  %v5878_v59 = vpop.f32.mrb[81].mxu0 }
 0x591   : > { %4986 = vst.msk [vmem:[#allocation5 + $0x290] sm:$0xff] %vm13933_vm14, %v4918_v60  ;;  %v4438_v32 = vpop.permute.xlu1 %4437  ;;  %vm13948_vm14 = vmmov %vm13925_vm4  ;;  %v5555_v60 = vld [vmem:[#allocation5 + $0xa0] sm:$0xff]  ;;  %v5561_v59 = vld [vmem:[#allocation5 + $0xd0] sm:$0xff] }
 0x592   : > { %4506 = vst.msk [vmem:[#allocation5 + $0x2a0] sm:$0xff] %vm13934_vm5, %v4438_v32  ;;  %vm13949_vm5 = vmmov %vm13936_vm0  ;;  %v5558_v32 = vld [vmem:[#allocation5 + $0xb8] sm:$0xff] }
 0x594   : > { %v4920_v63 = vpop.permute.xlu0 %4919  ;;  %v5614_v36 = vld [vmem:[#allocation5 + $0x278] sm:$0xff] }
 0x595   : > { %4987 = vst.msk [vmem:[#allocation5 + $0x2a8] sm:$0xff] %vm13935_vm10, %v4920_v63  ;;  %v4215_v21 = vpop.permute.xlu1 %4214  ;;  %5964 = vmatprep.mubr.f32.mxu0 %v5614_v36  ;;  %v5616_v24 = vld [vmem:[#allocation5 + $0x288] sm:$0xff]  ;;  %vm13950_vm10 = vmmov %vm13938_vm2 }
 0x596   : > { %4282 = vst.msk [vmem:[#allocation5 + $0x2b8] sm:$0xff] %vm13936_vm0, %v4215_v21  ;;  %5965 = vmatmul.mubr.f32.gmra.mrb[116].mxu0 %v5613_v26  ;;  %vm13951_vm0 = vmmov %vm13925_vm4  ;;  %v5564_v36 = vld [vmem:[#allocation5 + $0xe8] sm:$0xff]  ;;  %v5567_v26 = vld [vmem:[#allocation5 + $0x100] sm:$0xff] }
 0x598   : > { %v5142_v14 = vpop.permute.xlu0 %5141 }
 0x599   : > { %5210 = vst.msk [vmem:[#allocation5 + $0x290] sm:$0xff] %vm13937_vm12, %v5142_v14  ;;  %v4663_v53 = vpop.permute.xlu1 %4662  ;;  %vm13952_vm12 = vmmov %vm13951_vm0  ;;  %v5570_v14 = vld [vmem:[#allocation5 + $0x118] sm:$0xff] }
 0x59a   : > { %4731 = vst.msk [vmem:[#allocation5 + $0x2a0] sm:$0xff] %vm13938_vm2, %v4663_v53  ;;  %v5573_v53 = vld [vmem:[#allocation5 + $0x130] sm:$0xff] }
 0x59c   : > { %v5366_v30 = vpop.permute.xlu0 %5365 }
 0x59d   : > { %5434 = vst.msk [vmem:[#allocation5 + $0x290] sm:$0xff] %vm13939_vm11, %v5366_v30  ;;  %v4440_v49 = vpop.permute.xlu1 %4439  ;;  %vm13953_vm11 = vmmov %vm13938_vm2  ;;  %v5576_v30 = vld [vmem:[#allocation5 + $0x148] sm:$0xff] }
 0x59e   : > { %4507 = vst.msk [vmem:[#allocation5 + $0x2b8] sm:$0xff] %vm13940_vm9, %v4440_v49  ;;  %vm13954_vm9 = vmmov %vm13946_vm1  ;;  %v5579_v49 = vld [vmem:[#allocation5 + $0x160] sm:$0xff] }
 0x59f   : > { %v11768_v27 = vpop.f32.mrb[82].mxu0 }
 0x5a0   : > { %v5144_v17 = vpop.permute.xlu0 %5143  ;;  %v5883_v16 = vpop.f32.mrb[83].mxu0 }
 0x5a1   : > { %5211 = vst.msk [vmem:[#allocation5 + $0x2a8] sm:$0xff] %vm13925_vm4, %v5144_v17  ;;  %v4217_v2 = vpop.permute.xlu1 %4216  ;;  %v5619_v4 = vld [vmem:[#allocation5 + $0x2a0] sm:$0xff]  ;;  %vm13955_vm4 = vmmov %vm13951_vm0  ;;  %v5582_v17 = vld [vmem:[#allocation5 + $0x178] sm:$0xff] }
 0x5a2   : > { %4283 = vst.msk [vmem:[#allocation5 + $0x2d0] sm:$0xff] %vm13941_vm8, %v4217_v2  ;;  %vm13956_vm8 = vcmask 261120   ;;  %v5585_v2 = vld [vmem:[#allocation5 + $0x190] sm:$0xff] }
 0x5a4   : > { %v5368_v7 = vpop.permute.xlu0 %5367  ;;  %v5617_v34 = vld [vmem:[#allocation5 + $0x290] sm:$0xff] }
 0x5a5   : > { %5435 = vst.msk [vmem:[#allocation5 + $0x2a8] sm:$0xff] %vm13942_vm3, %v5368_v7  ;;  %v4665_v39 = vpop.permute.xlu1 %4664  ;;  %5969 = vmatprep.mubr.f32.mxu0 %v5617_v34  ;;  %vm13957_vm3 = vmmov %vm13938_vm2  ;;  %v5588_v7 = vld [vmem:[#allocation5 + $0x1a8] sm:$0xff] }
 0x5a6   : > { %4732 = vst.msk [vmem:[#allocation5 + $0x2b8] sm:$0xff] %vm13943_vm6, %v4665_v39  ;;  %5970 = vmatmul.mubr.f32.gmra.mrb[118].mxu0 %v5616_v24  ;;  %vm13958_vm6 = vmmov %vm13956_vm8  ;;  %v5591_v39 = vld [vmem:[#allocation5 + $0x1c0] sm:$0xff]  ;;  %v5594_v24 = vld [vmem:[#allocation5 + $0x1d8] sm:$0xff] }
 0x5a8   : > { %v4922_v55 = vpop.permute.xlu0 %4921 }
 0x5a9   : > { %4988 = vst.msk [vmem:[#allocation5 + $0x2c0] sm:$0xff] %vm13944_vm15, %v4922_v55  ;;  %v4442_v29 = vpop.permute.xlu1 %4441  ;;  %v11774_v35 = vpop.f32.mrb[84].mxu0  ;;  %vm13959_vm15 = vmmov %vm13958_vm6  ;;  %v5597_v55 = vld [vmem:[#allocation5 + $0x1f0] sm:$0xff] }
 0x5aa   : > { %4508 = vst.msk [vmem:[#allocation5 + $0x2d0] sm:$0xff] %vm13945_vm7, %v4442_v29  ;;  %v5888_v18 = vpop.f32.mrb[85].mxu0  ;;  %vm13960_vm7 = vmmov %vm13958_vm6 }
 0x5ab   : > { %v5600_v18 = vld [vmem:[#allocation5 + $0x208] sm:$0xff] }
 0x5ac   : > { %v4924_v37 = vpop.permute.xlu0 %4923  ;;  %v5620_v5 = vld [vmem:[#allocation5 + $0x2a8] sm:$0xff] }
 0x5ad   : > { %4989 = vst.msk [vmem:[#allocation5 + $0x2d8] sm:$0xff] %vm13946_vm1, %v4924_v37  ;;  %v4667_v22 = vpop.permute.xlu1 %4666  ;;  %5974 = vmatprep.mubr.f32.mxu0 %v5620_v5  ;;  %v5622_v58 = vld [vmem:[#allocation5 + $0x2b8] sm:$0xff]  ;;  %vm13961_vm1 = vmmov %vm13958_vm6  ;;  %v5603_v5 = vld [vmem:[#allocation5 + $0x220] sm:$0xff] }
 0x5ae   : > { %4733 = vst.msk [vmem:[#allocation5 + $0x2d0] sm:$0xff] %vm13947_vm13, %v4667_v22  ;;  %5975 = vmatmul.mubr.f32.gmra.mrb[120].mxu0 %v5619_v4  ;;  %vm13962_vm13 = vmmov %vm13961_vm1  ;;  %v5606_v22 = vld [vmem:[#allocation5 + $0x238] sm:$0xff]  ;;  %v5609_v4 = vld [vmem:[#allocation5 + $0x250] sm:$0xff] }
 0x5b0   : > { %v5146_v10 = vpop.permute.xlu0 %5145 }
 0x5b1   : > { %5212 = vst.msk [vmem:[#allocation5 + $0x2c0] sm:$0xff] %vm13948_vm14, %v5146_v10  ;;  %v4219_v12 = vpop.permute.xlu1 %4218  ;;  %vm13963_vm14 = vmmov %vm13961_vm1  ;;  %v5612_v10 = vld [vmem:[#allocation5 + $0x268] sm:$0xff] }
 0x5b2   : > { %4284 = vst.msk [vmem:[#allocation5 + $0x2e8] sm:$0xff] %vm13949_vm5, %v4219_v12  ;;  %vm13964_vm5 = vmmov %vm13961_vm1  ;;  %v5615_v12 = vld [vmem:[#allocation5 + $0x280] sm:$0xff] }
 0x5b4   : > { %v5370_v46 = vpop.permute.xlu0 %5369 }
 0x5b5   : > { %5436 = vst.msk [vmem:[#allocation5 + $0x2c0] sm:$0xff] %vm13950_vm10, %v5370_v46  ;;  %v4444_v48 = vpop.permute.xlu1 %4443  ;;  %v5625_v11 = vld [vmem:[#allocation5 + $0x2d0] sm:$0xff]  ;;  %vm13965_vm10 = vmmov %vm13961_vm1  ;;  %v5618_v46 = vld [vmem:[#allocation5 + $0x298] sm:$0xff] }
 0x5b6   : > { %4509 = vst.msk [vmem:[#allocation5 + $0x2e8] sm:$0xff] %vm13951_vm0, %v4444_v48  ;;  %vm13966_vm0 = vmmov %vm13961_vm1  ;;  %v5621_v48 = vld [vmem:[#allocation5 + $0x2b0] sm:$0xff] }
 0x5b8   : > { %v5148_v38 = vpop.permute.xlu0 %5147 }
 0x5b9   : > { %5213 = vst.msk [vmem:[#allocation5 + $0x2d8] sm:$0xff] %vm13952_vm12, %v5148_v38  ;;  %v4669_v25 = vpop.permute.xlu1 %4668  ;;  %v11784_v50 = vpop.f32.mrb[86].mxu0  ;;  %vm13967_vm12 = vmmov %vm13966_vm0  ;;  %v5627_v38 = vld [vmem:[#allocation5 + $0x2e0] sm:$0xff] }
 0x5ba   : > { %4734 = vst.msk [vmem:[#allocation5 + $0x2e8] sm:$0xff] %vm13938_vm2, %v4669_v25  ;;  %v5893_v31 = vpop.f32.mrb[87].mxu0  ;;  %vm13968_vm2 = vmmov %vm13966_vm0 }
 0x5bb   : > { %v5624_v31 = vld [vmem:[#allocation5 + $0x2c8] sm:$0xff] }
 0x5bc   : > { %v5372_v3 = vpop.permute.xlu0 %5371  ;;  %v5623_v20 = vld [vmem:[#allocation5 + $0x2c0] sm:$0xff] }
 0x5bd   : > { %5437 = vst.msk [vmem:[#allocation5 + $0x2d8] sm:$0xff] %vm13953_vm11, %v5372_v3  ;;  %5979 = vmatprep.mubr.f32.mxu0 %v5623_v20  ;;  %vm13969_vm11 = vmmov %vm13966_vm0  ;;  %v5630_v20 = vld [vmem:[#allocation5 + $0x2f8] sm:$0xff] }
 0x5be   : > { %5980 = vmatmul.mubr.f32.gmra.mrb[122].mxu0 %v5622_v58 }
 0x5c0   : > { %v5150_v47 = vpop.permute.xlu0 %5149 }
 0x5c1   : > { %v11788_v1 = vpop.f32.mrb[88].mxu0  ;;  %v5628_v6 = vld [vmem:[#allocation5 + $0x2e8] sm:$0xff] }
 0x5c2   : > { %v5898_v13 = vpop.f32.mrb[89].mxu0 }
 0x5c4   : > { %v4926_v51 = vpop.permute.xlu0 %4925  ;;  %v5626_v57 = vld [vmem:[#allocation5 + $0x2d8] sm:$0xff] }
 0x5c5   : > { %4990 = vst.msk [vmem:[#allocation5 + $0x2f0] sm:$0xff] %vm13954_vm9, %v4926_v51  ;;  %5984 = vmatprep.mubr.f32.mxu0 %v5626_v57  ;;  %vm13970_vm9 = vmmov %vm13966_vm0 }
 0x5c6   : > { %5214 = vst.msk [vmem:[#allocation5 + $0x2f0] sm:$0xff] %vm13955_vm4, %v5150_v47  ;;  %5985 = vmatmul.mubr.f32.gmra.mrb[124].mxu0 %v5625_v11  ;;  %vm13971_vm4 = vmmov %vm13966_vm0 }
 0x5c7   : > { %6787 = vmatprep.mubr.msk.f32.mxu0 %vm13956_vm8, %v5537_v15  ;;  %vm13972_vm8 = vmmov %vm13966_vm0 }
 0x5c8   : > { %v5374_v61 = vpop.permute.xlu0 %5373 }
 0x5c9   : > { %5438 = vst.msk [vmem:[#allocation5 + $0x2f0] sm:$0xff] %vm13957_vm3, %v5374_v61  ;;  %vm13973_vm3 = vmmov %vm13966_vm0 }
 0x5ca   : > { %6788 = vmatmul.mubr.msk.f32.vlgmr.msra.gmra.mrb[126].mxu0 %vm13958_vm6, %v5540_v43  ;;  %vm13974_vm6 = vmmov %vm13966_vm0 }
 0x5cb   : > { %6790 = vmatprep.mubr.msk.f32.mxu0 %vm13959_vm15, %v5543_v9  ;;  %vm13975_vm15 = vmmov %vm13966_vm0 }
 0x5ce   : > { %6791 = vmatmul.mubr.msk.f32.gmra.mrb[128].mxu0 %vm13960_vm7, %v5546_v40  ;;  %vm13976_vm7 = vmmov %vm13966_vm0 }
 0x5cf   : > { %6793 = vmatprep.mubr.msk.f32.mxu0 %vm13961_vm1, %v5549_v0  ;;  %vm13977_vm1 = vmmov %vm13966_vm0 }
 0x5d0   : > { %v5629_v42 = vld [vmem:[#allocation5 + $0x2f0] sm:$0xff] }
 0x5d1   : > { %v11798_v52 = vpop.f32.mrb[90].mxu0  ;;  %5989 = vmatprep.mubr.f32.mxu1 %v5629_v42 }
 0x5d2   : > { %v5903_v23 = vpop.f32.mrb[91].mxu0  ;;  %5990 = vmatmul.mubr.f32.vlgmr.msra.gmra.mrb[64].mxu1 %v5628_v6  ;;  %6794 = vmatmul.mubr.msk.f32.gmra.mrb[130].mxu0 %vm13962_vm13, %v5552_v62  ;;  %vm13978_vm13 = vmmov %vm13966_vm0 }
 0x5d3   : > { %6796 = vmatprep.mubr.msk.f32.mxu0 %vm13963_vm14, %v5555_v60  ;;  %vm13979_vm14 = vmmov %vm13966_vm0 }
 0x5d6   : > { %6797 = vmatmul.mubr.msk.f32.gmra.mrb[132].mxu0 %vm13964_vm5, %v5558_v32  ;;  %vm13980_vm5 = vmmov %vm13966_vm0 }
 0x5d7   : > { %6799 = vmatprep.mubr.msk.f32.mxu0 %vm13965_vm10, %v5561_v59  ;;  %vm13981_vm10 = vmmov %vm13966_vm0 }
 0x5d9   : > { %v11804_v63 = vpop.f32.mrb[92].mxu0 }
 0x5da   : > { %v5908_v21 = vpop.f32.mrb[93].mxu0  ;;  %6800 = vmatmul.mubr.msk.f32.gmra.mrb[134].mxu0 %vm13966_vm0, %v5564_v36 }
 0x5db   : > { %6802 = vmatprep.mubr.msk.f32.mxu0 %vm13967_vm12, %v5567_v26  ;;  %vm13982_vm12 = vmmov %vm13966_vm0 }
 0x5de   : > { %6803 = vmatmul.mubr.msk.f32.gmra.mrb[136].mxu0 %vm13968_vm2, %v5570_v14  ;;  %vm13983_vm2 = vmmov %vm13966_vm0 }
 0x5df   : > { %6805 = vmatprep.mubr.msk.f32.mxu0 %vm13969_vm11, %v5573_v53  ;;  %vm13984_vm11 = vmmov %vm13966_vm0 }
 0x5e2   : > { %6806 = vmatmul.mubr.msk.f32.gmra.mrb[138].mxu0 %vm13970_vm9, %v5576_v30  ;;  %vm13985_vm9 = vmmov %vm13966_vm0 }
 0x5e3   : > { %6808 = vmatprep.mubr.msk.f32.mxu0 %vm13971_vm4, %v5579_v49  ;;  %vm13986_vm4 = vmmov %vm13966_vm0  ;;  %v11864_v49 = vld [vmem:[%s12012_s6] ss:$0 sm:$0xff] }
 0x5e6   : > { %6809 = vmatmul.mubr.msk.f32.gmra.mrb[140].mxu0 %vm13972_vm8, %v5582_v17  ;;  %vm13987_vm8 = vmmov %vm13966_vm0 }
 0x5e7   : > { %6811 = vmatprep.mubr.msk.f32.mxu0 %vm13973_vm3, %v5585_v2  ;;  %v5842_v2 = vadd.f32 %v11864_v49, %v11676_v28  ;;  %vm6348_vm3 = vcmask 130048  }
 0x5e9   : > { %v11814_v16 = vpop.f32.mrb[94].mxu0 }
 0x5ea   : > { %v5913_v34 = vpop.f32.mrb[95].mxu0  ;;  %6812 = vmatmul.mubr.msk.f32.gmra.mrb[142].mxu0 %vm13974_vm6, %v5588_v7  ;;  %v5837_v7 = vadd.f32 %v11864_v49, %v11645_v44  ;;  %v5862_v44 = vadd.f32 %v11864_v49, %v11736_v33  ;;  %v5867_v33 = vadd.f32 %v11864_v49, %v11742_v54 }
 0x5eb   : > { %6814 = vmatprep.mubr.msk.f32.mxu0 %vm13975_vm15, %v5591_v39 }
 0x5ee   : > { %6815 = vmatmul.mubr.msk.f32.gmra.mrb[144].mxu0 %vm13976_vm7, %v5594_v24 }
 0x5ef   : > { %6817 = vmatprep.mubr.msk.f32.mxu0 %vm13977_vm1, %v5597_v55 }
 0x5f1   : > { %v11820_v29 = vpop.f32.mrb[96].mxu0 }
 0x5f2   : > { %v5918_v37 = vpop.f32.mrb[97].mxu0  ;;  %6818 = vmatmul.mubr.msk.f32.gmra.mrb[146].mxu0 %vm13978_vm13, %v5600_v18  ;;  %v5852_v18 = vadd.f32 %v11864_v49, %v11720_v8 }
 0x5f3   : > { %6820 = vmatprep.mubr.msk.f32.mxu0 %vm13979_vm14, %v5603_v5  ;;  %v5847_v5 = vadd.f32 %v11864_v49, %v11700_v19 }
 0x5f6   : > { %6821 = vmatmul.mubr.msk.f32.gmra.mrb[148].mxu0 %vm13980_vm5, %v5606_v22 }
 0x5f7   : > { %6823 = vmatprep.mubr.msk.f32.mxu0 %vm13981_vm10, %v5609_v4 }
 0x5fa   : > { %6824 = vmatmul.mubr.msk.f32.gmra.mrb[150].mxu0 %vm13966_vm0, %v5612_v10 }
 0x5fb   : > { %6826 = vmatprep.mubr.msk.f32.mxu0 %vm13982_vm12, %v5615_v12 }
 0x5fe   : > { %6827 = vmatmul.mubr.msk.f32.gmra.mrb[152].mxu0 %vm13983_vm2, %v5618_v46 }
 0x5ff   : > { %6829 = vmatprep.mubr.msk.f32.mxu0 %vm13984_vm11, %v5621_v48  ;;  %v5857_v48 = vadd.f32 %v11864_v49, %v11726_v56 }
 0x601   : > { %v11830_v25 = vpop.f32.mrb[98].mxu0 }
 0x602   : > { %v5923_v3 = vpop.f32.mrb[99].mxu0  ;;  %6830 = vmatmul.mubr.msk.f32.gmra.mrb[154].mxu0 %vm13985_vm9, %v5624_v31 }
 0x603   : > { %6832 = vmatprep.mubr.msk.f32.mxu0 %vm13986_vm4, %v5627_v38 }
 0x606   : > { %6833 = vmatmul.mubr.msk.f32.gmra.mrb[156].mxu0 %vm13987_vm8, %v5630_v20 }
 0x609   : > { %v11835_v58 = vpop.f32.mrb[100].mxu0 }
 0x60a   : > { %v5928_v47 = vpop.f32.mrb[101].mxu0 }
 0x619   : > { %v11837_v13 = vpop.f32.mrb[102].mxu0 }
 0x61a   : > { %v5933_v51 = vpop.f32.mrb[103].mxu0 }
 0x61b   : > { %v5872_v51 = vadd.f32 %v11864_v49, %v11752_v41  ;;  %v5877_v41 = vadd.f32 %v11864_v49, %v11758_v45 }
 0x621   : > { %v11839_v57 = vpop.f32.mrb[104].mxu0 }
 0x622   : > { %v5938_v11 = vpop.f32.mrb[105].mxu0 }
 0x631   : > { %v11841_v15 = vpop.f32.mrb[106].mxu0 }
 0x632   : > { %v5943_v61 = vpop.f32.mrb[107].mxu0 }
 0x639   : > { %v11843_v43 = vpop.f32.mrb[108].mxu0 }
 0x63a   : > { %v5948_v9 = vpop.f32.mrb[109].mxu0 }
 0x649   : > { %v11845_v40 = vpop.f32.mrb[110].mxu0 }
 0x64a   : > { %v5953_v0 = vpop.f32.mrb[111].mxu0 }
 0x651   : > { %v11847_v42 = vpop.f32.mrb[112].mxu0 }
 0x652   : > { %v5958_v6 = vpop.f32.mrb[113].mxu0 }
 0x661   : > { %v11849_v62 = vpop.f32.mrb[114].mxu0 }
 0x662   : > { %v5963_v23 = vpop.f32.mrb[115].mxu0 }
 0x669   : > { %v11851_v60 = vpop.f32.mrb[116].mxu0 }
 0x66a   : > { %v5968_v32 = vpop.f32.mrb[117].mxu0 }
 0x66b   : > { %v5882_v32 = vadd.f32 %v11864_v49, %v11768_v27 }
 0x679   : > { %v11853_v59 = vpop.f32.mrb[118].mxu0 }
 0x67a   : > { %v5973_v36 = vpop.f32.mrb[119].mxu0 }
 0x681   : > { %v11855_v21 = vpop.f32.mrb[120].mxu0 }
 0x682   : > { %v5978_v26 = vpop.f32.mrb[121].mxu0 }
 0x691   : > { %v11857_v14 = vpop.f32.mrb[122].mxu0 }
 0x692   : > { %v5983_v53 = vpop.f32.mrb[123].mxu0 }
 0x699   : > { %v11859_v30 = vpop.f32.mrb[124].mxu0 }
 0x69a   : > { %v5988_v17 = vpop.f32.mrb[125].mxu0 }
 0x69d   : > { %v6789_v34 = vpop.f32.mrb[126].mxu0 }
 0x69e   : > { %v6067_v39 = vadd.f32 %v6789_v34, %v5842_v2  ;;  %v6061_v24 = vpop.f32.mrb[127].mxu0 }
 0x69f   : > { %v6062_v55 = vadd.f32 %v6061_v24, %v5837_v7  ;;  %v5892_v24 = vadd.f32 %v11864_v49, %v11784_v50 }
 0x6a0   : > { %v6221_v37 = vmul.f32 0.5, %v6067_v39 }
 0x6a1   : > { %v6220_v22 = vmul.f32 0.5, %v6062_v55  ;;  %v6792_v4 = vpop.f32.mrb[128].mxu0 }
 0x6a2   : > { %7279 = vtanh.f32 %v6221_v37  ;;  %v6077_v10 = vadd.f32 %v6792_v4, %v5852_v18  ;;  %v6071_v12 = vpop.f32.mrb[129].mxu0 }
 0x6a3   : > { %7281 = vtanh.f32 %v6220_v22  ;;  %v6072_v28 = vadd.f32 %v6071_v12, %v5847_v5  ;;  %v5887_v5 = vadd.f32 %v11864_v49, %v11774_v35  ;;  %v5902_v35 = vadd.f32 %v11864_v49, %v11798_v52 }
 0x6a4   : > { %v6223_v46 = vmul.f32 0.5, %v6077_v10 }
 0x6a5   : > { %v6222_v38 = vmul.f32 0.5, %v6072_v28  ;;  %v11878_v8 = vpop.f32.mrb[64].mxu1  ;;  %v6795_v31 = vpop.f32.mrb[130].mxu0 }
 0x6a6   : > { %7283 = vtanh.f32 %v6223_v46  ;;  %v6087_v19 = vadd.f32 %v6795_v31, %v5862_v44  ;;  %v5993_v3 = vpop.f32.mrb[65].mxu1  ;;  %v6081_v20 = vpop.f32.mrb[131].mxu0 }
 0x6a7   : > { %7285 = vtanh.f32 %v6222_v38  ;;  %v6082_v47 = vadd.f32 %v6081_v20, %v5857_v48  ;;  %v5897_v3 = vadd.f32 %v11864_v49, %v11788_v1  ;;  %v5912_v1 = vadd.f32 %v11864_v49, %v11814_v16 }
 0x6a8   : > { %v6225_v11 = vmul.f32 0.5, %v6087_v19 }
 0x6a9   : > { %v6224_v61 = vmul.f32 0.5, %v6082_v47  ;;  %v6798_v56 = vpop.f32.mrb[132].mxu0 }
 0x6aa   : > { %7287 = vtanh.f32 %v6225_v11  ;;  %v6097_v9 = vadd.f32 %v6798_v56, %v5872_v51  ;;  %v6091_v0 = vpop.f32.mrb[133].mxu0 }
 0x6ab   : > { %7289 = vtanh.f32 %v6224_v61  ;;  %v6092_v6 = vadd.f32 %v6091_v0, %v5867_v33 }
 0x6ac   : > { %v7280_v23 = vpop.eup %7279  ;;  %v6227_v36 = vmul.f32 0.5, %v6097_v9 }
 0x6ad   : > { %v7282_v26 = vpop.eup %7281  ;;  %v6285_v53 = vmul.f32 0.5, %v7280_v23  ;;  %v6226_v17 = vmul.f32 0.5, %v6092_v6  ;;  %v6801_v54 = vpop.f32.mrb[134].mxu0 }
 0x6ae   : > { %v6284_v2 = vmul.f32 0.5, %v7282_v26  ;;  %7291 = vtanh.f32 %v6227_v36  ;;  %v6107_v27 = vadd.f32 %v6801_v54, %v5882_v32  ;;  %v6101_v7 = vpop.f32.mrb[135].mxu0  ;;  %v5907_v32 = vadd.f32 %v11864_v49, %v11804_v63 }
 0x6af   : > { %v6317_v34 = vadd.f32 0.5, %v6285_v53  ;;  %7293 = vtanh.f32 %v6226_v17  ;;  %v6102_v39 = vadd.f32 %v6101_v7, %v5877_v41  ;;  %v5922_v63 = vadd.f32 %v11864_v49, %v11830_v25 }
 0x6b0   : > { %v7284_v45 = vpop.eup %7283  ;;  %v6316_v55 = vadd.f32 0.5, %v6284_v2  ;;  %v6229_v18 = vmul.f32 0.5, %v6107_v27 }
 0x6b1   : > { %v7286_v37 = vpop.eup %7285  ;;  %6350 = vst.msk [vmem:[%s11893_s21 + $0x8] sm:$0xff] %vm6348_vm3, %v6317_v34  ;;  %v6287_v22 = vmul.f32 0.5, %v7284_v45  ;;  %v6228_v4 = vmul.f32 0.5, %v6102_v39  ;;  %v6804_v10 = vpop.f32.mrb[136].mxu0  ;;  %v5917_v45 = vadd.f32 %v11864_v49, %v11820_v29  ;;  %v5932_v29 = vadd.f32 %v11864_v49, %v11837_v13 }
 0x6b2   : > { %6349 = vst.msk [vmem:[%s11893_s21] sm:$0xff] %vm6348_vm3, %v6316_v55  ;;  %v6286_v12 = vmul.f32 0.5, %v7286_v37  ;;  %7295 = vtanh.f32 %v6229_v18  ;;  %v6117_v28 = vadd.f32 %v6804_v10, %v5892_v24  ;;  %v6111_v44 = vpop.f32.mrb[137].mxu0 }
 0x6b3   : > { %v6319_v50 = vadd.f32 0.5, %v6287_v22  ;;  %7297 = vtanh.f32 %v6228_v4  ;;  %v6112_v46 = vadd.f32 %v6111_v44, %v5887_v5 }
 0x6b4   : > { %v7288_v48 = vpop.eup %7287  ;;  %v6318_v38 = vadd.f32 0.5, %v6286_v12  ;;  %v6231_v31 = vmul.f32 0.5, %v6117_v28 }
 0x6b5   : > { %v7290_v19 = vpop.eup %7289  ;;  %6352 = vst.msk [vmem:[%s11893_s21 + $0x18] sm:$0xff] %vm6348_vm3, %v6319_v50  ;;  %v6289_v20 = vmul.f32 0.5, %v7288_v48  ;;  %v6230_v47 = vmul.f32 0.5, %v6112_v46  ;;  %v6807_v51 = vpop.f32.mrb[138].mxu0  ;;  %v5927_v50 = vadd.f32 %v11864_v49, %v11835_v58  ;;  %v5942_v58 = vadd.f32 %v11864_v49, %v11841_v15 }
 0x6b6   : > { %6351 = vst.msk [vmem:[%s11893_s21 + $0x10] sm:$0xff] %vm6348_vm3, %v6318_v38  ;;  %v6288_v11 = vmul.f32 0.5, %v7290_v19  ;;  %7299 = vtanh.f32 %v6231_v31  ;;  %v6127_v33 = vadd.f32 %v6807_v51, %v5902_v35  ;;  %v6121_v61 = vpop.f32.mrb[139].mxu0 }
 0x6b7   : > { %v6321_v52 = vadd.f32 0.5, %v6289_v20  ;;  %7301 = vtanh.f32 %v6230_v47  ;;  %v6122_v56 = vadd.f32 %v6121_v61, %v5897_v3 }
 0x6b8   : > { %v7292_v9 = vpop.eup %7291  ;;  %v6320_v0 = vadd.f32 0.5, %v6288_v11  ;;  %v6233_v6 = vmul.f32 0.5, %v6127_v33  ;;  %v5937_v33 = vadd.f32 %v11864_v49, %v11839_v57  ;;  %v5952_v57 = vadd.f32 %v11864_v49, %v11845_v40 }
 0x6b9   : > { %v7294_v23 = vpop.eup %7293  ;;  %6354 = vst.msk [vmem:[%s11893_s21 + $0x28] sm:$0xff] %vm6348_vm3, %v6321_v52  ;;  %v6291_v36 = vmul.f32 0.5, %v7292_v9  ;;  %v6232_v26 = vmul.f32 0.5, %v6122_v56  ;;  %v6810_v41 = vpop.f32.mrb[140].mxu0 }
 0x6ba   : > { %6353 = vst.msk [vmem:[%s11893_s21 + $0x20] sm:$0xff] %vm6348_vm3, %v6320_v0  ;;  %v6290_v53 = vmul.f32 0.5, %v7294_v23  ;;  %7303 = vtanh.f32 %v6233_v6  ;;  %v6137_v17 = vadd.f32 %v6810_v41, %v5912_v1  ;;  %v6131_v54 = vpop.f32.mrb[141].mxu0  ;;  %v5947_v41 = vadd.f32 %v11864_v49, %v11843_v43 }
 0x6bb   : > { %v6323_v16 = vadd.f32 0.5, %v6291_v36  ;;  %7305 = vtanh.f32 %v6232_v26  ;;  %v6132_v2 = vadd.f32 %v6131_v54, %v5907_v32  ;;  %v5962_v43 = vadd.f32 %v11864_v49, %v11849_v62 }
 0x6bc   : > { %v7296_v27 = vpop.eup %7295  ;;  %v6322_v7 = vadd.f32 0.5, %v6290_v53  ;;  %v6235_v34 = vmul.f32 0.5, %v6137_v17 }
 0x6bd   : > { %v7298_v39 = vpop.eup %7297  ;;  %6356 = vst.msk [vmem:[%s11893_s21 + $0x38] sm:$0xff] %vm6348_vm3, %v6323_v16  ;;  %v6293_v24 = vmul.f32 0.5, %v7296_v27  ;;  %v6234_v55 = vmul.f32 0.5, %v6132_v2  ;;  %v6813_v18 = vpop.f32.mrb[142].mxu0 }
 0x6be   : > { %6355 = vst.msk [vmem:[%s11893_s21 + $0x30] sm:$0xff] %vm6348_vm3, %v6322_v7  ;;  %v6292_v37 = vmul.f32 0.5, %v7298_v39  ;;  %7307 = vtanh.f32 %v6235_v34  ;;  %v6147_v5 = vadd.f32 %v6813_v18, %v5922_v63  ;;  %v6141_v22 = vpop.f32.mrb[143].mxu0 }
 0x6bf   : > { %v6325_v25 = vadd.f32 0.5, %v6293_v24  ;;  %7309 = vtanh.f32 %v6234_v55  ;;  %v6142_v4 = vadd.f32 %v6141_v22, %v5917_v45  ;;  %v5957_v24 = vadd.f32 %v11864_v49, %v11847_v42 }
 0x6c0   : > { %v7300_v10 = vpop.eup %7299  ;;  %v6324_v12 = vadd.f32 0.5, %v6292_v37  ;;  %v6237_v28 = vmul.f32 0.5, %v6147_v5  ;;  %v5972_v42 = vadd.f32 %v11864_v49, %v11853_v59 }
 0x6c1   : > { %v7302_v44 = vpop.eup %7301  ;;  %6358 = vst.msk [vmem:[%s11893_s21 + $0x48] sm:$0xff] %vm6348_vm3, %v6325_v25  ;;  %v6295_v46 = vmul.f32 0.5, %v7300_v10  ;;  %v6236_v48 = vmul.f32 0.5, %v6142_v4  ;;  %v6816_v35 = vpop.f32.mrb[144].mxu0 }
 0x6c2   : > { %6357 = vst.msk [vmem:[%s11893_s21 + $0x40] sm:$0xff] %vm6348_vm3, %v6324_v12  ;;  %v6294_v38 = vmul.f32 0.5, %v7302_v44  ;;  %7311 = vtanh.f32 %v6237_v28  ;;  %v6157_v31 = vadd.f32 %v6816_v35, %v5932_v29  ;;  %v6151_v19 = vpop.f32.mrb[145].mxu0  ;;  %v5967_v44 = vadd.f32 %v11864_v49, %v11851_v60 }
 0x6c3   : > { %v6327_v13 = vadd.f32 0.5, %v6295_v46  ;;  %7313 = vtanh.f32 %v6236_v48  ;;  %v6152_v3 = vadd.f32 %v6151_v19, %v5927_v50  ;;  %v5982_v60 = vadd.f32 %v11864_v49, %v11857_v14 }
 0x6c4   : > { %v7304_v20 = vpop.eup %7303  ;;  %v6326_v47 = vadd.f32 0.5, %v6294_v38  ;;  %v6239_v51 = vmul.f32 0.5, %v6157_v31 }
 0x6c5   : > { %v7306_v11 = vpop.eup %7305  ;;  %6360 = vst.msk [vmem:[%s11893_s21 + $0x58] sm:$0xff] %vm6348_vm3, %v6327_v13  ;;  %v6297_v61 = vmul.f32 0.5, %v7304_v20  ;;  %v6238_v52 = vmul.f32 0.5, %v6152_v3  ;;  %v6819_v56 = vpop.f32.mrb[146].mxu0 }
 0x6c6   : > { %6359 = vst.msk [vmem:[%s11893_s21 + $0x50] sm:$0xff] %vm6348_vm3, %v6326_v47  ;;  %v6296_v9 = vmul.f32 0.5, %v7306_v11  ;;  %7315 = vtanh.f32 %v6239_v51  ;;  %v6167_v1 = vadd.f32 %v6819_v56, %v5942_v58  ;;  %v6161_v0 = vpop.f32.mrb[147].mxu0  ;;  %v5977_v47 = vadd.f32 %v11864_v49, %v11855_v21 }
 0x6c7   : > { %v6329_v15 = vadd.f32 0.5, %v6297_v61  ;;  %7317 = vtanh.f32 %v6238_v52  ;;  %v6162_v6 = vadd.f32 %v6161_v0, %v5937_v33  ;;  %v5992_v21 = vadd.f32 %v11864_v49, %v11878_v8 }
 0x6c8   : > { %v7308_v23 = vpop.eup %7307  ;;  %v6328_v32 = vadd.f32 0.5, %v6296_v9  ;;  %v6241_v36 = vmul.f32 0.5, %v6167_v1 }
 0x6c9   : > { %v7310_v26 = vpop.eup %7309  ;;  %6362 = vst.msk [vmem:[%s11893_s21 + $0x68] sm:$0xff] %vm6348_vm3, %v6329_v15  ;;  %v6299_v53 = vmul.f32 0.5, %v7308_v23  ;;  %v6240_v17 = vmul.f32 0.5, %v6162_v6  ;;  %v6822_v54 = vpop.f32.mrb[148].mxu0  ;;  %v5987_v23 = vadd.f32 %v11864_v49, %v11859_v30 }
 0x6ca   : > { %6361 = vst.msk [vmem:[%s11893_s21 + $0x60] sm:$0xff] %vm6348_vm3, %v6328_v32  ;;  %v6298_v16 = vmul.f32 0.5, %v7310_v26  ;;  %7319 = vtanh.f32 %v6241_v36  ;;  %v6177_v2 = vadd.f32 %v6822_v54, %v5952_v57  ;;  %v6171_v27 = vpop.f32.mrb[149].mxu0 }
 0x6cb   : > { %v6331_v40 = vadd.f32 0.5, %v6299_v53  ;;  %7321 = vtanh.f32 %v6240_v17  ;;  %v6172_v63 = vadd.f32 %v6171_v27, %v5947_v41 }
 0x6cc   : > { %v7312_v7 = vpop.eup %7311  ;;  %v6330_v34 = vadd.f32 0.5, %v6298_v16  ;;  %v6243_v39 = vmul.f32 0.5, %v6177_v2 }
 0x6cd   : > { %v7314_v45 = vpop.eup %7313  ;;  %6364 = vst.msk [vmem:[%s11893_s21 + $0x78] sm:$0xff] %vm6348_vm3, %v6331_v40  ;;  %v6301_v55 = vmul.f32 0.5, %v7312_v7  ;;  %v6242_v18 = vmul.f32 0.5, %v6172_v63  ;;  %v6825_v37 = vpop.f32.mrb[150].mxu0 }
 0x6ce   : > { %6363 = vst.msk [vmem:[%s11893_s21 + $0x70] sm:$0xff] %vm6348_vm3, %v6330_v34  ;;  %v6300_v5 = vmul.f32 0.5, %v7314_v45  ;;  %7323 = vtanh.f32 %v6243_v39  ;;  %v6187_v22 = vadd.f32 %v6825_v37, %v5962_v43  ;;  %v6181_v25 = vpop.f32.mrb[151].mxu0 }
 0x6cf   : > { %v6333_v62 = vadd.f32 0.5, %v6301_v55  ;;  %7325 = vtanh.f32 %v6242_v18  ;;  %v6182_v4 = vadd.f32 %v6181_v25, %v5957_v24 }
 0x6d0   : > { %v7316_v10 = vpop.eup %7315  ;;  %v6332_v29 = vadd.f32 0.5, %v6300_v5  ;;  %v6245_v12 = vmul.f32 0.5, %v6187_v22 }
 0x6d1   : > { %v7318_v28 = vpop.eup %7317  ;;  %6366 = vst.msk [vmem:[%s11893_s21 + $0x88] sm:$0xff] %vm6348_vm3, %v6333_v62  ;;  %v6303_v50 = vmul.f32 0.5, %v7316_v10  ;;  %v6244_v46 = vmul.f32 0.5, %v6182_v4  ;;  %v6828_v48 = vpop.f32.mrb[152].mxu0 }
 0x6d2   : > { %6365 = vst.msk [vmem:[%s11893_s21 + $0x80] sm:$0xff] %vm6348_vm3, %v6332_v29  ;;  %v6302_v35 = vmul.f32 0.5, %v7318_v28  ;;  %7327 = vtanh.f32 %v6245_v12  ;;  %v6197_v38 = vadd.f32 %v6828_v48, %v5972_v42  ;;  %v6191_v31 = vpop.f32.mrb[153].mxu0 }
 0x6d3   : > { %v6335_v59 = vadd.f32 0.5, %v6303_v50  ;;  %7329 = vtanh.f32 %v6244_v46  ;;  %v6192_v19 = vadd.f32 %v6191_v31, %v5967_v44 }
 0x6d4   : > { %v7320_v13 = vpop.eup %7319  ;;  %v6334_v3 = vadd.f32 0.5, %v6302_v35  ;;  %v6247_v20 = vmul.f32 0.5, %v6197_v38 }
 0x6d5   : > { %v7322_v58 = vpop.eup %7321  ;;  %6368 = vst.msk [vmem:[%s11893_s21 + $0x98] sm:$0xff] %vm6348_vm3, %v6335_v59  ;;  %v6305_v51 = vmul.f32 0.5, %v7320_v13  ;;  %v6246_v11 = vmul.f32 0.5, %v6192_v19  ;;  %v6831_v33 = vpop.f32.mrb[154].mxu0 }
 0x6d6   : > { %6367 = vst.msk [vmem:[%s11893_s21 + $0x90] sm:$0xff] %vm6348_vm3, %v6334_v3  ;;  %v6304_v61 = vmul.f32 0.5, %v7322_v58  ;;  %7331 = vtanh.f32 %v6247_v20  ;;  %v6207_v52 = vadd.f32 %v6831_v33, %v5982_v60  ;;  %v6201_v56 = vpop.f32.mrb[155].mxu0 }
 0x6d7   : > { %v6337_v14 = vadd.f32 0.5, %v6305_v51  ;;  %7333 = vtanh.f32 %v6246_v11  ;;  %v6202_v9 = vadd.f32 %v6201_v56, %v5977_v47 }
 0x6d8   : > { %v7324_v1 = vpop.eup %7323  ;;  %v6336_v0 = vadd.f32 0.5, %v6304_v61  ;;  %v6249_v15 = vmul.f32 0.5, %v6207_v52 }
 0x6d9   : > { %v7326_v6 = vpop.eup %7325  ;;  %6370 = vst.msk [vmem:[%s11893_s21 + $0xa8] sm:$0xff] %vm6348_vm3, %v6337_v14  ;;  %v6307_v57 = vmul.f32 0.5, %v7324_v1  ;;  %v6248_v32 = vmul.f32 0.5, %v6202_v9  ;;  %v6834_v36 = vpop.f32.mrb[156].mxu0 }
 0x6da   : > { %6369 = vst.msk [vmem:[%s11893_s21 + $0xa0] sm:$0xff] %vm6348_vm3, %v6336_v0  ;;  %v6306_v26 = vmul.f32 0.5, %v7326_v6  ;;  %7335 = vtanh.f32 %v6249_v15  ;;  %v6217_v41 = vadd.f32 %v6834_v36, %v5992_v21  ;;  %v6211_v53 = vpop.f32.mrb[157].mxu0 }
 0x6db   : > { %v6339_v8 = vadd.f32 0.5, %v6307_v57  ;;  %7337 = vtanh.f32 %v6248_v32  ;;  %v6212_v17 = vadd.f32 %v6211_v53, %v5987_v23 }
 0x6dc   : > { %v7328_v54 = vpop.eup %7327  ;;  %v6338_v16 = vadd.f32 0.5, %v6306_v26  ;;  %v6251_v30 = vmul.f32 0.5, %v6217_v41 }
 0x6dd   : > { %v7330_v49 = vpop.eup %7329  ;;  %6372 = vst.msk [vmem:[%s11893_s21 + $0xb8] sm:$0xff] %vm6348_vm3, %v6339_v8  ;;  %v6309_v2 = vmul.f32 0.5, %v7328_v54  ;;  %v6250_v27 = vmul.f32 0.5, %v6212_v17 }
 0x6de   : > { %6371 = vst.msk [vmem:[%s11893_s21 + $0xb0] sm:$0xff] %vm6348_vm3, %v6338_v16  ;;  %v6308_v40 = vmul.f32 0.5, %v7330_v49  ;;  %7339 = vtanh.f32 %v6251_v30 }
 0x6df   : > { %v6341_v63 = vadd.f32 0.5, %v6309_v2  ;;  %7341 = vtanh.f32 %v6250_v27 }
 0x6e0   : > { %v7332_v7 = vpop.eup %7331  ;;  %v6340_v43 = vadd.f32 0.5, %v6308_v40 }
 0x6e1   : > { %v7334_v34 = vpop.eup %7333  ;;  %6374 = vst.msk [vmem:[%s11893_s21 + $0xc8] sm:$0xff] %vm6348_vm3, %v6341_v63  ;;  %v6311_v39 = vmul.f32 0.5, %v7332_v7 }
 0x6e2   : > { %6373 = vst.msk [vmem:[%s11893_s21 + $0xc0] sm:$0xff] %vm6348_vm3, %v6340_v43  ;;  %v6310_v45 = vmul.f32 0.5, %v7334_v34 }
 0x6e3   : > { %v6343_v24 = vadd.f32 0.5, %v6311_v39 }
 0x6e4   : > { %v7336_v55 = vpop.eup %7335  ;;  %v6342_v18 = vadd.f32 0.5, %v6310_v45 }
 0x6e5   : > { %v7338_v37 = vpop.eup %7337  ;;  %6376 = vst.msk [vmem:[%s11893_s21 + $0xd8] sm:$0xff] %vm6348_vm3, %v6343_v24  ;;  %v6313_v5 = vmul.f32 0.5, %v7336_v55 }
 0x6e6   : > { %6375 = vst.msk [vmem:[%s11893_s21 + $0xd0] sm:$0xff] %vm6348_vm3, %v6342_v18  ;;  %v6312_v22 = vmul.f32 0.5, %v7338_v37 }
 0x6e7   : > { %v6345_v25 = vadd.f32 0.5, %v6313_v5 }
 0x6e8   : > { %v7340_v62 = vpop.eup %7339  ;;  %v6344_v4 = vadd.f32 0.5, %v6312_v22 }
 0x6e9   : > { %v7342_v10 = vpop.eup %7341  ;;  %6378 = vst.msk [vmem:[%s11893_s21 + $0xe8] sm:$0xff] %vm6348_vm3, %v6345_v25  ;;  %v6315_v42 = vmul.f32 0.5, %v7340_v62 }
 0x6ea   : > { %6377 = vst.msk [vmem:[%s11893_s21 + $0xe0] sm:$0xff] %vm6348_vm3, %v6344_v4  ;;  %v6314_v29 = vmul.f32 0.5, %v7342_v10 }
 0x6eb   : > { %v6347_v12 = vadd.f32 0.5, %v6315_v42 }
 0x6ec   : > { %v6346_v28 = vadd.f32 0.5, %v6314_v29 }
 0x6ed   : > { %6380 = vst.msk [vmem:[%s11893_s21 + $0xf8] sm:$0xff] %vm6348_vm3, %v6347_v12 }
 0x6ee   : > { %6379 = vst.msk [vmem:[%s11893_s21 + $0xf0] sm:$0xff] %vm6348_vm3, %v6346_v28 }
 0x6ef PF: > { %s17_s24 = sadd.s32 1, %s7382_s24  }
 0x6f0   : > { %p14_p4 = scmp.ge.s32.totalorder %s17_s24, 4  }
 0x6f2   :  { %16 = sbr.rel (!%p14_p4) target bundleno = 1 (0x1), region = 78 }

</bundles_post_ra>
